<compile_context>
chip_gen: v6e
topology: v6e:2x2x1
jax: 0.10.0
libtpu: 0.0.40
codegen_flags: <defaults>
</compile_context>

<pallas_src>
import numpy as np

import jax
import jax.numpy as jnp
from jax.experimental import pallas as pl
from jax.experimental.pallas import tpu as pltpu


# ----------------------------------------------------------------------------
# helpers
# ----------------------------------------------------------------------------
def _round_up(x, m):
    return ((x + m - 1) // m) * m


def _pick_tile(dim, base):
    # Small/medium dims: one full-dim block (no padding, exempt from the (8,128)
    # divisibility rule).  Large dims: `base`-sized tiles + zero padding.
    if dim <= 2 * base:
        return dim, dim
    return base, _round_up(dim, base)


_TILE_CACHE = None


def _matmul_tiles():
    # Generation-aware tile bases: keep 256 on v5e (MXU already saturated, tight
    # HBM BW), bump M-tile to 512 on v6e/v7x (double-buffered working set ~4 MB,
    # safely under v7x's 32 MiB scoped / 64 MiB physical VMEM).
    global _TILE_CACHE
    if _TILE_CACHE is None:
        kind = ""
        try:
            kind = jax.devices()[0].device_kind.lower()
        except Exception:
            pass
        _TILE_CACHE = (256, 256, 512) if "v5" in kind else (512, 256, 512)
    return _TILE_CACHE


def _win_chunk(n_windows):
    # windows processed per attention grid step (must divide n_windows).
    for c in (8, 4, 2, 1):
        if n_windows % c == 0:
            return c
    return 1


# ----------------------------------------------------------------------------
# Pallas kernels
# ----------------------------------------------------------------------------
def _make_linear_kernel(has_bias, has_residual, activation):
    # refs: x, w, [bias], [residual], out, acc_scratch
    def kernel(*refs):
        x_ref, w_ref = refs[0], refs[1]
        i = 2
        b_ref = refs[i] if has_bias else None
        i += int(has_bias)
        r_ref = refs[i] if has_residual else None
        i += int(has_residual)
        o_ref, acc_ref = refs[i], refs[i + 1]

        @pl.when(pl.program_id(2) == 0)
        def _init():
            acc_ref[...] = jnp.zeros_like(acc_ref)

        # x/w are already bf16 in HBM (wrapper casts / upstream kernels emit bf16).
        acc_ref[...] += jnp.dot(x_ref[...], w_ref[...],
                                preferred_element_type=jnp.float32)

        @pl.when(pl.program_id(2) == pl.num_programs(2) - 1)
        def _finalize():
            y = acc_ref[...]
            if has_bias:
                y = y + b_ref[...]
            if activation == "gelu_tanh":
                # tanh-approx GELU on the f32 accumulator (EUP tanh -> nearly free).
                y = 0.5 * y * (1.0 + jnp.tanh(
                    0.7978845608028654 * (y + 0.044715 * y * y * y)))
            if has_residual:
                y = y + r_ref[...].astype(jnp.float32)  # fused residual add
            o_ref[...] = y.astype(o_ref.dtype)

    return kernel


def _make_layernorm_kernel(has_residual, eps):
    # refs: x, [residual], gamma, beta, [sum_out], norm_out
    def kernel(*refs):
        if has_residual:
            x_ref, r_ref, g_ref, b_ref, s_ref, o_ref = refs
        else:
            x_ref, g_ref, b_ref, o_ref = refs
        x = x_ref[...].astype(jnp.float32)
        if has_residual:
            x = x + r_ref[...].astype(jnp.float32)
            s_ref[...] = x.astype(s_ref.dtype)          # residual stream (f32)
        mu = jnp.mean(x, axis=-1, keepdims=True)
        var = jnp.mean(jnp.square(x - mu), axis=-1, keepdims=True)
        y = (x - mu) * jax.lax.rsqrt(var + eps)
        o_ref[...] = (y * g_ref[...] + b_ref[...]).astype(o_ref.dtype)
    return kernel


def _make_window_attn_kernel(scale, has_mask):
    # qkv_ref: (3, WBc, N, D) bf16   (head selected by the grid / BlockSpec)
    # bias_ref: (N, N) f32           mask_ref: (WBc, N, N) f32
    # o_ref:   (WBc, N, D)           (full-block, lane-dense store)
    def kernel(*refs):
        if has_mask:
            qkv_ref, bias_ref, mask_ref, o_ref = refs
        else:
            qkv_ref, bias_ref, o_ref = refs
        q = qkv_ref[0]                                   # (WBc, N, D) bf16
        k = qkv_ref[1]
        v = qkv_ref[2]
        # scores: batched q @ k^T over the window axis -> (WBc, N, N) f32
        s = jax.lax.dot_general(q, k, (((2,), (2,)), ((0,), (0,))),
                                preferred_element_type=jnp.float32)
        s = s * scale + bias_ref[...]
        if has_mask:
            s = s + mask_ref[...]
        s = s - jnp.max(s, axis=-1, keepdims=True)
        e = jnp.exp(s)
        p = e * pl.reciprocal(jnp.sum(e, axis=-1, keepdims=True), approx=True)
        o = jax.lax.dot_general(p.astype(jnp.bfloat16), v,
                                (((2,), (1,)), ((0,), (0,))),
                                preferred_element_type=jnp.float32)
        o_ref[...] = o.astype(o_ref.dtype)
    return kernel


def _meanpool_kernel(x_ref, o_ref):
    o_ref[...] = jnp.mean(x_ref[...].astype(jnp.float32), axis=1).astype(o_ref.dtype)


# ----------------------------------------------------------------------------
# Pallas wrappers
# ----------------------------------------------------------------------------
def linear2d(x2, w, b=None, *, residual=None, activation=None,
             out_dtype=jnp.float32):
    M, K = x2.shape
    N = w.shape[1]
    bm, bn, bk = _matmul_tiles()
    tm, Mp = _pick_tile(M, bm)
    tn, Np = _pick_tile(N, bn)
    tk, Kp = _pick_tile(K, bk)

    # bf16 operands for the MXU; halves x-tile DMA bytes.
    if x2.dtype != jnp.bfloat16:
        x2 = x2.astype(jnp.bfloat16)
    if w.dtype != jnp.bfloat16:
        w = w.astype(jnp.bfloat16)

    xp = x2 if (Mp == M and Kp == K) else jnp.pad(x2, ((0, Mp - M), (0, Kp - K)))
    wp = w if (Kp == K and Np == N) else jnp.pad(w, ((0, Kp - K), (0, Np - N)))

    has_bias = b is not None
    has_res = residual is not None

    args = [xp, wp]
    in_specs = [pl.BlockSpec((tm, tk), lambda i, j, k: (i, k)),
                pl.BlockSpec((tk, tn), lambda i, j, k: (k, j))]
    if has_bias:
        bp = b.reshape(1, N).astype(jnp.float32)
        if Np != N:
            bp = jnp.pad(bp, ((0, 0), (0, Np - N)))
        args.append(bp)
        in_specs.append(pl.BlockSpec((1, tn), lambda i, j, k: (0, j)))
    if has_res:
        rp = residual.astype(jnp.float32)
        if Mp != M or Np != N:
            rp = jnp.pad(rp, ((0, Mp - M), (0, Np - N)))
        args.append(rp)
        in_specs.append(pl.BlockSpec((tm, tn), lambda i, j, k: (i, j)))

    out = pl.pallas_call(
        _make_linear_kernel(has_bias, has_res, activation),
        out_shape=jax.ShapeDtypeStruct((Mp, Np), out_dtype),
        grid=(Mp // tm, Np // tn, Kp // tk),
        in_specs=in_specs,
        out_specs=pl.BlockSpec((tm, tn), lambda i, j, k: (i, j)),
        scratch_shapes=[pltpu.VMEM((tm, tn), jnp.float32)],
        compiler_params=pltpu.CompilerParams(
            dimension_semantics=("parallel", "parallel", "arbitrary")),
    )(*args)
    if Mp != M or Np != N:
        out = out[:M, :N]
    return out


def dense(x, w, b=None, *, residual=None, activation=None, out_dtype=jnp.float32):
    lead = x.shape[:-1]
    x2 = x.reshape(-1, x.shape[-1])
    r2 = None if residual is None else residual.reshape(-1, w.shape[1])
    y = linear2d(x2, w, b, residual=r2, activation=activation, out_dtype=out_dtype)
    return y.reshape(*lead, w.shape[1])


def layer_norm(x, g, b, *, residual=None, eps=1e-5, out_dtype=jnp.float32):
    lead = x.shape[:-1]
    C = x.shape[-1]
    x2 = x.reshape(-1, C)
    M = x2.shape[0]
    tr, Mp = _pick_tile(M, 512)
    pad = Mp - M
    if pad:
        x2 = jnp.pad(x2, ((0, pad), (0, 0)))
    g2 = g.reshape(1, C).astype(jnp.float32)
    b2 = b.reshape(1, C).astype(jnp.float32)
    grid = (Mp // tr,)
    cp = pltpu.CompilerParams(dimension_semantics=("parallel",))

    if residual is not None:
        r2 = residual.reshape(-1, C)
        if pad:
            r2 = jnp.pad(r2, ((0, pad), (0, 0)))
        s, y = pl.pallas_call(
            _make_layernorm_kernel(True, eps),
            out_shape=(jax.ShapeDtypeStruct((Mp, C), jnp.float32),
                       jax.ShapeDtypeStruct((Mp, C), out_dtype)),
            grid=grid,
            in_specs=[pl.BlockSpec((tr, C), lambda i: (i, 0)),
                      pl.BlockSpec((tr, C), lambda i: (i, 0)),
                      pl.BlockSpec((1, C), lambda i: (0, 0)),
                      pl.BlockSpec((1, C), lambda i: (0, 0))],
            out_specs=[pl.BlockSpec((tr, C), lambda i: (i, 0)),
                       pl.BlockSpec((tr, C), lambda i: (i, 0))],
            compiler_params=cp,
        )(x2, r2, g2, b2)
        if pad:
            s, y = s[:M], y[:M]
        return s.reshape(*lead, C), y.reshape(*lead, C)

    y = pl.pallas_call(
        _make_layernorm_kernel(False, eps),
        out_shape=jax.ShapeDtypeStruct((Mp, C), out_dtype),
        grid=grid,
        in_specs=[pl.BlockSpec((tr, C), lambda i: (i, 0)),
                  pl.BlockSpec((1, C), lambda i: (0, 0)),
                  pl.BlockSpec((1, C), lambda i: (0, 0))],
        out_specs=pl.BlockSpec((tr, C), lambda i: (i, 0)),
        compiler_params=cp,
    )(x2, g2, b2)
    if pad:
        y = y[:M]
    return y.reshape(*lead, C)


def window_attention_core(qkv5, rel_bias, mask, n_windows, scale, out_dtype):
    # qkv5: (3, H, B_, N, D) bf16 head-major; rel_bias: (H, N, N) f32;
    # mask: (nW, N, N) f32 or None.  Output: (H, B_, N, D) head-major.
    _, H, B_, N, D = qkv5.shape
    WBc = _win_chunk(n_windows)
    cpi = n_windows // WBc                                # window-chunks per image
    grid = (B_ // WBc, H)

    in_specs = [pl.BlockSpec((3, None, WBc, N, D), lambda g, h: (0, h, g, 0, 0)),
                pl.BlockSpec((None, N, N), lambda g, h: (h, 0, 0))]
    args = [qkv5, rel_bias]
    if mask is not None:
        in_specs.append(pl.BlockSpec((WBc, N, N), lambda g, h: (g % cpi, 0, 0)))
        args.append(mask.astype(jnp.float32))

    return pl.pallas_call(
        _make_window_attn_kernel(scale, mask is not None),
        out_shape=jax.ShapeDtypeStruct((H, B_, N, D), out_dtype),
        grid=grid,
        in_specs=in_specs,
        out_specs=pl.BlockSpec((None, WBc, N, D), lambda g, h: (h, g, 0, 0)),
        compiler_params=pltpu.CompilerParams(
            dimension_semantics=("parallel", "parallel")),
    )(*args)


def mean_pool(x):
    B, L, C = x.shape
    return pl.pallas_call(
        _meanpool_kernel,
        out_shape=jax.ShapeDtypeStruct((B, C), jnp.float32),
    )(x)


# ----------------------------------------------------------------------------
# Swin building blocks (glue + kernels)
# ----------------------------------------------------------------------------
def window_partition(x, ws):
    B, H, W, C = x.shape
    x = x.reshape(B, H // ws, ws, W // ws, ws, C)
    return x.transpose(0, 1, 3, 2, 4, 5).reshape(-1, ws, ws, C)


def window_reverse(windows, ws, Hp, Wp):
    B = windows.shape[0] // ((Hp // ws) * (Wp // ws))
    x = windows.reshape(B, Hp // ws, Wp // ws, ws, ws, -1)
    return x.transpose(0, 1, 3, 2, 4, 5).reshape(B, Hp, Wp, -1)


def make_rel_pos_index(ws):
    coords = np.stack(np.meshgrid(np.arange(ws), np.arange(ws), indexing='ij'))
    cf = coords.reshape(2, -1)
    rel = (cf[:, :, None] - cf[:, None, :]).transpose(1, 2, 0).astype(np.int64)
    rel[:, :, 0] += ws - 1
    rel[:, :, 1] += ws - 1
    rel[:, :, 0] *= 2 * ws - 1
    return rel.sum(-1)                                    # (N, N) int


def make_attn_mask(h, w, ws, shift):
    hp = int(np.ceil(h / ws)) * ws
    wp = int(np.ceil(w / ws)) * ws
    img_mask = np.zeros((1, hp, wp, 1), np.float32)
    slices = (slice(0, -ws), slice(-ws, -shift), slice(-shift, None))
    cnt = 0
    for hs in slices:
        for wsl in slices:
            img_mask[:, hs, wsl, :] = cnt
            cnt += 1
    mw = window_partition(img_mask, ws).reshape(-1, ws * ws)
    mask = mw[:, None, :] - mw[:, :, None]
    mask = np.where(mask != 0, -100.0, 0.0).astype(np.float32)
    return jnp.asarray(mask)                              # (nW, N, N)


def swin_block(x, h, w, p, n_heads, ws, shift, attn_mask, rel_index):
    B, L, C = x.shape
    shortcut = x                                           # f32 residual stream
    xn = layer_norm(x, p['norm1_g'], p['norm1_b'], out_dtype=jnp.bfloat16)
    xn = xn.reshape(B, h, w, C)

    pad_r = (ws - w % ws) % ws
    pad_b = (ws - h % ws) % ws
    if pad_r or pad_b:
        xn = jnp.pad(xn, ((0, 0), (0, pad_b), (0, pad_r), (0, 0)))
    Hp, Wp = h + pad_b, w + pad_r

    if shift > 0:
        xn = jnp.roll(xn, shift=(-shift, -shift), axis=(1, 2))
        mask = attn_mask
    else:
        mask = None
    nW = (Hp // ws) * (Wp // ws)
    N = ws * ws
    xw = window_partition(xn, ws).reshape(-1, N, C)        # (B*nW, N, C) bf16
    B_ = xw.shape[0]

    # ---- window attention (head-major, lane-dense) ----
    ap = p['attn']
    head_dim = C // n_heads
    scale = head_dim ** -0.5
    qkv = dense(xw, ap['qkv_w'], ap['qkv_b'], out_dtype=jnp.bfloat16)   # (B_, N, 3C)
    # XLA: reorder to head-major (3, H, B_, N, D) so the kernel never slices lanes.
    qkv5 = qkv.reshape(B_, N, 3, n_heads, head_dim).transpose(2, 3, 0, 1, 4)

    table = ap['rel_pos_table']                                          # ((2ws-1)^2, H)
    rel_bias = table[rel_index.reshape(-1)].reshape(N, N, n_heads)
    rel_bias = rel_bias.transpose(2, 0, 1).astype(jnp.float32)           # (H, N, N)

    attn_hm = window_attention_core(qkv5, rel_bias, mask, nW, scale,
                                    jnp.bfloat16)                        # (H, B_, N, D)
    attn = attn_hm.transpose(1, 2, 0, 3).reshape(B_, N, C)               # (B_, N, C)
    attn = dense(attn, ap['proj_w'], ap['proj_b'], out_dtype=jnp.float32)

    aw = attn.reshape(-1, ws, ws, C)
    sh = window_reverse(aw, ws, Hp, Wp)
    if shift > 0:
        sh = jnp.roll(sh, shift=(shift, shift), axis=(1, 2))
    if pad_r or pad_b:
        sh = sh[:, :h, :w, :]
    attn_tok = sh.reshape(B, h * w, C)

    # fused: xsum = shortcut + attn ; y = LN(xsum)
    xsum, y = layer_norm(attn_tok, p['norm2_g'], p['norm2_b'],
                         residual=shortcut, out_dtype=jnp.bfloat16)

    # MLP: GELU fused into the fc1 epilogue, residual fused into fc2 epilogue.
    hmid = dense(y, p['mlp_fc1_w'], p['mlp_fc1_b'],
                 activation="gelu_tanh", out_dtype=jnp.bfloat16)
    out = dense(hmid, p['mlp_fc2_w'], p['mlp_fc2_b'],
                residual=xsum, out_dtype=jnp.float32)
    return out


def patch_merging(x, h, w, p):
    B, L, C = x.shape
    x = x.reshape(B, h, w, C)
    if h % 2 or w % 2:
        x = jnp.pad(x, ((0, 0), (0, h % 2), (0, w % 2), (0, 0)))
    x0 = x[:, 0::2, 0::2, :]
    x1 = x[:, 1::2, 0::2, :]
    x2 = x[:, 0::2, 1::2, :]
    x3 = x[:, 1::2, 1::2, :]
    x = jnp.concatenate([x0, x1, x2, x3], axis=-1)
    x = x.reshape(B, -1, 4 * C)
    x = layer_norm(x, p['norm_g'], p['norm_b'], out_dtype=jnp.bfloat16)
    return dense(x, p['reduction_w'], None, out_dtype=jnp.float32)


def patch_embed(x, p, patch_size):
    # x: NCHW.  stride==kernel conv -> unfold into non-overlapping patches + matmul.
    B, C, H, W = x.shape
    ph = (patch_size - H % patch_size) % patch_size
    pw = (patch_size - W % patch_size) % patch_size
    if ph or pw:
        x = jnp.pad(x, ((0, 0), (0, 0), (0, ph), (0, pw)))
    H, W = H + ph, W + pw
    Hp, Wp = H // patch_size, W // patch_size
    patches = x.reshape(B, C, Hp, patch_size, Wp, patch_size)
    patches = patches.transpose(0, 2, 4, 1, 3, 5).reshape(B, Hp * Wp,
                                                          C * patch_size * patch_size)
    patches = patches.astype(jnp.bfloat16)                 # bf16 feed for the MXU
    x = dense(patches, p['proj_w'], p['proj_b'], out_dtype=jnp.float32)
    x = layer_norm(x, p['norm_g'], p['norm_b'], out_dtype=jnp.float32)
    return x, Hp, Wp


def swin_forward(x, params, cfg):
    ws = cfg['window_size']
    rel_index = make_rel_pos_index(ws)

    x, h, w = patch_embed(x, params['patch_embed'], cfg['patch_size'])
    n_layers = len(cfg['depths'])
    for i in range(n_layers):
        lp = params['layers'][i]
        nh = cfg['n_heads'][i]
        shift = ws // 2
        attn_mask = make_attn_mask(h, w, ws, shift)
        for d in range(cfg['depths'][i]):
            s = 0 if d % 2 == 0 else shift
            x = swin_block(x, h, w, lp['blocks'][d], nh, ws, s, attn_mask, rel_index)
        if lp['downsample'] is not None:
            x = patch_merging(x, h, w, lp['downsample'])
            h, w = (h + 1) // 2, (w + 1) // 2

    x = layer_norm(x, params['norm_g'], params['norm_b'], out_dtype=jnp.bfloat16)
    pooled = mean_pool(x)                                  # (B, n_features) f32
    logits = linear2d(pooled, params['head_w'], params['head_b'])
    return logits


# ----------------------------------------------------------------------------
# deterministic parameter init (trunc-normal-ish for Linear, ones/zeros for LN).
# Matmul weights stored in bf16 (MXU inputs); biases / LN params / tables in f32.
# ----------------------------------------------------------------------------
def init_params(key, cfg):
    keys = iter(jax.random.split(key, 256))

    def nk():
        return next(keys)

    def lin(k_in, k_out, bias=True):
        w = (0.02 * jax.random.normal(nk(), (k_in, k_out), jnp.float32)).astype(jnp.bfloat16)
        b = jnp.zeros((k_out,), jnp.float32) if bias else None
        return w, b

    p_sz, in_c, E = cfg['patch_size'], cfg['in_c'], cfg['embed_dim']
    params = {}

    pw, pb = lin(in_c * p_sz * p_sz, E)
    params['patch_embed'] = dict(proj_w=pw, proj_b=pb,
                                 norm_g=jnp.ones((E,), jnp.float32),
                                 norm_b=jnp.zeros((E,), jnp.float32))

    n_layers = len(cfg['depths'])
    layers = []
    for i in range(n_layers):
        dim = E * (2 ** i)
        nh = cfg['n_heads'][i]
        hidden = int(dim * cfg['mlp_ratio'])
        blocks = []
        for _ in range(cfg['depths'][i]):
            qkv_w, qkv_b = lin(dim, 3 * dim)
            proj_w, proj_b = lin(dim, dim)
            table = 0.02 * jax.random.normal(
                nk(), ((2 * cfg['window_size'] - 1) ** 2, nh), jnp.float32)
            fc1_w, fc1_b = lin(dim, hidden)
            fc2_w, fc2_b = lin(hidden, dim)
            blocks.append(dict(
                norm1_g=jnp.ones((dim,), jnp.float32), norm1_b=jnp.zeros((dim,), jnp.float32),
                attn=dict(qkv_w=qkv_w, qkv_b=qkv_b, proj_w=proj_w, proj_b=proj_b,
                          rel_pos_table=table),
                norm2_g=jnp.ones((dim,), jnp.float32), norm2_b=jnp.zeros((dim,), jnp.float32),
                mlp_fc1_w=fc1_w, mlp_fc1_b=fc1_b, mlp_fc2_w=fc2_w, mlp_fc2_b=fc2_b))
        layer = dict(blocks=blocks)
        if i < n_layers - 1:
            rw, _ = lin(4 * dim, 2 * dim, bias=False)
            layer['downsample'] = dict(norm_g=jnp.ones((4 * dim,), jnp.float32),
                                       norm_b=jnp.zeros((4 * dim,), jnp.float32),
                                       reduction_w=rw)
        else:
            layer['downsample'] = None
        layers.append(layer)
    params['layers'] = layers

    nf = E * (2 ** (n_layers - 1))
    params['norm_g'] = jnp.ones((nf,), jnp.float32)
    params['norm_b'] = jnp.zeros((nf,), jnp.float32)
    hw, hb = lin(nf, cfg['n_classes'])
    params['head_w'] = hw
    params['head_b'] = hb
    return params


# ----------------------------------------------------------------------------
if __name__ == "__main__":
    cfg = dict(patch_size=4, in_c=3, n_classes=10, embed_dim=32,
               depths=(2, 2), n_heads=(2, 4), window_size=4, mlp_ratio=4.0)

    key = jax.random.PRNGKey(0)
    kp, kx = jax.random.split(key)
    params = init_params(kp, cfg)
    x = jax.random.normal(kx, (2, 3, 32, 32), jnp.float32)   # NCHW, like PyTorch

    fwd = jax.jit(lambda xx, pp: swin_forward(xx, pp, cfg))
    logits = fwd(x, params)
    logits = jax.block_until_ready(logits)

    assert logits.shape == (2, cfg['n_classes'])
    assert bool(jnp.all(jnp.isfinite(logits)))
    print("KERNEL_OK")
</pallas_src>

<mosaic_0001>
module attributes {stable_mosaic.version = 11 : i64} {
  func.func @kernel(%arg0: i32, %arg1: memref<128x32xf32, #tpu.memory_space<vmem>>, %arg2: memref<1x32xf32, #tpu.memory_space<vmem>>, %arg3: memref<1x32xf32, #tpu.memory_space<vmem>>, %arg4: memref<128x32xf32, #tpu.memory_space<vmem>>) attributes {dimension_semantics = [#tpu.dimension_semantics<parallel>], iteration_bounds = array<i64: 1>, scalar_prefetch = 0 : i64, scratch_operands = 0 : i64, tpu.core_type = #tpu.core_type<tc>, window_params = [{transform_indices = @transform_0, window_bounds = array<i64: 128, 32>}, {pipeline_mode = #tpu.pipeline_mode<synchronous>, transform_indices = @transform_1, window_bounds = array<i64: 1, 32>}, {pipeline_mode = #tpu.pipeline_mode<synchronous>, transform_indices = @transform_2, window_bounds = array<i64: 1, 32>}, {transform_indices = @transform_3, window_bounds = array<i64: 128, 32>}]} {
    %c0 = arith.constant 0 : index
    %c0_0 = arith.constant 0 : index
    %0 = vector.load %arg1[%c0, %c0_0] : memref<128x32xf32, #tpu.memory_space<vmem>>, vector<128x32xf32>
    %cst = arith.constant dense<0.000000e+00> : vector<128xf32>
    %1 = vector.multi_reduction <add>, %0, %cst [1] : vector<128x32xf32> to vector<128xf32>
    %2 = vector.shape_cast %1 : vector<128xf32> to vector<128x1xf32>
    %cst_1 = arith.constant 3.200000e+01 : f32
    %3 = vector.broadcast %cst_1 : f32 to vector<128x1xf32>
    %4 = arith.divf %2, %3 : vector<128x1xf32>
    %5 = vector.broadcast %4 : vector<128x1xf32> to vector<128x32xf32>
    %6 = arith.subf %0, %5 : vector<128x32xf32>
    %7 = arith.mulf %6, %6 : vector<128x32xf32>
    %cst_2 = arith.constant dense<0.000000e+00> : vector<128xf32>
    %8 = vector.multi_reduction <add>, %7, %cst_2 [1] : vector<128x32xf32> to vector<128xf32>
    %9 = vector.shape_cast %8 : vector<128xf32> to vector<128x1xf32>
    %cst_3 = arith.constant 3.200000e+01 : f32
    %10 = vector.broadcast %cst_3 : f32 to vector<128x1xf32>
    %11 = arith.divf %9, %10 : vector<128x1xf32>
    %12 = vector.broadcast %4 : vector<128x1xf32> to vector<128x32xf32>
    %13 = arith.subf %0, %12 : vector<128x32xf32>
    %cst_4 = arith.constant 9.99999974E-6 : f32
    %14 = vector.broadcast %cst_4 : f32 to vector<128x1xf32>
    %15 = arith.addf %11, %14 : vector<128x1xf32>
    %16 = math.rsqrt %15 : vector<128x1xf32>
    %17 = vector.broadcast %16 : vector<128x1xf32> to vector<128x32xf32>
    %18 = arith.mulf %13, %17 : vector<128x32xf32>
    %c0_5 = arith.constant 0 : index
    %c0_6 = arith.constant 0 : index
    %19 = vector.load %arg2[%c0_5, %c0_6] : memref<1x32xf32, #tpu.memory_space<vmem>>, vector<1x32xf32>
    %20 = vector.broadcast %19 : vector<1x32xf32> to vector<128x32xf32>
    %21 = arith.mulf %18, %20 : vector<128x32xf32>
    %c0_7 = arith.constant 0 : index
    %c0_8 = arith.constant 0 : index
    %22 = vector.load %arg3[%c0_7, %c0_8] : memref<1x32xf32, #tpu.memory_space<vmem>>, vector<1x32xf32>
    %23 = vector.broadcast %22 : vector<1x32xf32> to vector<128x32xf32>
    %24 = arith.addf %21, %23 : vector<128x32xf32>
    %c0_9 = arith.constant 0 : index
    %c0_10 = arith.constant 0 : index
    %25 = vector.load %arg4[%c0_9, %c0_10] : memref<128x32xf32, #tpu.memory_space<vmem>>, vector<128x32xf32>
    tpu.vector_store %arg4[%c0_9, %c0_10], %24 {strides = array<i32>} : memref<128x32xf32, #tpu.memory_space<vmem>>, vector<128x32xf32>,
    return
  }
  func.func @transform_0(%arg0: i32) -> (i32, i32) {
    %c0_i32 = arith.constant 0 : i32
    %c0_i32_0 = arith.constant 0 : i32
    return %arg0, %c0_i32 : i32, i32
  }
  func.func @transform_1(%arg0: i32) -> (i32, i32) {
    %c0_i32 = arith.constant 0 : i32
    %c0_i32_0 = arith.constant 0 : i32
    %c0_i32_1 = arith.constant 0 : i32
    return %c0_i32, %c0_i32_0 : i32, i32
  }
  func.func @transform_2(%arg0: i32) -> (i32, i32) {
    %c0_i32 = arith.constant 0 : i32
    %c0_i32_0 = arith.constant 0 : i32
    %c0_i32_1 = arith.constant 0 : i32
    return %c0_i32, %c0_i32_0 : i32, i32
  }
  func.func @transform_3(%arg0: i32) -> (i32, i32) {
    %c0_i32 = arith.constant 0 : i32
    %c0_i32_0 = arith.constant 0 : i32
    return %arg0, %c0_i32 : i32, i32
  }
}

module attributes {stable_mosaic.version = 11 : i64} {
  func.func @kernel(%arg0: i32, %arg1: i32, %arg2: i32, %arg3: memref<128x48xbf16, #tpu.memory_space<vmem>>, %arg4: memref<48x32xbf16, #tpu.memory_space<vmem>>, %arg5: memref<1x32xf32, #tpu.memory_space<vmem>>, %arg6: memref<128x32xf32, #tpu.memory_space<vmem>>, %arg7: memref<128x32xf32, #tpu.memory_space<vmem>>) attributes {dimension_semantics = [#tpu.dimension_semantics<parallel>, #tpu.dimension_semantics<parallel>, #tpu.dimension_semantics<arbitrary>], iteration_bounds = array<i64: 1, 1, 1>, scalar_prefetch = 0 : i64, scratch_operands = 1 : i64, tpu.core_type = #tpu.core_type<tc>, window_params = [{transform_indices = @transform_0, window_bounds = array<i64: 128, 48>}, {transform_indices = @transform_1, window_bounds = array<i64: 48, 32>}, {transform_indices = @transform_2, window_bounds = array<i64: 1, 32>}, {transform_indices = @transform_3, window_bounds = array<i64: 128, 32>}]} {
    %c0_i32 = arith.constant 0 : i32
    %0 = arith.cmpi eq, %arg2, %c0_i32 : i32
    %1 = arith.extui %0 : i1 to i32
    %c0_i32_0 = arith.constant 0 : i32
    %2 = arith.cmpi ne, %1, %c0_i32_0 : i32
    scf.if %2 {
      %cst_10 = arith.constant 0.000000e+00 : f32
      %12 = vector.broadcast %cst_10 : f32 to vector<128x32xf32>
      %c0_11 = arith.constant 0 : index
      %c0_12 = arith.constant 0 : index
      %13 = vector.load %arg7[%c0_11, %c0_12] : memref<128x32xf32, #tpu.memory_space<vmem>>, vector<128x32xf32>
      tpu.vector_store %arg7[%c0_11, %c0_12], %12 {strides = array<i32>} : memref<128x32xf32, #tpu.memory_space<vmem>>, vector<128x32xf32>,
    } else {
    }
    %c0 = arith.constant 0 : index
    %c0_1 = arith.constant 0 : index
    %3 = vector.load %arg7[%c0, %c0_1] : memref<128x32xf32, #tpu.memory_space<vmem>>, vector<128x32xf32>
    %c0_2 = arith.constant 0 : index
    %c0_3 = arith.constant 0 : index
    %4 = vector.load %arg3[%c0_2, %c0_3] : memref<128x48xbf16, #tpu.memory_space<vmem>>, vector<128x48xbf16>
    %c0_4 = arith.constant 0 : index
    %c0_5 = arith.constant 0 : index
    %5 = vector.load %arg4[%c0_4, %c0_5] : memref<48x32xbf16, #tpu.memory_space<vmem>>, vector<48x32xbf16>
    %cst = arith.constant dense<0.000000e+00> : vector<128x32xf32>
    %6 = tpu.matmul %4, %5, %cst {dimension_numbers = #tpu.dot_dimension_numbers<[1], [0], [0], [1], [0, 0, 1, 1], [], []>} : vector<128x48xbf16>, vector<48x32xbf16>, vector<128x32xf32> -> vector<128x32xf32>
    %7 = arith.addf %3, %6 : vector<128x32xf32>
    %c0_6 = arith.constant 0 : index
    %c0_7 = arith.constant 0 : index
    %8 = vector.load %arg7[%c0_6, %c0_7] : memref<128x32xf32, #tpu.memory_space<vmem>>, vector<128x32xf32>
    tpu.vector_store %arg7[%c0_6, %c0_7], %7 {strides = array<i32>} : memref<128x32xf32, #tpu.memory_space<vmem>>, vector<128x32xf32>,
    %c0_i32_8 = arith.constant 0 : i32
    %9 = arith.cmpi eq, %arg2, %c0_i32_8 : i32
    %10 = arith.extui %9 : i1 to i32
    %c0_i32_9 = arith.constant 0 : i32
    %11 = arith.cmpi ne, %10, %c0_i32_9 : i32
    scf.if %11 {
      %c0_10 = arith.constant 0 : index
      %c0_11 = arith.constant 0 : index
      %12 = vector.load %arg7[%c0_10, %c0_11] : memref<128x32xf32, #tpu.memory_space<vmem>>, vector<128x32xf32>
      %c0_12 = arith.constant 0 : index
      %c0_13 = arith.constant 0 : index
      %13 = vector.load %arg5[%c0_12, %c0_13] : memref<1x32xf32, #tpu.memory_space<vmem>>, vector<1x32xf32>
      %14 = vector.broadcast %13 : vector<1x32xf32> to vector<128x32xf32>
      %15 = arith.addf %12, %14 : vector<128x32xf32>
      %c0_14 = arith.constant 0 : index
      %c0_15 = arith.constant 0 : index
      %16 = vector.load %arg6[%c0_14, %c0_15] : memref<128x32xf32, #tpu.memory_space<vmem>>, vector<128x32xf32>
      tpu.vector_store %arg6[%c0_14, %c0_15], %15 {strides = array<i32>} : memref<128x32xf32, #tpu.memory_space<vmem>>, vector<128x32xf32>,
    } else {
    }
    return
  }
  func.func @transform_0(%arg0: i32, %arg1: i32, %arg2: i32) -> (i32, i32) {
    %c0_i32 = arith.constant 0 : i32
    return %arg0, %arg2 : i32, i32
  }
  func.func @transform_1(%arg0: i32, %arg1: i32, %arg2: i32) -> (i32, i32) {
    %c0_i32 = arith.constant 0 : i32
    return %arg2, %arg1 : i32, i32
  }
  func.func @transform_2(%arg0: i32, %arg1: i32, %arg2: i32) -> (i32, i32) {
    %c0_i32 = arith.constant 0 : i32
    %c0_i32_0 = arith.constant 0 : i32
    return %c0_i32, %arg1 : i32, i32
  }
  func.func @transform_3(%arg0: i32, %arg1: i32, %arg2: i32) -> (i32, i32) {
    %c0_i32 = arith.constant 0 : i32
    return %arg0, %arg1 : i32, i32
  }
}

module attributes {stable_mosaic.version = 11 : i64} {
  func.func @kernel(%arg0: i32, %arg1: memref<128x32xf32, #tpu.memory_space<vmem>>, %arg2: memref<1x32xf32, #tpu.memory_space<vmem>>, %arg3: memref<1x32xf32, #tpu.memory_space<vmem>>, %arg4: memref<128x32xbf16, #tpu.memory_space<vmem>>) attributes {dimension_semantics = [#tpu.dimension_semantics<parallel>], iteration_bounds = array<i64: 1>, scalar_prefetch = 0 : i64, scratch_operands = 0 : i64, tpu.core_type = #tpu.core_type<tc>, window_params = [{transform_indices = @transform_0, window_bounds = array<i64: 128, 32>}, {pipeline_mode = #tpu.pipeline_mode<synchronous>, transform_indices = @transform_1, window_bounds = array<i64: 1, 32>}, {pipeline_mode = #tpu.pipeline_mode<synchronous>, transform_indices = @transform_2, window_bounds = array<i64: 1, 32>}, {transform_indices = @transform_3, window_bounds = array<i64: 128, 32>}]} {
    %c0 = arith.constant 0 : index
    %c0_0 = arith.constant 0 : index
    %0 = vector.load %arg1[%c0, %c0_0] : memref<128x32xf32, #tpu.memory_space<vmem>>, vector<128x32xf32>
    %cst = arith.constant dense<0.000000e+00> : vector<128xf32>
    %1 = vector.multi_reduction <add>, %0, %cst [1] : vector<128x32xf32> to vector<128xf32>
    %2 = vector.shape_cast %1 : vector<128xf32> to vector<128x1xf32>
    %cst_1 = arith.constant 3.200000e+01 : f32
    %3 = vector.broadcast %cst_1 : f32 to vector<128x1xf32>
    %4 = arith.divf %2, %3 : vector<128x1xf32>
    %5 = vector.broadcast %4 : vector<128x1xf32> to vector<128x32xf32>
    %6 = arith.subf %0, %5 : vector<128x32xf32>
    %7 = arith.mulf %6, %6 : vector<128x32xf32>
    %cst_2 = arith.constant dense<0.000000e+00> : vector<128xf32>
    %8 = vector.multi_reduction <add>, %7, %cst_2 [1] : vector<128x32xf32> to vector<128xf32>
    %9 = vector.shape_cast %8 : vector<128xf32> to vector<128x1xf32>
    %cst_3 = arith.constant 3.200000e+01 : f32
    %10 = vector.broadcast %cst_3 : f32 to vector<128x1xf32>
    %11 = arith.divf %9, %10 : vector<128x1xf32>
    %12 = vector.broadcast %4 : vector<128x1xf32> to vector<128x32xf32>
    %13 = arith.subf %0, %12 : vector<128x32xf32>
    %cst_4 = arith.constant 9.99999974E-6 : f32
    %14 = vector.broadcast %cst_4 : f32 to vector<128x1xf32>
    %15 = arith.addf %11, %14 : vector<128x1xf32>
    %16 = math.rsqrt %15 : vector<128x1xf32>
    %17 = vector.broadcast %16 : vector<128x1xf32> to vector<128x32xf32>
    %18 = arith.mulf %13, %17 : vector<128x32xf32>
    %c0_5 = arith.constant 0 : index
    %c0_6 = arith.constant 0 : index
    %19 = vector.load %arg2[%c0_5, %c0_6] : memref<1x32xf32, #tpu.memory_space<vmem>>, vector<1x32xf32>
    %20 = vector.broadcast %19 : vector<1x32xf32> to vector<128x32xf32>
    %21 = arith.mulf %18, %20 : vector<128x32xf32>
    %c0_7 = arith.constant 0 : index
    %c0_8 = arith.constant 0 : index
    %22 = vector.load %arg3[%c0_7, %c0_8] : memref<1x32xf32, #tpu.memory_space<vmem>>, vector<1x32xf32>
    %23 = vector.broadcast %22 : vector<1x32xf32> to vector<128x32xf32>
    %24 = arith.addf %21, %23 : vector<128x32xf32>
    %25 = arith.truncf %24 : vector<128x32xf32> to vector<128x32xbf16>
    %c0_9 = arith.constant 0 : index
    %c0_10 = arith.constant 0 : index
    %26 = vector.load %arg4[%c0_9, %c0_10] : memref<128x32xbf16, #tpu.memory_space<vmem>>, vector<128x32xbf16>
    tpu.vector_store %arg4[%c0_9, %c0_10], %25 {strides = array<i32>} : memref<128x32xbf16, #tpu.memory_space<vmem>>, vector<128x32xbf16>,
    return
  }
  func.func @transform_0(%arg0: i32) -> (i32, i32) {
    %c0_i32 = arith.constant 0 : i32
    %c0_i32_0 = arith.constant 0 : i32
    return %arg0, %c0_i32 : i32, i32
  }
  func.func @transform_1(%arg0: i32) -> (i32, i32) {
    %c0_i32 = arith.constant 0 : i32
    %c0_i32_0 = arith.constant 0 : i32
    %c0_i32_1 = arith.constant 0 : i32
    return %c0_i32, %c0_i32_0 : i32, i32
  }
  func.func @transform_2(%arg0: i32) -> (i32, i32) {
    %c0_i32 = arith.constant 0 : i32
    %c0_i32_0 = arith.constant 0 : i32
    %c0_i32_1 = arith.constant 0 : i32
    return %c0_i32, %c0_i32_0 : i32, i32
  }
  func.func @transform_3(%arg0: i32) -> (i32, i32) {
    %c0_i32 = arith.constant 0 : i32
    %c0_i32_0 = arith.constant 0 : i32
    return %arg0, %c0_i32 : i32, i32
  }
}

module attributes {stable_mosaic.version = 11 : i64} {
  func.func @kernel(%arg0: i32, %arg1: i32, %arg2: i32, %arg3: memref<128x32xbf16, #tpu.memory_space<vmem>>, %arg4: memref<32x96xbf16, #tpu.memory_space<vmem>>, %arg5: memref<1x96xf32, #tpu.memory_space<vmem>>, %arg6: memref<128x96xbf16, #tpu.memory_space<vmem>>, %arg7: memref<128x96xf32, #tpu.memory_space<vmem>>) attributes {dimension_semantics = [#tpu.dimension_semantics<parallel>, #tpu.dimension_semantics<parallel>, #tpu.dimension_semantics<arbitrary>], iteration_bounds = array<i64: 1, 1, 1>, scalar_prefetch = 0 : i64, scratch_operands = 1 : i64, tpu.core_type = #tpu.core_type<tc>, window_params = [{transform_indices = @transform_0, window_bounds = array<i64: 128, 32>}, {transform_indices = @transform_1, window_bounds = array<i64: 32, 96>}, {transform_indices = @transform_2, window_bounds = array<i64: 1, 96>}, {transform_indices = @transform_3, window_bounds = array<i64: 128, 96>}]} {
    %c0_i32 = arith.constant 0 : i32
    %0 = arith.cmpi eq, %arg2, %c0_i32 : i32
    %1 = arith.extui %0 : i1 to i32
    %c0_i32_0 = arith.constant 0 : i32
    %2 = arith.cmpi ne, %1, %c0_i32_0 : i32
    scf.if %2 {
      %cst_10 = arith.constant 0.000000e+00 : f32
      %12 = vector.broadcast %cst_10 : f32 to vector<128x96xf32>
      %c0_11 = arith.constant 0 : index
      %c0_12 = arith.constant 0 : index
      %13 = vector.load %arg7[%c0_11, %c0_12] : memref<128x96xf32, #tpu.memory_space<vmem>>, vector<128x96xf32>
      tpu.vector_store %arg7[%c0_11, %c0_12], %12 {strides = array<i32>} : memref<128x96xf32, #tpu.memory_space<vmem>>, vector<128x96xf32>,
    } else {
    }
    %c0 = arith.constant 0 : index
    %c0_1 = arith.constant 0 : index
    %3 = vector.load %arg7[%c0, %c0_1] : memref<128x96xf32, #tpu.memory_space<vmem>>, vector<128x96xf32>
    %c0_2 = arith.constant 0 : index
    %c0_3 = arith.constant 0 : index
    %4 = vector.load %arg3[%c0_2, %c0_3] : memref<128x32xbf16, #tpu.memory_space<vmem>>, vector<128x32xbf16>
    %c0_4 = arith.constant 0 : index
    %c0_5 = arith.constant 0 : index
    %5 = vector.load %arg4[%c0_4, %c0_5] : memref<32x96xbf16, #tpu.memory_space<vmem>>, vector<32x96xbf16>
    %cst = arith.constant dense<0.000000e+00> : vector<128x96xf32>
    %6 = tpu.matmul %4, %5, %cst {dimension_numbers = #tpu.dot_dimension_numbers<[1], [0], [0], [1], [0, 0, 1, 1], [], []>} : vector<128x32xbf16>, vector<32x96xbf16>, vector<128x96xf32> -> vector<128x96xf32>
    %7 = arith.addf %3, %6 : vector<128x96xf32>
    %c0_6 = arith.constant 0 : index
    %c0_7 = arith.constant 0 : index
    %8 = vector.load %arg7[%c0_6, %c0_7] : memref<128x96xf32, #tpu.memory_space<vmem>>, vector<128x96xf32>
    tpu.vector_store %arg7[%c0_6, %c0_7], %7 {strides = array<i32>} : memref<128x96xf32, #tpu.memory_space<vmem>>, vector<128x96xf32>,
    %c0_i32_8 = arith.constant 0 : i32
    %9 = arith.cmpi eq, %arg2, %c0_i32_8 : i32
    %10 = arith.extui %9 : i1 to i32
    %c0_i32_9 = arith.constant 0 : i32
    %11 = arith.cmpi ne, %10, %c0_i32_9 : i32
    scf.if %11 {
      %c0_10 = arith.constant 0 : index
      %c0_11 = arith.constant 0 : index
      %12 = vector.load %arg7[%c0_10, %c0_11] : memref<128x96xf32, #tpu.memory_space<vmem>>, vector<128x96xf32>
      %c0_12 = arith.constant 0 : index
      %c0_13 = arith.constant 0 : index
      %13 = vector.load %arg5[%c0_12, %c0_13] : memref<1x96xf32, #tpu.memory_space<vmem>>, vector<1x96xf32>
      %14 = vector.broadcast %13 : vector<1x96xf32> to vector<128x96xf32>
      %15 = arith.addf %12, %14 : vector<128x96xf32>
      %16 = arith.truncf %15 : vector<128x96xf32> to vector<128x96xbf16>
      %c0_14 = arith.constant 0 : index
      %c0_15 = arith.constant 0 : index
      %17 = vector.load %arg6[%c0_14, %c0_15] : memref<128x96xbf16, #tpu.memory_space<vmem>>, vector<128x96xbf16>
      tpu.vector_store %arg6[%c0_14, %c0_15], %16 {strides = array<i32>} : memref<128x96xbf16, #tpu.memory_space<vmem>>, vector<128x96xbf16>,
    } else {
    }
    return
  }
  func.func @transform_0(%arg0: i32, %arg1: i32, %arg2: i32) -> (i32, i32) {
    %c0_i32 = arith.constant 0 : i32
    return %arg0, %arg2 : i32, i32
  }
  func.func @transform_1(%arg0: i32, %arg1: i32, %arg2: i32) -> (i32, i32) {
    %c0_i32 = arith.constant 0 : i32
    return %arg2, %arg1 : i32, i32
  }
  func.func @transform_2(%arg0: i32, %arg1: i32, %arg2: i32) -> (i32, i32) {
    %c0_i32 = arith.constant 0 : i32
    %c0_i32_0 = arith.constant 0 : i32
    return %c0_i32, %arg1 : i32, i32
  }
  func.func @transform_3(%arg0: i32, %arg1: i32, %arg2: i32) -> (i32, i32) {
    %c0_i32 = arith.constant 0 : i32
    return %arg0, %arg1 : i32, i32
  }
}

module attributes {stable_mosaic.version = 11 : i64} {
  func.func @kernel(%arg0: i32, %arg1: i32, %arg2: memref<3x1x4x16x16xbf16, #tpu.memory_space<vmem>>, %arg3: memref<1x16x16xf32, #tpu.memory_space<vmem>>, %arg4: memref<1x4x16x16xbf16, #tpu.memory_space<vmem>>) attributes {dimension_semantics = [#tpu.dimension_semantics<parallel>, #tpu.dimension_semantics<parallel>], iteration_bounds = array<i64: 2, 2>, scalar_prefetch = 0 : i64, scratch_operands = 0 : i64, tpu.core_type = #tpu.core_type<tc>, window_params = [{transform_indices = @transform_0, window_bounds = array<i64: 3, 1, 4, 16, 16>}, {transform_indices = @transform_1, window_bounds = array<i64: 1, 16, 16>}, {transform_indices = @transform_2, window_bounds = array<i64: 1, 4, 16, 16>}]} {
    %c0 = arith.constant 0 : index
    %c0_0 = arith.constant 0 : index
    %c0_1 = arith.constant 0 : index
    %c0_2 = arith.constant 0 : index
    %c0_3 = arith.constant 0 : index
    %0 = vector.load %arg2[%c0, %c0_0, %c0_1, %c0_2, %c0_3] : memref<3x1x4x16x16xbf16, #tpu.memory_space<vmem>>, vector<1x1x4x16x16xbf16>
    %1 = vector.shape_cast %0 : vector<1x1x4x16x16xbf16> to vector<4x16x16xbf16>
    %c1 = arith.constant 1 : index
    %c0_4 = arith.constant 0 : index
    %c0_5 = arith.constant 0 : index
    %c0_6 = arith.constant 0 : index
    %c0_7 = arith.constant 0 : index
    %2 = vector.load %arg2[%c1, %c0_4, %c0_5, %c0_6, %c0_7] : memref<3x1x4x16x16xbf16, #tpu.memory_space<vmem>>, vector<1x1x4x16x16xbf16>
    %3 = vector.shape_cast %2 : vector<1x1x4x16x16xbf16> to vector<4x16x16xbf16>
    %c2 = arith.constant 2 : index
    %c0_8 = arith.constant 0 : index
    %c0_9 = arith.constant 0 : index
    %c0_10 = arith.constant 0 : index
    %c0_11 = arith.constant 0 : index
    %4 = vector.load %arg2[%c2, %c0_8, %c0_9, %c0_10, %c0_11] : memref<3x1x4x16x16xbf16, #tpu.memory_space<vmem>>, vector<1x1x4x16x16xbf16>
    %5 = vector.shape_cast %4 : vector<1x1x4x16x16xbf16> to vector<4x16x16xbf16>
    %cst = arith.constant dense<0.000000e+00> : vector<4x16x16xf32>
    %6 = tpu.matmul %1, %3, %cst {dimension_numbers = #tpu.dot_dimension_numbers<[2], [2], [1], [1], [0, 0, 0, 1, 1, 1], [0], [0]>} : vector<4x16x16xbf16>, vector<4x16x16xbf16>, vector<4x16x16xf32> -> vector<4x16x16xf32>
    %cst_12 = arith.constant 2.500000e-01 : f32
    %7 = vector.broadcast %cst_12 : f32 to vector<4x16x16xf32>
    %8 = arith.mulf %6, %7 : vector<4x16x16xf32>
    %c0_13 = arith.constant 0 : index
    %c0_14 = arith.constant 0 : index
    %c0_15 = arith.constant 0 : index
    %9 = vector.load %arg3[%c0_13, %c0_14, %c0_15] : memref<1x16x16xf32, #tpu.memory_space<vmem>>, vector<1x16x16xf32>
    %10 = vector.shape_cast %9 : vector<1x16x16xf32> to vector<16x16xf32>
    %11 = vector.shape_cast %10 : vector<16x16xf32> to vector<1x16x16xf32>
    %12 = vector.broadcast %11 : vector<1x16x16xf32> to vector<4x16x16xf32>
    %13 = arith.addf %8, %12 : vector<4x16x16xf32>
    %cst_16 = arith.constant dense<0xFF800000> : vector<4x16xf32>
    %14 = vector.multi_reduction <maximumf>, %13, %cst_16 [2] : vector<4x16x16xf32> to vector<4x16xf32>
    %15 = vector.shape_cast %14 : vector<4x16xf32> to vector<4x16x1xf32>
    %16 = vector.broadcast %15 : vector<4x16x1xf32> to vector<4x16x16xf32>
    %17 = arith.subf %13, %16 : vector<4x16x16xf32>
    %18 = math.exp %17 : vector<4x16x16xf32>
    %cst_17 = arith.constant dense<0.000000e+00> : vector<4x16xf32>
    %19 = vector.multi_reduction <add>, %18, %cst_17 [2] : vector<4x16x16xf32> to vector<4x16xf32>
    %20 = vector.shape_cast %19 : vector<4x16xf32> to vector<4x16x1xf32>
    %21 = tpu.reciprocal %20 {approx = true} : vector<4x16x1xf32> -> vector<4x16x1xf32>
    %22 = vector.broadcast %21 : vector<4x16x1xf32> to vector<4x16x16xf32>
    %23 = arith.mulf %18, %22 : vector<4x16x16xf32>
    %24 = arith.truncf %23 : vector<4x16x16xf32> to vector<4x16x16xbf16>
    %cst_18 = arith.constant dense<0.000000e+00> : vector<4x16x16xf32>
    %25 = tpu.matmul %24, %5, %cst_18 {dimension_numbers = #tpu.dot_dimension_numbers<[2], [1], [1], [2], [0, 0, 0, 1, 1, 2], [0], [0]>} : vector<4x16x16xbf16>, vector<4x16x16xbf16>, vector<4x16x16xf32> -> vector<4x16x16xf32>
    %26 = arith.truncf %25 : vector<4x16x16xf32> to vector<4x16x16xbf16>
    %c0_19 = arith.constant 0 : index
    %c0_20 = arith.constant 0 : index
    %c0_21 = arith.constant 0 : index
    %c0_22 = arith.constant 0 : index
    %27 = vector.load %arg4[%c0_19, %c0_20, %c0_21, %c0_22] : memref<1x4x16x16xbf16, #tpu.memory_space<vmem>>, vector<1x4x16x16xbf16>
    %28 = vector.shape_cast %27 : vector<1x4x16x16xbf16> to vector<4x16x16xbf16>
    %29 = vector.shape_cast %26 : vector<4x16x16xbf16> to vector<1x4x16x16xbf16>
    tpu.vector_store %arg4[%c0_19, %c0_20, %c0_21, %c0_22], %29 {strides = array<i32>} : memref<1x4x16x16xbf16, #tpu.memory_space<vmem>>, vector<1x4x16x16xbf16>,
    return
  }
  func.func @transform_0(%arg0: i32, %arg1: i32) -> (i32, i32, i32, i32, i32) {
    %c0_i32 = arith.constant 0 : i32
    %c0_i32_0 = arith.constant 0 : i32
    %c0_i32_1 = arith.constant 0 : i32
    %c0_i32_2 = arith.constant 0 : i32
    return %c0_i32, %arg1, %arg0, %c0_i32_0, %c0_i32_1 : i32, i32, i32, i32, i32
  }
  func.func @transform_1(%arg0: i32, %arg1: i32) -> (i32, i32, i32) {
    %c0_i32 = arith.constant 0 : i32
    %c0_i32_0 = arith.constant 0 : i32
    %c0_i32_1 = arith.constant 0 : i32
    return %arg1, %c0_i32, %c0_i32_0 : i32, i32, i32
  }
  func.func @transform_2(%arg0: i32, %arg1: i32) -> (i32, i32, i32, i32) {
    %c0_i32 = arith.constant 0 : i32
    %c0_i32_0 = arith.constant 0 : i32
    %c0_i32_1 = arith.constant 0 : i32
    return %arg1, %arg0, %c0_i32, %c0_i32_0 : i32, i32, i32, i32
  }
}

module attributes {stable_mosaic.version = 11 : i64} {
  func.func @kernel(%arg0: i32, %arg1: i32, %arg2: i32, %arg3: memref<128x32xbf16, #tpu.memory_space<vmem>>, %arg4: memref<32x32xbf16, #tpu.memory_space<vmem>>, %arg5: memref<1x32xf32, #tpu.memory_space<vmem>>, %arg6: memref<128x32xf32, #tpu.memory_space<vmem>>, %arg7: memref<128x32xf32, #tpu.memory_space<vmem>>) attributes {dimension_semantics = [#tpu.dimension_semantics<parallel>, #tpu.dimension_semantics<parallel>, #tpu.dimension_semantics<arbitrary>], iteration_bounds = array<i64: 1, 1, 1>, scalar_prefetch = 0 : i64, scratch_operands = 1 : i64, tpu.core_type = #tpu.core_type<tc>, window_params = [{transform_indices = @transform_0, window_bounds = array<i64: 128, 32>}, {transform_indices = @transform_1, window_bounds = array<i64: 32, 32>}, {transform_indices = @transform_2, window_bounds = array<i64: 1, 32>}, {transform_indices = @transform_3, window_bounds = array<i64: 128, 32>}]} {
    %c0_i32 = arith.constant 0 : i32
    %0 = arith.cmpi eq, %arg2, %c0_i32 : i32
    %1 = arith.extui %0 : i1 to i32
    %c0_i32_0 = arith.constant 0 : i32
    %2 = arith.cmpi ne, %1, %c0_i32_0 : i32
    scf.if %2 {
      %cst_10 = arith.constant 0.000000e+00 : f32
      %12 = vector.broadcast %cst_10 : f32 to vector<128x32xf32>
      %c0_11 = arith.constant 0 : index
      %c0_12 = arith.constant 0 : index
      %13 = vector.load %arg7[%c0_11, %c0_12] : memref<128x32xf32, #tpu.memory_space<vmem>>, vector<128x32xf32>
      tpu.vector_store %arg7[%c0_11, %c0_12], %12 {strides = array<i32>} : memref<128x32xf32, #tpu.memory_space<vmem>>, vector<128x32xf32>,
    } else {
    }
    %c0 = arith.constant 0 : index
    %c0_1 = arith.constant 0 : index
    %3 = vector.load %arg7[%c0, %c0_1] : memref<128x32xf32, #tpu.memory_space<vmem>>, vector<128x32xf32>
    %c0_2 = arith.constant 0 : index
    %c0_3 = arith.constant 0 : index
    %4 = vector.load %arg3[%c0_2, %c0_3] : memref<128x32xbf16, #tpu.memory_space<vmem>>, vector<128x32xbf16>
    %c0_4 = arith.constant 0 : index
    %c0_5 = arith.constant 0 : index
    %5 = vector.load %arg4[%c0_4, %c0_5] : memref<32x32xbf16, #tpu.memory_space<vmem>>, vector<32x32xbf16>
    %cst = arith.constant dense<0.000000e+00> : vector<128x32xf32>
    %6 = tpu.matmul %4, %5, %cst {dimension_numbers = #tpu.dot_dimension_numbers<[1], [0], [0], [1], [0, 0, 1, 1], [], []>} : vector<128x32xbf16>, vector<32x32xbf16>, vector<128x32xf32> -> vector<128x32xf32>
    %7 = arith.addf %3, %6 : vector<128x32xf32>
    %c0_6 = arith.constant 0 : index
    %c0_7 = arith.constant 0 : index
    %8 = vector.load %arg7[%c0_6, %c0_7] : memref<128x32xf32, #tpu.memory_space<vmem>>, vector<128x32xf32>
    tpu.vector_store %arg7[%c0_6, %c0_7], %7 {strides = array<i32>} : memref<128x32xf32, #tpu.memory_space<vmem>>, vector<128x32xf32>,
    %c0_i32_8 = arith.constant 0 : i32
    %9 = arith.cmpi eq, %arg2, %c0_i32_8 : i32
    %10 = arith.extui %9 : i1 to i32
    %c0_i32_9 = arith.constant 0 : i32
    %11 = arith.cmpi ne, %10, %c0_i32_9 : i32
    scf.if %11 {
      %c0_10 = arith.constant 0 : index
      %c0_11 = arith.constant 0 : index
      %12 = vector.load %arg7[%c0_10, %c0_11] : memref<128x32xf32, #tpu.memory_space<vmem>>, vector<128x32xf32>
      %c0_12 = arith.constant 0 : index
      %c0_13 = arith.constant 0 : index
      %13 = vector.load %arg5[%c0_12, %c0_13] : memref<1x32xf32, #tpu.memory_space<vmem>>, vector<1x32xf32>
      %14 = vector.broadcast %13 : vector<1x32xf32> to vector<128x32xf32>
      %15 = arith.addf %12, %14 : vector<128x32xf32>
      %c0_14 = arith.constant 0 : index
      %c0_15 = arith.constant 0 : index
      %16 = vector.load %arg6[%c0_14, %c0_15] : memref<128x32xf32, #tpu.memory_space<vmem>>, vector<128x32xf32>
      tpu.vector_store %arg6[%c0_14, %c0_15], %15 {strides = array<i32>} : memref<128x32xf32, #tpu.memory_space<vmem>>, vector<128x32xf32>,
    } else {
    }
    return
  }
  func.func @transform_0(%arg0: i32, %arg1: i32, %arg2: i32) -> (i32, i32) {
    %c0_i32 = arith.constant 0 : i32
    return %arg0, %arg2 : i32, i32
  }
  func.func @transform_1(%arg0: i32, %arg1: i32, %arg2: i32) -> (i32, i32) {
    %c0_i32 = arith.constant 0 : i32
    return %arg2, %arg1 : i32, i32
  }
  func.func @transform_2(%arg0: i32, %arg1: i32, %arg2: i32) -> (i32, i32) {
    %c0_i32 = arith.constant 0 : i32
    %c0_i32_0 = arith.constant 0 : i32
    return %c0_i32, %arg1 : i32, i32
  }
  func.func @transform_3(%arg0: i32, %arg1: i32, %arg2: i32) -> (i32, i32) {
    %c0_i32 = arith.constant 0 : i32
    return %arg0, %arg1 : i32, i32
  }
}

module attributes {stable_mosaic.version = 11 : i64} {
  func.func @kernel(%arg0: i32, %arg1: i32, %arg2: i32, %arg3: memref<128x32xbf16, #tpu.memory_space<vmem>>, %arg4: memref<32x128xbf16, #tpu.memory_space<vmem>>, %arg5: memref<1x128xf32, #tpu.memory_space<vmem>>, %arg6: memref<128x128xbf16, #tpu.memory_space<vmem>>, %arg7: memref<128x128xf32, #tpu.memory_space<vmem>>) attributes {dimension_semantics = [#tpu.dimension_semantics<parallel>, #tpu.dimension_semantics<parallel>, #tpu.dimension_semantics<arbitrary>], iteration_bounds = array<i64: 1, 1, 1>, scalar_prefetch = 0 : i64, scratch_operands = 1 : i64, tpu.core_type = #tpu.core_type<tc>, window_params = [{transform_indices = @transform_0, window_bounds = array<i64: 128, 32>}, {transform_indices = @transform_1, window_bounds = array<i64: 32, 128>}, {transform_indices = @transform_2, window_bounds = array<i64: 1, 128>}, {transform_indices = @transform_3, window_bounds = array<i64: 128, 128>}]} {
    %c0_i32 = arith.constant 0 : i32
    %0 = arith.cmpi eq, %arg2, %c0_i32 : i32
    %1 = arith.extui %0 : i1 to i32
    %c0_i32_0 = arith.constant 0 : i32
    %2 = arith.cmpi ne, %1, %c0_i32_0 : i32
    scf.if %2 {
      %cst_10 = arith.constant 0.000000e+00 : f32
      %12 = vector.broadcast %cst_10 : f32 to vector<128x128xf32>
      %c0_11 = arith.constant 0 : index
      %c0_12 = arith.constant 0 : index
      %13 = vector.load %arg7[%c0_11, %c0_12] : memref<128x128xf32, #tpu.memory_space<vmem>>, vector<128x128xf32>
      tpu.vector_store %arg7[%c0_11, %c0_12], %12 {strides = array<i32>} : memref<128x128xf32, #tpu.memory_space<vmem>>, vector<128x128xf32>,
    } else {
    }
    %c0 = arith.constant 0 : index
    %c0_1 = arith.constant 0 : index
    %3 = vector.load %arg7[%c0, %c0_1] : memref<128x128xf32, #tpu.memory_space<vmem>>, vector<128x128xf32>
    %c0_2 = arith.constant 0 : index
    %c0_3 = arith.constant 0 : index
    %4 = vector.load %arg3[%c0_2, %c0_3] : memref<128x32xbf16, #tpu.memory_space<vmem>>, vector<128x32xbf16>
    %c0_4 = arith.constant 0 : index
    %c0_5 = arith.constant 0 : index
    %5 = vector.load %arg4[%c0_4, %c0_5] : memref<32x128xbf16, #tpu.memory_space<vmem>>, vector<32x128xbf16>
    %cst = arith.constant dense<0.000000e+00> : vector<128x128xf32>
    %6 = tpu.matmul %4, %5, %cst {dimension_numbers = #tpu.dot_dimension_numbers<[1], [0], [0], [1], [0, 0, 1, 1], [], []>} : vector<128x32xbf16>, vector<32x128xbf16>, vector<128x128xf32> -> vector<128x128xf32>
    %7 = arith.addf %3, %6 : vector<128x128xf32>
    %c0_6 = arith.constant 0 : index
    %c0_7 = arith.constant 0 : index
    %8 = vector.load %arg7[%c0_6, %c0_7] : memref<128x128xf32, #tpu.memory_space<vmem>>, vector<128x128xf32>
    tpu.vector_store %arg7[%c0_6, %c0_7], %7 {strides = array<i32>} : memref<128x128xf32, #tpu.memory_space<vmem>>, vector<128x128xf32>,
    %c0_i32_8 = arith.constant 0 : i32
    %9 = arith.cmpi eq, %arg2, %c0_i32_8 : i32
    %10 = arith.extui %9 : i1 to i32
    %c0_i32_9 = arith.constant 0 : i32
    %11 = arith.cmpi ne, %10, %c0_i32_9 : i32
    scf.if %11 {
      %c0_10 = arith.constant 0 : index
      %c0_11 = arith.constant 0 : index
      %12 = vector.load %arg7[%c0_10, %c0_11] : memref<128x128xf32, #tpu.memory_space<vmem>>, vector<128x128xf32>
      %c0_12 = arith.constant 0 : index
      %c0_13 = arith.constant 0 : index
      %13 = vector.load %arg5[%c0_12, %c0_13] : memref<1x128xf32, #tpu.memory_space<vmem>>, vector<1x128xf32>
      %14 = vector.broadcast %13 : vector<1x128xf32> to vector<128x128xf32>
      %15 = arith.addf %12, %14 : vector<128x128xf32>
      %cst_14 = arith.constant 5.000000e-01 : f32
      %16 = vector.broadcast %cst_14 : f32 to vector<128x128xf32>
      %17 = arith.mulf %16, %15 : vector<128x128xf32>
      %cst_15 = arith.constant 4.471500e-02 : f32
      %18 = vector.broadcast %cst_15 : f32 to vector<128x128xf32>
      %19 = arith.mulf %18, %15 : vector<128x128xf32>
      %20 = arith.mulf %19, %15 : vector<128x128xf32>
      %21 = arith.mulf %20, %15 : vector<128x128xf32>
      %22 = arith.addf %15, %21 : vector<128x128xf32>
      %cst_16 = arith.constant 0.797884583 : f32
      %23 = vector.broadcast %cst_16 : f32 to vector<128x128xf32>
      %24 = arith.mulf %23, %22 : vector<128x128xf32>
      %25 = math.tanh %24 : vector<128x128xf32>
      %cst_17 = arith.constant 1.000000e+00 : f32
      %26 = vector.broadcast %cst_17 : f32 to vector<128x128xf32>
      %27 = arith.addf %26, %25 : vector<128x128xf32>
      %28 = arith.mulf %17, %27 : vector<128x128xf32>
      %29 = arith.truncf %28 : vector<128x128xf32> to vector<128x128xbf16>
      %c0_18 = arith.constant 0 : index
      %c0_19 = arith.constant 0 : index
      %30 = vector.load %arg6[%c0_18, %c0_19] : memref<128x128xbf16, #tpu.memory_space<vmem>>, vector<128x128xbf16>
      tpu.vector_store %arg6[%c0_18, %c0_19], %29 {strides = array<i32>} : memref<128x128xbf16, #tpu.memory_space<vmem>>, vector<128x128xbf16>,
    } else {
    }
    return
  }
  func.func @transform_0(%arg0: i32, %arg1: i32, %arg2: i32) -> (i32, i32) {
    %c0_i32 = arith.constant 0 : i32
    return %arg0, %arg2 : i32, i32
  }
  func.func @transform_1(%arg0: i32, %arg1: i32, %arg2: i32) -> (i32, i32) {
    %c0_i32 = arith.constant 0 : i32
    return %arg2, %arg1 : i32, i32
  }
  func.func @transform_2(%arg0: i32, %arg1: i32, %arg2: i32) -> (i32, i32) {
    %c0_i32 = arith.constant 0 : i32
    %c0_i32_0 = arith.constant 0 : i32
    return %c0_i32, %arg1 : i32, i32
  }
  func.func @transform_3(%arg0: i32, %arg1: i32, %arg2: i32) -> (i32, i32) {
    %c0_i32 = arith.constant 0 : i32
    return %arg0, %arg1 : i32, i32
  }
}

module attributes {stable_mosaic.version = 11 : i64} {
  func.func @kernel(%arg0: i32, %arg1: memref<128x32xf32, #tpu.memory_space<vmem>>, %arg2: memref<128x32xf32, #tpu.memory_space<vmem>>, %arg3: memref<1x32xf32, #tpu.memory_space<vmem>>, %arg4: memref<1x32xf32, #tpu.memory_space<vmem>>, %arg5: memref<128x32xf32, #tpu.memory_space<vmem>>, %arg6: memref<128x32xbf16, #tpu.memory_space<vmem>>) attributes {dimension_semantics = [#tpu.dimension_semantics<parallel>], iteration_bounds = array<i64: 1>, scalar_prefetch = 0 : i64, scratch_operands = 0 : i64, tpu.core_type = #tpu.core_type<tc>, window_params = [{transform_indices = @transform_0, window_bounds = array<i64: 128, 32>}, {transform_indices = @transform_1, window_bounds = array<i64: 128, 32>}, {pipeline_mode = #tpu.pipeline_mode<synchronous>, transform_indices = @transform_2, window_bounds = array<i64: 1, 32>}, {pipeline_mode = #tpu.pipeline_mode<synchronous>, transform_indices = @transform_3, window_bounds = array<i64: 1, 32>}, {transform_indices = @transform_4, window_bounds = array<i64: 128, 32>}, {transform_indices = @transform_5, window_bounds = array<i64: 128, 32>}]} {
    %c0 = arith.constant 0 : index
    %c0_0 = arith.constant 0 : index
    %0 = vector.load %arg1[%c0, %c0_0] : memref<128x32xf32, #tpu.memory_space<vmem>>, vector<128x32xf32>
    %c0_1 = arith.constant 0 : index
    %c0_2 = arith.constant 0 : index
    %1 = vector.load %arg2[%c0_1, %c0_2] : memref<128x32xf32, #tpu.memory_space<vmem>>, vector<128x32xf32>
    %2 = arith.addf %0, %1 : vector<128x32xf32>
    %c0_3 = arith.constant 0 : index
    %c0_4 = arith.constant 0 : index
    %3 = vector.load %arg5[%c0_3, %c0_4] : memref<128x32xf32, #tpu.memory_space<vmem>>, vector<128x32xf32>
    tpu.vector_store %arg5[%c0_3, %c0_4], %2 {strides = array<i32>} : memref<128x32xf32, #tpu.memory_space<vmem>>, vector<128x32xf32>,
    %cst = arith.constant dense<0.000000e+00> : vector<128xf32>
    %4 = vector.multi_reduction <add>, %2, %cst [1] : vector<128x32xf32> to vector<128xf32>
    %5 = vector.shape_cast %4 : vector<128xf32> to vector<128x1xf32>
    %cst_5 = arith.constant 3.200000e+01 : f32
    %6 = vector.broadcast %cst_5 : f32 to vector<128x1xf32>
    %7 = arith.divf %5, %6 : vector<128x1xf32>
    %8 = vector.broadcast %7 : vector<128x1xf32> to vector<128x32xf32>
    %9 = arith.subf %2, %8 : vector<128x32xf32>
    %10 = arith.mulf %9, %9 : vector<128x32xf32>
    %cst_6 = arith.constant dense<0.000000e+00> : vector<128xf32>
    %11 = vector.multi_reduction <add>, %10, %cst_6 [1] : vector<128x32xf32> to vector<128xf32>
    %12 = vector.shape_cast %11 : vector<128xf32> to vector<128x1xf32>
    %cst_7 = arith.constant 3.200000e+01 : f32
    %13 = vector.broadcast %cst_7 : f32 to vector<128x1xf32>
    %14 = arith.divf %12, %13 : vector<128x1xf32>
    %15 = vector.broadcast %7 : vector<128x1xf32> to vector<128x32xf32>
    %16 = arith.subf %2, %15 : vector<128x32xf32>
    %cst_8 = arith.constant 9.99999974E-6 : f32
    %17 = vector.broadcast %cst_8 : f32 to vector<128x1xf32>
    %18 = arith.addf %14, %17 : vector<128x1xf32>
    %19 = math.rsqrt %18 : vector<128x1xf32>
    %20 = vector.broadcast %19 : vector<128x1xf32> to vector<128x32xf32>
    %21 = arith.mulf %16, %20 : vector<128x32xf32>
    %c0_9 = arith.constant 0 : index
    %c0_10 = arith.constant 0 : index
    %22 = vector.load %arg3[%c0_9, %c0_10] : memref<1x32xf32, #tpu.memory_space<vmem>>, vector<1x32xf32>
    %23 = vector.broadcast %22 : vector<1x32xf32> to vector<128x32xf32>
    %24 = arith.mulf %21, %23 : vector<128x32xf32>
    %c0_11 = arith.constant 0 : index
    %c0_12 = arith.constant 0 : index
    %25 = vector.load %arg4[%c0_11, %c0_12] : memref<1x32xf32, #tpu.memory_space<vmem>>, vector<1x32xf32>
    %26 = vector.broadcast %25 : vector<1x32xf32> to vector<128x32xf32>
    %27 = arith.addf %24, %26 : vector<128x32xf32>
    %28 = arith.truncf %27 : vector<128x32xf32> to vector<128x32xbf16>
    %c0_13 = arith.constant 0 : index
    %c0_14 = arith.constant 0 : index
    %29 = vector.load %arg6[%c0_13, %c0_14] : memref<128x32xbf16, #tpu.memory_space<vmem>>, vector<128x32xbf16>
    tpu.vector_store %arg6[%c0_13, %c0_14], %28 {strides = array<i32>} : memref<128x32xbf16, #tpu.memory_space<vmem>>, vector<128x32xbf16>,
    return
  }
  func.func @transform_0(%arg0: i32) -> (i32, i32) {
    %c0_i32 = arith.constant 0 : i32
    %c0_i32_0 = arith.constant 0 : i32
    return %arg0, %c0_i32 : i32, i32
  }
  func.func @transform_1(%arg0: i32) -> (i32, i32) {
    %c0_i32 = arith.constant 0 : i32
    %c0_i32_0 = arith.constant 0 : i32
    return %arg0, %c0_i32 : i32, i32
  }
  func.func @transform_2(%arg0: i32) -> (i32, i32) {
    %c0_i32 = arith.constant 0 : i32
    %c0_i32_0 = arith.constant 0 : i32
    %c0_i32_1 = arith.constant 0 : i32
    return %c0_i32, %c0_i32_0 : i32, i32
  }
  func.func @transform_3(%arg0: i32) -> (i32, i32) {
    %c0_i32 = arith.constant 0 : i32
    %c0_i32_0 = arith.constant 0 : i32
    %c0_i32_1 = arith.constant 0 : i32
    return %c0_i32, %c0_i32_0 : i32, i32
  }
  func.func @transform_4(%arg0: i32) -> (i32, i32) {
    %c0_i32 = arith.constant 0 : i32
    %c0_i32_0 = arith.constant 0 : i32
    return %arg0, %c0_i32 : i32, i32
  }
  func.func @transform_5(%arg0: i32) -> (i32, i32) {
    %c0_i32 = arith.constant 0 : i32
    %c0_i32_0 = arith.constant 0 : i32
    return %arg0, %c0_i32 : i32, i32
  }
}

module attributes {stable_mosaic.version = 11 : i64} {
  func.func @kernel(%arg0: i32, %arg1: i32, %arg2: i32, %arg3: memref<128x128xbf16, #tpu.memory_space<vmem>>, %arg4: memref<128x32xbf16, #tpu.memory_space<vmem>>, %arg5: memref<1x32xf32, #tpu.memory_space<vmem>>, %arg6: memref<128x32xf32, #tpu.memory_space<vmem>>, %arg7: memref<128x32xf32, #tpu.memory_space<vmem>>, %arg8: memref<128x32xf32, #tpu.memory_space<vmem>>) attributes {dimension_semantics = [#tpu.dimension_semantics<parallel>, #tpu.dimension_semantics<parallel>, #tpu.dimension_semantics<arbitrary>], iteration_bounds = array<i64: 1, 1, 1>, scalar_prefetch = 0 : i64, scratch_operands = 1 : i64, tpu.core_type = #tpu.core_type<tc>, window_params = [{transform_indices = @transform_0, window_bounds = array<i64: 128, 128>}, {transform_indices = @transform_1, window_bounds = array<i64: 128, 32>}, {transform_indices = @transform_2, window_bounds = array<i64: 1, 32>}, {transform_indices = @transform_3, window_bounds = array<i64: 128, 32>}, {transform_indices = @transform_4, window_bounds = array<i64: 128, 32>}]} {
    %c0_i32 = arith.constant 0 : i32
    %0 = arith.cmpi eq, %arg2, %c0_i32 : i32
    %1 = arith.extui %0 : i1 to i32
    %c0_i32_0 = arith.constant 0 : i32
    %2 = arith.cmpi ne, %1, %c0_i32_0 : i32
    scf.if %2 {
      %cst_10 = arith.constant 0.000000e+00 : f32
      %12 = vector.broadcast %cst_10 : f32 to vector<128x32xf32>
      %c0_11 = arith.constant 0 : index
      %c0_12 = arith.constant 0 : index
      %13 = vector.load %arg8[%c0_11, %c0_12] : memref<128x32xf32, #tpu.memory_space<vmem>>, vector<128x32xf32>
      tpu.vector_store %arg8[%c0_11, %c0_12], %12 {strides = array<i32>} : memref<128x32xf32, #tpu.memory_space<vmem>>, vector<128x32xf32>,
    } else {
    }
    %c0 = arith.constant 0 : index
    %c0_1 = arith.constant 0 : index
    %3 = vector.load %arg8[%c0, %c0_1] : memref<128x32xf32, #tpu.memory_space<vmem>>, vector<128x32xf32>
    %c0_2 = arith.constant 0 : index
    %c0_3 = arith.constant 0 : index
    %4 = vector.load %arg3[%c0_2, %c0_3] : memref<128x128xbf16, #tpu.memory_space<vmem>>, vector<128x128xbf16>
    %c0_4 = arith.constant 0 : index
    %c0_5 = arith.constant 0 : index
    %5 = vector.load %arg4[%c0_4, %c0_5] : memref<128x32xbf16, #tpu.memory_space<vmem>>, vector<128x32xbf16>
    %cst = arith.constant dense<0.000000e+00> : vector<128x32xf32>
    %6 = tpu.matmul %4, %5, %cst {dimension_numbers = #tpu.dot_dimension_numbers<[1], [0], [0], [1], [0, 0, 1, 1], [], []>} : vector<128x128xbf16>, vector<128x32xbf16>, vector<128x32xf32> -> vector<128x32xf32>
    %7 = arith.addf %3, %6 : vector<128x32xf32>
    %c0_6 = arith.constant 0 : index
    %c0_7 = arith.constant 0 : index
    %8 = vector.load %arg8[%c0_6, %c0_7] : memref<128x32xf32, #tpu.memory_space<vmem>>, vector<128x32xf32>
    tpu.vector_store %arg8[%c0_6, %c0_7], %7 {strides = array<i32>} : memref<128x32xf32, #tpu.memory_space<vmem>>, vector<128x32xf32>,
    %c0_i32_8 = arith.constant 0 : i32
    %9 = arith.cmpi eq, %arg2, %c0_i32_8 : i32
    %10 = arith.extui %9 : i1 to i32
    %c0_i32_9 = arith.constant 0 : i32
    %11 = arith.cmpi ne, %10, %c0_i32_9 : i32
    scf.if %11 {
      %c0_10 = arith.constant 0 : index
      %c0_11 = arith.constant 0 : index
      %12 = vector.load %arg8[%c0_10, %c0_11] : memref<128x32xf32, #tpu.memory_space<vmem>>, vector<128x32xf32>
      %c0_12 = arith.constant 0 : index
      %c0_13 = arith.constant 0 : index
      %13 = vector.load %arg5[%c0_12, %c0_13] : memref<1x32xf32, #tpu.memory_space<vmem>>, vector<1x32xf32>
      %14 = vector.broadcast %13 : vector<1x32xf32> to vector<128x32xf32>
      %15 = arith.addf %12, %14 : vector<128x32xf32>
      %c0_14 = arith.constant 0 : index
      %c0_15 = arith.constant 0 : index
      %16 = vector.load %arg6[%c0_14, %c0_15] : memref<128x32xf32, #tpu.memory_space<vmem>>, vector<128x32xf32>
      %17 = arith.addf %15, %16 : vector<128x32xf32>
      %c0_16 = arith.constant 0 : index
      %c0_17 = arith.constant 0 : index
      %18 = vector.load %arg7[%c0_16, %c0_17] : memref<128x32xf32, #tpu.memory_space<vmem>>, vector<128x32xf32>
      tpu.vector_store %arg7[%c0_16, %c0_17], %17 {strides = array<i32>} : memref<128x32xf32, #tpu.memory_space<vmem>>, vector<128x32xf32>,
    } else {
    }
    return
  }
  func.func @transform_0(%arg0: i32, %arg1: i32, %arg2: i32) -> (i32, i32) {
    %c0_i32 = arith.constant 0 : i32
    return %arg0, %arg2 : i32, i32
  }
  func.func @transform_1(%arg0: i32, %arg1: i32, %arg2: i32) -> (i32, i32) {
    %c0_i32 = arith.constant 0 : i32
    return %arg2, %arg1 : i32, i32
  }
  func.func @transform_2(%arg0: i32, %arg1: i32, %arg2: i32) -> (i32, i32) {
    %c0_i32 = arith.constant 0 : i32
    %c0_i32_0 = arith.constant 0 : i32
    return %c0_i32, %arg1 : i32, i32
  }
  func.func @transform_3(%arg0: i32, %arg1: i32, %arg2: i32) -> (i32, i32) {
    %c0_i32 = arith.constant 0 : i32
    return %arg0, %arg1 : i32, i32
  }
  func.func @transform_4(%arg0: i32, %arg1: i32, %arg2: i32) -> (i32, i32) {
    %c0_i32 = arith.constant 0 : i32
    return %arg0, %arg1 : i32, i32
  }
}

module attributes {stable_mosaic.version = 11 : i64} {
  func.func @kernel(%arg0: i32, %arg1: i32, %arg2: memref<3x1x4x16x16xbf16, #tpu.memory_space<vmem>>, %arg3: memref<1x16x16xf32, #tpu.memory_space<vmem>>, %arg4: memref<4x16x16xf32, #tpu.memory_space<vmem>>, %arg5: memref<1x4x16x16xbf16, #tpu.memory_space<vmem>>) attributes {dimension_semantics = [#tpu.dimension_semantics<parallel>, #tpu.dimension_semantics<parallel>], iteration_bounds = array<i64: 2, 2>, scalar_prefetch = 0 : i64, scratch_operands = 0 : i64, tpu.core_type = #tpu.core_type<tc>, window_params = [{transform_indices = @transform_0, window_bounds = array<i64: 3, 1, 4, 16, 16>}, {transform_indices = @transform_1, window_bounds = array<i64: 1, 16, 16>}, {transform_indices = @transform_2, window_bounds = array<i64: 4, 16, 16>}, {transform_indices = @transform_3, window_bounds = array<i64: 1, 4, 16, 16>}]} {
    %c0 = arith.constant 0 : index
    %c0_0 = arith.constant 0 : index
    %c0_1 = arith.constant 0 : index
    %c0_2 = arith.constant 0 : index
    %c0_3 = arith.constant 0 : index
    %0 = vector.load %arg2[%c0, %c0_0, %c0_1, %c0_2, %c0_3] : memref<3x1x4x16x16xbf16, #tpu.memory_space<vmem>>, vector<1x1x4x16x16xbf16>
    %1 = vector.shape_cast %0 : vector<1x1x4x16x16xbf16> to vector<4x16x16xbf16>
    %c1 = arith.constant 1 : index
    %c0_4 = arith.constant 0 : index
    %c0_5 = arith.constant 0 : index
    %c0_6 = arith.constant 0 : index
    %c0_7 = arith.constant 0 : index
    %2 = vector.load %arg2[%c1, %c0_4, %c0_5, %c0_6, %c0_7] : memref<3x1x4x16x16xbf16, #tpu.memory_space<vmem>>, vector<1x1x4x16x16xbf16>
    %3 = vector.shape_cast %2 : vector<1x1x4x16x16xbf16> to vector<4x16x16xbf16>
    %c2 = arith.constant 2 : index
    %c0_8 = arith.constant 0 : index
    %c0_9 = arith.constant 0 : index
    %c0_10 = arith.constant 0 : index
    %c0_11 = arith.constant 0 : index
    %4 = vector.load %arg2[%c2, %c0_8, %c0_9, %c0_10, %c0_11] : memref<3x1x4x16x16xbf16, #tpu.memory_space<vmem>>, vector<1x1x4x16x16xbf16>
    %5 = vector.shape_cast %4 : vector<1x1x4x16x16xbf16> to vector<4x16x16xbf16>
    %cst = arith.constant dense<0.000000e+00> : vector<4x16x16xf32>
    %6 = tpu.matmul %1, %3, %cst {dimension_numbers = #tpu.dot_dimension_numbers<[2], [2], [1], [1], [0, 0, 0, 1, 1, 1], [0], [0]>} : vector<4x16x16xbf16>, vector<4x16x16xbf16>, vector<4x16x16xf32> -> vector<4x16x16xf32>
    %cst_12 = arith.constant 2.500000e-01 : f32
    %7 = vector.broadcast %cst_12 : f32 to vector<4x16x16xf32>
    %8 = arith.mulf %6, %7 : vector<4x16x16xf32>
    %c0_13 = arith.constant 0 : index
    %c0_14 = arith.constant 0 : index
    %c0_15 = arith.constant 0 : index
    %9 = vector.load %arg3[%c0_13, %c0_14, %c0_15] : memref<1x16x16xf32, #tpu.memory_space<vmem>>, vector<1x16x16xf32>
    %10 = vector.shape_cast %9 : vector<1x16x16xf32> to vector<16x16xf32>
    %11 = vector.shape_cast %10 : vector<16x16xf32> to vector<1x16x16xf32>
    %12 = vector.broadcast %11 : vector<1x16x16xf32> to vector<4x16x16xf32>
    %13 = arith.addf %8, %12 : vector<4x16x16xf32>
    %c0_16 = arith.constant 0 : index
    %c0_17 = arith.constant 0 : index
    %c0_18 = arith.constant 0 : index
    %14 = vector.load %arg4[%c0_16, %c0_17, %c0_18] : memref<4x16x16xf32, #tpu.memory_space<vmem>>, vector<4x16x16xf32>
    %15 = arith.addf %13, %14 : vector<4x16x16xf32>
    %cst_19 = arith.constant dense<0xFF800000> : vector<4x16xf32>
    %16 = vector.multi_reduction <maximumf>, %15, %cst_19 [2] : vector<4x16x16xf32> to vector<4x16xf32>
    %17 = vector.shape_cast %16 : vector<4x16xf32> to vector<4x16x1xf32>
    %18 = vector.broadcast %17 : vector<4x16x1xf32> to vector<4x16x16xf32>
    %19 = arith.subf %15, %18 : vector<4x16x16xf32>
    %20 = math.exp %19 : vector<4x16x16xf32>
    %cst_20 = arith.constant dense<0.000000e+00> : vector<4x16xf32>
    %21 = vector.multi_reduction <add>, %20, %cst_20 [2] : vector<4x16x16xf32> to vector<4x16xf32>
    %22 = vector.shape_cast %21 : vector<4x16xf32> to vector<4x16x1xf32>
    %23 = tpu.reciprocal %22 {approx = true} : vector<4x16x1xf32> -> vector<4x16x1xf32>
    %24 = vector.broadcast %23 : vector<4x16x1xf32> to vector<4x16x16xf32>
    %25 = arith.mulf %20, %24 : vector<4x16x16xf32>
    %26 = arith.truncf %25 : vector<4x16x16xf32> to vector<4x16x16xbf16>
    %cst_21 = arith.constant dense<0.000000e+00> : vector<4x16x16xf32>
    %27 = tpu.matmul %26, %5, %cst_21 {dimension_numbers = #tpu.dot_dimension_numbers<[2], [1], [1], [2], [0, 0, 0, 1, 1, 2], [0], [0]>} : vector<4x16x16xbf16>, vector<4x16x16xbf16>, vector<4x16x16xf32> -> vector<4x16x16xf32>
    %28 = arith.truncf %27 : vector<4x16x16xf32> to vector<4x16x16xbf16>
    %c0_22 = arith.constant 0 : index
    %c0_23 = arith.constant 0 : index
    %c0_24 = arith.constant 0 : index
    %c0_25 = arith.constant 0 : index
    %29 = vector.load %arg5[%c0_22, %c0_23, %c0_24, %c0_25] : memref<1x4x16x16xbf16, #tpu.memory_space<vmem>>, vector<1x4x16x16xbf16>
    %30 = vector.shape_cast %29 : vector<1x4x16x16xbf16> to vector<4x16x16xbf16>
    %31 = vector.shape_cast %28 : vector<4x16x16xbf16> to vector<1x4x16x16xbf16>
    tpu.vector_store %arg5[%c0_22, %c0_23, %c0_24, %c0_25], %31 {strides = array<i32>} : memref<1x4x16x16xbf16, #tpu.memory_space<vmem>>, vector<1x4x16x16xbf16>,
    return
  }
  func.func @transform_0(%arg0: i32, %arg1: i32) -> (i32, i32, i32, i32, i32) {
    %c0_i32 = arith.constant 0 : i32
    %c0_i32_0 = arith.constant 0 : i32
    %c0_i32_1 = arith.constant 0 : i32
    %c0_i32_2 = arith.constant 0 : i32
    return %c0_i32, %arg1, %arg0, %c0_i32_0, %c0_i32_1 : i32, i32, i32, i32, i32
  }
  func.func @transform_1(%arg0: i32, %arg1: i32) -> (i32, i32, i32) {
    %c0_i32 = arith.constant 0 : i32
    %c0_i32_0 = arith.constant 0 : i32
    %c0_i32_1 = arith.constant 0 : i32
    return %arg1, %c0_i32, %c0_i32_0 : i32, i32, i32
  }
  func.func @transform_2(%arg0: i32, %arg1: i32) -> (i32, i32, i32) {
    %c1_i32 = arith.constant 1 : i32
    %c0_i32 = arith.constant 0 : i32
    %0 = arith.cmpi eq, %c1_i32, %c0_i32 : i32
    %c1_i32_0 = arith.constant 1 : i32
    %1 = arith.select %0, %c1_i32_0, %c1_i32 : i32
    %2 = arith.remsi %arg0, %1 : i32
    %c0_i32_1 = arith.constant 0 : i32
    %3 = arith.cmpi ne, %2, %c0_i32_1 : i32
    %c0_i32_2 = arith.constant 0 : i32
    %4 = arith.cmpi slt, %2, %c0_i32_2 : i32
    %c0_i32_3 = arith.constant 0 : i32
    %5 = arith.cmpi slt, %1, %c0_i32_3 : i32
    %6 = arith.xori %4, %5 : i1
    %7 = arith.andi %6, %3 : i1
    %8 = arith.addi %2, %1 : i32
    %9 = arith.select %7, %8, %2 : i32
    %c0_i32_4 = arith.constant 0 : i32
    %c0_i32_5 = arith.constant 0 : i32
    %c0_i32_6 = arith.constant 0 : i32
    return %9, %c0_i32_4, %c0_i32_5 : i32, i32, i32
  }
  func.func @transform_3(%arg0: i32, %arg1: i32) -> (i32, i32, i32, i32) {
    %c0_i32 = arith.constant 0 : i32
    %c0_i32_0 = arith.constant 0 : i32
    %c0_i32_1 = arith.constant 0 : i32
    return %arg1, %arg0, %c0_i32, %c0_i32_0 : i32, i32, i32, i32
  }
}

module attributes {stable_mosaic.version = 11 : i64} {
  func.func @kernel(%arg0: i32, %arg1: memref<32x128xf32, #tpu.memory_space<vmem>>, %arg2: memref<1x128xf32, #tpu.memory_space<vmem>>, %arg3: memref<1x128xf32, #tpu.memory_space<vmem>>, %arg4: memref<32x128xbf16, #tpu.memory_space<vmem>>) attributes {dimension_semantics = [#tpu.dimension_semantics<parallel>], iteration_bounds = array<i64: 1>, scalar_prefetch = 0 : i64, scratch_operands = 0 : i64, tpu.core_type = #tpu.core_type<tc>, window_params = [{transform_indices = @transform_0, window_bounds = array<i64: 32, 128>}, {pipeline_mode = #tpu.pipeline_mode<synchronous>, transform_indices = @transform_1, window_bounds = array<i64: 1, 128>}, {pipeline_mode = #tpu.pipeline_mode<synchronous>, transform_indices = @transform_2, window_bounds = array<i64: 1, 128>}, {transform_indices = @transform_3, window_bounds = array<i64: 32, 128>}]} {
    %c0 = arith.constant 0 : index
    %c0_0 = arith.constant 0 : index
    %0 = vector.load %arg1[%c0, %c0_0] : memref<32x128xf32, #tpu.memory_space<vmem>>, vector<32x128xf32>
    %cst = arith.constant dense<0.000000e+00> : vector<32xf32>
    %1 = vector.multi_reduction <add>, %0, %cst [1] : vector<32x128xf32> to vector<32xf32>
    %2 = vector.shape_cast %1 : vector<32xf32> to vector<32x1xf32>
    %cst_1 = arith.constant 1.280000e+02 : f32
    %3 = vector.broadcast %cst_1 : f32 to vector<32x1xf32>
    %4 = arith.divf %2, %3 : vector<32x1xf32>
    %5 = vector.broadcast %4 : vector<32x1xf32> to vector<32x128xf32>
    %6 = arith.subf %0, %5 : vector<32x128xf32>
    %7 = arith.mulf %6, %6 : vector<32x128xf32>
    %cst_2 = arith.constant dense<0.000000e+00> : vector<32xf32>
    %8 = vector.multi_reduction <add>, %7, %cst_2 [1] : vector<32x128xf32> to vector<32xf32>
    %9 = vector.shape_cast %8 : vector<32xf32> to vector<32x1xf32>
    %cst_3 = arith.constant 1.280000e+02 : f32
    %10 = vector.broadcast %cst_3 : f32 to vector<32x1xf32>
    %11 = arith.divf %9, %10 : vector<32x1xf32>
    %12 = vector.broadcast %4 : vector<32x1xf32> to vector<32x128xf32>
    %13 = arith.subf %0, %12 : vector<32x128xf32>
    %cst_4 = arith.constant 9.99999974E-6 : f32
    %14 = vector.broadcast %cst_4 : f32 to vector<32x1xf32>
    %15 = arith.addf %11, %14 : vector<32x1xf32>
    %16 = math.rsqrt %15 : vector<32x1xf32>
    %17 = vector.broadcast %16 : vector<32x1xf32> to vector<32x128xf32>
    %18 = arith.mulf %13, %17 : vector<32x128xf32>
    %c0_5 = arith.constant 0 : index
    %c0_6 = arith.constant 0 : index
    %19 = vector.load %arg2[%c0_5, %c0_6] : memref<1x128xf32, #tpu.memory_space<vmem>>, vector<1x128xf32>
    %20 = vector.broadcast %19 : vector<1x128xf32> to vector<32x128xf32>
    %21 = arith.mulf %18, %20 : vector<32x128xf32>
    %c0_7 = arith.constant 0 : index
    %c0_8 = arith.constant 0 : index
    %22 = vector.load %arg3[%c0_7, %c0_8] : memref<1x128xf32, #tpu.memory_space<vmem>>, vector<1x128xf32>
    %23 = vector.broadcast %22 : vector<1x128xf32> to vector<32x128xf32>
    %24 = arith.addf %21, %23 : vector<32x128xf32>
    %25 = arith.truncf %24 : vector<32x128xf32> to vector<32x128xbf16>
    %c0_9 = arith.constant 0 : index
    %c0_10 = arith.constant 0 : index
    %26 = vector.load %arg4[%c0_9, %c0_10] : memref<32x128xbf16, #tpu.memory_space<vmem>>, vector<32x128xbf16>
    tpu.vector_store %arg4[%c0_9, %c0_10], %25 {strides = array<i32>} : memref<32x128xbf16, #tpu.memory_space<vmem>>, vector<32x128xbf16>,
    return
  }
  func.func @transform_0(%arg0: i32) -> (i32, i32) {
    %c0_i32 = arith.constant 0 : i32
    %c0_i32_0 = arith.constant 0 : i32
    return %arg0, %c0_i32 : i32, i32
  }
  func.func @transform_1(%arg0: i32) -> (i32, i32) {
    %c0_i32 = arith.constant 0 : i32
    %c0_i32_0 = arith.constant 0 : i32
    %c0_i32_1 = arith.constant 0 : i32
    return %c0_i32, %c0_i32_0 : i32, i32
  }
  func.func @transform_2(%arg0: i32) -> (i32, i32) {
    %c0_i32 = arith.constant 0 : i32
    %c0_i32_0 = arith.constant 0 : i32
    %c0_i32_1 = arith.constant 0 : i32
    return %c0_i32, %c0_i32_0 : i32, i32
  }
  func.func @transform_3(%arg0: i32) -> (i32, i32) {
    %c0_i32 = arith.constant 0 : i32
    %c0_i32_0 = arith.constant 0 : i32
    return %arg0, %c0_i32 : i32, i32
  }
}

module attributes {stable_mosaic.version = 11 : i64} {
  func.func @kernel(%arg0: i32, %arg1: i32, %arg2: i32, %arg3: memref<32x128xbf16, #tpu.memory_space<vmem>>, %arg4: memref<128x64xbf16, #tpu.memory_space<vmem>>, %arg5: memref<32x64xf32, #tpu.memory_space<vmem>>, %arg6: memref<32x64xf32, #tpu.memory_space<vmem>>) attributes {dimension_semantics = [#tpu.dimension_semantics<parallel>, #tpu.dimension_semantics<parallel>, #tpu.dimension_semantics<arbitrary>], iteration_bounds = array<i64: 1, 1, 1>, scalar_prefetch = 0 : i64, scratch_operands = 1 : i64, tpu.core_type = #tpu.core_type<tc>, window_params = [{transform_indices = @transform_0, window_bounds = array<i64: 32, 128>}, {transform_indices = @transform_1, window_bounds = array<i64: 128, 64>}, {transform_indices = @transform_2, window_bounds = array<i64: 32, 64>}]} {
    %c0_i32 = arith.constant 0 : i32
    %0 = arith.cmpi eq, %arg2, %c0_i32 : i32
    %1 = arith.extui %0 : i1 to i32
    %c0_i32_0 = arith.constant 0 : i32
    %2 = arith.cmpi ne, %1, %c0_i32_0 : i32
    scf.if %2 {
      %cst_10 = arith.constant 0.000000e+00 : f32
      %12 = vector.broadcast %cst_10 : f32 to vector<32x64xf32>
      %c0_11 = arith.constant 0 : index
      %c0_12 = arith.constant 0 : index
      %13 = vector.load %arg6[%c0_11, %c0_12] : memref<32x64xf32, #tpu.memory_space<vmem>>, vector<32x64xf32>
      tpu.vector_store %arg6[%c0_11, %c0_12], %12 {strides = array<i32>} : memref<32x64xf32, #tpu.memory_space<vmem>>, vector<32x64xf32>,
    } else {
    }
    %c0 = arith.constant 0 : index
    %c0_1 = arith.constant 0 : index
    %3 = vector.load %arg6[%c0, %c0_1] : memref<32x64xf32, #tpu.memory_space<vmem>>, vector<32x64xf32>
    %c0_2 = arith.constant 0 : index
    %c0_3 = arith.constant 0 : index
    %4 = vector.load %arg3[%c0_2, %c0_3] : memref<32x128xbf16, #tpu.memory_space<vmem>>, vector<32x128xbf16>
    %c0_4 = arith.constant 0 : index
    %c0_5 = arith.constant 0 : index
    %5 = vector.load %arg4[%c0_4, %c0_5] : memref<128x64xbf16, #tpu.memory_space<vmem>>, vector<128x64xbf16>
    %cst = arith.constant dense<0.000000e+00> : vector<32x64xf32>
    %6 = tpu.matmul %4, %5, %cst {dimension_numbers = #tpu.dot_dimension_numbers<[1], [0], [0], [1], [0, 0, 1, 1], [], []>} : vector<32x128xbf16>, vector<128x64xbf16>, vector<32x64xf32> -> vector<32x64xf32>
    %7 = arith.addf %3, %6 : vector<32x64xf32>
    %c0_6 = arith.constant 0 : index
    %c0_7 = arith.constant 0 : index
    %8 = vector.load %arg6[%c0_6, %c0_7] : memref<32x64xf32, #tpu.memory_space<vmem>>, vector<32x64xf32>
    tpu.vector_store %arg6[%c0_6, %c0_7], %7 {strides = array<i32>} : memref<32x64xf32, #tpu.memory_space<vmem>>, vector<32x64xf32>,
    %c0_i32_8 = arith.constant 0 : i32
    %9 = arith.cmpi eq, %arg2, %c0_i32_8 : i32
    %10 = arith.extui %9 : i1 to i32
    %c0_i32_9 = arith.constant 0 : i32
    %11 = arith.cmpi ne, %10, %c0_i32_9 : i32
    scf.if %11 {
      %c0_10 = arith.constant 0 : index
      %c0_11 = arith.constant 0 : index
      %12 = vector.load %arg6[%c0_10, %c0_11] : memref<32x64xf32, #tpu.memory_space<vmem>>, vector<32x64xf32>
      %c0_12 = arith.constant 0 : index
      %c0_13 = arith.constant 0 : index
      %13 = vector.load %arg5[%c0_12, %c0_13] : memref<32x64xf32, #tpu.memory_space<vmem>>, vector<32x64xf32>
      tpu.vector_store %arg5[%c0_12, %c0_13], %12 {strides = array<i32>} : memref<32x64xf32, #tpu.memory_space<vmem>>, vector<32x64xf32>,
    } else {
    }
    return
  }
  func.func @transform_0(%arg0: i32, %arg1: i32, %arg2: i32) -> (i32, i32) {
    %c0_i32 = arith.constant 0 : i32
    return %arg0, %arg2 : i32, i32
  }
  func.func @transform_1(%arg0: i32, %arg1: i32, %arg2: i32) -> (i32, i32) {
    %c0_i32 = arith.constant 0 : i32
    return %arg2, %arg1 : i32, i32
  }
  func.func @transform_2(%arg0: i32, %arg1: i32, %arg2: i32) -> (i32, i32) {
    %c0_i32 = arith.constant 0 : i32
    return %arg0, %arg1 : i32, i32
  }
}

module attributes {stable_mosaic.version = 11 : i64} {
  func.func @kernel(%arg0: i32, %arg1: memref<32x64xf32, #tpu.memory_space<vmem>>, %arg2: memref<1x64xf32, #tpu.memory_space<vmem>>, %arg3: memref<1x64xf32, #tpu.memory_space<vmem>>, %arg4: memref<32x64xbf16, #tpu.memory_space<vmem>>) attributes {dimension_semantics = [#tpu.dimension_semantics<parallel>], iteration_bounds = array<i64: 1>, scalar_prefetch = 0 : i64, scratch_operands = 0 : i64, tpu.core_type = #tpu.core_type<tc>, window_params = [{transform_indices = @transform_0, window_bounds = array<i64: 32, 64>}, {pipeline_mode = #tpu.pipeline_mode<synchronous>, transform_indices = @transform_1, window_bounds = array<i64: 1, 64>}, {pipeline_mode = #tpu.pipeline_mode<synchronous>, transform_indices = @transform_2, window_bounds = array<i64: 1, 64>}, {transform_indices = @transform_3, window_bounds = array<i64: 32, 64>}]} {
    %c0 = arith.constant 0 : index
    %c0_0 = arith.constant 0 : index
    %0 = vector.load %arg1[%c0, %c0_0] : memref<32x64xf32, #tpu.memory_space<vmem>>, vector<32x64xf32>
    %cst = arith.constant dense<0.000000e+00> : vector<32xf32>
    %1 = vector.multi_reduction <add>, %0, %cst [1] : vector<32x64xf32> to vector<32xf32>
    %2 = vector.shape_cast %1 : vector<32xf32> to vector<32x1xf32>
    %cst_1 = arith.constant 6.400000e+01 : f32
    %3 = vector.broadcast %cst_1 : f32 to vector<32x1xf32>
    %4 = arith.divf %2, %3 : vector<32x1xf32>
    %5 = vector.broadcast %4 : vector<32x1xf32> to vector<32x64xf32>
    %6 = arith.subf %0, %5 : vector<32x64xf32>
    %7 = arith.mulf %6, %6 : vector<32x64xf32>
    %cst_2 = arith.constant dense<0.000000e+00> : vector<32xf32>
    %8 = vector.multi_reduction <add>, %7, %cst_2 [1] : vector<32x64xf32> to vector<32xf32>
    %9 = vector.shape_cast %8 : vector<32xf32> to vector<32x1xf32>
    %cst_3 = arith.constant 6.400000e+01 : f32
    %10 = vector.broadcast %cst_3 : f32 to vector<32x1xf32>
    %11 = arith.divf %9, %10 : vector<32x1xf32>
    %12 = vector.broadcast %4 : vector<32x1xf32> to vector<32x64xf32>
    %13 = arith.subf %0, %12 : vector<32x64xf32>
    %cst_4 = arith.constant 9.99999974E-6 : f32
    %14 = vector.broadcast %cst_4 : f32 to vector<32x1xf32>
    %15 = arith.addf %11, %14 : vector<32x1xf32>
    %16 = math.rsqrt %15 : vector<32x1xf32>
    %17 = vector.broadcast %16 : vector<32x1xf32> to vector<32x64xf32>
    %18 = arith.mulf %13, %17 : vector<32x64xf32>
    %c0_5 = arith.constant 0 : index
    %c0_6 = arith.constant 0 : index
    %19 = vector.load %arg2[%c0_5, %c0_6] : memref<1x64xf32, #tpu.memory_space<vmem>>, vector<1x64xf32>
    %20 = vector.broadcast %19 : vector<1x64xf32> to vector<32x64xf32>
    %21 = arith.mulf %18, %20 : vector<32x64xf32>
    %c0_7 = arith.constant 0 : index
    %c0_8 = arith.constant 0 : index
    %22 = vector.load %arg3[%c0_7, %c0_8] : memref<1x64xf32, #tpu.memory_space<vmem>>, vector<1x64xf32>
    %23 = vector.broadcast %22 : vector<1x64xf32> to vector<32x64xf32>
    %24 = arith.addf %21, %23 : vector<32x64xf32>
    %25 = arith.truncf %24 : vector<32x64xf32> to vector<32x64xbf16>
    %c0_9 = arith.constant 0 : index
    %c0_10 = arith.constant 0 : index
    %26 = vector.load %arg4[%c0_9, %c0_10] : memref<32x64xbf16, #tpu.memory_space<vmem>>, vector<32x64xbf16>
    tpu.vector_store %arg4[%c0_9, %c0_10], %25 {strides = array<i32>} : memref<32x64xbf16, #tpu.memory_space<vmem>>, vector<32x64xbf16>,
    return
  }
  func.func @transform_0(%arg0: i32) -> (i32, i32) {
    %c0_i32 = arith.constant 0 : i32
    %c0_i32_0 = arith.constant 0 : i32
    return %arg0, %c0_i32 : i32, i32
  }
  func.func @transform_1(%arg0: i32) -> (i32, i32) {
    %c0_i32 = arith.constant 0 : i32
    %c0_i32_0 = arith.constant 0 : i32
    %c0_i32_1 = arith.constant 0 : i32
    return %c0_i32, %c0_i32_0 : i32, i32
  }
  func.func @transform_2(%arg0: i32) -> (i32, i32) {
    %c0_i32 = arith.constant 0 : i32
    %c0_i32_0 = arith.constant 0 : i32
    %c0_i32_1 = arith.constant 0 : i32
    return %c0_i32, %c0_i32_0 : i32, i32
  }
  func.func @transform_3(%arg0: i32) -> (i32, i32) {
    %c0_i32 = arith.constant 0 : i32
    %c0_i32_0 = arith.constant 0 : i32
    return %arg0, %c0_i32 : i32, i32
  }
}

module attributes {stable_mosaic.version = 11 : i64} {
  func.func @kernel(%arg0: i32, %arg1: i32, %arg2: i32, %arg3: memref<32x64xbf16, #tpu.memory_space<vmem>>, %arg4: memref<64x192xbf16, #tpu.memory_space<vmem>>, %arg5: memref<1x192xf32, #tpu.memory_space<vmem>>, %arg6: memref<32x192xbf16, #tpu.memory_space<vmem>>, %arg7: memref<32x192xf32, #tpu.memory_space<vmem>>) attributes {dimension_semantics = [#tpu.dimension_semantics<parallel>, #tpu.dimension_semantics<parallel>, #tpu.dimension_semantics<arbitrary>], iteration_bounds = array<i64: 1, 1, 1>, scalar_prefetch = 0 : i64, scratch_operands = 1 : i64, tpu.core_type = #tpu.core_type<tc>, window_params = [{transform_indices = @transform_0, window_bounds = array<i64: 32, 64>}, {transform_indices = @transform_1, window_bounds = array<i64: 64, 192>}, {transform_indices = @transform_2, window_bounds = array<i64: 1, 192>}, {transform_indices = @transform_3, window_bounds = array<i64: 32, 192>}]} {
    %c0_i32 = arith.constant 0 : i32
    %0 = arith.cmpi eq, %arg2, %c0_i32 : i32
    %1 = arith.extui %0 : i1 to i32
    %c0_i32_0 = arith.constant 0 : i32
    %2 = arith.cmpi ne, %1, %c0_i32_0 : i32
    scf.if %2 {
      %cst_10 = arith.constant 0.000000e+00 : f32
      %12 = vector.broadcast %cst_10 : f32 to vector<32x192xf32>
      %c0_11 = arith.constant 0 : index
      %c0_12 = arith.constant 0 : index
      %13 = vector.load %arg7[%c0_11, %c0_12] : memref<32x192xf32, #tpu.memory_space<vmem>>, vector<32x192xf32>
      tpu.vector_store %arg7[%c0_11, %c0_12], %12 {strides = array<i32>} : memref<32x192xf32, #tpu.memory_space<vmem>>, vector<32x192xf32>,
    } else {
    }
    %c0 = arith.constant 0 : index
    %c0_1 = arith.constant 0 : index
    %3 = vector.load %arg7[%c0, %c0_1] : memref<32x192xf32, #tpu.memory_space<vmem>>, vector<32x192xf32>
    %c0_2 = arith.constant 0 : index
    %c0_3 = arith.constant 0 : index
    %4 = vector.load %arg3[%c0_2, %c0_3] : memref<32x64xbf16, #tpu.memory_space<vmem>>, vector<32x64xbf16>
    %c0_4 = arith.constant 0 : index
    %c0_5 = arith.constant 0 : index
    %5 = vector.load %arg4[%c0_4, %c0_5] : memref<64x192xbf16, #tpu.memory_space<vmem>>, vector<64x192xbf16>
    %cst = arith.constant dense<0.000000e+00> : vector<32x192xf32>
    %6 = tpu.matmul %4, %5, %cst {dimension_numbers = #tpu.dot_dimension_numbers<[1], [0], [0], [1], [0, 0, 1, 1], [], []>} : vector<32x64xbf16>, vector<64x192xbf16>, vector<32x192xf32> -> vector<32x192xf32>
    %7 = arith.addf %3, %6 : vector<32x192xf32>
    %c0_6 = arith.constant 0 : index
    %c0_7 = arith.constant 0 : index
    %8 = vector.load %arg7[%c0_6, %c0_7] : memref<32x192xf32, #tpu.memory_space<vmem>>, vector<32x192xf32>
    tpu.vector_store %arg7[%c0_6, %c0_7], %7 {strides = array<i32>} : memref<32x192xf32, #tpu.memory_space<vmem>>, vector<32x192xf32>,
    %c0_i32_8 = arith.constant 0 : i32
    %9 = arith.cmpi eq, %arg2, %c0_i32_8 : i32
    %10 = arith.extui %9 : i1 to i32
    %c0_i32_9 = arith.constant 0 : i32
    %11 = arith.cmpi ne, %10, %c0_i32_9 : i32
    scf.if %11 {
      %c0_10 = arith.constant 0 : index
      %c0_11 = arith.constant 0 : index
      %12 = vector.load %arg7[%c0_10, %c0_11] : memref<32x192xf32, #tpu.memory_space<vmem>>, vector<32x192xf32>
      %c0_12 = arith.constant 0 : index
      %c0_13 = arith.constant 0 : index
      %13 = vector.load %arg5[%c0_12, %c0_13] : memref<1x192xf32, #tpu.memory_space<vmem>>, vector<1x192xf32>
      %14 = vector.broadcast %13 : vector<1x192xf32> to vector<32x192xf32>
      %15 = arith.addf %12, %14 : vector<32x192xf32>
      %16 = arith.truncf %15 : vector<32x192xf32> to vector<32x192xbf16>
      %c0_14 = arith.constant 0 : index
      %c0_15 = arith.constant 0 : index
      %17 = vector.load %arg6[%c0_14, %c0_15] : memref<32x192xbf16, #tpu.memory_space<vmem>>, vector<32x192xbf16>
      tpu.vector_store %arg6[%c0_14, %c0_15], %16 {strides = array<i32>} : memref<32x192xbf16, #tpu.memory_space<vmem>>, vector<32x192xbf16>,
    } else {
    }
    return
  }
  func.func @transform_0(%arg0: i32, %arg1: i32, %arg2: i32) -> (i32, i32) {
    %c0_i32 = arith.constant 0 : i32
    return %arg0, %arg2 : i32, i32
  }
  func.func @transform_1(%arg0: i32, %arg1: i32, %arg2: i32) -> (i32, i32) {
    %c0_i32 = arith.constant 0 : i32
    return %arg2, %arg1 : i32, i32
  }
  func.func @transform_2(%arg0: i32, %arg1: i32, %arg2: i32) -> (i32, i32) {
    %c0_i32 = arith.constant 0 : i32
    %c0_i32_0 = arith.constant 0 : i32
    return %c0_i32, %arg1 : i32, i32
  }
  func.func @transform_3(%arg0: i32, %arg1: i32, %arg2: i32) -> (i32, i32) {
    %c0_i32 = arith.constant 0 : i32
    return %arg0, %arg1 : i32, i32
  }
}

module attributes {stable_mosaic.version = 11 : i64} {
  func.func @kernel(%arg0: i32, %arg1: i32, %arg2: memref<3x1x1x16x16xbf16, #tpu.memory_space<vmem>>, %arg3: memref<1x16x16xf32, #tpu.memory_space<vmem>>, %arg4: memref<1x1x16x16xbf16, #tpu.memory_space<vmem>>) attributes {dimension_semantics = [#tpu.dimension_semantics<parallel>, #tpu.dimension_semantics<parallel>], iteration_bounds = array<i64: 2, 4>, scalar_prefetch = 0 : i64, scratch_operands = 0 : i64, tpu.core_type = #tpu.core_type<tc>, window_params = [{transform_indices = @transform_0, window_bounds = array<i64: 3, 1, 1, 16, 16>}, {transform_indices = @transform_1, window_bounds = array<i64: 1, 16, 16>}, {transform_indices = @transform_2, window_bounds = array<i64: 1, 1, 16, 16>}]} {
    %c0 = arith.constant 0 : index
    %c0_0 = arith.constant 0 : index
    %c0_1 = arith.constant 0 : index
    %c0_2 = arith.constant 0 : index
    %c0_3 = arith.constant 0 : index
    %0 = vector.load %arg2[%c0, %c0_0, %c0_1, %c0_2, %c0_3] : memref<3x1x1x16x16xbf16, #tpu.memory_space<vmem>>, vector<1x1x1x16x16xbf16>
    %1 = vector.shape_cast %0 : vector<1x1x1x16x16xbf16> to vector<1x16x16xbf16>
    %c1 = arith.constant 1 : index
    %c0_4 = arith.constant 0 : index
    %c0_5 = arith.constant 0 : index
    %c0_6 = arith.constant 0 : index
    %c0_7 = arith.constant 0 : index
    %2 = vector.load %arg2[%c1, %c0_4, %c0_5, %c0_6, %c0_7] : memref<3x1x1x16x16xbf16, #tpu.memory_space<vmem>>, vector<1x1x1x16x16xbf16>
    %3 = vector.shape_cast %2 : vector<1x1x1x16x16xbf16> to vector<1x16x16xbf16>
    %c2 = arith.constant 2 : index
    %c0_8 = arith.constant 0 : index
    %c0_9 = arith.constant 0 : index
    %c0_10 = arith.constant 0 : index
    %c0_11 = arith.constant 0 : index
    %4 = vector.load %arg2[%c2, %c0_8, %c0_9, %c0_10, %c0_11] : memref<3x1x1x16x16xbf16, #tpu.memory_space<vmem>>, vector<1x1x1x16x16xbf16>
    %5 = vector.shape_cast %4 : vector<1x1x1x16x16xbf16> to vector<1x16x16xbf16>
    %cst = arith.constant dense<0.000000e+00> : vector<1x16x16xf32>
    %6 = tpu.matmul %1, %3, %cst {dimension_numbers = #tpu.dot_dimension_numbers<[2], [2], [1], [1], [0, 0, 0, 1, 1, 1], [0], [0]>} : vector<1x16x16xbf16>, vector<1x16x16xbf16>, vector<1x16x16xf32> -> vector<1x16x16xf32>
    %cst_12 = arith.constant 2.500000e-01 : f32
    %7 = vector.broadcast %cst_12 : f32 to vector<1x16x16xf32>
    %8 = arith.mulf %6, %7 : vector<1x16x16xf32>
    %c0_13 = arith.constant 0 : index
    %c0_14 = arith.constant 0 : index
    %c0_15 = arith.constant 0 : index
    %9 = vector.load %arg3[%c0_13, %c0_14, %c0_15] : memref<1x16x16xf32, #tpu.memory_space<vmem>>, vector<1x16x16xf32>
    %10 = vector.shape_cast %9 : vector<1x16x16xf32> to vector<16x16xf32>
    %11 = vector.shape_cast %10 : vector<16x16xf32> to vector<1x16x16xf32>
    %12 = arith.addf %8, %11 : vector<1x16x16xf32>
    %cst_16 = arith.constant dense<0xFF800000> : vector<1x16xf32>
    %13 = vector.multi_reduction <maximumf>, %12, %cst_16 [2] : vector<1x16x16xf32> to vector<1x16xf32>
    %14 = vector.shape_cast %13 : vector<1x16xf32> to vector<1x16x1xf32>
    %15 = vector.broadcast %14 : vector<1x16x1xf32> to vector<1x16x16xf32>
    %16 = arith.subf %12, %15 : vector<1x16x16xf32>
    %17 = math.exp %16 : vector<1x16x16xf32>
    %cst_17 = arith.constant dense<0.000000e+00> : vector<1x16xf32>
    %18 = vector.multi_reduction <add>, %17, %cst_17 [2] : vector<1x16x16xf32> to vector<1x16xf32>
    %19 = vector.shape_cast %18 : vector<1x16xf32> to vector<1x16x1xf32>
    %20 = tpu.reciprocal %19 {approx = true} : vector<1x16x1xf32> -> vector<1x16x1xf32>
    %21 = vector.broadcast %20 : vector<1x16x1xf32> to vector<1x16x16xf32>
    %22 = arith.mulf %17, %21 : vector<1x16x16xf32>
    %23 = arith.truncf %22 : vector<1x16x16xf32> to vector<1x16x16xbf16>
    %cst_18 = arith.constant dense<0.000000e+00> : vector<1x16x16xf32>
    %24 = tpu.matmul %23, %5, %cst_18 {dimension_numbers = #tpu.dot_dimension_numbers<[2], [1], [1], [2], [0, 0, 0, 1, 1, 2], [0], [0]>} : vector<1x16x16xbf16>, vector<1x16x16xbf16>, vector<1x16x16xf32> -> vector<1x16x16xf32>
    %25 = arith.truncf %24 : vector<1x16x16xf32> to vector<1x16x16xbf16>
    %c0_19 = arith.constant 0 : index
    %c0_20 = arith.constant 0 : index
    %c0_21 = arith.constant 0 : index
    %c0_22 = arith.constant 0 : index
    %26 = vector.load %arg4[%c0_19, %c0_20, %c0_21, %c0_22] : memref<1x1x16x16xbf16, #tpu.memory_space<vmem>>, vector<1x1x16x16xbf16>
    %27 = vector.shape_cast %26 : vector<1x1x16x16xbf16> to vector<1x16x16xbf16>
    %28 = vector.shape_cast %25 : vector<1x16x16xbf16> to vector<1x1x16x16xbf16>
    tpu.vector_store %arg4[%c0_19, %c0_20, %c0_21, %c0_22], %28 {strides = array<i32>} : memref<1x1x16x16xbf16, #tpu.memory_space<vmem>>, vector<1x1x16x16xbf16>,
    return
  }
  func.func @transform_0(%arg0: i32, %arg1: i32) -> (i32, i32, i32, i32, i32) {
    %c0_i32 = arith.constant 0 : i32
    %c0_i32_0 = arith.constant 0 : i32
    %c0_i32_1 = arith.constant 0 : i32
    %c0_i32_2 = arith.constant 0 : i32
    return %c0_i32, %arg1, %arg0, %c0_i32_0, %c0_i32_1 : i32, i32, i32, i32, i32
  }
  func.func @transform_1(%arg0: i32, %arg1: i32) -> (i32, i32, i32) {
    %c0_i32 = arith.constant 0 : i32
    %c0_i32_0 = arith.constant 0 : i32
    %c0_i32_1 = arith.constant 0 : i32
    return %arg1, %c0_i32, %c0_i32_0 : i32, i32, i32
  }
  func.func @transform_2(%arg0: i32, %arg1: i32) -> (i32, i32, i32, i32) {
    %c0_i32 = arith.constant 0 : i32
    %c0_i32_0 = arith.constant 0 : i32
    %c0_i32_1 = arith.constant 0 : i32
    return %arg1, %arg0, %c0_i32, %c0_i32_0 : i32, i32, i32, i32
  }
}

module attributes {stable_mosaic.version = 11 : i64} {
  func.func @kernel(%arg0: i32, %arg1: i32, %arg2: i32, %arg3: memref<32x64xbf16, #tpu.memory_space<vmem>>, %arg4: memref<64x64xbf16, #tpu.memory_space<vmem>>, %arg5: memref<1x64xf32, #tpu.memory_space<vmem>>, %arg6: memref<32x64xf32, #tpu.memory_space<vmem>>, %arg7: memref<32x64xf32, #tpu.memory_space<vmem>>) attributes {dimension_semantics = [#tpu.dimension_semantics<parallel>, #tpu.dimension_semantics<parallel>, #tpu.dimension_semantics<arbitrary>], iteration_bounds = array<i64: 1, 1, 1>, scalar_prefetch = 0 : i64, scratch_operands = 1 : i64, tpu.core_type = #tpu.core_type<tc>, window_params = [{transform_indices = @transform_0, window_bounds = array<i64: 32, 64>}, {transform_indices = @transform_1, window_bounds = array<i64: 64, 64>}, {transform_indices = @transform_2, window_bounds = array<i64: 1, 64>}, {transform_indices = @transform_3, window_bounds = array<i64: 32, 64>}]} {
    %c0_i32 = arith.constant 0 : i32
    %0 = arith.cmpi eq, %arg2, %c0_i32 : i32
    %1 = arith.extui %0 : i1 to i32
    %c0_i32_0 = arith.constant 0 : i32
    %2 = arith.cmpi ne, %1, %c0_i32_0 : i32
    scf.if %2 {
      %cst_10 = arith.constant 0.000000e+00 : f32
      %12 = vector.broadcast %cst_10 : f32 to vector<32x64xf32>
      %c0_11 = arith.constant 0 : index
      %c0_12 = arith.constant 0 : index
      %13 = vector.load %arg7[%c0_11, %c0_12] : memref<32x64xf32, #tpu.memory_space<vmem>>, vector<32x64xf32>
      tpu.vector_store %arg7[%c0_11, %c0_12], %12 {strides = array<i32>} : memref<32x64xf32, #tpu.memory_space<vmem>>, vector<32x64xf32>,
    } else {
    }
    %c0 = arith.constant 0 : index
    %c0_1 = arith.constant 0 : index
    %3 = vector.load %arg7[%c0, %c0_1] : memref<32x64xf32, #tpu.memory_space<vmem>>, vector<32x64xf32>
    %c0_2 = arith.constant 0 : index
    %c0_3 = arith.constant 0 : index
    %4 = vector.load %arg3[%c0_2, %c0_3] : memref<32x64xbf16, #tpu.memory_space<vmem>>, vector<32x64xbf16>
    %c0_4 = arith.constant 0 : index
    %c0_5 = arith.constant 0 : index
    %5 = vector.load %arg4[%c0_4, %c0_5] : memref<64x64xbf16, #tpu.memory_space<vmem>>, vector<64x64xbf16>
    %cst = arith.constant dense<0.000000e+00> : vector<32x64xf32>
    %6 = tpu.matmul %4, %5, %cst {dimension_numbers = #tpu.dot_dimension_numbers<[1], [0], [0], [1], [0, 0, 1, 1], [], []>} : vector<32x64xbf16>, vector<64x64xbf16>, vector<32x64xf32> -> vector<32x64xf32>
    %7 = arith.addf %3, %6 : vector<32x64xf32>
    %c0_6 = arith.constant 0 : index
    %c0_7 = arith.constant 0 : index
    %8 = vector.load %arg7[%c0_6, %c0_7] : memref<32x64xf32, #tpu.memory_space<vmem>>, vector<32x64xf32>
    tpu.vector_store %arg7[%c0_6, %c0_7], %7 {strides = array<i32>} : memref<32x64xf32, #tpu.memory_space<vmem>>, vector<32x64xf32>,
    %c0_i32_8 = arith.constant 0 : i32
    %9 = arith.cmpi eq, %arg2, %c0_i32_8 : i32
    %10 = arith.extui %9 : i1 to i32
    %c0_i32_9 = arith.constant 0 : i32
    %11 = arith.cmpi ne, %10, %c0_i32_9 : i32
    scf.if %11 {
      %c0_10 = arith.constant 0 : index
      %c0_11 = arith.constant 0 : index
      %12 = vector.load %arg7[%c0_10, %c0_11] : memref<32x64xf32, #tpu.memory_space<vmem>>, vector<32x64xf32>
      %c0_12 = arith.constant 0 : index
      %c0_13 = arith.constant 0 : index
      %13 = vector.load %arg5[%c0_12, %c0_13] : memref<1x64xf32, #tpu.memory_space<vmem>>, vector<1x64xf32>
      %14 = vector.broadcast %13 : vector<1x64xf32> to vector<32x64xf32>
      %15 = arith.addf %12, %14 : vector<32x64xf32>
      %c0_14 = arith.constant 0 : index
      %c0_15 = arith.constant 0 : index
      %16 = vector.load %arg6[%c0_14, %c0_15] : memref<32x64xf32, #tpu.memory_space<vmem>>, vector<32x64xf32>
      tpu.vector_store %arg6[%c0_14, %c0_15], %15 {strides = array<i32>} : memref<32x64xf32, #tpu.memory_space<vmem>>, vector<32x64xf32>,
    } else {
    }
    return
  }
  func.func @transform_0(%arg0: i32, %arg1: i32, %arg2: i32) -> (i32, i32) {
    %c0_i32 = arith.constant 0 : i32
    return %arg0, %arg2 : i32, i32
  }
  func.func @transform_1(%arg0: i32, %arg1: i32, %arg2: i32) -> (i32, i32) {
    %c0_i32 = arith.constant 0 : i32
    return %arg2, %arg1 : i32, i32
  }
  func.func @transform_2(%arg0: i32, %arg1: i32, %arg2: i32) -> (i32, i32) {
    %c0_i32 = arith.constant 0 : i32
    %c0_i32_0 = arith.constant 0 : i32
    return %c0_i32, %arg1 : i32, i32
  }
  func.func @transform_3(%arg0: i32, %arg1: i32, %arg2: i32) -> (i32, i32) {
    %c0_i32 = arith.constant 0 : i32
    return %arg0, %arg1 : i32, i32
  }
}

module attributes {stable_mosaic.version = 11 : i64} {
  func.func @kernel(%arg0: i32, %arg1: memref<32x64xf32, #tpu.memory_space<vmem>>, %arg2: memref<32x64xf32, #tpu.memory_space<vmem>>, %arg3: memref<1x64xf32, #tpu.memory_space<vmem>>, %arg4: memref<1x64xf32, #tpu.memory_space<vmem>>, %arg5: memref<32x64xf32, #tpu.memory_space<vmem>>, %arg6: memref<32x64xbf16, #tpu.memory_space<vmem>>) attributes {dimension_semantics = [#tpu.dimension_semantics<parallel>], iteration_bounds = array<i64: 1>, scalar_prefetch = 0 : i64, scratch_operands = 0 : i64, tpu.core_type = #tpu.core_type<tc>, window_params = [{transform_indices = @transform_0, window_bounds = array<i64: 32, 64>}, {transform_indices = @transform_1, window_bounds = array<i64: 32, 64>}, {pipeline_mode = #tpu.pipeline_mode<synchronous>, transform_indices = @transform_2, window_bounds = array<i64: 1, 64>}, {pipeline_mode = #tpu.pipeline_mode<synchronous>, transform_indices = @transform_3, window_bounds = array<i64: 1, 64>}, {transform_indices = @transform_4, window_bounds = array<i64: 32, 64>}, {transform_indices = @transform_5, window_bounds = array<i64: 32, 64>}]} {
    %c0 = arith.constant 0 : index
    %c0_0 = arith.constant 0 : index
    %0 = vector.load %arg1[%c0, %c0_0] : memref<32x64xf32, #tpu.memory_space<vmem>>, vector<32x64xf32>
    %c0_1 = arith.constant 0 : index
    %c0_2 = arith.constant 0 : index
    %1 = vector.load %arg2[%c0_1, %c0_2] : memref<32x64xf32, #tpu.memory_space<vmem>>, vector<32x64xf32>
    %2 = arith.addf %0, %1 : vector<32x64xf32>
    %c0_3 = arith.constant 0 : index
    %c0_4 = arith.constant 0 : index
    %3 = vector.load %arg5[%c0_3, %c0_4] : memref<32x64xf32, #tpu.memory_space<vmem>>, vector<32x64xf32>
    tpu.vector_store %arg5[%c0_3, %c0_4], %2 {strides = array<i32>} : memref<32x64xf32, #tpu.memory_space<vmem>>, vector<32x64xf32>,
    %cst = arith.constant dense<0.000000e+00> : vector<32xf32>
    %4 = vector.multi_reduction <add>, %2, %cst [1] : vector<32x64xf32> to vector<32xf32>
    %5 = vector.shape_cast %4 : vector<32xf32> to vector<32x1xf32>
    %cst_5 = arith.constant 6.400000e+01 : f32
    %6 = vector.broadcast %cst_5 : f32 to vector<32x1xf32>
    %7 = arith.divf %5, %6 : vector<32x1xf32>
    %8 = vector.broadcast %7 : vector<32x1xf32> to vector<32x64xf32>
    %9 = arith.subf %2, %8 : vector<32x64xf32>
    %10 = arith.mulf %9, %9 : vector<32x64xf32>
    %cst_6 = arith.constant dense<0.000000e+00> : vector<32xf32>
    %11 = vector.multi_reduction <add>, %10, %cst_6 [1] : vector<32x64xf32> to vector<32xf32>
    %12 = vector.shape_cast %11 : vector<32xf32> to vector<32x1xf32>
    %cst_7 = arith.constant 6.400000e+01 : f32
    %13 = vector.broadcast %cst_7 : f32 to vector<32x1xf32>
    %14 = arith.divf %12, %13 : vector<32x1xf32>
    %15 = vector.broadcast %7 : vector<32x1xf32> to vector<32x64xf32>
    %16 = arith.subf %2, %15 : vector<32x64xf32>
    %cst_8 = arith.constant 9.99999974E-6 : f32
    %17 = vector.broadcast %cst_8 : f32 to vector<32x1xf32>
    %18 = arith.addf %14, %17 : vector<32x1xf32>
    %19 = math.rsqrt %18 : vector<32x1xf32>
    %20 = vector.broadcast %19 : vector<32x1xf32> to vector<32x64xf32>
    %21 = arith.mulf %16, %20 : vector<32x64xf32>
    %c0_9 = arith.constant 0 : index
    %c0_10 = arith.constant 0 : index
    %22 = vector.load %arg3[%c0_9, %c0_10] : memref<1x64xf32, #tpu.memory_space<vmem>>, vector<1x64xf32>
    %23 = vector.broadcast %22 : vector<1x64xf32> to vector<32x64xf32>
    %24 = arith.mulf %21, %23 : vector<32x64xf32>
    %c0_11 = arith.constant 0 : index
    %c0_12 = arith.constant 0 : index
    %25 = vector.load %arg4[%c0_11, %c0_12] : memref<1x64xf32, #tpu.memory_space<vmem>>, vector<1x64xf32>
    %26 = vector.broadcast %25 : vector<1x64xf32> to vector<32x64xf32>
    %27 = arith.addf %24, %26 : vector<32x64xf32>
    %28 = arith.truncf %27 : vector<32x64xf32> to vector<32x64xbf16>
    %c0_13 = arith.constant 0 : index
    %c0_14 = arith.constant 0 : index
    %29 = vector.load %arg6[%c0_13, %c0_14] : memref<32x64xbf16, #tpu.memory_space<vmem>>, vector<32x64xbf16>
    tpu.vector_store %arg6[%c0_13, %c0_14], %28 {strides = array<i32>} : memref<32x64xbf16, #tpu.memory_space<vmem>>, vector<32x64xbf16>,
    return
  }
  func.func @transform_0(%arg0: i32) -> (i32, i32) {
    %c0_i32 = arith.constant 0 : i32
    %c0_i32_0 = arith.constant 0 : i32
    return %arg0, %c0_i32 : i32, i32
  }
  func.func @transform_1(%arg0: i32) -> (i32, i32) {
    %c0_i32 = arith.constant 0 : i32
    %c0_i32_0 = arith.constant 0 : i32
    return %arg0, %c0_i32 : i32, i32
  }
  func.func @transform_2(%arg0: i32) -> (i32, i32) {
    %c0_i32 = arith.constant 0 : i32
    %c0_i32_0 = arith.constant 0 : i32
    %c0_i32_1 = arith.constant 0 : i32
    return %c0_i32, %c0_i32_0 : i32, i32
  }
  func.func @transform_3(%arg0: i32) -> (i32, i32) {
    %c0_i32 = arith.constant 0 : i32
    %c0_i32_0 = arith.constant 0 : i32
    %c0_i32_1 = arith.constant 0 : i32
    return %c0_i32, %c0_i32_0 : i32, i32
  }
  func.func @transform_4(%arg0: i32) -> (i32, i32) {
    %c0_i32 = arith.constant 0 : i32
    %c0_i32_0 = arith.constant 0 : i32
    return %arg0, %c0_i32 : i32, i32
  }
  func.func @transform_5(%arg0: i32) -> (i32, i32) {
    %c0_i32 = arith.constant 0 : i32
    %c0_i32_0 = arith.constant 0 : i32
    return %arg0, %c0_i32 : i32, i32
  }
}

module attributes {stable_mosaic.version = 11 : i64} {
  func.func @kernel(%arg0: i32, %arg1: i32, %arg2: i32, %arg3: memref<32x64xbf16, #tpu.memory_space<vmem>>, %arg4: memref<64x256xbf16, #tpu.memory_space<vmem>>, %arg5: memref<1x256xf32, #tpu.memory_space<vmem>>, %arg6: memref<32x256xbf16, #tpu.memory_space<vmem>>, %arg7: memref<32x256xf32, #tpu.memory_space<vmem>>) attributes {dimension_semantics = [#tpu.dimension_semantics<parallel>, #tpu.dimension_semantics<parallel>, #tpu.dimension_semantics<arbitrary>], iteration_bounds = array<i64: 1, 1, 1>, scalar_prefetch = 0 : i64, scratch_operands = 1 : i64, tpu.core_type = #tpu.core_type<tc>, window_params = [{transform_indices = @transform_0, window_bounds = array<i64: 32, 64>}, {transform_indices = @transform_1, window_bounds = array<i64: 64, 256>}, {transform_indices = @transform_2, window_bounds = array<i64: 1, 256>}, {transform_indices = @transform_3, window_bounds = array<i64: 32, 256>}]} {
    %c0_i32 = arith.constant 0 : i32
    %0 = arith.cmpi eq, %arg2, %c0_i32 : i32
    %1 = arith.extui %0 : i1 to i32
    %c0_i32_0 = arith.constant 0 : i32
    %2 = arith.cmpi ne, %1, %c0_i32_0 : i32
    scf.if %2 {
      %cst_10 = arith.constant 0.000000e+00 : f32
      %12 = vector.broadcast %cst_10 : f32 to vector<32x256xf32>
      %c0_11 = arith.constant 0 : index
      %c0_12 = arith.constant 0 : index
      %13 = vector.load %arg7[%c0_11, %c0_12] : memref<32x256xf32, #tpu.memory_space<vmem>>, vector<32x256xf32>
      tpu.vector_store %arg7[%c0_11, %c0_12], %12 {strides = array<i32>} : memref<32x256xf32, #tpu.memory_space<vmem>>, vector<32x256xf32>,
    } else {
    }
    %c0 = arith.constant 0 : index
    %c0_1 = arith.constant 0 : index
    %3 = vector.load %arg7[%c0, %c0_1] : memref<32x256xf32, #tpu.memory_space<vmem>>, vector<32x256xf32>
    %c0_2 = arith.constant 0 : index
    %c0_3 = arith.constant 0 : index
    %4 = vector.load %arg3[%c0_2, %c0_3] : memref<32x64xbf16, #tpu.memory_space<vmem>>, vector<32x64xbf16>
    %c0_4 = arith.constant 0 : index
    %c0_5 = arith.constant 0 : index
    %5 = vector.load %arg4[%c0_4, %c0_5] : memref<64x256xbf16, #tpu.memory_space<vmem>>, vector<64x256xbf16>
    %cst = arith.constant dense<0.000000e+00> : vector<32x256xf32>
    %6 = tpu.matmul %4, %5, %cst {dimension_numbers = #tpu.dot_dimension_numbers<[1], [0], [0], [1], [0, 0, 1, 1], [], []>} : vector<32x64xbf16>, vector<64x256xbf16>, vector<32x256xf32> -> vector<32x256xf32>
    %7 = arith.addf %3, %6 : vector<32x256xf32>
    %c0_6 = arith.constant 0 : index
    %c0_7 = arith.constant 0 : index
    %8 = vector.load %arg7[%c0_6, %c0_7] : memref<32x256xf32, #tpu.memory_space<vmem>>, vector<32x256xf32>
    tpu.vector_store %arg7[%c0_6, %c0_7], %7 {strides = array<i32>} : memref<32x256xf32, #tpu.memory_space<vmem>>, vector<32x256xf32>,
    %c0_i32_8 = arith.constant 0 : i32
    %9 = arith.cmpi eq, %arg2, %c0_i32_8 : i32
    %10 = arith.extui %9 : i1 to i32
    %c0_i32_9 = arith.constant 0 : i32
    %11 = arith.cmpi ne, %10, %c0_i32_9 : i32
    scf.if %11 {
      %c0_10 = arith.constant 0 : index
      %c0_11 = arith.constant 0 : index
      %12 = vector.load %arg7[%c0_10, %c0_11] : memref<32x256xf32, #tpu.memory_space<vmem>>, vector<32x256xf32>
      %c0_12 = arith.constant 0 : index
      %c0_13 = arith.constant 0 : index
      %13 = vector.load %arg5[%c0_12, %c0_13] : memref<1x256xf32, #tpu.memory_space<vmem>>, vector<1x256xf32>
      %14 = vector.broadcast %13 : vector<1x256xf32> to vector<32x256xf32>
      %15 = arith.addf %12, %14 : vector<32x256xf32>
      %cst_14 = arith.constant 5.000000e-01 : f32
      %16 = vector.broadcast %cst_14 : f32 to vector<32x256xf32>
      %17 = arith.mulf %16, %15 : vector<32x256xf32>
      %cst_15 = arith.constant 4.471500e-02 : f32
      %18 = vector.broadcast %cst_15 : f32 to vector<32x256xf32>
      %19 = arith.mulf %18, %15 : vector<32x256xf32>
      %20 = arith.mulf %19, %15 : vector<32x256xf32>
      %21 = arith.mulf %20, %15 : vector<32x256xf32>
      %22 = arith.addf %15, %21 : vector<32x256xf32>
      %cst_16 = arith.constant 0.797884583 : f32
      %23 = vector.broadcast %cst_16 : f32 to vector<32x256xf32>
      %24 = arith.mulf %23, %22 : vector<32x256xf32>
      %25 = math.tanh %24 : vector<32x256xf32>
      %cst_17 = arith.constant 1.000000e+00 : f32
      %26 = vector.broadcast %cst_17 : f32 to vector<32x256xf32>
      %27 = arith.addf %26, %25 : vector<32x256xf32>
      %28 = arith.mulf %17, %27 : vector<32x256xf32>
      %29 = arith.truncf %28 : vector<32x256xf32> to vector<32x256xbf16>
      %c0_18 = arith.constant 0 : index
      %c0_19 = arith.constant 0 : index
      %30 = vector.load %arg6[%c0_18, %c0_19] : memref<32x256xbf16, #tpu.memory_space<vmem>>, vector<32x256xbf16>
      tpu.vector_store %arg6[%c0_18, %c0_19], %29 {strides = array<i32>} : memref<32x256xbf16, #tpu.memory_space<vmem>>, vector<32x256xbf16>,
    } else {
    }
    return
  }
  func.func @transform_0(%arg0: i32, %arg1: i32, %arg2: i32) -> (i32, i32) {
    %c0_i32 = arith.constant 0 : i32
    return %arg0, %arg2 : i32, i32
  }
  func.func @transform_1(%arg0: i32, %arg1: i32, %arg2: i32) -> (i32, i32) {
    %c0_i32 = arith.constant 0 : i32
    return %arg2, %arg1 : i32, i32
  }
  func.func @transform_2(%arg0: i32, %arg1: i32, %arg2: i32) -> (i32, i32) {
    %c0_i32 = arith.constant 0 : i32
    %c0_i32_0 = arith.constant 0 : i32
    return %c0_i32, %arg1 : i32, i32
  }
  func.func @transform_3(%arg0: i32, %arg1: i32, %arg2: i32) -> (i32, i32) {
    %c0_i32 = arith.constant 0 : i32
    return %arg0, %arg1 : i32, i32
  }
}

module attributes {stable_mosaic.version = 11 : i64} {
  func.func @kernel(%arg0: i32, %arg1: i32, %arg2: i32, %arg3: memref<32x256xbf16, #tpu.memory_space<vmem>>, %arg4: memref<256x64xbf16, #tpu.memory_space<vmem>>, %arg5: memref<1x64xf32, #tpu.memory_space<vmem>>, %arg6: memref<32x64xf32, #tpu.memory_space<vmem>>, %arg7: memref<32x64xf32, #tpu.memory_space<vmem>>, %arg8: memref<32x64xf32, #tpu.memory_space<vmem>>) attributes {dimension_semantics = [#tpu.dimension_semantics<parallel>, #tpu.dimension_semantics<parallel>, #tpu.dimension_semantics<arbitrary>], iteration_bounds = array<i64: 1, 1, 1>, scalar_prefetch = 0 : i64, scratch_operands = 1 : i64, tpu.core_type = #tpu.core_type<tc>, window_params = [{transform_indices = @transform_0, window_bounds = array<i64: 32, 256>}, {transform_indices = @transform_1, window_bounds = array<i64: 256, 64>}, {transform_indices = @transform_2, window_bounds = array<i64: 1, 64>}, {transform_indices = @transform_3, window_bounds = array<i64: 32, 64>}, {transform_indices = @transform_4, window_bounds = array<i64: 32, 64>}]} {
    %c0_i32 = arith.constant 0 : i32
    %0 = arith.cmpi eq, %arg2, %c0_i32 : i32
    %1 = arith.extui %0 : i1 to i32
    %c0_i32_0 = arith.constant 0 : i32
    %2 = arith.cmpi ne, %1, %c0_i32_0 : i32
    scf.if %2 {
      %cst_10 = arith.constant 0.000000e+00 : f32
      %12 = vector.broadcast %cst_10 : f32 to vector<32x64xf32>
      %c0_11 = arith.constant 0 : index
      %c0_12 = arith.constant 0 : index
      %13 = vector.load %arg8[%c0_11, %c0_12] : memref<32x64xf32, #tpu.memory_space<vmem>>, vector<32x64xf32>
      tpu.vector_store %arg8[%c0_11, %c0_12], %12 {strides = array<i32>} : memref<32x64xf32, #tpu.memory_space<vmem>>, vector<32x64xf32>,
    } else {
    }
    %c0 = arith.constant 0 : index
    %c0_1 = arith.constant 0 : index
    %3 = vector.load %arg8[%c0, %c0_1] : memref<32x64xf32, #tpu.memory_space<vmem>>, vector<32x64xf32>
    %c0_2 = arith.constant 0 : index
    %c0_3 = arith.constant 0 : index
    %4 = vector.load %arg3[%c0_2, %c0_3] : memref<32x256xbf16, #tpu.memory_space<vmem>>, vector<32x256xbf16>
    %c0_4 = arith.constant 0 : index
    %c0_5 = arith.constant 0 : index
    %5 = vector.load %arg4[%c0_4, %c0_5] : memref<256x64xbf16, #tpu.memory_space<vmem>>, vector<256x64xbf16>
    %cst = arith.constant dense<0.000000e+00> : vector<32x64xf32>
    %6 = tpu.matmul %4, %5, %cst {dimension_numbers = #tpu.dot_dimension_numbers<[1], [0], [0], [1], [0, 0, 1, 1], [], []>} : vector<32x256xbf16>, vector<256x64xbf16>, vector<32x64xf32> -> vector<32x64xf32>
    %7 = arith.addf %3, %6 : vector<32x64xf32>
    %c0_6 = arith.constant 0 : index
    %c0_7 = arith.constant 0 : index
    %8 = vector.load %arg8[%c0_6, %c0_7] : memref<32x64xf32, #tpu.memory_space<vmem>>, vector<32x64xf32>
    tpu.vector_store %arg8[%c0_6, %c0_7], %7 {strides = array<i32>} : memref<32x64xf32, #tpu.memory_space<vmem>>, vector<32x64xf32>,
    %c0_i32_8 = arith.constant 0 : i32
    %9 = arith.cmpi eq, %arg2, %c0_i32_8 : i32
    %10 = arith.extui %9 : i1 to i32
    %c0_i32_9 = arith.constant 0 : i32
    %11 = arith.cmpi ne, %10, %c0_i32_9 : i32
    scf.if %11 {
      %c0_10 = arith.constant 0 : index
      %c0_11 = arith.constant 0 : index
      %12 = vector.load %arg8[%c0_10, %c0_11] : memref<32x64xf32, #tpu.memory_space<vmem>>, vector<32x64xf32>
      %c0_12 = arith.constant 0 : index
      %c0_13 = arith.constant 0 : index
      %13 = vector.load %arg5[%c0_12, %c0_13] : memref<1x64xf32, #tpu.memory_space<vmem>>, vector<1x64xf32>
      %14 = vector.broadcast %13 : vector<1x64xf32> to vector<32x64xf32>
      %15 = arith.addf %12, %14 : vector<32x64xf32>
      %c0_14 = arith.constant 0 : index
      %c0_15 = arith.constant 0 : index
      %16 = vector.load %arg6[%c0_14, %c0_15] : memref<32x64xf32, #tpu.memory_space<vmem>>, vector<32x64xf32>
      %17 = arith.addf %15, %16 : vector<32x64xf32>
      %c0_16 = arith.constant 0 : index
      %c0_17 = arith.constant 0 : index
      %18 = vector.load %arg7[%c0_16, %c0_17] : memref<32x64xf32, #tpu.memory_space<vmem>>, vector<32x64xf32>
      tpu.vector_store %arg7[%c0_16, %c0_17], %17 {strides = array<i32>} : memref<32x64xf32, #tpu.memory_space<vmem>>, vector<32x64xf32>,
    } else {
    }
    return
  }
  func.func @transform_0(%arg0: i32, %arg1: i32, %arg2: i32) -> (i32, i32) {
    %c0_i32 = arith.constant 0 : i32
    return %arg0, %arg2 : i32, i32
  }
  func.func @transform_1(%arg0: i32, %arg1: i32, %arg2: i32) -> (i32, i32) {
    %c0_i32 = arith.constant 0 : i32
    return %arg2, %arg1 : i32, i32
  }
  func.func @transform_2(%arg0: i32, %arg1: i32, %arg2: i32) -> (i32, i32) {
    %c0_i32 = arith.constant 0 : i32
    %c0_i32_0 = arith.constant 0 : i32
    return %c0_i32, %arg1 : i32, i32
  }
  func.func @transform_3(%arg0: i32, %arg1: i32, %arg2: i32) -> (i32, i32) {
    %c0_i32 = arith.constant 0 : i32
    return %arg0, %arg1 : i32, i32
  }
  func.func @transform_4(%arg0: i32, %arg1: i32, %arg2: i32) -> (i32, i32) {
    %c0_i32 = arith.constant 0 : i32
    return %arg0, %arg1 : i32, i32
  }
}

module attributes {stable_mosaic.version = 11 : i64} {
  func.func @kernel(%arg0: i32, %arg1: i32, %arg2: memref<3x1x1x16x16xbf16, #tpu.memory_space<vmem>>, %arg3: memref<1x16x16xf32, #tpu.memory_space<vmem>>, %arg4: memref<1x16x16xf32, #tpu.memory_space<vmem>>, %arg5: memref<1x1x16x16xbf16, #tpu.memory_space<vmem>>) attributes {dimension_semantics = [#tpu.dimension_semantics<parallel>, #tpu.dimension_semantics<parallel>], iteration_bounds = array<i64: 2, 4>, scalar_prefetch = 0 : i64, scratch_operands = 0 : i64, tpu.core_type = #tpu.core_type<tc>, window_params = [{transform_indices = @transform_0, window_bounds = array<i64: 3, 1, 1, 16, 16>}, {transform_indices = @transform_1, window_bounds = array<i64: 1, 16, 16>}, {transform_indices = @transform_2, window_bounds = array<i64: 1, 16, 16>}, {transform_indices = @transform_3, window_bounds = array<i64: 1, 1, 16, 16>}]} {
    %c0 = arith.constant 0 : index
    %c0_0 = arith.constant 0 : index
    %c0_1 = arith.constant 0 : index
    %c0_2 = arith.constant 0 : index
    %c0_3 = arith.constant 0 : index
    %0 = vector.load %arg2[%c0, %c0_0, %c0_1, %c0_2, %c0_3] : memref<3x1x1x16x16xbf16, #tpu.memory_space<vmem>>, vector<1x1x1x16x16xbf16>
    %1 = vector.shape_cast %0 : vector<1x1x1x16x16xbf16> to vector<1x16x16xbf16>
    %c1 = arith.constant 1 : index
    %c0_4 = arith.constant 0 : index
    %c0_5 = arith.constant 0 : index
    %c0_6 = arith.constant 0 : index
    %c0_7 = arith.constant 0 : index
    %2 = vector.load %arg2[%c1, %c0_4, %c0_5, %c0_6, %c0_7] : memref<3x1x1x16x16xbf16, #tpu.memory_space<vmem>>, vector<1x1x1x16x16xbf16>
    %3 = vector.shape_cast %2 : vector<1x1x1x16x16xbf16> to vector<1x16x16xbf16>
    %c2 = arith.constant 2 : index
    %c0_8 = arith.constant 0 : index
    %c0_9 = arith.constant 0 : index
    %c0_10 = arith.constant 0 : index
    %c0_11 = arith.constant 0 : index
    %4 = vector.load %arg2[%c2, %c0_8, %c0_9, %c0_10, %c0_11] : memref<3x1x1x16x16xbf16, #tpu.memory_space<vmem>>, vector<1x1x1x16x16xbf16>
    %5 = vector.shape_cast %4 : vector<1x1x1x16x16xbf16> to vector<1x16x16xbf16>
    %cst = arith.constant dense<0.000000e+00> : vector<1x16x16xf32>
    %6 = tpu.matmul %1, %3, %cst {dimension_numbers = #tpu.dot_dimension_numbers<[2], [2], [1], [1], [0, 0, 0, 1, 1, 1], [0], [0]>} : vector<1x16x16xbf16>, vector<1x16x16xbf16>, vector<1x16x16xf32> -> vector<1x16x16xf32>
    %cst_12 = arith.constant 2.500000e-01 : f32
    %7 = vector.broadcast %cst_12 : f32 to vector<1x16x16xf32>
    %8 = arith.mulf %6, %7 : vector<1x16x16xf32>
    %c0_13 = arith.constant 0 : index
    %c0_14 = arith.constant 0 : index
    %c0_15 = arith.constant 0 : index
    %9 = vector.load %arg3[%c0_13, %c0_14, %c0_15] : memref<1x16x16xf32, #tpu.memory_space<vmem>>, vector<1x16x16xf32>
    %10 = vector.shape_cast %9 : vector<1x16x16xf32> to vector<16x16xf32>
    %11 = vector.shape_cast %10 : vector<16x16xf32> to vector<1x16x16xf32>
    %12 = arith.addf %8, %11 : vector<1x16x16xf32>
    %c0_16 = arith.constant 0 : index
    %c0_17 = arith.constant 0 : index
    %c0_18 = arith.constant 0 : index
    %13 = vector.load %arg4[%c0_16, %c0_17, %c0_18] : memref<1x16x16xf32, #tpu.memory_space<vmem>>, vector<1x16x16xf32>
    %14 = arith.addf %12, %13 : vector<1x16x16xf32>
    %cst_19 = arith.constant dense<0xFF800000> : vector<1x16xf32>
    %15 = vector.multi_reduction <maximumf>, %14, %cst_19 [2] : vector<1x16x16xf32> to vector<1x16xf32>
    %16 = vector.shape_cast %15 : vector<1x16xf32> to vector<1x16x1xf32>
    %17 = vector.broadcast %16 : vector<1x16x1xf32> to vector<1x16x16xf32>
    %18 = arith.subf %14, %17 : vector<1x16x16xf32>
    %19 = math.exp %18 : vector<1x16x16xf32>
    %cst_20 = arith.constant dense<0.000000e+00> : vector<1x16xf32>
    %20 = vector.multi_reduction <add>, %19, %cst_20 [2] : vector<1x16x16xf32> to vector<1x16xf32>
    %21 = vector.shape_cast %20 : vector<1x16xf32> to vector<1x16x1xf32>
    %22 = tpu.reciprocal %21 {approx = true} : vector<1x16x1xf32> -> vector<1x16x1xf32>
    %23 = vector.broadcast %22 : vector<1x16x1xf32> to vector<1x16x16xf32>
    %24 = arith.mulf %19, %23 : vector<1x16x16xf32>
    %25 = arith.truncf %24 : vector<1x16x16xf32> to vector<1x16x16xbf16>
    %cst_21 = arith.constant dense<0.000000e+00> : vector<1x16x16xf32>
    %26 = tpu.matmul %25, %5, %cst_21 {dimension_numbers = #tpu.dot_dimension_numbers<[2], [1], [1], [2], [0, 0, 0, 1, 1, 2], [0], [0]>} : vector<1x16x16xbf16>, vector<1x16x16xbf16>, vector<1x16x16xf32> -> vector<1x16x16xf32>
    %27 = arith.truncf %26 : vector<1x16x16xf32> to vector<1x16x16xbf16>
    %c0_22 = arith.constant 0 : index
    %c0_23 = arith.constant 0 : index
    %c0_24 = arith.constant 0 : index
    %c0_25 = arith.constant 0 : index
    %28 = vector.load %arg5[%c0_22, %c0_23, %c0_24, %c0_25] : memref<1x1x16x16xbf16, #tpu.memory_space<vmem>>, vector<1x1x16x16xbf16>
    %29 = vector.shape_cast %28 : vector<1x1x16x16xbf16> to vector<1x16x16xbf16>
    %30 = vector.shape_cast %27 : vector<1x16x16xbf16> to vector<1x1x16x16xbf16>
    tpu.vector_store %arg5[%c0_22, %c0_23, %c0_24, %c0_25], %30 {strides = array<i32>} : memref<1x1x16x16xbf16, #tpu.memory_space<vmem>>, vector<1x1x16x16xbf16>,
    return
  }
  func.func @transform_0(%arg0: i32, %arg1: i32) -> (i32, i32, i32, i32, i32) {
    %c0_i32 = arith.constant 0 : i32
    %c0_i32_0 = arith.constant 0 : i32
    %c0_i32_1 = arith.constant 0 : i32
    %c0_i32_2 = arith.constant 0 : i32
    return %c0_i32, %arg1, %arg0, %c0_i32_0, %c0_i32_1 : i32, i32, i32, i32, i32
  }
  func.func @transform_1(%arg0: i32, %arg1: i32) -> (i32, i32, i32) {
    %c0_i32 = arith.constant 0 : i32
    %c0_i32_0 = arith.constant 0 : i32
    %c0_i32_1 = arith.constant 0 : i32
    return %arg1, %c0_i32, %c0_i32_0 : i32, i32, i32
  }
  func.func @transform_2(%arg0: i32, %arg1: i32) -> (i32, i32, i32) {
    %c1_i32 = arith.constant 1 : i32
    %c0_i32 = arith.constant 0 : i32
    %0 = arith.cmpi eq, %c1_i32, %c0_i32 : i32
    %c1_i32_0 = arith.constant 1 : i32
    %1 = arith.select %0, %c1_i32_0, %c1_i32 : i32
    %2 = arith.remsi %arg0, %1 : i32
    %c0_i32_1 = arith.constant 0 : i32
    %3 = arith.cmpi ne, %2, %c0_i32_1 : i32
    %c0_i32_2 = arith.constant 0 : i32
    %4 = arith.cmpi slt, %2, %c0_i32_2 : i32
    %c0_i32_3 = arith.constant 0 : i32
    %5 = arith.cmpi slt, %1, %c0_i32_3 : i32
    %6 = arith.xori %4, %5 : i1
    %7 = arith.andi %6, %3 : i1
    %8 = arith.addi %2, %1 : i32
    %9 = arith.select %7, %8, %2 : i32
    %c0_i32_4 = arith.constant 0 : i32
    %c0_i32_5 = arith.constant 0 : i32
    %c0_i32_6 = arith.constant 0 : i32
    return %9, %c0_i32_4, %c0_i32_5 : i32, i32, i32
  }
  func.func @transform_3(%arg0: i32, %arg1: i32) -> (i32, i32, i32, i32) {
    %c0_i32 = arith.constant 0 : i32
    %c0_i32_0 = arith.constant 0 : i32
    %c0_i32_1 = arith.constant 0 : i32
    return %arg1, %arg0, %c0_i32, %c0_i32_0 : i32, i32, i32, i32
  }
}

module attributes {stable_mosaic.version = 11 : i64} {
  func.func @_meanpool_kernel(%arg0: memref<2x16x64xbf16, #tpu.memory_space<vmem>>, %arg1: memref<2x64xf32, #tpu.memory_space<vmem>>) attributes {dimension_semantics = [], scalar_prefetch = 0 : i64, scratch_operands = 0 : i64, tpu.core_type = #tpu.core_type<tc>} {
    %c0 = arith.constant 0 : index
    %c0_0 = arith.constant 0 : index
    %c0_1 = arith.constant 0 : index
    %0 = vector.load %arg0[%c0, %c0_0, %c0_1] : memref<2x16x64xbf16, #tpu.memory_space<vmem>>, vector<2x16x64xbf16>
    %1 = arith.extf %0 : vector<2x16x64xbf16> to vector<2x16x64xf32>
    %cst = arith.constant dense<0.000000e+00> : vector<2x64xf32>
    %2 = vector.multi_reduction <add>, %1, %cst [1] : vector<2x16x64xf32> to vector<2x64xf32>
    %cst_2 = arith.constant 1.600000e+01 : f32
    %3 = vector.broadcast %cst_2 : f32 to vector<2x64xf32>
    %4 = arith.divf %2, %3 : vector<2x64xf32>
    %c0_3 = arith.constant 0 : index
    %c0_4 = arith.constant 0 : index
    %5 = vector.load %arg1[%c0_3, %c0_4] : memref<2x64xf32, #tpu.memory_space<vmem>>, vector<2x64xf32>
    tpu.vector_store %arg1[%c0_3, %c0_4], %4 {strides = array<i32>} : memref<2x64xf32, #tpu.memory_space<vmem>>, vector<2x64xf32>,
    return
  }
}

module attributes {stable_mosaic.version = 11 : i64} {
  func.func @kernel(%arg0: i32, %arg1: i32, %arg2: i32, %arg3: memref<2x64xbf16, #tpu.memory_space<vmem>>, %arg4: memref<64x10xbf16, #tpu.memory_space<vmem>>, %arg5: memref<1x10xf32, #tpu.memory_space<vmem>>, %arg6: memref<2x10xf32, #tpu.memory_space<vmem>>, %arg7: memref<2x10xf32, #tpu.memory_space<vmem>>) attributes {dimension_semantics = [#tpu.dimension_semantics<parallel>, #tpu.dimension_semantics<parallel>, #tpu.dimension_semantics<arbitrary>], iteration_bounds = array<i64: 1, 1, 1>, scalar_prefetch = 0 : i64, scratch_operands = 1 : i64, tpu.core_type = #tpu.core_type<tc>, window_params = [{transform_indices = @transform_0, window_bounds = array<i64: 2, 64>}, {transform_indices = @transform_1, window_bounds = array<i64: 64, 10>}, {transform_indices = @transform_2, window_bounds = array<i64: 1, 10>}, {transform_indices = @transform_3, window_bounds = array<i64: 2, 10>}]} {
    %c0_i32 = arith.constant 0 : i32
    %0 = arith.cmpi eq, %arg2, %c0_i32 : i32
    %1 = arith.extui %0 : i1 to i32
    %c0_i32_0 = arith.constant 0 : i32
    %2 = arith.cmpi ne, %1, %c0_i32_0 : i32
    scf.if %2 {
      %cst_10 = arith.constant 0.000000e+00 : f32
      %12 = vector.broadcast %cst_10 : f32 to vector<2x10xf32>
      %c0_11 = arith.constant 0 : index
      %c0_12 = arith.constant 0 : index
      %13 = vector.load %arg7[%c0_11, %c0_12] : memref<2x10xf32, #tpu.memory_space<vmem>>, vector<2x10xf32>
      tpu.vector_store %arg7[%c0_11, %c0_12], %12 {strides = array<i32>} : memref<2x10xf32, #tpu.memory_space<vmem>>, vector<2x10xf32>,
    } else {
    }
    %c0 = arith.constant 0 : index
    %c0_1 = arith.constant 0 : index
    %3 = vector.load %arg7[%c0, %c0_1] : memref<2x10xf32, #tpu.memory_space<vmem>>, vector<2x10xf32>
    %c0_2 = arith.constant 0 : index
    %c0_3 = arith.constant 0 : index
    %4 = vector.load %arg3[%c0_2, %c0_3] : memref<2x64xbf16, #tpu.memory_space<vmem>>, vector<2x64xbf16>
    %c0_4 = arith.constant 0 : index
    %c0_5 = arith.constant 0 : index
    %5 = vector.load %arg4[%c0_4, %c0_5] : memref<64x10xbf16, #tpu.memory_space<vmem>>, vector<64x10xbf16>
    %cst = arith.constant dense<0.000000e+00> : vector<2x10xf32>
    %6 = tpu.matmul %4, %5, %cst {dimension_numbers = #tpu.dot_dimension_numbers<[1], [0], [0], [1], [0, 0, 1, 1], [], []>} : vector<2x64xbf16>, vector<64x10xbf16>, vector<2x10xf32> -> vector<2x10xf32>
    %7 = arith.addf %3, %6 : vector<2x10xf32>
    %c0_6 = arith.constant 0 : index
    %c0_7 = arith.constant 0 : index
    %8 = vector.load %arg7[%c0_6, %c0_7] : memref<2x10xf32, #tpu.memory_space<vmem>>, vector<2x10xf32>
    tpu.vector_store %arg7[%c0_6, %c0_7], %7 {strides = array<i32>} : memref<2x10xf32, #tpu.memory_space<vmem>>, vector<2x10xf32>,
    %c0_i32_8 = arith.constant 0 : i32
    %9 = arith.cmpi eq, %arg2, %c0_i32_8 : i32
    %10 = arith.extui %9 : i1 to i32
    %c0_i32_9 = arith.constant 0 : i32
    %11 = arith.cmpi ne, %10, %c0_i32_9 : i32
    scf.if %11 {
      %c0_10 = arith.constant 0 : index
      %c0_11 = arith.constant 0 : index
      %12 = vector.load %arg7[%c0_10, %c0_11] : memref<2x10xf32, #tpu.memory_space<vmem>>, vector<2x10xf32>
      %c0_12 = arith.constant 0 : index
      %c0_13 = arith.constant 0 : index
      %13 = vector.load %arg5[%c0_12, %c0_13] : memref<1x10xf32, #tpu.memory_space<vmem>>, vector<1x10xf32>
      %14 = vector.broadcast %13 : vector<1x10xf32> to vector<2x10xf32>
      %15 = arith.addf %12, %14 : vector<2x10xf32>
      %c0_14 = arith.constant 0 : index
      %c0_15 = arith.constant 0 : index
      %16 = vector.load %arg6[%c0_14, %c0_15] : memref<2x10xf32, #tpu.memory_space<vmem>>, vector<2x10xf32>
      tpu.vector_store %arg6[%c0_14, %c0_15], %15 {strides = array<i32>} : memref<2x10xf32, #tpu.memory_space<vmem>>, vector<2x10xf32>,
    } else {
    }
    return
  }
  func.func @transform_0(%arg0: i32, %arg1: i32, %arg2: i32) -> (i32, i32) {
    %c0_i32 = arith.constant 0 : i32
    return %arg0, %arg2 : i32, i32
  }
  func.func @transform_1(%arg0: i32, %arg1: i32, %arg2: i32) -> (i32, i32) {
    %c0_i32 = arith.constant 0 : i32
    return %arg2, %arg1 : i32, i32
  }
  func.func @transform_2(%arg0: i32, %arg1: i32, %arg2: i32) -> (i32, i32) {
    %c0_i32 = arith.constant 0 : i32
    %c0_i32_0 = arith.constant 0 : i32
    return %c0_i32, %arg1 : i32, i32
  }
  func.func @transform_3(%arg0: i32, %arg1: i32, %arg2: i32) -> (i32, i32) {
    %c0_i32 = arith.constant 0 : i32
    return %arg0, %arg1 : i32, i32
  }
}

</mosaic_0001>

<bundles_post_ra>
// kernel: _lambda_.37
= control target key start
LH: loop header
LB: loop body
LE: loop exit
PB: predicated region body
PF: predicated region fallthrough
CT: control target
= control target key end

     0   :  { %vm30_vm0 = vcmask 261120   ;;  %vm350_vm1 = vcmask 257024   ;;  %s763_s0 = inlined_call_operand.vmem [shape: f32[128,32], index: 0, kind: input, shape index: {}]   ;;  %s764_s1 = inlined_call_operand.vmem [shape: f32[1,32], index: 1, kind: input, shape index: {}]   ;;  %s765_s2 = inlined_call_operand.vmem [shape: f32[1,32], index: 2, kind: input, shape index: {}]   ;;  %s766_s3 = inlined_call_operand.vmem [shape: bf16[128,32], index: 3, kind: output, shape index: {}]  }
   0x1   :  { %v14_v0 = vld [vmem:[%s763_s0] sm:$0xff]  ;;  %v16_v1 = vld [vmem:[%s763_s0 + $0x10] sm:$0xff]  ;;  %v15_v2 = vld [vmem:[%s763_s0 + $0x8] sm:$0xff] }
   0x2   :  { %v31_v3 = vsel %vm30_vm0, %v14_v0, 0.0  ;;  %v37_v4 = vsel %vm30_vm0, %v16_v1, 0.0  ;;  %v17_v5 = vld [vmem:[%s763_s0 + $0x18] sm:$0xff]  ;;  %v34_v6 = vsel %vm30_vm0, %v15_v2, 0.0  ;;  %v18_v8 = vld [vmem:[%s763_s0 + $0x20] sm:$0xff]  ;;  %v19_v9 = vld [vmem:[%s763_s0 + $0x28] sm:$0xff] }
   0x3   :  { %32 = vadd.xlane.f32.xlu0 %v31_v3  ;;  %38 = vadd.xlane.f32.xlu1 %v37_v4  ;;  %v40_v7 = vsel %vm30_vm0, %v17_v5, 0.0  ;;  %v43_v10 = vsel %vm30_vm0, %v18_v8, 0.0  ;;  %v46_v11 = vsel %vm30_vm0, %v19_v9, 0.0  ;;  %v484_v12 = vld [vmem:[%s763_s0 + $0x30] sm:$0xff]  ;;  %v489_v13 = vld [vmem:[%s763_s0 + $0x38] sm:$0xff]  ;;  %v498_v16 = vld [vmem:[%s763_s0 + $0x40] sm:$0xff] }
   0x4   :  { %v49_v14 = vsel %vm30_vm0, %v484_v12, 0.0  ;;  %v52_v15 = vsel %vm30_vm0, %v489_v13, 0.0  ;;  %v503_v17 = vld [vmem:[%s763_s0 + $0x48] sm:$0xff]  ;;  %v55_v18 = vsel %vm30_vm0, %v498_v16, 0.0  ;;  %v512_v20 = vld [vmem:[%s763_s0 + $0x50] sm:$0xff]  ;;  %v517_v21 = vld [vmem:[%s763_s0 + $0x58] sm:$0xff] }
   0x5   :  { %v58_v19 = vsel %vm30_vm0, %v503_v17, 0.0  ;;  %v61_v22 = vsel %vm30_vm0, %v512_v20, 0.0  ;;  %v64_v23 = vsel %vm30_vm0, %v517_v21, 0.0  ;;  %v526_v24 = vld [vmem:[%s763_s0 + $0x60] sm:$0xff]  ;;  %v531_v25 = vld [vmem:[%s763_s0 + $0x68] sm:$0xff]  ;;  %v540_v28 = vld [vmem:[%s763_s0 + $0x70] sm:$0xff] }
   0x6   :  { %v67_v26 = vsel %vm30_vm0, %v526_v24, 0.0  ;;  %v70_v27 = vsel %vm30_vm0, %v531_v25, 0.0  ;;  %v545_v29 = vld [vmem:[%s763_s0 + $0x78] sm:$0xff]  ;;  %v73_v30 = vsel %vm30_vm0, %v540_v28, 0.0 }
   0x7   :  { %35 = vadd.xlane.f32.xlu0 %v34_v6  ;;  %41 = vadd.xlane.f32.xlu1 %v40_v7  ;;  %v76_v31 = vsel %vm30_vm0, %v545_v29, 0.0 }
   0xb   :  { %44 = vadd.xlane.f32.xlu0 %v43_v10  ;;  %47 = vadd.xlane.f32.xlu1 %v46_v11 }
   0xf   :  { %50 = vadd.xlane.f32.xlu0 %v49_v14  ;;  %53 = vadd.xlane.f32.xlu1 %v52_v15 }
  0x13   :  { %56 = vadd.xlane.f32.xlu0 %v55_v18  ;;  %59 = vadd.xlane.f32.xlu1 %v58_v19 }
  0x17   :  { %62 = vadd.xlane.f32.xlu0 %v61_v22  ;;  %65 = vadd.xlane.f32.xlu1 %v64_v23 }
  0x1b   :  { %68 = vadd.xlane.f32.xlu0 %v67_v26  ;;  %71 = vadd.xlane.f32.xlu1 %v70_v27 }
  0x1f   :  { %74 = vadd.xlane.f32.xlu0 %v73_v30  ;;  %77 = vadd.xlane.f32.xlu1 %v76_v31 }
  0x8c   :  { %v33_v32 = vpop.xlane.xlu0 %32  ;;  %v39_v33 = vpop.xlane.xlu1 %38 }
  0x8d   :  { %v80_v34 = vmul.f32 0.03125, %v33_v32  ;;  %v82_v35 = vmul.f32 0.03125, %v39_v33 }
  0x8f   :  { %v551_v36 = vsub.f32 %v14_v0, %v80_v34  ;;  %v553_v37 = vsub.f32 %v16_v1, %v82_v35 }
  0x90   :  { %v36_v38 = vpop.xlane.xlu0 %35  ;;  %v42_v39 = vpop.xlane.xlu1 %41 }
  0x91   :  { %v81_v40 = vmul.f32 0.03125, %v36_v38  ;;  %v83_v41 = vmul.f32 0.03125, %v42_v39  ;;  %v112_v42 = vmul.f32 %v551_v36, %v551_v36  ;;  %v114_v43 = vmul.f32 %v553_v37, %v553_v37 }
  0x93   :  { %v559_v44 = vsub.f32 %v15_v2, %v81_v40  ;;  %v561_v45 = vsub.f32 %v17_v5, %v83_v41  ;;  %v128_v46 = vsel %vm30_vm0, %v112_v42, 0.0  ;;  %v134_v49 = vsel %vm30_vm0, %v114_v43, 0.0 }
  0x94   :  { %129 = vadd.xlane.f32.xlu0 %v128_v46  ;;  %v45_v47 = vpop.xlane.xlu0 %44  ;;  %v48_v48 = vpop.xlane.xlu1 %47 }
  0x95   :  { %v84_v50 = vmul.f32 0.03125, %v45_v47  ;;  %v85_v51 = vmul.f32 0.03125, %v48_v48  ;;  %v113_v52 = vmul.f32 %v559_v44, %v559_v44  ;;  %v115_v53 = vmul.f32 %v561_v45, %v561_v45 }
  0x97   :  { %v569_v54 = vsub.f32 %v18_v8, %v84_v50  ;;  %v571_v55 = vsub.f32 %v19_v9, %v85_v51  ;;  %v131_v56 = vsel %vm30_vm0, %v113_v52, 0.0  ;;  %v137_v59 = vsel %vm30_vm0, %v115_v53, 0.0 }
  0x98   :  { %135 = vadd.xlane.f32.xlu0 %v134_v49  ;;  %132 = vadd.xlane.f32.xlu1 %v131_v56  ;;  %v51_v57 = vpop.xlane.xlu0 %50  ;;  %v54_v58 = vpop.xlane.xlu1 %53 }
  0x99   :  { %v86_v60 = vmul.f32 0.03125, %v51_v57  ;;  %v87_v61 = vmul.f32 0.03125, %v54_v58  ;;  %v116_v62 = vmul.f32 %v569_v54, %v569_v54  ;;  %v117_v63 = vmul.f32 %v571_v55, %v571_v55 }
  0x9b   :  { %v580_v0 = vsub.f32 %v484_v12, %v86_v60  ;;  %v583_v1 = vsub.f32 %v489_v13, %v87_v61  ;;  %v140_v2 = vsel %vm30_vm0, %v116_v62, 0.0  ;;  %v143_v5 = vsel %vm30_vm0, %v117_v63, 0.0 }
  0x9c   :  { %138 = vadd.xlane.f32.xlu1 %v137_v59  ;;  %141 = vadd.xlane.f32.xlu0 %v140_v2  ;;  %v57_v3 = vpop.xlane.xlu0 %56  ;;  %v60_v4 = vpop.xlane.xlu1 %59 }
  0x9d   :  { %v88_v6 = vmul.f32 0.03125, %v57_v3  ;;  %v89_v7 = vmul.f32 0.03125, %v60_v4  ;;  %v118_v8 = vmul.f32 %v580_v0, %v580_v0  ;;  %v119_v9 = vmul.f32 %v583_v1, %v583_v1 }
  0x9f   :  { %v592_v10 = vsub.f32 %v498_v16, %v88_v6  ;;  %v595_v11 = vsub.f32 %v503_v17, %v89_v7  ;;  %v146_v12 = vsel %vm30_vm0, %v118_v8, 0.0  ;;  %v149_v15 = vsel %vm30_vm0, %v119_v9, 0.0 }
  0xa0   :  { %144 = vadd.xlane.f32.xlu1 %v143_v5  ;;  %147 = vadd.xlane.f32.xlu0 %v146_v12  ;;  %v63_v13 = vpop.xlane.xlu0 %62  ;;  %v66_v14 = vpop.xlane.xlu1 %65 }
  0xa1   :  { %v90_v18 = vmul.f32 0.03125, %v63_v13  ;;  %v91_v19 = vmul.f32 0.03125, %v66_v14  ;;  %v120_v22 = vmul.f32 %v592_v10, %v592_v10  ;;  %v121_v16 = vmul.f32 %v595_v11, %v595_v11 }
  0xa3   :  { %v604_v23 = vsub.f32 %v512_v20, %v90_v18  ;;  %v607_v17 = vsub.f32 %v517_v21, %v91_v19  ;;  %v152_v26 = vsel %vm30_vm0, %v120_v22, 0.0  ;;  %v155_v31 = vsel %vm30_vm0, %v121_v16, 0.0 }
  0xa4   :  { %150 = vadd.xlane.f32.xlu1 %v149_v15  ;;  %153 = vadd.xlane.f32.xlu0 %v152_v26  ;;  %v69_v27 = vpop.xlane.xlu0 %68  ;;  %v72_v30 = vpop.xlane.xlu1 %71  ;;  %v644_v26 = vld [vmem:[%s764_s1] ss:$0 sm:$0xff] }
  0xa5   :  { %v92_v32 = vmul.f32 0.03125, %v69_v27  ;;  %v93_v33 = vmul.f32 0.03125, %v72_v30  ;;  %v122_v34 = vmul.f32 %v604_v23, %v604_v23  ;;  %v123_v20 = vmul.f32 %v607_v17, %v607_v17 }
  0xa7   :  { %v616_v35 = vsub.f32 %v526_v24, %v92_v32  ;;  %v619_v21 = vsub.f32 %v531_v25, %v93_v33  ;;  %v158_v38 = vsel %vm30_vm0, %v122_v34, 0.0  ;;  %v161_v41 = vsel %vm30_vm0, %v123_v20, 0.0  ;;  %v650_v32 = vld [vmem:[%s765_s2] ss:$0 sm:$0xff] }
  0xa8   :  { %156 = vadd.xlane.f32.xlu1 %v155_v31  ;;  %159 = vadd.xlane.f32.xlu0 %v158_v38  ;;  %v75_v39 = vpop.xlane.xlu0 %74  ;;  %v78_v40 = vpop.xlane.xlu1 %77 }
  0xa9   :  { %v94_v42 = vmul.f32 0.03125, %v75_v39  ;;  %v95_v43 = vmul.f32 0.03125, %v78_v40  ;;  %v124_v46 = vmul.f32 %v616_v35, %v616_v35  ;;  %v125_v24 = vmul.f32 %v619_v21, %v619_v21 }
  0xab   :  { %v628_v47 = vsub.f32 %v540_v28, %v94_v42  ;;  %v631_v25 = vsub.f32 %v545_v29, %v95_v43  ;;  %v164_v48 = vsel %vm30_vm0, %v124_v46, 0.0  ;;  %v167_v49 = vsel %vm30_vm0, %v125_v24, 0.0 }
  0xac   :  { %162 = vadd.xlane.f32.xlu1 %v161_v41  ;;  %165 = vadd.xlane.f32.xlu0 %v164_v48 }
  0xad   :  { %v126_v50 = vmul.f32 %v628_v47, %v628_v47  ;;  %v127_v51 = vmul.f32 %v631_v25, %v631_v25 }
  0xaf   :  { %v170_v52 = vsel %vm30_vm0, %v126_v50, 0.0  ;;  %v173_v28 = vsel %vm30_vm0, %v127_v51, 0.0 }
  0xb0   :  { %168 = vadd.xlane.f32.xlu1 %v167_v49  ;;  %171 = vadd.xlane.f32.xlu0 %v170_v52 }
  0xb4   :  { %174 = vadd.xlane.f32.xlu1 %v173_v28 }
 0x11d   :  { %v130_v29 = vpop.xlane.xlu0 %129 }
 0x11e   :  { %v176_v53 = vmul.f32 0.03125, %v130_v29 }
 0x120   :  { %v192_v56 = vadd.f32 1e-05, %v176_v53 }
 0x121   :  { %v133_v57 = vpop.xlane.xlu1 %132  ;;  %v136_v58 = vpop.xlane.xlu0 %135 }
 0x122   :  { %405 = vrsqrt.f32 %v192_v56  ;;  %v177_v59 = vmul.f32 0.03125, %v133_v57  ;;  %v178_v60 = vmul.f32 0.03125, %v136_v58 }
 0x124   :  { %v193_v61 = vadd.f32 1e-05, %v177_v59  ;;  %v194_v62 = vadd.f32 1e-05, %v178_v60 }
 0x125   :  { %v139_v63 = vpop.xlane.xlu1 %138  ;;  %v142_v2 = vpop.xlane.xlu0 %141 }
 0x126   :  { %407 = vrsqrt.f32 %v193_v61  ;;  %v179_v3 = vmul.f32 0.03125, %v139_v63  ;;  %v180_v4 = vmul.f32 0.03125, %v142_v2 }
 0x127   :  { %409 = vrsqrt.f32 %v194_v62 }
 0x128   :  { %v195_v5 = vadd.f32 1e-05, %v179_v3  ;;  %v196_v6 = vadd.f32 1e-05, %v180_v4 }
 0x129   :  { %v145_v7 = vpop.xlane.xlu1 %144  ;;  %v148_v8 = vpop.xlane.xlu0 %147 }
 0x12a   :  { %411 = vrsqrt.f32 %v195_v5  ;;  %v181_v9 = vmul.f32 0.03125, %v145_v7  ;;  %v182_v12 = vmul.f32 0.03125, %v148_v8 }
 0x12b   :  { %413 = vrsqrt.f32 %v196_v6 }
 0x12c   :  { %v197_v13 = vadd.f32 1e-05, %v181_v9  ;;  %v198_v14 = vadd.f32 1e-05, %v182_v12 }
 0x12d   :  { %v151_v15 = vpop.xlane.xlu1 %150  ;;  %v154_v18 = vpop.xlane.xlu0 %153 }
 0x12e   :  { %415 = vrsqrt.f32 %v197_v13  ;;  %v183_v19 = vmul.f32 0.03125, %v151_v15  ;;  %v184_v22 = vmul.f32 0.03125, %v154_v18 }
 0x12f   :  { %v406_v16 = vpop.eup %405  ;;  %417 = vrsqrt.f32 %v198_v14 }
 0x130   :  { %v224_v27 = vmul.f32 %v406_v16, %v551_v36  ;;  %v199_v30 = vadd.f32 1e-05, %v183_v19  ;;  %v200_v31 = vadd.f32 1e-05, %v184_v22 }
 0x131   :  { %v157_v33 = vpop.xlane.xlu1 %156  ;;  %v160_v34 = vpop.xlane.xlu0 %159 }
 0x132   :  { %v247_v20 = vmul.f32 %v644_v26, %v224_v27  ;;  %419 = vrsqrt.f32 %v199_v30  ;;  %v185_v38 = vmul.f32 0.03125, %v157_v33  ;;  %v186_v39 = vmul.f32 0.03125, %v160_v34 }
 0x133   :  { %v408_v40 = vpop.eup %407  ;;  %421 = vrsqrt.f32 %v200_v31 }
 0x134   :  { %v410_v41 = vpop.eup %409  ;;  %v270_v42 = vadd.f32 %v650_v32, %v247_v20  ;;  %v225_v36 = vmul.f32 %v408_v40, %v559_v44  ;;  %v201_v43 = vadd.f32 1e-05, %v185_v38  ;;  %v202_v46 = vadd.f32 1e-05, %v186_v39 }
 0x135   :  { %v226_v24 = vmul.f32 %v410_v41, %v553_v37  ;;  %v163_v48 = vpop.xlane.xlu1 %162  ;;  %v166_v49 = vpop.xlane.xlu0 %165 }
 0x136   :  { %v389_v50 = vpack.c.bf16 %v270_v42, %v270_v42  ;;  %v248_v51 = vmul.f32 %v644_v26, %v225_v36  ;;  %423 = vrsqrt.f32 %v201_v43  ;;  %v187_v52 = vmul.f32 0.03125, %v163_v48 }
 0x137   :  { %v412_v28 = vpop.eup %411  ;;  %v249_v29 = vmul.f32 %v644_v26, %v226_v24  ;;  %425 = vrsqrt.f32 %v202_v46  ;;  %v188_v53 = vmul.f32 0.03125, %v166_v49 }
 0x138   :  { %v414_v56 = vpop.eup %413  ;;  %351 = vst.msk [vmem:[%s766_s3] sm:$0xf] %vm350_vm1, %v389_v50  ;;  %v271_v37 = vadd.f32 %v650_v32, %v248_v51  ;;  %v227_v44 = vmul.f32 %v412_v28, %v561_v45  ;;  %v203_v57 = vadd.f32 1e-05, %v187_v52 }
 0x139   :  { %v272_v58 = vadd.f32 %v650_v32, %v249_v29  ;;  %v228_v59 = vmul.f32 %v414_v56, %v569_v54  ;;  %v204_v60 = vadd.f32 1e-05, %v188_v53  ;;  %v169_v61 = vpop.xlane.xlu1 %168  ;;  %v172_v62 = vpop.xlane.xlu0 %171 }
 0x13a   :  { %v390_v63 = vpack.c.bf16 %v271_v37, %v271_v37  ;;  %v250_v2 = vmul.f32 %v644_v26, %v227_v44  ;;  %427 = vrsqrt.f32 %v203_v57  ;;  %v189_v3 = vmul.f32 0.03125, %v169_v61 }
 0x13b   :  { %v416_v4 = vpop.eup %415  ;;  %v391_v5 = vpack.c.bf16 %v272_v58, %v272_v58  ;;  %v251_v6 = vmul.f32 %v644_v26, %v228_v59  ;;  %429 = vrsqrt.f32 %v204_v60  ;;  %v190_v7 = vmul.f32 0.03125, %v172_v62 }
 0x13c   :  { %v418_v45 = vpop.eup %417  ;;  %352 = vst.msk [vmem:[%s766_s3 + $0x4] sm:$0xf] %vm350_vm1, %v390_v63  ;;  %v273_v54 = vadd.f32 %v650_v32, %v250_v2  ;;  %v229_v8 = vmul.f32 %v416_v4, %v571_v55  ;;  %v205_v9 = vadd.f32 1e-05, %v189_v3 }
 0x13d   :  { %353 = vst.msk [vmem:[%s766_s3 + $0x8] sm:$0xf] %vm350_vm1, %v391_v5  ;;  %v274_v12 = vadd.f32 %v650_v32, %v251_v6  ;;  %v230_v13 = vmul.f32 %v418_v45, %v580_v0  ;;  %v206_v14 = vadd.f32 1e-05, %v190_v7  ;;  %v175_v15 = vpop.xlane.xlu1 %174 }
 0x13e   :  { %v392_v18 = vpack.c.bf16 %v273_v54, %v273_v54  ;;  %v252_v19 = vmul.f32 %v644_v26, %v229_v8  ;;  %431 = vrsqrt.f32 %v205_v9  ;;  %v191_v22 = vmul.f32 0.03125, %v175_v15 }
 0x13f   :  { %v420_v16 = vpop.eup %419  ;;  %v393_v27 = vpack.c.bf16 %v274_v12, %v274_v12  ;;  %v253_v55 = vmul.f32 %v644_v26, %v230_v13  ;;  %433 = vrsqrt.f32 %v206_v14 }
 0x140   :  { %v422_v30 = vpop.eup %421  ;;  %354 = vst.msk [vmem:[%s766_s3 + $0xc] sm:$0xf] %vm350_vm1, %v392_v18  ;;  %v275_v0 = vadd.f32 %v650_v32, %v252_v19  ;;  %v231_v31 = vmul.f32 %v420_v16, %v583_v1  ;;  %v207_v33 = vadd.f32 1e-05, %v191_v22 }
 0x141   :  { %355 = vst.msk [vmem:[%s766_s3 + $0x10] sm:$0xf] %vm350_vm1, %v393_v27  ;;  %v276_v34 = vadd.f32 %v650_v32, %v253_v55  ;;  %v232_v20 = vmul.f32 %v422_v30, %v592_v10 }
 0x142   :  { %v394_v38 = vpack.c.bf16 %v275_v0, %v275_v0  ;;  %v254_v39 = vmul.f32 %v644_v26, %v231_v31  ;;  %435 = vrsqrt.f32 %v207_v33 }
 0x143   :  { %v424_v40 = vpop.eup %423  ;;  %v395_v41 = vpack.c.bf16 %v276_v34, %v276_v34  ;;  %v255_v42 = vmul.f32 %v644_v26, %v232_v20 }
 0x144   :  { %v426_v36 = vpop.eup %425  ;;  %356 = vst.msk [vmem:[%s766_s3 + $0x14] sm:$0xf] %vm350_vm1, %v394_v38  ;;  %v277_v1 = vadd.f32 %v650_v32, %v254_v39  ;;  %v233_v43 = vmul.f32 %v424_v40, %v595_v11 }
 0x145   :  { %357 = vst.msk [vmem:[%s766_s3 + $0x18] sm:$0xf] %vm350_vm1, %v395_v41  ;;  %v278_v10 = vadd.f32 %v650_v32, %v255_v42  ;;  %v234_v46 = vmul.f32 %v426_v36, %v604_v23 }
 0x146   :  { %v396_v24 = vpack.c.bf16 %v277_v1, %v277_v1  ;;  %v256_v48 = vmul.f32 %v644_v26, %v233_v43 }
 0x147   :  { %v428_v49 = vpop.eup %427  ;;  %v397_v50 = vpack.c.bf16 %v278_v10, %v278_v10  ;;  %v257_v51 = vmul.f32 %v644_v26, %v234_v46 }
 0x148   :  { %v430_v52 = vpop.eup %429  ;;  %358 = vst.msk [vmem:[%s766_s3 + $0x1c] sm:$0xf] %vm350_vm1, %v396_v24  ;;  %v279_v11 = vadd.f32 %v650_v32, %v256_v48  ;;  %v235_v28 = vmul.f32 %v428_v49, %v607_v17 }
 0x149   :  { %359 = vst.msk [vmem:[%s766_s3 + $0x20] sm:$0xf] %vm350_vm1, %v397_v50  ;;  %v280_v23 = vadd.f32 %v650_v32, %v257_v51  ;;  %v236_v29 = vmul.f32 %v430_v52, %v616_v35 }
 0x14a   :  { %v398_v53 = vpack.c.bf16 %v279_v11, %v279_v11  ;;  %v258_v56 = vmul.f32 %v644_v26, %v235_v28 }
 0x14b   :  { %v432_v37 = vpop.eup %431  ;;  %v399_v44 = vpack.c.bf16 %v280_v23, %v280_v23  ;;  %v259_v57 = vmul.f32 %v644_v26, %v236_v29 }
 0x14c   :  { %v434_v58 = vpop.eup %433  ;;  %360 = vst.msk [vmem:[%s766_s3 + $0x24] sm:$0xf] %vm350_vm1, %v398_v53  ;;  %v281_v17 = vadd.f32 %v650_v32, %v258_v56  ;;  %v237_v59 = vmul.f32 %v432_v37, %v619_v21 }
 0x14d   :  { %361 = vst.msk [vmem:[%s766_s3 + $0x28] sm:$0xf] %vm350_vm1, %v399_v44  ;;  %v282_v35 = vadd.f32 %v650_v32, %v259_v57  ;;  %v238_v60 = vmul.f32 %v434_v58, %v628_v47 }
 0x14e   :  { %v400_v61 = vpack.c.bf16 %v281_v17, %v281_v17  ;;  %v260_v62 = vmul.f32 %v644_v26, %v237_v59 }
 0x14f   :  { %v436_v63 = vpop.eup %435  ;;  %v401_v2 = vpack.c.bf16 %v282_v35, %v282_v35  ;;  %v261_v3 = vmul.f32 %v644_v26, %v238_v60 }
 0x150   :  { %362 = vst.msk [vmem:[%s766_s3 + $0x2c] sm:$0xf] %vm350_vm1, %v400_v61  ;;  %v283_v21 = vadd.f32 %v650_v32, %v260_v62  ;;  %v239_v4 = vmul.f32 %v436_v63, %v631_v25 }
 0x151   :  { %363 = vst.msk [vmem:[%s766_s3 + $0x30] sm:$0xf] %vm350_vm1, %v401_v2  ;;  %v284_v47 = vadd.f32 %v650_v32, %v261_v3 }
 0x152   :  { %v402_v5 = vpack.c.bf16 %v283_v21, %v283_v21  ;;  %v262_v6 = vmul.f32 %v644_v26, %v239_v4 }
 0x153   :  { %v403_v7 = vpack.c.bf16 %v284_v47, %v284_v47 }
 0x154   :  { %364 = vst.msk [vmem:[%s766_s3 + $0x34] sm:$0xf] %vm350_vm1, %v402_v5  ;;  %v285_v45 = vadd.f32 %v650_v32, %v262_v6 }
 0x155   :  { %365 = vst.msk [vmem:[%s766_s3 + $0x38] sm:$0xf] %vm350_vm1, %v403_v7 }
 0x156   :  { %v404_v25 = vpack.c.bf16 %v285_v45, %v285_v45 }
 0x158   :  { %366 = vst.msk [vmem:[%s766_s3 + $0x3c] sm:$0xf] %vm350_vm1, %v404_v25 }

// kernel: _lambda_.36
= control target key start
LH: loop header
LB: loop body
LE: loop exit
PB: predicated region body
PF: predicated region fallthrough
CT: control target
= control target key end

     0   :  { %vm30_vm0 = vcmask 261120   ;;  %s666_s0 = inlined_call_operand.vmem [shape: f32[128,32], index: 0, kind: input, shape index: {}]   ;;  %s667_s1 = inlined_call_operand.vmem [shape: f32[1,32], index: 1, kind: input, shape index: {}]   ;;  %s668_s2 = inlined_call_operand.vmem [shape: f32[1,32], index: 2, kind: input, shape index: {}]   ;;  %s669_s3 = inlined_call_operand.vmem [shape: f32[128,32], index: 3, kind: output, shape index: {}]  }
   0x1   :  { %v14_v0 = vld [vmem:[%s666_s0] sm:$0xff]  ;;  %v16_v1 = vld [vmem:[%s666_s0 + $0x10] sm:$0xff]  ;;  %v15_v2 = vld [vmem:[%s666_s0 + $0x8] sm:$0xff] }
   0x2   :  { %v31_v3 = vsel %vm30_vm0, %v14_v0, 0.0  ;;  %v37_v4 = vsel %vm30_vm0, %v16_v1, 0.0  ;;  %v17_v5 = vld [vmem:[%s666_s0 + $0x18] sm:$0xff]  ;;  %v34_v6 = vsel %vm30_vm0, %v15_v2, 0.0  ;;  %v18_v8 = vld [vmem:[%s666_s0 + $0x20] sm:$0xff]  ;;  %v19_v9 = vld [vmem:[%s666_s0 + $0x28] sm:$0xff] }
   0x3   :  { %32 = vadd.xlane.f32.xlu0 %v31_v3  ;;  %38 = vadd.xlane.f32.xlu1 %v37_v4  ;;  %v40_v7 = vsel %vm30_vm0, %v17_v5, 0.0  ;;  %v43_v10 = vsel %vm30_vm0, %v18_v8, 0.0  ;;  %v46_v11 = vsel %vm30_vm0, %v19_v9, 0.0  ;;  %v387_v12 = vld [vmem:[%s666_s0 + $0x30] sm:$0xff]  ;;  %v392_v13 = vld [vmem:[%s666_s0 + $0x38] sm:$0xff]  ;;  %v401_v16 = vld [vmem:[%s666_s0 + $0x40] sm:$0xff] }
   0x4   :  { %v49_v14 = vsel %vm30_vm0, %v387_v12, 0.0  ;;  %v52_v15 = vsel %vm30_vm0, %v392_v13, 0.0  ;;  %v406_v17 = vld [vmem:[%s666_s0 + $0x48] sm:$0xff]  ;;  %v55_v18 = vsel %vm30_vm0, %v401_v16, 0.0  ;;  %v415_v20 = vld [vmem:[%s666_s0 + $0x50] sm:$0xff]  ;;  %v420_v21 = vld [vmem:[%s666_s0 + $0x58] sm:$0xff] }
   0x5   :  { %v58_v19 = vsel %vm30_vm0, %v406_v17, 0.0  ;;  %v61_v22 = vsel %vm30_vm0, %v415_v20, 0.0  ;;  %v64_v23 = vsel %vm30_vm0, %v420_v21, 0.0  ;;  %v429_v24 = vld [vmem:[%s666_s0 + $0x60] sm:$0xff]  ;;  %v434_v25 = vld [vmem:[%s666_s0 + $0x68] sm:$0xff]  ;;  %v443_v28 = vld [vmem:[%s666_s0 + $0x70] sm:$0xff] }
   0x6   :  { %v67_v26 = vsel %vm30_vm0, %v429_v24, 0.0  ;;  %v70_v27 = vsel %vm30_vm0, %v434_v25, 0.0  ;;  %v448_v29 = vld [vmem:[%s666_s0 + $0x78] sm:$0xff]  ;;  %v73_v30 = vsel %vm30_vm0, %v443_v28, 0.0 }
   0x7   :  { %35 = vadd.xlane.f32.xlu0 %v34_v6  ;;  %41 = vadd.xlane.f32.xlu1 %v40_v7  ;;  %v76_v31 = vsel %vm30_vm0, %v448_v29, 0.0 }
   0xb   :  { %44 = vadd.xlane.f32.xlu0 %v43_v10  ;;  %47 = vadd.xlane.f32.xlu1 %v46_v11 }
   0xf   :  { %50 = vadd.xlane.f32.xlu0 %v49_v14  ;;  %53 = vadd.xlane.f32.xlu1 %v52_v15 }
  0x13   :  { %56 = vadd.xlane.f32.xlu0 %v55_v18  ;;  %59 = vadd.xlane.f32.xlu1 %v58_v19 }
  0x17   :  { %62 = vadd.xlane.f32.xlu0 %v61_v22  ;;  %65 = vadd.xlane.f32.xlu1 %v64_v23 }
  0x1b   :  { %68 = vadd.xlane.f32.xlu0 %v67_v26  ;;  %71 = vadd.xlane.f32.xlu1 %v70_v27 }
  0x1f   :  { %74 = vadd.xlane.f32.xlu0 %v73_v30  ;;  %77 = vadd.xlane.f32.xlu1 %v76_v31 }
  0x8c   :  { %v33_v32 = vpop.xlane.xlu0 %32  ;;  %v39_v33 = vpop.xlane.xlu1 %38 }
  0x8d   :  { %v80_v34 = vmul.f32 0.03125, %v33_v32  ;;  %v82_v35 = vmul.f32 0.03125, %v39_v33 }
  0x8f   :  { %v454_v36 = vsub.f32 %v14_v0, %v80_v34  ;;  %v456_v37 = vsub.f32 %v16_v1, %v82_v35 }
  0x90   :  { %v36_v38 = vpop.xlane.xlu0 %35  ;;  %v42_v39 = vpop.xlane.xlu1 %41 }
  0x91   :  { %v81_v40 = vmul.f32 0.03125, %v36_v38  ;;  %v83_v41 = vmul.f32 0.03125, %v42_v39  ;;  %v112_v42 = vmul.f32 %v454_v36, %v454_v36  ;;  %v114_v43 = vmul.f32 %v456_v37, %v456_v37 }
  0x93   :  { %v462_v44 = vsub.f32 %v15_v2, %v81_v40  ;;  %v464_v45 = vsub.f32 %v17_v5, %v83_v41  ;;  %v128_v46 = vsel %vm30_vm0, %v112_v42, 0.0  ;;  %v134_v49 = vsel %vm30_vm0, %v114_v43, 0.0 }
  0x94   :  { %129 = vadd.xlane.f32.xlu0 %v128_v46  ;;  %v45_v47 = vpop.xlane.xlu0 %44  ;;  %v48_v48 = vpop.xlane.xlu1 %47 }
  0x95   :  { %v84_v50 = vmul.f32 0.03125, %v45_v47  ;;  %v85_v51 = vmul.f32 0.03125, %v48_v48  ;;  %v113_v52 = vmul.f32 %v462_v44, %v462_v44  ;;  %v115_v53 = vmul.f32 %v464_v45, %v464_v45 }
  0x97   :  { %v472_v54 = vsub.f32 %v18_v8, %v84_v50  ;;  %v474_v55 = vsub.f32 %v19_v9, %v85_v51  ;;  %v131_v56 = vsel %vm30_vm0, %v113_v52, 0.0  ;;  %v137_v59 = vsel %vm30_vm0, %v115_v53, 0.0 }
  0x98   :  { %135 = vadd.xlane.f32.xlu0 %v134_v49  ;;  %132 = vadd.xlane.f32.xlu1 %v131_v56  ;;  %v51_v57 = vpop.xlane.xlu0 %50  ;;  %v54_v58 = vpop.xlane.xlu1 %53 }
  0x99   :  { %v86_v60 = vmul.f32 0.03125, %v51_v57  ;;  %v87_v61 = vmul.f32 0.03125, %v54_v58  ;;  %v116_v62 = vmul.f32 %v472_v54, %v472_v54  ;;  %v117_v63 = vmul.f32 %v474_v55, %v474_v55 }
  0x9b   :  { %v483_v0 = vsub.f32 %v387_v12, %v86_v60  ;;  %v486_v1 = vsub.f32 %v392_v13, %v87_v61  ;;  %v140_v2 = vsel %vm30_vm0, %v116_v62, 0.0  ;;  %v143_v5 = vsel %vm30_vm0, %v117_v63, 0.0 }
  0x9c   :  { %138 = vadd.xlane.f32.xlu1 %v137_v59  ;;  %141 = vadd.xlane.f32.xlu0 %v140_v2  ;;  %v57_v3 = vpop.xlane.xlu0 %56  ;;  %v60_v4 = vpop.xlane.xlu1 %59 }
  0x9d   :  { %v88_v6 = vmul.f32 0.03125, %v57_v3  ;;  %v89_v7 = vmul.f32 0.03125, %v60_v4  ;;  %v118_v8 = vmul.f32 %v483_v0, %v483_v0  ;;  %v119_v9 = vmul.f32 %v486_v1, %v486_v1 }
  0x9f   :  { %v495_v10 = vsub.f32 %v401_v16, %v88_v6  ;;  %v498_v11 = vsub.f32 %v406_v17, %v89_v7  ;;  %v146_v12 = vsel %vm30_vm0, %v118_v8, 0.0  ;;  %v149_v15 = vsel %vm30_vm0, %v119_v9, 0.0 }
  0xa0   :  { %144 = vadd.xlane.f32.xlu1 %v143_v5  ;;  %147 = vadd.xlane.f32.xlu0 %v146_v12  ;;  %v63_v13 = vpop.xlane.xlu0 %62  ;;  %v66_v14 = vpop.xlane.xlu1 %65 }
  0xa1   :  { %v90_v18 = vmul.f32 0.03125, %v63_v13  ;;  %v91_v19 = vmul.f32 0.03125, %v66_v14  ;;  %v120_v22 = vmul.f32 %v495_v10, %v495_v10  ;;  %v121_v16 = vmul.f32 %v498_v11, %v498_v11 }
  0xa3   :  { %v507_v23 = vsub.f32 %v415_v20, %v90_v18  ;;  %v510_v17 = vsub.f32 %v420_v21, %v91_v19  ;;  %v152_v26 = vsel %vm30_vm0, %v120_v22, 0.0  ;;  %v155_v31 = vsel %vm30_vm0, %v121_v16, 0.0 }
  0xa4   :  { %150 = vadd.xlane.f32.xlu1 %v149_v15  ;;  %153 = vadd.xlane.f32.xlu0 %v152_v26  ;;  %v69_v27 = vpop.xlane.xlu0 %68  ;;  %v72_v30 = vpop.xlane.xlu1 %71  ;;  %v547_v26 = vld [vmem:[%s667_s1] ss:$0 sm:$0xff] }
  0xa5   :  { %v92_v32 = vmul.f32 0.03125, %v69_v27  ;;  %v93_v33 = vmul.f32 0.03125, %v72_v30  ;;  %v122_v34 = vmul.f32 %v507_v23, %v507_v23  ;;  %v123_v20 = vmul.f32 %v510_v17, %v510_v17 }
  0xa7   :  { %v519_v35 = vsub.f32 %v429_v24, %v92_v32  ;;  %v522_v21 = vsub.f32 %v434_v25, %v93_v33  ;;  %v158_v38 = vsel %vm30_vm0, %v122_v34, 0.0  ;;  %v161_v41 = vsel %vm30_vm0, %v123_v20, 0.0  ;;  %v553_v32 = vld [vmem:[%s668_s2] ss:$0 sm:$0xff] }
  0xa8   :  { %156 = vadd.xlane.f32.xlu1 %v155_v31  ;;  %159 = vadd.xlane.f32.xlu0 %v158_v38  ;;  %v75_v39 = vpop.xlane.xlu0 %74  ;;  %v78_v40 = vpop.xlane.xlu1 %77 }
  0xa9   :  { %v94_v42 = vmul.f32 0.03125, %v75_v39  ;;  %v95_v43 = vmul.f32 0.03125, %v78_v40  ;;  %v124_v46 = vmul.f32 %v519_v35, %v519_v35  ;;  %v125_v24 = vmul.f32 %v522_v21, %v522_v21 }
  0xab   :  { %v531_v47 = vsub.f32 %v443_v28, %v94_v42  ;;  %v534_v25 = vsub.f32 %v448_v29, %v95_v43  ;;  %v164_v48 = vsel %vm30_vm0, %v124_v46, 0.0  ;;  %v167_v49 = vsel %vm30_vm0, %v125_v24, 0.0 }
  0xac   :  { %162 = vadd.xlane.f32.xlu1 %v161_v41  ;;  %165 = vadd.xlane.f32.xlu0 %v164_v48 }
  0xad   :  { %v126_v50 = vmul.f32 %v531_v47, %v531_v47  ;;  %v127_v51 = vmul.f32 %v534_v25, %v534_v25 }
  0xaf   :  { %v170_v52 = vsel %vm30_vm0, %v126_v50, 0.0  ;;  %v173_v28 = vsel %vm30_vm0, %v127_v51, 0.0 }
  0xb0   :  { %168 = vadd.xlane.f32.xlu1 %v167_v49  ;;  %171 = vadd.xlane.f32.xlu0 %v170_v52 }
  0xb4   :  { %174 = vadd.xlane.f32.xlu1 %v173_v28 }
 0x11d   :  { %v130_v29 = vpop.xlane.xlu0 %129 }
 0x11e   :  { %v176_v53 = vmul.f32 0.03125, %v130_v29 }
 0x120   :  { %v192_v56 = vadd.f32 1e-05, %v176_v53 }
 0x121   :  { %v133_v57 = vpop.xlane.xlu1 %132  ;;  %v136_v58 = vpop.xlane.xlu0 %135 }
 0x122   :  { %308 = vrsqrt.f32 %v192_v56  ;;  %v177_v59 = vmul.f32 0.03125, %v133_v57  ;;  %v178_v60 = vmul.f32 0.03125, %v136_v58 }
 0x124   :  { %v193_v61 = vadd.f32 1e-05, %v177_v59  ;;  %v194_v62 = vadd.f32 1e-05, %v178_v60 }
 0x125   :  { %v139_v63 = vpop.xlane.xlu1 %138  ;;  %v142_v2 = vpop.xlane.xlu0 %141 }
 0x126   :  { %310 = vrsqrt.f32 %v193_v61  ;;  %v179_v3 = vmul.f32 0.03125, %v139_v63  ;;  %v180_v4 = vmul.f32 0.03125, %v142_v2 }
 0x127   :  { %312 = vrsqrt.f32 %v194_v62 }
 0x128   :  { %v195_v5 = vadd.f32 1e-05, %v179_v3  ;;  %v196_v6 = vadd.f32 1e-05, %v180_v4 }
 0x129   :  { %v145_v7 = vpop.xlane.xlu1 %144  ;;  %v148_v8 = vpop.xlane.xlu0 %147 }
 0x12a   :  { %314 = vrsqrt.f32 %v195_v5  ;;  %v181_v9 = vmul.f32 0.03125, %v145_v7  ;;  %v182_v12 = vmul.f32 0.03125, %v148_v8 }
 0x12b   :  { %316 = vrsqrt.f32 %v196_v6 }
 0x12c   :  { %v197_v13 = vadd.f32 1e-05, %v181_v9  ;;  %v198_v14 = vadd.f32 1e-05, %v182_v12 }
 0x12d   :  { %v151_v15 = vpop.xlane.xlu1 %150  ;;  %v154_v18 = vpop.xlane.xlu0 %153 }
 0x12e   :  { %318 = vrsqrt.f32 %v197_v13  ;;  %v183_v19 = vmul.f32 0.03125, %v151_v15  ;;  %v184_v22 = vmul.f32 0.03125, %v154_v18 }
 0x12f   :  { %v309_v16 = vpop.eup %308  ;;  %320 = vrsqrt.f32 %v198_v14 }
 0x130   :  { %v224_v27 = vmul.f32 %v309_v16, %v454_v36  ;;  %v199_v30 = vadd.f32 1e-05, %v183_v19  ;;  %v200_v31 = vadd.f32 1e-05, %v184_v22 }
 0x131   :  { %v157_v33 = vpop.xlane.xlu1 %156  ;;  %v160_v34 = vpop.xlane.xlu0 %159 }
 0x132   :  { %v247_v20 = vmul.f32 %v547_v26, %v224_v27  ;;  %322 = vrsqrt.f32 %v199_v30  ;;  %v185_v38 = vmul.f32 0.03125, %v157_v33  ;;  %v186_v39 = vmul.f32 0.03125, %v160_v34 }
 0x133   :  { %v311_v40 = vpop.eup %310  ;;  %324 = vrsqrt.f32 %v200_v31 }
 0x134   :  { %v313_v41 = vpop.eup %312  ;;  %v270_v42 = vadd.f32 %v553_v32, %v247_v20  ;;  %v225_v36 = vmul.f32 %v311_v40, %v462_v44  ;;  %v201_v43 = vadd.f32 1e-05, %v185_v38  ;;  %v202_v46 = vadd.f32 1e-05, %v186_v39 }
 0x135   :  { %v226_v24 = vmul.f32 %v313_v41, %v456_v37  ;;  %v163_v48 = vpop.xlane.xlu1 %162  ;;  %v166_v49 = vpop.xlane.xlu0 %165 }
 0x136   :  { %286 = vst.msk [vmem:[%s669_s3] sm:$0xff] %vm30_vm0, %v270_v42  ;;  %v248_v50 = vmul.f32 %v547_v26, %v225_v36  ;;  %326 = vrsqrt.f32 %v201_v43  ;;  %v187_v51 = vmul.f32 0.03125, %v163_v48  ;;  %v188_v52 = vmul.f32 0.03125, %v166_v49 }
 0x137   :  { %v315_v28 = vpop.eup %314  ;;  %v249_v29 = vmul.f32 %v547_v26, %v226_v24  ;;  %328 = vrsqrt.f32 %v202_v46 }
 0x138   :  { %v317_v44 = vpop.eup %316  ;;  %v271_v53 = vadd.f32 %v553_v32, %v248_v50  ;;  %v227_v37 = vmul.f32 %v315_v28, %v464_v45  ;;  %v203_v56 = vadd.f32 1e-05, %v187_v51  ;;  %v204_v57 = vadd.f32 1e-05, %v188_v52 }
 0x139   :  { %v272_v58 = vadd.f32 %v553_v32, %v249_v29  ;;  %v228_v59 = vmul.f32 %v317_v44, %v472_v54  ;;  %v169_v60 = vpop.xlane.xlu1 %168  ;;  %v172_v61 = vpop.xlane.xlu0 %171 }
 0x13a   :  { %287 = vst.msk [vmem:[%s669_s3 + $0x8] sm:$0xff] %vm30_vm0, %v271_v53  ;;  %v250_v62 = vmul.f32 %v547_v26, %v227_v37  ;;  %330 = vrsqrt.f32 %v203_v56  ;;  %v189_v63 = vmul.f32 0.03125, %v169_v60  ;;  %v190_v2 = vmul.f32 0.03125, %v172_v61 }
 0x13b   :  { %v319_v3 = vpop.eup %318  ;;  %288 = vst.msk [vmem:[%s669_s3 + $0x10] sm:$0xff] %vm30_vm0, %v272_v58  ;;  %v251_v45 = vmul.f32 %v547_v26, %v228_v59  ;;  %332 = vrsqrt.f32 %v204_v57 }
 0x13c   :  { %v321_v54 = vpop.eup %320  ;;  %v273_v4 = vadd.f32 %v553_v32, %v250_v62  ;;  %v229_v5 = vmul.f32 %v319_v3, %v474_v55  ;;  %v205_v6 = vadd.f32 1e-05, %v189_v63  ;;  %v206_v7 = vadd.f32 1e-05, %v190_v2 }
 0x13d   :  { %v274_v8 = vadd.f32 %v553_v32, %v251_v45  ;;  %v230_v9 = vmul.f32 %v321_v54, %v483_v0  ;;  %v175_v12 = vpop.xlane.xlu1 %174 }
 0x13e   :  { %289 = vst.msk [vmem:[%s669_s3 + $0x18] sm:$0xff] %vm30_vm0, %v273_v4  ;;  %v252_v13 = vmul.f32 %v547_v26, %v229_v5  ;;  %334 = vrsqrt.f32 %v205_v6  ;;  %v191_v14 = vmul.f32 0.03125, %v175_v12 }
 0x13f   :  { %v323_v15 = vpop.eup %322  ;;  %290 = vst.msk [vmem:[%s669_s3 + $0x20] sm:$0xff] %vm30_vm0, %v274_v8  ;;  %v253_v55 = vmul.f32 %v547_v26, %v230_v9  ;;  %336 = vrsqrt.f32 %v206_v7 }
 0x140   :  { %v325_v0 = vpop.eup %324  ;;  %v275_v18 = vadd.f32 %v553_v32, %v252_v13  ;;  %v231_v19 = vmul.f32 %v323_v15, %v486_v1  ;;  %v207_v22 = vadd.f32 1e-05, %v191_v14 }
 0x141   :  { %v276_v16 = vadd.f32 %v553_v32, %v253_v55  ;;  %v232_v27 = vmul.f32 %v325_v0, %v495_v10 }
 0x142   :  { %291 = vst.msk [vmem:[%s669_s3 + $0x28] sm:$0xff] %vm30_vm0, %v275_v18  ;;  %v254_v30 = vmul.f32 %v547_v26, %v231_v19  ;;  %338 = vrsqrt.f32 %v207_v22 }
 0x143   :  { %v327_v31 = vpop.eup %326  ;;  %292 = vst.msk [vmem:[%s669_s3 + $0x30] sm:$0xff] %vm30_vm0, %v276_v16  ;;  %v255_v1 = vmul.f32 %v547_v26, %v232_v27 }
 0x144   :  { %v329_v33 = vpop.eup %328  ;;  %v277_v34 = vadd.f32 %v553_v32, %v254_v30  ;;  %v233_v10 = vmul.f32 %v327_v31, %v498_v11 }
 0x145   :  { %v278_v20 = vadd.f32 %v553_v32, %v255_v1  ;;  %v234_v38 = vmul.f32 %v329_v33, %v507_v23 }
 0x146   :  { %293 = vst.msk [vmem:[%s669_s3 + $0x38] sm:$0xff] %vm30_vm0, %v277_v34  ;;  %v256_v39 = vmul.f32 %v547_v26, %v233_v10 }
 0x147   :  { %v331_v40 = vpop.eup %330  ;;  %294 = vst.msk [vmem:[%s669_s3 + $0x40] sm:$0xff] %vm30_vm0, %v278_v20  ;;  %v257_v41 = vmul.f32 %v547_v26, %v234_v38 }
 0x148   :  { %v333_v11 = vpop.eup %332  ;;  %v279_v42 = vadd.f32 %v553_v32, %v256_v39  ;;  %v235_v23 = vmul.f32 %v331_v40, %v510_v17 }
 0x149   :  { %v280_v36 = vadd.f32 %v553_v32, %v257_v41  ;;  %v236_v43 = vmul.f32 %v333_v11, %v519_v35 }
 0x14a   :  { %295 = vst.msk [vmem:[%s669_s3 + $0x48] sm:$0xff] %vm30_vm0, %v279_v42  ;;  %v258_v46 = vmul.f32 %v547_v26, %v235_v23 }
 0x14b   :  { %v335_v24 = vpop.eup %334  ;;  %296 = vst.msk [vmem:[%s669_s3 + $0x50] sm:$0xff] %vm30_vm0, %v280_v36  ;;  %v259_v48 = vmul.f32 %v547_v26, %v236_v43 }
 0x14c   :  { %v337_v17 = vpop.eup %336  ;;  %v281_v49 = vadd.f32 %v553_v32, %v258_v46  ;;  %v237_v35 = vmul.f32 %v335_v24, %v522_v21 }
 0x14d   :  { %v282_v50 = vadd.f32 %v553_v32, %v259_v48  ;;  %v238_v51 = vmul.f32 %v337_v17, %v531_v47 }
 0x14e   :  { %297 = vst.msk [vmem:[%s669_s3 + $0x58] sm:$0xff] %vm30_vm0, %v281_v49  ;;  %v260_v52 = vmul.f32 %v547_v26, %v237_v35 }
 0x14f   :  { %v339_v28 = vpop.eup %338  ;;  %298 = vst.msk [vmem:[%s669_s3 + $0x60] sm:$0xff] %vm30_vm0, %v282_v50  ;;  %v261_v29 = vmul.f32 %v547_v26, %v238_v51 }
 0x150   :  { %v283_v21 = vadd.f32 %v553_v32, %v260_v52  ;;  %v239_v44 = vmul.f32 %v339_v28, %v534_v25 }
 0x151   :  { %v284_v47 = vadd.f32 %v553_v32, %v261_v29 }
 0x152   :  { %299 = vst.msk [vmem:[%s669_s3 + $0x68] sm:$0xff] %vm30_vm0, %v283_v21  ;;  %v262_v53 = vmul.f32 %v547_v26, %v239_v44 }
 0x153   :  { %300 = vst.msk [vmem:[%s669_s3 + $0x70] sm:$0xff] %vm30_vm0, %v284_v47 }
 0x154   :  { %v285_v37 = vadd.f32 %v553_v32, %v262_v53 }
 0x156   :  { %301 = vst.msk [vmem:[%s669_s3 + $0x78] sm:$0xff] %vm30_vm0, %v285_v37 }

// kernel: _lambda_.35
= control target key start
LH: loop header
LB: loop body
LE: loop exit
PB: predicated region body
PF: predicated region fallthrough
CT: control target
= control target key end

     0   :  { %vm19_vm0 = vcmask 261120   ;;  %v420_v1 = vmov 0.0   ;;  %vm132_vm1 = vcmask 392192   ;;  %s599_s1 = inlined_call_operand.vmem [shape: bf16[48,32], index: 1, kind: input, shape index: {}]   ;;  %s600_s0 = inlined_call_operand.vmem [shape: bf16[128,48], index: 0, kind: input, shape index: {}]   ;;  %s601_s2 = inlined_call_operand.vmem [shape: f32[1,32], index: 2, kind: input, shape index: {}]   ;;  %s602_s3 = inlined_call_operand.vmem [shape: f32[128,32], index: 3, kind: output, shape index: {}]  }
   0x1   :  { %v409_v0 = vld [vmem:[%s599_s1 + $0x10] sm:$0xff]   ;;  %22 = vst.msk [vmem:[#allocation2 + $0x10] sm:$0xff] %vm19_vm0, %v420_v1  ;;  %20 = vst.msk [vmem:[#allocation2] sm:$0xff] %vm19_vm0, %v420_v1  ;;  %v410_v2 = vld [vmem:[%s599_s1 + $0x8] sm:$0xff]  }
   0x2   :  { %21 = vst.msk [vmem:[#allocation2 + $0x8] sm:$0xff] %vm19_vm0, %v420_v1  ;;  %23 = vst.msk [vmem:[#allocation2 + $0x18] sm:$0xff] %vm19_vm0, %v420_v1  ;;  %380 = vmatprep.subr.bf16.mxu0 %v409_v0  ;;  %402 = vmatprep.subr.bf16.mxu1 %v409_v0  ;;  %v411_v3 = vld [vmem:[%s599_s1] sm:$0xff]   ;;  %v414_v6 = vld [vmem:[%s600_s0 + $0x8] sm:$0xff]  }
   0x3   :  { %24 = vst.msk [vmem:[#allocation2 + $0x20] sm:$0xff] %vm19_vm0, %v420_v1  ;;  %25 = vst.msk [vmem:[#allocation2 + $0x28] sm:$0xff] %vm19_vm0, %v420_v1  ;;  %381 = vmatpush3.bf16.msra.mxu0 %v409_v0  ;;  %405 = vmatpush3.bf16.msra.mxu1 %v409_v0  ;;  %v412_v4 = vld [vmem:[%s600_s0] sm:$0xff]   ;;  %v415_v7 = vld [vmem:[%s600_s0 + $0x28] sm:$0xff]  }
   0x4   :  { %26 = vst.msk [vmem:[#allocation2 + $0x30] sm:$0xff] %vm19_vm0, %v420_v1  ;;  %27 = vst.msk [vmem:[#allocation2 + $0x38] sm:$0xff] %vm19_vm0, %v420_v1  ;;  %382 = vmatprep.subr.bf16.mxu0 %v410_v2  ;;  %403 = vmatprep.subr.bf16.mxu1 %v410_v2  ;;  %v413_v5 = vld [vmem:[%s600_s0 + $0x20] sm:$0xff]   ;;  %v416_v8 = vld [vmem:[%s600_s0 + $0x10] sm:$0xff]  }
   0x5   :  { %28 = vst.msk [vmem:[#allocation2 + $0x40] sm:$0xff] %vm19_vm0, %v420_v1  ;;  %29 = vst.msk [vmem:[#allocation2 + $0x48] sm:$0xff] %vm19_vm0, %v420_v1  ;;  %386 = vmatprep.mubr.msk.bf16.mxu0 %vm132_vm1, %v412_v4  ;;  %394 = vmatprep.mubr.msk.bf16.mxu1 %vm132_vm1, %v413_v5  ;;  %v417_v9 = vld [vmem:[%s600_s0 + $0x30] sm:$0xff]   ;;  %v418_v10 = vld [vmem:[%s600_s0 + $0x18] sm:$0xff]  }
   0x6   :  { %30 = vst.msk [vmem:[#allocation2 + $0x50] sm:$0xff] %vm19_vm0, %v420_v1  ;;  %31 = vst.msk [vmem:[#allocation2 + $0x58] sm:$0xff] %vm19_vm0, %v420_v1  ;;  %v419_v11 = vld [vmem:[%s600_s0 + $0x38] sm:$0xff]   ;;  %v507_v38 = vld [vmem:[%s601_s2] ss:$0 sm:$0xff] }
   0x7   :  { %32 = vst.msk [vmem:[#allocation2 + $0x60] sm:$0xff] %vm19_vm0, %v420_v1  ;;  %33 = vst.msk [vmem:[#allocation2 + $0x68] sm:$0xff] %vm19_vm0, %v420_v1  ;;  %383 = vmatpush3.bf16.msra.mxu0 %v410_v2  ;;  %406 = vmatpush3.bf16.msra.mxu1 %v410_v2 }
   0x8   :  { %34 = vst.msk [vmem:[#allocation2 + $0x70] sm:$0xff] %vm19_vm0, %v420_v1  ;;  %35 = vst.msk [vmem:[#allocation2 + $0x78] sm:$0xff] %vm19_vm0, %v420_v1  ;;  %384 = vmatprep.subr.bf16.mxu0 %v411_v3  ;;  %404 = vmatprep.subr.bf16.mxu1 %v411_v3  ;;  %v38_v12 = vld [vmem:[#allocation2 + $0x10] sm:$0xff]  ;;  %v36_v16 = vld [vmem:[#allocation2] sm:$0xff] }
   0x9   :  { %v39_v22 = vld [vmem:[#allocation2 + $0x18] sm:$0xff]  ;;  %v37_v28 = vld [vmem:[#allocation2 + $0x8] sm:$0xff] }
   0xa   :  { %v40_v41 = vld [vmem:[#allocation2 + $0x20] sm:$0xff]  ;;  %v41_v55 = vld [vmem:[#allocation2 + $0x28] sm:$0xff] }
   0xb   :  { %385 = vmatpush3.bf16.msra.mxu0 %v411_v3  ;;  %407 = vmatpush3.bf16.msra.mxu1 %v411_v3  ;;  %v42_v34 = vld [vmem:[#allocation2 + $0x30] sm:$0xff]  ;;  %v43_v45 = vld [vmem:[#allocation2 + $0x38] sm:$0xff] }
   0xc   :  { %v44_v17 = vld [vmem:[#allocation2 + $0x40] sm:$0xff]  ;;  %v45_v29 = vld [vmem:[#allocation2 + $0x48] sm:$0xff] }
   0xd   :  { %v46_v13 = vld [vmem:[#allocation2 + $0x50] sm:$0xff]  ;;  %v47_v23 = vld [vmem:[#allocation2 + $0x58] sm:$0xff] }
   0xe   :  { %387 = vmatmul.mubr.msk.bf16.vlgmr.msra.gmra.mxu0 %vm132_vm1, %v414_v6  ;;  %395 = vmatmul.mubr.msk.bf16.vlgmr.msra.gmra.mxu1 %vm132_vm1, %v415_v7  ;;  %v48_v42 = vld [vmem:[#allocation2 + $0x60] sm:$0xff]  ;;  %v49_v60 = vld [vmem:[#allocation2 + $0x68] sm:$0xff] }
   0xf   :  { %390 = vmatprep.mubr.msk.bf16.mxu0 %vm132_vm1, %v416_v8  ;;  %398 = vmatprep.mubr.msk.bf16.mxu1 %vm132_vm1, %v417_v9  ;;  %v50_v35 = vld [vmem:[#allocation2 + $0x70] sm:$0xff]  ;;  %v51_v50 = vld [vmem:[#allocation2 + $0x78] sm:$0xff] }
  0x16   :  { %391 = vmatmul.mubr.msk.bf16.gmra.mxu0 %vm132_vm1, %v418_v10  ;;  %399 = vmatmul.mubr.msk.bf16.gmra.mxu1 %vm132_vm1, %v419_v11 }
  0xce   :  { %v388_v14 = vpop.f32.mrf.mxu0  ;;  %v396_v15 = vpop.f32.mrf.mxu1 }
  0xcf   :  { %v256_v18 = vadd.f32 %v388_v14, %v38_v12  ;;  %v264_v19 = vadd.f32 %v396_v15, %v46_v13 }
  0xd0   :  { %v191_v20 = vpop.f32.mrf.mxu0  ;;  %v223_v21 = vpop.f32.mrf.mxu1 }
  0xd1   :  { %273 = vst.msk [vmem:[#allocation2 + $0x10] sm:$0xff] %vm19_vm0, %v256_v18  ;;  %281 = vst.msk [vmem:[#allocation2 + $0x50] sm:$0xff] %vm19_vm0, %v264_v19  ;;  %v254_v24 = vadd.f32 %v191_v20, %v36_v16  ;;  %v262_v25 = vadd.f32 %v223_v21, %v44_v17 }
  0xd2   :  { %v389_v26 = vpop.f32.mrf.mxu0  ;;  %v397_v27 = vpop.f32.mrf.mxu1 }
  0xd3   :  { %271 = vst.msk [vmem:[#allocation2] sm:$0xff] %vm19_vm0, %v254_v24  ;;  %279 = vst.msk [vmem:[#allocation2 + $0x40] sm:$0xff] %vm19_vm0, %v262_v25  ;;  %v257_v30 = vadd.f32 %v389_v26, %v39_v22  ;;  %v265_v31 = vadd.f32 %v397_v27, %v47_v23 }
  0xd4   :  { %v194_v32 = vpop.f32.mrf.mxu0  ;;  %v226_v33 = vpop.f32.mrf.mxu1 }
  0xd5   :  { %274 = vst.msk [vmem:[#allocation2 + $0x18] sm:$0xff] %vm19_vm0, %v257_v30  ;;  %282 = vst.msk [vmem:[#allocation2 + $0x58] sm:$0xff] %vm19_vm0, %v265_v31  ;;  %v255_v36 = vadd.f32 %v194_v32, %v37_v28  ;;  %v263_v37 = vadd.f32 %v226_v33, %v45_v29 }
  0xd6   :  { %v392_v39 = vpop.f32.mrf.mxu0  ;;  %v400_v40 = vpop.f32.mrf.mxu1 }
  0xd7   :  { %272 = vst.msk [vmem:[#allocation2 + $0x8] sm:$0xff] %vm19_vm0, %v255_v36  ;;  %280 = vst.msk [vmem:[#allocation2 + $0x48] sm:$0xff] %vm19_vm0, %v263_v37  ;;  %v260_v43 = vadd.f32 %v392_v39, %v42_v34  ;;  %v268_v44 = vadd.f32 %v400_v40, %v50_v35 }
  0xd8   :  { %v292_v46 = vld [vmem:[#allocation2 + $0x10] sm:$0xff]  ;;  %v207_v48 = vpop.f32.mrf.mxu0  ;;  %v239_v49 = vpop.f32.mrf.mxu1 }
  0xd9   :  { %v300_v47 = vld [vmem:[#allocation2 + $0x50] sm:$0xff]  ;;  %v315_v51 = vadd.f32 %v507_v38, %v292_v46  ;;  %277 = vst.msk [vmem:[#allocation2 + $0x30] sm:$0xff] %vm19_vm0, %v260_v43  ;;  %285 = vst.msk [vmem:[#allocation2 + $0x70] sm:$0xff] %vm19_vm0, %v268_v44  ;;  %v258_v53 = vadd.f32 %v207_v48, %v40_v41  ;;  %v266_v54 = vadd.f32 %v239_v49, %v48_v42 }
  0xda   :  { %v323_v52 = vadd.f32 %v507_v38, %v300_v47  ;;  %v290_v56 = vld [vmem:[#allocation2] sm:$0xff]  ;;  %v393_v58 = vpop.f32.mrf.mxu0  ;;  %v401_v59 = vpop.f32.mrf.mxu1 }
  0xdb   :  { %v298_v57 = vld [vmem:[#allocation2 + $0x40] sm:$0xff]  ;;  %331 = vst.msk [vmem:[%s602_s3 + $0x10] sm:$0xff] %vm19_vm0, %v315_v51  ;;  %v313_v61 = vadd.f32 %v507_v38, %v290_v56  ;;  %275 = vst.msk [vmem:[#allocation2 + $0x20] sm:$0xff] %vm19_vm0, %v258_v53  ;;  %v261_v63 = vadd.f32 %v393_v58, %v43_v45  ;;  %v269_v0 = vadd.f32 %v401_v59, %v51_v50 }
  0xdc   :  { %339 = vst.msk [vmem:[%s602_s3 + $0x50] sm:$0xff] %vm19_vm0, %v323_v52  ;;  %v321_v62 = vadd.f32 %v507_v38, %v298_v57  ;;  %283 = vst.msk [vmem:[#allocation2 + $0x60] sm:$0xff] %vm19_vm0, %v266_v54  ;;  %v293_v1 = vld [vmem:[#allocation2 + $0x18] sm:$0xff]  ;;  %v210_v3 = vpop.f32.mrf.mxu0  ;;  %v242_v4 = vpop.f32.mrf.mxu1 }
  0xdd   :  { %v301_v2 = vld [vmem:[#allocation2 + $0x58] sm:$0xff]  ;;  %329 = vst.msk [vmem:[%s602_s3] sm:$0xff] %vm19_vm0, %v313_v61  ;;  %v316_v5 = vadd.f32 %v507_v38, %v293_v1  ;;  %278 = vst.msk [vmem:[#allocation2 + $0x38] sm:$0xff] %vm19_vm0, %v261_v63  ;;  %v259_v7 = vadd.f32 %v210_v3, %v41_v55  ;;  %v267_v8 = vadd.f32 %v242_v4, %v49_v60 }
  0xde   :  { %337 = vst.msk [vmem:[%s602_s3 + $0x40] sm:$0xff] %vm19_vm0, %v321_v62  ;;  %v324_v6 = vadd.f32 %v507_v38, %v301_v2  ;;  %286 = vst.msk [vmem:[#allocation2 + $0x78] sm:$0xff] %vm19_vm0, %v269_v0  ;;  %v291_v9 = vld [vmem:[#allocation2 + $0x8] sm:$0xff] }
  0xdf   :  { %v299_v10 = vld [vmem:[#allocation2 + $0x48] sm:$0xff]  ;;  %332 = vst.msk [vmem:[%s602_s3 + $0x18] sm:$0xff] %vm19_vm0, %v316_v5  ;;  %v314_v11 = vadd.f32 %v507_v38, %v291_v9  ;;  %276 = vst.msk [vmem:[#allocation2 + $0x28] sm:$0xff] %vm19_vm0, %v259_v7 }
  0xe0   :  { %340 = vst.msk [vmem:[%s602_s3 + $0x58] sm:$0xff] %vm19_vm0, %v324_v6  ;;  %v322_v12 = vadd.f32 %v507_v38, %v299_v10  ;;  %284 = vst.msk [vmem:[#allocation2 + $0x68] sm:$0xff] %vm19_vm0, %v267_v8  ;;  %v296_v13 = vld [vmem:[#allocation2 + $0x30] sm:$0xff] }
  0xe1   :  { %v304_v14 = vld [vmem:[#allocation2 + $0x70] sm:$0xff]  ;;  %330 = vst.msk [vmem:[%s602_s3 + $0x8] sm:$0xff] %vm19_vm0, %v314_v11  ;;  %v319_v15 = vadd.f32 %v507_v38, %v296_v13 }
  0xe2   :  { %338 = vst.msk [vmem:[%s602_s3 + $0x48] sm:$0xff] %vm19_vm0, %v322_v12  ;;  %v327_v16 = vadd.f32 %v507_v38, %v304_v14  ;;  %v294_v17 = vld [vmem:[#allocation2 + $0x20] sm:$0xff] }
  0xe3   :  { %v302_v18 = vld [vmem:[#allocation2 + $0x60] sm:$0xff]  ;;  %335 = vst.msk [vmem:[%s602_s3 + $0x30] sm:$0xff] %vm19_vm0, %v319_v15  ;;  %v317_v19 = vadd.f32 %v507_v38, %v294_v17 }
  0xe4   :  { %343 = vst.msk [vmem:[%s602_s3 + $0x70] sm:$0xff] %vm19_vm0, %v327_v16  ;;  %v325_v20 = vadd.f32 %v507_v38, %v302_v18  ;;  %v297_v21 = vld [vmem:[#allocation2 + $0x38] sm:$0xff] }
  0xe5   :  { %v305_v22 = vld [vmem:[#allocation2 + $0x78] sm:$0xff]  ;;  %333 = vst.msk [vmem:[%s602_s3 + $0x20] sm:$0xff] %vm19_vm0, %v317_v19  ;;  %v320_v23 = vadd.f32 %v507_v38, %v297_v21 }
  0xe6   :  { %341 = vst.msk [vmem:[%s602_s3 + $0x60] sm:$0xff] %vm19_vm0, %v325_v20  ;;  %v328_v24 = vadd.f32 %v507_v38, %v305_v22  ;;  %v295_v25 = vld [vmem:[#allocation2 + $0x28] sm:$0xff] }
  0xe7   :  { %v303_v26 = vld [vmem:[#allocation2 + $0x68] sm:$0xff]  ;;  %336 = vst.msk [vmem:[%s602_s3 + $0x38] sm:$0xff] %vm19_vm0, %v320_v23  ;;  %v318_v27 = vadd.f32 %v507_v38, %v295_v25 }
  0xe8   :  { %344 = vst.msk [vmem:[%s602_s3 + $0x78] sm:$0xff] %vm19_vm0, %v328_v24  ;;  %v326_v28 = vadd.f32 %v507_v38, %v303_v26 }
  0xe9   :  { %334 = vst.msk [vmem:[%s602_s3 + $0x28] sm:$0xff] %vm19_vm0, %v318_v27 }
  0xea   :  { %342 = vst.msk [vmem:[%s602_s3 + $0x68] sm:$0xff] %vm19_vm0, %v326_v28 }

// kernel: _lambda_.38
= control target key start
LH: loop header
LB: loop body
LE: loop exit
PB: predicated region body
PF: predicated region fallthrough
CT: control target
= control target key end

     0   :  { %vm19_vm0 = vcmask 785408   ;;  %v502_v1 = vmov 0.0   ;;  %vm124_vm1 = vcmask 261120   ;;  %vm385_vm2 = vcmask 781312   ;;  %s678_s1 = inlined_call_operand.vmem [shape: bf16[32,96], index: 1, kind: input, shape index: {}]   ;;  %s679_s0 = inlined_call_operand.vmem [shape: bf16[128,32], index: 0, kind: input, shape index: {}]   ;;  %s680_s2 = inlined_call_operand.vmem [shape: f32[1,96], index: 2, kind: input, shape index: {}]   ;;  %s681_s3 = inlined_call_operand.vmem [shape: bf16[128,96], index: 3, kind: output, shape index: {}]  }
   0x1   :  { %v492_v0 = vld [vmem:[%s678_s1 + $0x8] sm:$0xff]   ;;  %22 = vst.msk [vmem:[#allocation2 + $0x10] sm:$0xff] %vm19_vm0, %v502_v1  ;;  %20 = vst.msk [vmem:[#allocation2] sm:$0xff] %vm19_vm0, %v502_v1  ;;  %v493_v2 = vld [vmem:[%s678_s1] sm:$0xff]  }
   0x2   :  { %21 = vst.msk [vmem:[#allocation2 + $0x8] sm:$0xff] %vm19_vm0, %v502_v1  ;;  %23 = vst.msk [vmem:[#allocation2 + $0x18] sm:$0xff] %vm19_vm0, %v502_v1  ;;  %467 = vmatprep.subr.bf16.mxu0 %v492_v0  ;;  %487 = vmatprep.subr.bf16.mxu1 %v492_v0  ;;  %v494_v3 = vld [vmem:[%s679_s0] sm:$0xff]   ;;  %v496_v5 = vld [vmem:[%s679_s0 + $0x8] sm:$0xff]  }
   0x3   :  { %24 = vst.msk [vmem:[#allocation2 + $0x20] sm:$0xff] %vm19_vm0, %v502_v1  ;;  %25 = vst.msk [vmem:[#allocation2 + $0x28] sm:$0xff] %vm19_vm0, %v502_v1  ;;  %468 = vmatpush3.bf16.msra.mxu0 %v492_v0  ;;  %489 = vmatpush3.bf16.msra.mxu1 %v492_v0  ;;  %v495_v4 = vld [vmem:[%s679_s0 + $0x20] sm:$0xff]   ;;  %v497_v6 = vld [vmem:[%s679_s0 + $0x28] sm:$0xff]  }
   0x4   :  { %26 = vst.msk [vmem:[#allocation2 + $0x30] sm:$0xff] %vm19_vm0, %v502_v1  ;;  %27 = vst.msk [vmem:[#allocation2 + $0x38] sm:$0xff] %vm19_vm0, %v502_v1  ;;  %469 = vmatprep.subr.bf16.mxu0 %v493_v2  ;;  %488 = vmatprep.subr.bf16.mxu1 %v493_v2  ;;  %v498_v7 = vld [vmem:[%s679_s0 + $0x10] sm:$0xff]   ;;  %v500_v9 = vld [vmem:[%s679_s0 + $0x18] sm:$0xff]  }
   0x5   :  { %28 = vst.msk [vmem:[#allocation2 + $0x40] sm:$0xff] %vm19_vm0, %v502_v1  ;;  %29 = vst.msk [vmem:[#allocation2 + $0x48] sm:$0xff] %vm19_vm0, %v502_v1  ;;  %471 = vmatprep.mubr.msk.bf16.mxu0 %vm124_vm1, %v494_v3  ;;  %479 = vmatprep.mubr.msk.bf16.mxu1 %vm124_vm1, %v495_v4  ;;  %v499_v8 = vld [vmem:[%s679_s0 + $0x30] sm:$0xff]   ;;  %v501_v10 = vld [vmem:[%s679_s0 + $0x38] sm:$0xff]  }
   0x6   :  { %30 = vst.msk [vmem:[#allocation2 + $0x50] sm:$0xff] %vm19_vm0, %v502_v1  ;;  %31 = vst.msk [vmem:[#allocation2 + $0x58] sm:$0xff] %vm19_vm0, %v502_v1  ;;  %v586_v37 = vld [vmem:[%s680_s2] ss:$0 sm:$0xff] }
   0x7   :  { %32 = vst.msk [vmem:[#allocation2 + $0x60] sm:$0xff] %vm19_vm0, %v502_v1  ;;  %33 = vst.msk [vmem:[#allocation2 + $0x68] sm:$0xff] %vm19_vm0, %v502_v1  ;;  %470 = vmatpush3.bf16.msra.mxu0 %v493_v2  ;;  %490 = vmatpush3.bf16.msra.mxu1 %v493_v2 }
   0x8   :  { %34 = vst.msk [vmem:[#allocation2 + $0x70] sm:$0xff] %vm19_vm0, %v502_v1  ;;  %35 = vst.msk [vmem:[#allocation2 + $0x78] sm:$0xff] %vm19_vm0, %v502_v1  ;;  %v38_v11 = vld [vmem:[#allocation2 + $0x10] sm:$0xff]  ;;  %v36_v15 = vld [vmem:[#allocation2] sm:$0xff] }
   0x9   :  { %v39_v21 = vld [vmem:[#allocation2 + $0x18] sm:$0xff]  ;;  %v37_v27 = vld [vmem:[#allocation2 + $0x8] sm:$0xff] }
   0xa   :  { %472 = vmatmul.mubr.msk.bf16.vlgmr.msra.gmra.mxu0 %vm124_vm1, %v496_v5  ;;  %480 = vmatmul.mubr.msk.bf16.vlgmr.msra.gmra.mxu1 %vm124_vm1, %v497_v6  ;;  %v40_v40 = vld [vmem:[#allocation2 + $0x20] sm:$0xff]  ;;  %v41_v62 = vld [vmem:[#allocation2 + $0x28] sm:$0xff] }
   0xb   :  { %475 = vmatprep.mubr.msk.bf16.mxu0 %vm124_vm1, %v498_v7  ;;  %483 = vmatprep.mubr.msk.bf16.mxu1 %vm124_vm1, %v499_v8  ;;  %v42_v33 = vld [vmem:[#allocation2 + $0x30] sm:$0xff]  ;;  %v43_v52 = vld [vmem:[#allocation2 + $0x38] sm:$0xff] }
   0xc   :  { %v44_v16 = vld [vmem:[#allocation2 + $0x40] sm:$0xff]  ;;  %v45_v28 = vld [vmem:[#allocation2 + $0x48] sm:$0xff] }
   0xd   :  { %v46_v12 = vld [vmem:[#allocation2 + $0x50] sm:$0xff]  ;;  %v47_v22 = vld [vmem:[#allocation2 + $0x58] sm:$0xff] }
   0xe   :  { %v48_v41 = vld [vmem:[#allocation2 + $0x60] sm:$0xff]  ;;  %v49_v63 = vld [vmem:[#allocation2 + $0x68] sm:$0xff] }
   0xf   :  { %v50_v34 = vld [vmem:[#allocation2 + $0x70] sm:$0xff]  ;;  %v51_v53 = vld [vmem:[#allocation2 + $0x78] sm:$0xff] }
  0x12   :  { %476 = vmatmul.mubr.msk.bf16.gmra.mxu0 %vm124_vm1, %v500_v9  ;;  %484 = vmatmul.mubr.msk.bf16.gmra.mxu1 %vm124_vm1, %v501_v10 }
  0xca   :  { %v473_v13 = vpop.f32.mrf.mxu0  ;;  %v481_v14 = vpop.f32.mrf.mxu1 }
  0xcb   :  { %v248_v17 = vadd.f32 %v473_v13, %v38_v11  ;;  %v256_v18 = vadd.f32 %v481_v14, %v46_v12 }
  0xcc   :  { %v183_v19 = vpop.f32.mrf.mxu0  ;;  %v215_v20 = vpop.f32.mrf.mxu1 }
  0xcd   :  { %265 = vst.msk [vmem:[#allocation2 + $0x10] sm:$0xff] %vm19_vm0, %v248_v17  ;;  %273 = vst.msk [vmem:[#allocation2 + $0x50] sm:$0xff] %vm19_vm0, %v256_v18  ;;  %v246_v23 = vadd.f32 %v183_v19, %v36_v15  ;;  %v254_v24 = vadd.f32 %v215_v20, %v44_v16 }
  0xce   :  { %v474_v25 = vpop.f32.mrf.mxu0  ;;  %v482_v26 = vpop.f32.mrf.mxu1 }
  0xcf   :  { %263 = vst.msk [vmem:[#allocation2] sm:$0xff] %vm19_vm0, %v246_v23  ;;  %271 = vst.msk [vmem:[#allocation2 + $0x40] sm:$0xff] %vm19_vm0, %v254_v24  ;;  %v249_v29 = vadd.f32 %v474_v25, %v39_v21  ;;  %v257_v30 = vadd.f32 %v482_v26, %v47_v22 }
  0xd0   :  { %v186_v31 = vpop.f32.mrf.mxu0  ;;  %v218_v32 = vpop.f32.mrf.mxu1 }
  0xd1   :  { %266 = vst.msk [vmem:[#allocation2 + $0x18] sm:$0xff] %vm19_vm0, %v249_v29  ;;  %274 = vst.msk [vmem:[#allocation2 + $0x58] sm:$0xff] %vm19_vm0, %v257_v30  ;;  %v247_v35 = vadd.f32 %v186_v31, %v37_v27  ;;  %v255_v36 = vadd.f32 %v218_v32, %v45_v28 }
  0xd2   :  { %v477_v38 = vpop.f32.mrf.mxu0  ;;  %v485_v39 = vpop.f32.mrf.mxu1 }
  0xd3   :  { %264 = vst.msk [vmem:[#allocation2 + $0x8] sm:$0xff] %vm19_vm0, %v247_v35  ;;  %272 = vst.msk [vmem:[#allocation2 + $0x48] sm:$0xff] %vm19_vm0, %v255_v36  ;;  %v252_v42 = vadd.f32 %v477_v38, %v42_v33  ;;  %v260_v43 = vadd.f32 %v485_v39, %v50_v34 }
  0xd4   :  { %v284_v44 = vld [vmem:[#allocation2 + $0x10] sm:$0xff]  ;;  %v199_v46 = vpop.f32.mrf.mxu0  ;;  %v231_v47 = vpop.f32.mrf.mxu1 }
  0xd5   :  { %v292_v45 = vld [vmem:[#allocation2 + $0x50] sm:$0xff]  ;;  %v307_v48 = vadd.f32 %v586_v37, %v284_v44  ;;  %269 = vst.msk [vmem:[#allocation2 + $0x30] sm:$0xff] %vm19_vm0, %v252_v42  ;;  %277 = vst.msk [vmem:[#allocation2 + $0x70] sm:$0xff] %vm19_vm0, %v260_v43  ;;  %v250_v50 = vadd.f32 %v199_v46, %v40_v40  ;;  %v258_v51 = vadd.f32 %v231_v47, %v48_v41 }
  0xd6   :  { %v315_v49 = vadd.f32 %v586_v37, %v292_v45  ;;  %v282_v54 = vld [vmem:[#allocation2] sm:$0xff]  ;;  %v478_v56 = vpop.f32.mrf.mxu0  ;;  %v486_v57 = vpop.f32.mrf.mxu1 }
  0xd7   :  { %v290_v55 = vld [vmem:[#allocation2 + $0x40] sm:$0xff]  ;;  %v443_v58 = vpack.c.bf16 %v307_v48, %v307_v48  ;;  %v305_v60 = vadd.f32 %v586_v37, %v282_v54  ;;  %267 = vst.msk [vmem:[#allocation2 + $0x20] sm:$0xff] %vm19_vm0, %v250_v50  ;;  %275 = vst.msk [vmem:[#allocation2 + $0x60] sm:$0xff] %vm19_vm0, %v258_v51  ;;  %v253_v2 = vadd.f32 %v478_v56, %v43_v52 }
  0xd8   :  { %v451_v59 = vpack.c.bf16 %v315_v49, %v315_v49  ;;  %v313_v61 = vadd.f32 %v586_v37, %v290_v55  ;;  %v285_v0 = vld [vmem:[#allocation2 + $0x18] sm:$0xff]  ;;  %v261_v3 = vadd.f32 %v486_v57, %v51_v53  ;;  %v202_v4 = vpop.f32.mrf.mxu0  ;;  %v234_v5 = vpop.f32.mrf.mxu1 }
  0xd9   :  { %v293_v1 = vld [vmem:[#allocation2 + $0x58] sm:$0xff]  ;;  %388 = vst.msk [vmem:[%s681_s3 + $0x8] sm:$0xf] %vm385_vm2, %v443_v58  ;;  %v441_v6 = vpack.c.bf16 %v305_v60, %v305_v60  ;;  %v308_v8 = vadd.f32 %v586_v37, %v285_v0  ;;  %v251_v12 = vadd.f32 %v202_v4, %v41_v62  ;;  %v259_v13 = vadd.f32 %v234_v5, %v49_v63 }
  0xda   :  { %396 = vst.msk [vmem:[%s681_s3 + $0x28] sm:$0xf] %vm385_vm2, %v451_v59  ;;  %v449_v7 = vpack.c.bf16 %v313_v61, %v313_v61  ;;  %v316_v9 = vadd.f32 %v586_v37, %v293_v1  ;;  %v283_v10 = vld [vmem:[#allocation2 + $0x8] sm:$0xff] }
  0xdb   :  { %v291_v11 = vld [vmem:[#allocation2 + $0x48] sm:$0xff]  ;;  %270 = vst.msk [vmem:[#allocation2 + $0x38] sm:$0xff] %vm19_vm0, %v253_v2  ;;  %278 = vst.msk [vmem:[#allocation2 + $0x78] sm:$0xff] %vm19_vm0, %v261_v3  ;;  %v444_v14 = vpack.c.bf16 %v308_v8, %v308_v8  ;;  %v306_v16 = vadd.f32 %v586_v37, %v283_v10 }
  0xdc   :  { %386 = vst.msk [vmem:[%s681_s3] sm:$0xf] %vm385_vm2, %v441_v6  ;;  %394 = vst.msk [vmem:[%s681_s3 + $0x20] sm:$0xf] %vm385_vm2, %v449_v7  ;;  %v452_v15 = vpack.c.bf16 %v316_v9, %v316_v9  ;;  %v314_v17 = vadd.f32 %v586_v37, %v291_v11  ;;  %v288_v18 = vld [vmem:[#allocation2 + $0x30] sm:$0xff] }
  0xdd   :  { %v296_v19 = vld [vmem:[#allocation2 + $0x70] sm:$0xff]  ;;  %268 = vst.msk [vmem:[#allocation2 + $0x28] sm:$0xff] %vm19_vm0, %v251_v12  ;;  %276 = vst.msk [vmem:[#allocation2 + $0x68] sm:$0xff] %vm19_vm0, %v259_v13  ;;  %v442_v20 = vpack.c.bf16 %v306_v16, %v306_v16  ;;  %v311_v22 = vadd.f32 %v586_v37, %v288_v18 }
  0xde   :  { %389 = vst.msk [vmem:[%s681_s3 + $0xc] sm:$0xf] %vm385_vm2, %v444_v14  ;;  %397 = vst.msk [vmem:[%s681_s3 + $0x2c] sm:$0xf] %vm385_vm2, %v452_v15  ;;  %v450_v21 = vpack.c.bf16 %v314_v17, %v314_v17  ;;  %v319_v23 = vadd.f32 %v586_v37, %v296_v19  ;;  %v286_v24 = vld [vmem:[#allocation2 + $0x20] sm:$0xff] }
  0xdf   :  { %v294_v25 = vld [vmem:[#allocation2 + $0x60] sm:$0xff]  ;;  %387 = vst.msk [vmem:[%s681_s3 + $0x4] sm:$0xf] %vm385_vm2, %v442_v20  ;;  %v447_v26 = vpack.c.bf16 %v311_v22, %v311_v22  ;;  %v309_v28 = vadd.f32 %v586_v37, %v286_v24 }
  0xe0   :  { %395 = vst.msk [vmem:[%s681_s3 + $0x24] sm:$0xf] %vm385_vm2, %v450_v21  ;;  %v455_v27 = vpack.c.bf16 %v319_v23, %v319_v23  ;;  %v317_v29 = vadd.f32 %v586_v37, %v294_v25 }
  0xe1   :  { %392 = vst.msk [vmem:[%s681_s3 + $0x18] sm:$0xf] %vm385_vm2, %v447_v26  ;;  %v445_v30 = vpack.c.bf16 %v309_v28, %v309_v28 }
  0xe2   :  { %400 = vst.msk [vmem:[%s681_s3 + $0x38] sm:$0xf] %vm385_vm2, %v455_v27  ;;  %v453_v31 = vpack.c.bf16 %v317_v29, %v317_v29  ;;  %v289_v32 = vld [vmem:[#allocation2 + $0x38] sm:$0xff] }
  0xe3   :  { %v297_v33 = vld [vmem:[#allocation2 + $0x78] sm:$0xff]  ;;  %v312_v34 = vadd.f32 %v586_v37, %v289_v32  ;;  %390 = vst.msk [vmem:[%s681_s3 + $0x10] sm:$0xf] %vm385_vm2, %v445_v30 }
  0xe4   :  { %v320_v35 = vadd.f32 %v586_v37, %v297_v33  ;;  %398 = vst.msk [vmem:[%s681_s3 + $0x30] sm:$0xf] %vm385_vm2, %v453_v31  ;;  %v287_v36 = vld [vmem:[#allocation2 + $0x28] sm:$0xff] }
  0xe5   :  { %v295_v38 = vld [vmem:[#allocation2 + $0x68] sm:$0xff]  ;;  %v448_v39 = vpack.c.bf16 %v312_v34, %v312_v34  ;;  %v310_v41 = vadd.f32 %v586_v37, %v287_v36 }
  0xe6   :  { %v456_v40 = vpack.c.bf16 %v320_v35, %v320_v35  ;;  %v318_v42 = vadd.f32 %v586_v37, %v295_v38 }
  0xe7   :  { %393 = vst.msk [vmem:[%s681_s3 + $0x1c] sm:$0xf] %vm385_vm2, %v448_v39  ;;  %v446_v43 = vpack.c.bf16 %v310_v41, %v310_v41 }
  0xe8   :  { %401 = vst.msk [vmem:[%s681_s3 + $0x3c] sm:$0xf] %vm385_vm2, %v456_v40  ;;  %v454_v44 = vpack.c.bf16 %v318_v42, %v318_v42 }
  0xe9   :  { %391 = vst.msk [vmem:[%s681_s3 + $0x14] sm:$0xf] %vm385_vm2, %v446_v43 }
  0xea   :  { %399 = vst.msk [vmem:[%s681_s3 + $0x34] sm:$0xf] %vm385_vm2, %v454_v44 }

// kernel: _lambda_.39
= control target key start
LH: loop header
LB: loop body
LE: loop exit
PB: predicated region body
PF: predicated region fallthrough
CT: control target
= control target key end

     0   :  { %s1361_s9 = smov 0   ;;  %s1363_s10 = smov 0   ;;  %s1545_s0 = inlined_call_operand.vmem [shape: bf16[3,2,8,16,16], index: 0, kind: input, shape index: {}]   ;;  %s1546_s1 = inlined_call_operand.vmem [shape: f32[2,16,16], index: 1, kind: input, shape index: {}]   ;;  %s1547_s2 = inlined_call_operand.vmem [shape: bf16[2,8,16,16], index: 2, kind: output, shape index: {}]  }
   0x1   :  { %s1365_s11 = smov 0   ;;  %s1367_s12 = smov 0  }
   0x2   :  { %s1369_s13 = smov 0   ;;  %s1371_s14 = smov 0  }
   0x3   :  { %s1373_s15 = smov 0  }
   0x4 LB: > { %s21_s16 = sadd.s32 1, %s1334_s13  ;;  %s24_s17 = sadd.s32 1, %s1338_s14  ;;  %s1342_s15 = sphi %s1373_s15, %s12_s15   ;;  %s1338_s14 = sphi %s1371_s14, %s1553_s14   ;;  %s1334_s13 = sphi %s1369_s13, %s1552_s13   ;;  %s1330_s12 = sphi %s1367_s12, %s1551_s12   ;;  %s1326_s11 = sphi %s1365_s11, %s1550_s11   ;;  %s1322_s10 = sphi %s1363_s10, %s1549_s10   ;;  %s1318_s9 = sphi %s1361_s9, %s1548_s9  }
   0x5   : > { %p22_p0 = scmp.ge.s32.totalorder %s21_s16, 2  ;;  %p40_p1 = scmp.ne.s32.totalorder %s1322_s10, %s1318_s9 }
   0x6   : > { %p41_p2 = scmp.eq.s32.totalorder %s1342_s15, 0  ;;  %s33_s21 = sadd.s32 1, %s1322_s10 }
   0x7   : > { %s1555_s16 = smov (%p22_p0, %s21_s16), 0  ;;  %s1557_s17 = smov (!%p22_p0, %s24_s17), %s1338_s14 }
   0x8   : > { %p42_p3 = por %p41_p2, %p40_p1  ;;  %p26_p4 = scmp.ge.s32.totalorder %s1557_s17, 2 }
   0x9   : > { %s28_s18 = ssub.s32 %s1334_s13, %s1555_s16  ;;  %p1052_p6 = scmp.ge.s32.totalorder %s1342_s15, 4 }
   0xa   : > { %s1559_s17 = smov (%p26_p4, %s1557_s17), 0 }
   0xb   : > { %s29_s19 = ssub.s32 %s1338_s14, %s1559_s17  ;;  %120 = sbr.rel (%p1052_p6) target bundleno = 29 (0x1d), region = 16 }
   0xc   : > { %s30_s20 = sor.u32 %s29_s19, %s28_s18 }
   0xd   : > { %p31_p5 = scmp.eq.s32.totalorder %s30_s20, 0 }
   0xf   : > { %s1412_s22 = scalar_select %p31_p5, %s1322_s10, %s33_s21  }
  0x10   : > { %123 = sbr.rel (!%p42_p3) target bundleno = 29 (0x1d), region = 20  ;;  %s125_s23 = sand.u32 (%p42_p3), 1, %s1322_s10  }
  0x11   : > { %s1110_s24 = sshll.u32 (%p42_p3), %s1338_s14, 3  ;;  %s1184_s25 = smul.u32 (%p42_p3), 96, %s125_s23 }
  0x12   : > { %s1055_s26 = sshll.u32 (%p42_p3), %s1334_s13, 4 }
  0x13   : > { %s131_s27 = sadd.s32 (%p42_p3), %s1110_s24, %s1055_s26  ;;  %s127_s4 = scalar_lea.vmem (%p42_p3), [#allocation2], %s1184_s25 }
  0x14   : > { %s1056_s28 = sshll.u32 (%p42_p3), %s131_s27, 2 }
  0x15   : > { %s133_s3 = scalar_lea.vmem %s1545_s0, %s1056_s28 }
  0x16   : > { %v150_v0 = vld [vmem:[%s133_s3] sm:$0xff]   ;;  %v154_v1 = vld [vmem:[%s133_s3 + $0x8] sm:$0xff]   ;;  %v158_v2 = vld [vmem:[%s133_s3 + $0x10] sm:$0xff]  }
  0x17   : > { %151 = vst [vmem:[%s127_s4] sm:$0xff] %v150_v0   ;;  %155 = vst [vmem:[%s127_s4 + $0x8] sm:$0xff] %v154_v1   ;;  %v162_v3 = vld [vmem:[%s133_s3 + $0x18] sm:$0xff]   ;;  %v166_v4 = vld [vmem:[%s133_s3 + $0x80] sm:$0xff]  }
  0x18   : > { %159 = vst [vmem:[%s127_s4 + $0x10] sm:$0xff] %v158_v2   ;;  %v170_v5 = vld [vmem:[%s133_s3 + $0x88] sm:$0xff]   ;;  %163 = vst [vmem:[%s127_s4 + $0x18] sm:$0xff] %v162_v3   ;;  %v174_v6 = vld [vmem:[%s133_s3 + $0x90] sm:$0xff]  }
  0x19   : > { %167 = vst [vmem:[%s127_s4 + $0x20] sm:$0xff] %v166_v4   ;;  %171 = vst [vmem:[%s127_s4 + $0x28] sm:$0xff] %v170_v5   ;;  %v178_v7 = vld [vmem:[%s133_s3 + $0x98] sm:$0xff]   ;;  %v182_v8 = vld [vmem:[%s133_s3 + $0x100] sm:$0xff]  }
  0x1a   : > { %175 = vst [vmem:[%s127_s4 + $0x30] sm:$0xff] %v174_v6   ;;  %179 = vst [vmem:[%s127_s4 + $0x38] sm:$0xff] %v178_v7   ;;  %v186_v9 = vld [vmem:[%s133_s3 + $0x108] sm:$0xff]   ;;  %v190_v10 = vld [vmem:[%s133_s3 + $0x110] sm:$0xff]  }
  0x1b   : > { %183 = vst [vmem:[%s127_s4 + $0x40] sm:$0xff] %v182_v8   ;;  %v194_v11 = vld [vmem:[%s133_s3 + $0x118] sm:$0xff]   ;;  %187 = vst [vmem:[%s127_s4 + $0x48] sm:$0xff] %v186_v9  }
  0x1c   : > { %191 = vst [vmem:[%s127_s4 + $0x50] sm:$0xff] %v190_v10   ;;  %195 = vst [vmem:[%s127_s4 + $0x58] sm:$0xff] %v194_v11  }
  0x1d PF: > { %p1057_p7 = scmp.ge.s32.totalorder %s1342_s15, 1  ;;  %p276_p8 = scmp.lt.s32.totalorder %s1342_s15, 5 }
  0x1f   : > { %p277_p9 = pnand %p1057_p7, %p276_p8 }
  0x20   : > { %s283_s5 = sand.u32 (!%p277_p9), 1, %s1318_s9   ;;  %p315_p10 = scmp.lt.s32.totalorder (!%p277_p9), %s1326_s11, 1 }
  0x21   : > { %280 = sbr.rel (%p277_p9) target bundleno = 776 (0x308), region = 65  ;;  %s1060_s20 = sshll.u32 (!%p277_p9), %s1330_s12, 2 }
  0x22   : > { %s1185_s6 = smul.u32 (!%p277_p9), 96, %s283_s5  ;;  %p323_p11 = scmp.lt.s32.totalorder (!%p277_p9), %s1060_s20, 7 }
  0x24   : > { %s1430_s7 = scalar_lea.vmem (!%p277_p9), [#allocation2], %s1185_s6 }
  0x26   : > { %v1344_v12 = vmov 0.0   ;;  %vm1345_vm0 = vmmov 0   ;;  %vm368_vm1 = vcmask 130048   ;;  %v1244_v13 = vld [vmem:[%s1430_s7 + $0x20] sm:$0xff]   ;;  %v1245_v14 = vld [vmem:[%s1430_s7 + $0x28] sm:$0xff]   ;;  %v1248_v18 = vld [vmem:[%s1430_s7 + $0x30] sm:$0xff]  }
  0x27   : > { %1136 = vmatprep.subr.bf16.mxu0 %v1344_v12  ;;  %1142 = vmatprep.subr.bf16.mxu1 %v1344_v12  ;;  %v373_v15 = vsel %vm368_vm1, %v1244_v13, 0  ;;  %v430_v16 = vsel %vm368_vm1, %v1245_v14, 0  ;;  %v1246_v17 = vld [vmem:[%s1430_s7] sm:$0xff]   ;;  %v1249_v19 = vld [vmem:[%s1430_s7 + $0x38] sm:$0xff]   ;;  %v1247_v20 = vld [vmem:[%s1430_s7 + $0x8] sm:$0xff]   ;;  %v487_v21 = vsel %vm368_vm1, %v1248_v18, 0 }
  0x28   : > { %1138 = vmatprep.mubr.msk.bf16.mxu0 %vm1345_vm0, %v1344_v12  ;;  %1144 = vmatprep.mubr.msk.bf16.mxu1 %vm1345_vm0, %v1344_v12  ;;  %v544_v22 = vsel %vm368_vm1, %v1249_v19, 0  ;;  %v1250_v23 = vld [vmem:[%s1430_s7 + $0x10] sm:$0xff]   ;;  %v1251_v24 = vld [vmem:[%s1430_s7 + $0x18] sm:$0xff]   ;;  %s1561_s11 = smov (!%p315_p10, %s1326_s11), 1  ;;  %s1563_s20 = smov (!%p323_p11, %s1060_s20), 7  ;;  %vm929_vm2 = vcmask 125952  }
  0x29   : > { %1137 = vmatpush3.bf16.xpose.msra.mxu0 %v373_v15  ;;  %1143 = vmatpush3.bf16.xpose.msra.mxu1 %v430_v16  ;;  %s1111_s8 = sshll.u32 %s1561_s11, 4  ;;  %s1061_s21 = sshll.u32 %s1563_s20, 1 }
  0x2a   : > { %1148 = vmatprep.subr.bf16.mxu0 %v1344_v12  ;;  %1154 = vmatprep.subr.bf16.mxu1 %v1344_v12  ;;  %s319_s19 = scalar_lea.vmem %s1546_s1, %s1111_s8  ;;  %s327_s23 = sadd.s32 %s1111_s8, %s1061_s21 }
  0x2b   : > { %v595_v26 = vld [vmem:[%s319_s19] sm:$0xff]  ;;  %v596_v35 = vld [vmem:[%s319_s19 + $0x8] sm:$0xff]  ;;  %s1063_s24 = sshll.u32 %s327_s23, 2 }
  0x2c   : > { %s1506_s27 = scalar_lea.vmem %s1547_s2, %s1063_s24 }
  0x30   : > { %1139 = vmatmul.mubr.msk.bf16.vlgmr.msra.gmra.mxu0 %vm368_vm1, %v1246_v17  ;;  %1145 = vmatmul.mubr.msk.bf16.vlgmr.msra.gmra.mxu1 %vm368_vm1, %v1247_v20 }
  0x31   : > { %1149 = vmatpush3.bf16.xpose.msra.mxu0 %v487_v21  ;;  %1155 = vmatpush3.bf16.xpose.msra.mxu1 %v544_v22 }
  0x32   : > { %1150 = vmatprep.mubr.msk.bf16.mxu0 %vm1345_vm0, %v1344_v12  ;;  %1156 = vmatprep.mubr.msk.bf16.mxu1 %vm1345_vm0, %v1344_v12 }
  0x33   : > { %1160 = vmatprep.subr.bf16.mxu0 %v1344_v12  ;;  %1166 = vmatprep.subr.bf16.mxu1 %v1344_v12 }
  0x38   : > { %1151 = vmatmul.mubr.msk.bf16.vlgmr.msra.gmra.mxu0 %vm368_vm1, %v1250_v23  ;;  %1157 = vmatmul.mubr.msk.bf16.vlgmr.msra.gmra.mxu1 %vm368_vm1, %v1251_v24 }
  0x39   : > { %1162 = vmatprep.mubr.msk.bf16.mxu0 %vm1345_vm0, %v1344_v12  ;;  %1168 = vmatprep.mubr.msk.bf16.mxu1 %vm1345_vm0, %v1344_v12 }
  0xf0   : > { %v409_v25 = vpop.f32.mrf.mxu0  ;;  %v466_v28 = vpop.f32.mrf.mxu1 }
  0xf1   : > { %v587_v27 = vmul.f32 0.25, %v409_v25  ;;  %v589_v29 = vmul.f32 0.25, %v466_v28 }
  0xf2   : > { %v1140_v30 = vpop.f32.mrf.mxu0  ;;  %v1146_v31 = vpop.f32.mrf.mxu1 }
  0xf3   : > { %v597_v32 = vadd.f32 %v595_v26, %v587_v27  ;;  %v599_v34 = vadd.f32 %v595_v26, %v589_v29 }
  0xf4   : > { %v412_v33 = vpop.f32.mrf.mxu0  ;;  %v469_v37 = vpop.f32.mrf.mxu1 }
  0xf5   : > { %v588_v36 = vmul.f32 0.25, %v412_v33  ;;  %v605_v38 = vsel %vm368_vm1, %v597_v32, -inf  ;;  %v590_v39 = vmul.f32 0.25, %v469_v37  ;;  %v611_v40 = vsel %vm368_vm1, %v599_v34, -inf }
  0xf6   : > { %606 = vmax.xlane.f32.xlu0 %v605_v38  ;;  %v1141_v41 = vpop.f32.mrf.mxu0  ;;  %612 = vmax.xlane.f32.xlu1 %v611_v40  ;;  %v1147_v42 = vpop.f32.mrf.mxu1 }
  0xf7   : > { %v598_v43 = vadd.f32 %v596_v35, %v588_v36  ;;  %v600_v45 = vadd.f32 %v596_v35, %v590_v39 }
  0xf8   : > { %v523_v44 = vpop.f32.mrf.mxu0  ;;  %v580_v47 = vpop.f32.mrf.mxu1 }
  0xf9   : > { %v591_v46 = vmul.f32 0.25, %v523_v44  ;;  %v608_v48 = vsel %vm368_vm1, %v598_v43, -inf  ;;  %v593_v49 = vmul.f32 0.25, %v580_v47  ;;  %v614_v50 = vsel %vm368_vm1, %v600_v45, -inf  ;;  %v1252_v44 = vld [vmem:[%s1430_s7 + $0x40] sm:$0xff]  }
  0xfa   : > { %609 = vmax.xlane.f32.xlu0 %v608_v48  ;;  %v1152_v51 = vpop.f32.mrf.mxu0  ;;  %615 = vmax.xlane.f32.xlu1 %v614_v50  ;;  %v1158_v52 = vpop.f32.mrf.mxu1 }
  0xfb   : > { %v601_v53 = vadd.f32 %v595_v26, %v591_v46  ;;  %v603_v55 = vadd.f32 %v595_v26, %v593_v49  ;;  %1161 = vmatpush3.bf16.msra.mxu0 %v1252_v44 }
  0xfc   : > { %v526_v54 = vpop.f32.mrf.mxu0  ;;  %v583_v57 = vpop.f32.mrf.mxu1  ;;  %1172 = vmatprep.subr.bf16.mxu0 %v1344_v12 }
  0xfd   : > { %v592_v56 = vmul.f32 0.25, %v526_v54  ;;  %v617_v58 = vsel %vm368_vm1, %v601_v53, -inf  ;;  %v594_v59 = vmul.f32 0.25, %v583_v57  ;;  %v623_v62 = vsel %vm368_vm1, %v603_v55, -inf }
  0xfe   : > { %618 = vmax.xlane.f32.xlu0 %v617_v58  ;;  %v1153_v60 = vpop.f32.mrf.mxu0  ;;  %v1159_v61 = vpop.f32.mrf.mxu1 }
  0xff   : > { %v602_v63 = vadd.f32 %v596_v35, %v592_v56  ;;  %v604_v1 = vadd.f32 %v596_v35, %v594_v59  ;;  %v1254_v59 = vld [vmem:[%s1430_s7 + $0x50] sm:$0xff]  }
 0x101   : > { %v620_v0 = vsel %vm368_vm1, %v602_v63, -inf  ;;  %v626_v2 = vsel %vm368_vm1, %v604_v1, -inf }
 0x102   : > { %624 = vmax.xlane.f32.xlu0 %v623_v62  ;;  %621 = vmax.xlane.f32.xlu1 %v620_v0 }
 0x106   : > { %627 = vmax.xlane.f32.xlu1 %v626_v2 }
 0x17f   : > { %v607_v3 = vpop.xlane.xlu0 %606  ;;  %v613_v4 = vpop.xlane.xlu1 %612 }
 0x180   : > { %v629_v5 = vsub.f32 %v597_v32, %v607_v3  ;;  %v631_v6 = vsub.f32 %v599_v34, %v613_v4 }
 0x182   : > { %v637_v7 = vmul.f32 1.442695, %v629_v5  ;;  %v641_v8 = vmul.f32 1.442695, %v631_v6 }
 0x183   : > { %v610_v9 = vpop.xlane.xlu0 %609  ;;  %v616_v10 = vpop.xlane.xlu1 %615 }
 0x184   : > { %1256 = vpow2.f32 %v637_v7  ;;  %v630_v11 = vsub.f32 %v598_v43, %v610_v9  ;;  %v632_v13 = vsub.f32 %v600_v45, %v616_v10  ;;  %v1253_v45 = vld [vmem:[%s1430_s7 + $0x48] sm:$0xff]  }
 0x185   : > { %1258 = vpow2.f32 %v641_v8  ;;  %1167 = vmatpush3.bf16.msra.mxu1 %v1253_v45 }
 0x186   : > { %v639_v14 = vmul.f32 1.442695, %v630_v11  ;;  %v643_v15 = vmul.f32 1.442695, %v632_v13  ;;  %1178 = vmatprep.subr.bf16.mxu1 %v1344_v12 }
 0x187   : > { %v619_v16 = vpop.xlane.xlu0 %618 }
 0x188   : > { %1260 = vpow2.f32 %v639_v14  ;;  %v633_v17 = vsub.f32 %v601_v53, %v619_v16 }
 0x189   : > { %1262 = vpow2.f32 %v643_v15 }
 0x18a   : > { %v645_v18 = vmul.f32 1.442695, %v633_v17 }
 0x18b   : > { %v625_v19 = vpop.xlane.xlu0 %624  ;;  %v622_v20 = vpop.xlane.xlu1 %621 }
 0x18c   : > { %1264 = vpow2.f32 %v645_v18  ;;  %v635_v21 = vsub.f32 %v603_v55, %v625_v19  ;;  %v634_v22 = vsub.f32 %v602_v63, %v622_v20 }
 0x18e   : > { %v649_v23 = vmul.f32 1.442695, %v635_v21  ;;  %v647_v24 = vmul.f32 1.442695, %v634_v22 }
 0x18f   : > { %v628_v25 = vpop.xlane.xlu1 %627 }
 0x190   : > { %1266 = vpow2.f32 %v649_v23  ;;  %v636_v26 = vsub.f32 %v604_v1, %v628_v25  ;;  %v1255_v1 = vld [vmem:[%s1430_s7 + $0x58] sm:$0xff]  }
 0x191   : > { %v1257_v27 = vpop.eup %1256  ;;  %1268 = vpow2.f32 %v647_v24 }
 0x192   : > { %v651_v28 = vmul.f32 1.442695, %v636_v26  ;;  %v653_v29 = vsel %vm368_vm1, %v1257_v27, 0.0  ;;  %v1259_v30 = vpop.eup %1258 }
 0x193   : > { %654 = vadd.xlane.f32.xlu0 %v653_v29  ;;  %v659_v32 = vsel %vm368_vm1, %v1259_v30, 0.0 }
 0x194   : > { %1270 = vpow2.f32 %v651_v28 }
 0x195   : > { %v1261_v31 = vpop.eup %1260 }
 0x196   : > { %v656_v33 = vsel %vm368_vm1, %v1261_v31, 0.0  ;;  %v1263_v34 = vpop.eup %1262 }
 0x197   : > { %660 = vadd.xlane.f32.xlu0 %v659_v32  ;;  %657 = vadd.xlane.f32.xlu1 %v656_v33  ;;  %v662_v37 = vsel %vm368_vm1, %v1263_v34, 0.0 }
 0x199   : > { %v1265_v35 = vpop.eup %1264 }
 0x19a   : > { %v665_v36 = vsel %vm368_vm1, %v1265_v35, 0.0 }
 0x19b   : > { %666 = vadd.xlane.f32.xlu0 %v665_v36  ;;  %663 = vadd.xlane.f32.xlu1 %v662_v37 }
 0x19d   : > { %v1267_v38 = vpop.eup %1266 }
 0x19e   : > { %v1269_v39 = vpop.eup %1268  ;;  %v671_v40 = vsel %vm368_vm1, %v1267_v38, 0.0 }
 0x19f   : > { %672 = vadd.xlane.f32.xlu0 %v671_v40  ;;  %v668_v41 = vsel %vm368_vm1, %v1269_v39, 0.0 }
 0x1a0   : > { %669 = vadd.xlane.f32.xlu1 %v668_v41 }
 0x1a1   : > { %v1271_v42 = vpop.eup %1270 }
 0x1a2   : > { %v674_v43 = vsel %vm368_vm1, %v1271_v42, 0.0 }
 0x1a4   : > { %675 = vadd.xlane.f32.xlu1 %v674_v43 }
 0x21c   : > { %v655_v46 = vpop.xlane.xlu0 %654 }
 0x21d   : > { %1272 = vrcp.f32 %v655_v46 }
 0x220   : > { %v661_v47 = vpop.xlane.xlu0 %660  ;;  %v658_v48 = vpop.xlane.xlu1 %657 }
 0x221   : > { %1274 = vrcp.f32 %v658_v48 }
 0x222   : > { %1276 = vrcp.f32 %v661_v47 }
 0x224   : > { %v667_v49 = vpop.xlane.xlu0 %666  ;;  %v664_v50 = vpop.xlane.xlu1 %663 }
 0x225   : > { %1278 = vrcp.f32 %v664_v50 }
 0x226   : > { %1280 = vrcp.f32 %v667_v49 }
 0x228   : > { %v673_v51 = vpop.xlane.xlu0 %672 }
 0x229   : > { %v670_v52 = vpop.xlane.xlu1 %669 }
 0x22a   : > { %1282 = vrcp.f32 %v670_v52  ;;  %v1273_v53 = vpop.eup %1272 }
 0x22b   : > { %1284 = vrcp.f32 %v673_v51  ;;  %v685_v56 = vmul.f32 %v1273_v53, %v1257_v27 }
 0x22d   : > { %v676_v54 = vpop.xlane.xlu1 %675 }
 0x22e   : > { %1286 = vrcp.f32 %v676_v54  ;;  %v1275_v55 = vpop.eup %1274 }
 0x22f   : > { %v686_v57 = vmul.f32 %v1275_v55, %v1261_v31  ;;  %v1277_v58 = vpop.eup %1276 }
 0x230   : > { %v687_v62 = vmul.f32 %v1277_v58, %v1259_v30 }
 0x231   : > { %v693_v60 = vpack.c.bf16 %v686_v57, %v685_v56 }
 0x232   : > { %v1279_v61 = vpop.eup %1278 }
 0x233   : > { %1163 = vmatmul.mubr.msk.bf16.vlgmr.msra.gmra.mxu0 %vm368_vm1, %v693_v60  ;;  %v688_v63 = vmul.f32 %v1279_v61, %v1263_v34  ;;  %v1281_v0 = vpop.eup %1280 }
 0x234   : > { %1173 = vmatpush3.bf16.msra.mxu0 %v1254_v59  ;;  %1174 = vmatprep.mubr.msk.bf16.mxu0 %vm1345_vm0, %v1344_v12  ;;  %v689_v4 = vmul.f32 %v1281_v0, %v1265_v35 }
 0x235   : > { %v694_v2 = vpack.c.bf16 %v688_v63, %v687_v62 }
 0x237   : > { %v1283_v3 = vpop.eup %1282  ;;  %1169 = vmatmul.mubr.msk.bf16.vlgmr.msra.gmra.mxu1 %vm368_vm1, %v694_v2 }
 0x238   : > { %v690_v5 = vmul.f32 %v1283_v3, %v1269_v39  ;;  %v1285_v6 = vpop.eup %1284  ;;  %1179 = vmatpush3.bf16.msra.mxu1 %v1255_v1  ;;  %1180 = vmatprep.mubr.msk.bf16.mxu1 %vm1345_vm0, %v1344_v12 }
 0x239   : > { %v691_v9 = vmul.f32 %v1285_v6, %v1267_v38 }
 0x23a   : > { %v695_v7 = vpack.c.bf16 %v690_v5, %v689_v4 }
 0x23b   : > { %v1287_v8 = vpop.eup %1286 }
 0x23c   : > { %v692_v10 = vmul.f32 %v1287_v8, %v1271_v42  ;;  %1175 = vmatmul.mubr.msk.bf16.vlgmr.msra.gmra.mxu0 %vm368_vm1, %v695_v7 }
 0x23e   : > { %v696_v11 = vpack.c.bf16 %v692_v10, %v691_v9 }
 0x240   : > { %1181 = vmatmul.mubr.msk.bf16.vlgmr.msra.gmra.mxu1 %vm368_vm1, %v696_v11 }
 0x2f3   : > { %v740_v12 = vpop.f32.mrf.mxu0 }
 0x2f4   : > { %v1112_v13 = vpack.c.bf16 %v740_v12, %v740_v12 }
 0x2f5   : > { %v1164_v14 = vpop.f32.mrf.mxu0 }
 0x2f6   : > { %930 = vst.msk [vmem:[%s1506_s27] sm:$0xf] %vm929_vm2, %v1112_v13 }
 0x2f7   : > { %v743_v15 = vpop.f32.mrf.mxu0  ;;  %v790_v16 = vpop.f32.mrf.mxu1 }
 0x2f8   : > { %v1113_v17 = vpack.c.bf16 %v743_v15, %v743_v15  ;;  %v1114_v18 = vpack.c.bf16 %v790_v16, %v790_v16 }
 0x2f9   : > { %v1165_v19 = vpop.f32.mrf.mxu0  ;;  %v1170_v20 = vpop.f32.mrf.mxu1 }
 0x2fa   : > { %931 = vst.msk [vmem:[%s1506_s27 + $0x4] sm:$0xf] %vm929_vm2, %v1113_v17  ;;  %932 = vst.msk [vmem:[%s1506_s27 + $0x8] sm:$0xf] %vm929_vm2, %v1114_v18 }
 0x2fb   : > { %v793_v21 = vpop.f32.mrf.mxu1 }
 0x2fc   : > { %v840_v22 = vpop.f32.mrf.mxu0  ;;  %v1115_v23 = vpack.c.bf16 %v793_v21, %v793_v21 }
 0x2fd   : > { %v1116_v24 = vpack.c.bf16 %v840_v22, %v840_v22  ;;  %v1171_v25 = vpop.f32.mrf.mxu1 }
 0x2fe   : > { %v1176_v26 = vpop.f32.mrf.mxu0  ;;  %933 = vst.msk [vmem:[%s1506_s27 + $0xc] sm:$0xf] %vm929_vm2, %v1115_v23 }
 0x2ff   : > { %934 = vst.msk [vmem:[%s1506_s27 + $0x10] sm:$0xf] %vm929_vm2, %v1116_v24 }
 0x300   : > { %v843_v27 = vpop.f32.mrf.mxu0  ;;  %v890_v28 = vpop.f32.mrf.mxu1 }
 0x301   : > { %v1117_v29 = vpack.c.bf16 %v843_v27, %v843_v27  ;;  %v1118_v30 = vpack.c.bf16 %v890_v28, %v890_v28 }
 0x302   : > { %v1177_v31 = vpop.f32.mrf.mxu0  ;;  %v1182_v32 = vpop.f32.mrf.mxu1 }
 0x303   : > { %935 = vst.msk [vmem:[%s1506_s27 + $0x14] sm:$0xf] %vm929_vm2, %v1117_v29  ;;  %936 = vst.msk [vmem:[%s1506_s27 + $0x18] sm:$0xf] %vm929_vm2, %v1118_v30 }
 0x304   : > { %v893_v33 = vpop.f32.mrf.mxu1 }
 0x305   : > { %v1119_v34 = vpack.c.bf16 %v893_v33, %v893_v33 }
 0x306   : > { %v1183_v35 = vpop.f32.mrf.mxu1 }
 0x307   : > { %937 = vst.msk [vmem:[%s1506_s27 + $0x1c] sm:$0xf] %vm929_vm2, %v1119_v34 }
 0x308 PF: > { %s12_s15 = sadd.s32 1, %s1342_s15   ;;  %s1548_s9 = smov %s1322_s10 }
 0x309   : > { %p9_p12 = scmp.ge.s32.totalorder %s12_s15, 6   ;;  %s1549_s10 = smov %s1412_s22 }
 0x30a   : > { %s1550_s11 = smov %s1334_s13  ;;  %s1551_s12 = smov %s1338_s14 }
 0x30b   : > { %s1552_s13 = smov %s1555_s16  ;;  %s1553_s14 = smov %s1559_s17 }
 0x30c   :  { %11 = sbr.rel (!%p9_p12) target bundleno = 4 (0x4), region = 109 }

// kernel: _lambda_.40
= control target key start
LH: loop header
LB: loop body
LE: loop exit
PB: predicated region body
PF: predicated region fallthrough
CT: control target
= control target key end

     0   :  { %vm19_vm0 = vcmask 261120   ;;  %v404_v1 = vmov 0.0   ;;  %s580_s1 = inlined_call_operand.vmem [shape: bf16[32,32], index: 1, kind: input, shape index: {}]   ;;  %s581_s0 = inlined_call_operand.vmem [shape: bf16[128,32], index: 0, kind: input, shape index: {}]   ;;  %s582_s2 = inlined_call_operand.vmem [shape: f32[1,32], index: 2, kind: input, shape index: {}]   ;;  %s583_s3 = inlined_call_operand.vmem [shape: f32[128,32], index: 3, kind: output, shape index: {}]  }
   0x1   :  { %v394_v0 = vld [vmem:[%s580_s1 + $0x8] sm:$0xff]   ;;  %22 = vst.msk [vmem:[#allocation2 + $0x10] sm:$0xff] %vm19_vm0, %v404_v1  ;;  %20 = vst.msk [vmem:[#allocation2] sm:$0xff] %vm19_vm0, %v404_v1  ;;  %v395_v2 = vld [vmem:[%s580_s1] sm:$0xff]  }
   0x2   :  { %21 = vst.msk [vmem:[#allocation2 + $0x8] sm:$0xff] %vm19_vm0, %v404_v1  ;;  %23 = vst.msk [vmem:[#allocation2 + $0x18] sm:$0xff] %vm19_vm0, %v404_v1  ;;  %369 = vmatprep.subr.bf16.mxu0 %v394_v0  ;;  %389 = vmatprep.subr.bf16.mxu1 %v394_v0  ;;  %v396_v3 = vld [vmem:[%s581_s0] sm:$0xff]   ;;  %v398_v5 = vld [vmem:[%s581_s0 + $0x8] sm:$0xff]  }
   0x3   :  { %24 = vst.msk [vmem:[#allocation2 + $0x20] sm:$0xff] %vm19_vm0, %v404_v1  ;;  %25 = vst.msk [vmem:[#allocation2 + $0x28] sm:$0xff] %vm19_vm0, %v404_v1  ;;  %370 = vmatpush3.bf16.msra.mxu0 %v394_v0  ;;  %391 = vmatpush3.bf16.msra.mxu1 %v394_v0  ;;  %v397_v4 = vld [vmem:[%s581_s0 + $0x20] sm:$0xff]   ;;  %v399_v6 = vld [vmem:[%s581_s0 + $0x28] sm:$0xff]  }
   0x4   :  { %26 = vst.msk [vmem:[#allocation2 + $0x30] sm:$0xff] %vm19_vm0, %v404_v1  ;;  %27 = vst.msk [vmem:[#allocation2 + $0x38] sm:$0xff] %vm19_vm0, %v404_v1  ;;  %371 = vmatprep.subr.bf16.mxu0 %v395_v2  ;;  %390 = vmatprep.subr.bf16.mxu1 %v395_v2  ;;  %v400_v7 = vld [vmem:[%s581_s0 + $0x10] sm:$0xff]   ;;  %v402_v9 = vld [vmem:[%s581_s0 + $0x18] sm:$0xff]  }
   0x5   :  { %28 = vst.msk [vmem:[#allocation2 + $0x40] sm:$0xff] %vm19_vm0, %v404_v1  ;;  %29 = vst.msk [vmem:[#allocation2 + $0x48] sm:$0xff] %vm19_vm0, %v404_v1  ;;  %373 = vmatprep.mubr.msk.bf16.mxu0 %vm19_vm0, %v396_v3  ;;  %381 = vmatprep.mubr.msk.bf16.mxu1 %vm19_vm0, %v397_v4  ;;  %v401_v8 = vld [vmem:[%s581_s0 + $0x30] sm:$0xff]   ;;  %v403_v10 = vld [vmem:[%s581_s0 + $0x38] sm:$0xff]  }
   0x6   :  { %30 = vst.msk [vmem:[#allocation2 + $0x50] sm:$0xff] %vm19_vm0, %v404_v1  ;;  %31 = vst.msk [vmem:[#allocation2 + $0x58] sm:$0xff] %vm19_vm0, %v404_v1  ;;  %v488_v37 = vld [vmem:[%s582_s2] ss:$0 sm:$0xff] }
   0x7   :  { %32 = vst.msk [vmem:[#allocation2 + $0x60] sm:$0xff] %vm19_vm0, %v404_v1  ;;  %33 = vst.msk [vmem:[#allocation2 + $0x68] sm:$0xff] %vm19_vm0, %v404_v1  ;;  %372 = vmatpush3.bf16.msra.mxu0 %v395_v2  ;;  %392 = vmatpush3.bf16.msra.mxu1 %v395_v2 }
   0x8   :  { %34 = vst.msk [vmem:[#allocation2 + $0x70] sm:$0xff] %vm19_vm0, %v404_v1  ;;  %35 = vst.msk [vmem:[#allocation2 + $0x78] sm:$0xff] %vm19_vm0, %v404_v1  ;;  %v38_v11 = vld [vmem:[#allocation2 + $0x10] sm:$0xff]  ;;  %v36_v15 = vld [vmem:[#allocation2] sm:$0xff] }
   0x9   :  { %v39_v21 = vld [vmem:[#allocation2 + $0x18] sm:$0xff]  ;;  %v37_v27 = vld [vmem:[#allocation2 + $0x8] sm:$0xff] }
   0xa   :  { %374 = vmatmul.mubr.msk.bf16.vlgmr.msra.gmra.mxu0 %vm19_vm0, %v398_v5  ;;  %382 = vmatmul.mubr.msk.bf16.vlgmr.msra.gmra.mxu1 %vm19_vm0, %v399_v6  ;;  %v40_v40 = vld [vmem:[#allocation2 + $0x20] sm:$0xff]  ;;  %v41_v54 = vld [vmem:[#allocation2 + $0x28] sm:$0xff] }
   0xb   :  { %377 = vmatprep.mubr.msk.bf16.mxu0 %vm19_vm0, %v400_v7  ;;  %385 = vmatprep.mubr.msk.bf16.mxu1 %vm19_vm0, %v401_v8  ;;  %v42_v33 = vld [vmem:[#allocation2 + $0x30] sm:$0xff]  ;;  %v43_v44 = vld [vmem:[#allocation2 + $0x38] sm:$0xff] }
   0xc   :  { %v44_v16 = vld [vmem:[#allocation2 + $0x40] sm:$0xff]  ;;  %v45_v28 = vld [vmem:[#allocation2 + $0x48] sm:$0xff] }
   0xd   :  { %v46_v12 = vld [vmem:[#allocation2 + $0x50] sm:$0xff]  ;;  %v47_v22 = vld [vmem:[#allocation2 + $0x58] sm:$0xff] }
   0xe   :  { %v48_v41 = vld [vmem:[#allocation2 + $0x60] sm:$0xff]  ;;  %v49_v59 = vld [vmem:[#allocation2 + $0x68] sm:$0xff] }
   0xf   :  { %v50_v34 = vld [vmem:[#allocation2 + $0x70] sm:$0xff]  ;;  %v51_v49 = vld [vmem:[#allocation2 + $0x78] sm:$0xff] }
  0x12   :  { %378 = vmatmul.mubr.msk.bf16.gmra.mxu0 %vm19_vm0, %v402_v9  ;;  %386 = vmatmul.mubr.msk.bf16.gmra.mxu1 %vm19_vm0, %v403_v10 }
  0xca   :  { %v375_v13 = vpop.f32.mrf.mxu0  ;;  %v383_v14 = vpop.f32.mrf.mxu1 }
  0xcb   :  { %v248_v17 = vadd.f32 %v375_v13, %v38_v11  ;;  %v256_v18 = vadd.f32 %v383_v14, %v46_v12 }
  0xcc   :  { %v183_v19 = vpop.f32.mrf.mxu0  ;;  %v215_v20 = vpop.f32.mrf.mxu1 }
  0xcd   :  { %264 = vst.msk [vmem:[#allocation2 + $0x10] sm:$0xff] %vm19_vm0, %v248_v17  ;;  %272 = vst.msk [vmem:[#allocation2 + $0x50] sm:$0xff] %vm19_vm0, %v256_v18  ;;  %v246_v23 = vadd.f32 %v183_v19, %v36_v15  ;;  %v254_v24 = vadd.f32 %v215_v20, %v44_v16 }
  0xce   :  { %v376_v25 = vpop.f32.mrf.mxu0  ;;  %v384_v26 = vpop.f32.mrf.mxu1 }
  0xcf   :  { %262 = vst.msk [vmem:[#allocation2] sm:$0xff] %vm19_vm0, %v246_v23  ;;  %270 = vst.msk [vmem:[#allocation2 + $0x40] sm:$0xff] %vm19_vm0, %v254_v24  ;;  %v249_v29 = vadd.f32 %v376_v25, %v39_v21  ;;  %v257_v30 = vadd.f32 %v384_v26, %v47_v22 }
  0xd0   :  { %v186_v31 = vpop.f32.mrf.mxu0  ;;  %v218_v32 = vpop.f32.mrf.mxu1 }
  0xd1   :  { %265 = vst.msk [vmem:[#allocation2 + $0x18] sm:$0xff] %vm19_vm0, %v249_v29  ;;  %273 = vst.msk [vmem:[#allocation2 + $0x58] sm:$0xff] %vm19_vm0, %v257_v30  ;;  %v247_v35 = vadd.f32 %v186_v31, %v37_v27  ;;  %v255_v36 = vadd.f32 %v218_v32, %v45_v28 }
  0xd2   :  { %v379_v38 = vpop.f32.mrf.mxu0  ;;  %v387_v39 = vpop.f32.mrf.mxu1 }
  0xd3   :  { %263 = vst.msk [vmem:[#allocation2 + $0x8] sm:$0xff] %vm19_vm0, %v247_v35  ;;  %271 = vst.msk [vmem:[#allocation2 + $0x48] sm:$0xff] %vm19_vm0, %v255_v36  ;;  %v252_v42 = vadd.f32 %v379_v38, %v42_v33  ;;  %v260_v43 = vadd.f32 %v387_v39, %v50_v34 }
  0xd4   :  { %v283_v45 = vld [vmem:[#allocation2 + $0x10] sm:$0xff]  ;;  %v199_v47 = vpop.f32.mrf.mxu0  ;;  %v231_v48 = vpop.f32.mrf.mxu1 }
  0xd5   :  { %v291_v46 = vld [vmem:[#allocation2 + $0x50] sm:$0xff]  ;;  %v306_v50 = vadd.f32 %v488_v37, %v283_v45  ;;  %268 = vst.msk [vmem:[#allocation2 + $0x30] sm:$0xff] %vm19_vm0, %v252_v42  ;;  %276 = vst.msk [vmem:[#allocation2 + $0x70] sm:$0xff] %vm19_vm0, %v260_v43  ;;  %v250_v52 = vadd.f32 %v199_v47, %v40_v40  ;;  %v258_v53 = vadd.f32 %v231_v48, %v48_v41 }
  0xd6   :  { %v314_v51 = vadd.f32 %v488_v37, %v291_v46  ;;  %v281_v55 = vld [vmem:[#allocation2] sm:$0xff]  ;;  %v380_v57 = vpop.f32.mrf.mxu0  ;;  %v388_v58 = vpop.f32.mrf.mxu1 }
  0xd7   :  { %v289_v56 = vld [vmem:[#allocation2 + $0x40] sm:$0xff]  ;;  %322 = vst.msk [vmem:[%s583_s3 + $0x10] sm:$0xff] %vm19_vm0, %v306_v50  ;;  %v304_v60 = vadd.f32 %v488_v37, %v281_v55  ;;  %266 = vst.msk [vmem:[#allocation2 + $0x20] sm:$0xff] %vm19_vm0, %v250_v52  ;;  %v253_v62 = vadd.f32 %v380_v57, %v43_v44  ;;  %v261_v63 = vadd.f32 %v388_v58, %v51_v49 }
  0xd8   :  { %330 = vst.msk [vmem:[%s583_s3 + $0x50] sm:$0xff] %vm19_vm0, %v314_v51  ;;  %v312_v61 = vadd.f32 %v488_v37, %v289_v56  ;;  %274 = vst.msk [vmem:[#allocation2 + $0x60] sm:$0xff] %vm19_vm0, %v258_v53  ;;  %v284_v0 = vld [vmem:[#allocation2 + $0x18] sm:$0xff]  ;;  %v202_v2 = vpop.f32.mrf.mxu0  ;;  %v234_v3 = vpop.f32.mrf.mxu1 }
  0xd9   :  { %v292_v1 = vld [vmem:[#allocation2 + $0x58] sm:$0xff]  ;;  %320 = vst.msk [vmem:[%s583_s3] sm:$0xff] %vm19_vm0, %v304_v60  ;;  %v307_v4 = vadd.f32 %v488_v37, %v284_v0  ;;  %269 = vst.msk [vmem:[#allocation2 + $0x38] sm:$0xff] %vm19_vm0, %v253_v62  ;;  %v251_v6 = vadd.f32 %v202_v2, %v41_v54  ;;  %v259_v7 = vadd.f32 %v234_v3, %v49_v59 }
  0xda   :  { %328 = vst.msk [vmem:[%s583_s3 + $0x40] sm:$0xff] %vm19_vm0, %v312_v61  ;;  %v315_v5 = vadd.f32 %v488_v37, %v292_v1  ;;  %277 = vst.msk [vmem:[#allocation2 + $0x78] sm:$0xff] %vm19_vm0, %v261_v63  ;;  %v282_v8 = vld [vmem:[#allocation2 + $0x8] sm:$0xff] }
  0xdb   :  { %v290_v9 = vld [vmem:[#allocation2 + $0x48] sm:$0xff]  ;;  %323 = vst.msk [vmem:[%s583_s3 + $0x18] sm:$0xff] %vm19_vm0, %v307_v4  ;;  %v305_v10 = vadd.f32 %v488_v37, %v282_v8  ;;  %267 = vst.msk [vmem:[#allocation2 + $0x28] sm:$0xff] %vm19_vm0, %v251_v6 }
  0xdc   :  { %331 = vst.msk [vmem:[%s583_s3 + $0x58] sm:$0xff] %vm19_vm0, %v315_v5  ;;  %v313_v11 = vadd.f32 %v488_v37, %v290_v9  ;;  %275 = vst.msk [vmem:[#allocation2 + $0x68] sm:$0xff] %vm19_vm0, %v259_v7  ;;  %v287_v12 = vld [vmem:[#allocation2 + $0x30] sm:$0xff] }
  0xdd   :  { %v295_v13 = vld [vmem:[#allocation2 + $0x70] sm:$0xff]  ;;  %321 = vst.msk [vmem:[%s583_s3 + $0x8] sm:$0xff] %vm19_vm0, %v305_v10  ;;  %v310_v14 = vadd.f32 %v488_v37, %v287_v12 }
  0xde   :  { %329 = vst.msk [vmem:[%s583_s3 + $0x48] sm:$0xff] %vm19_vm0, %v313_v11  ;;  %v318_v15 = vadd.f32 %v488_v37, %v295_v13  ;;  %v285_v16 = vld [vmem:[#allocation2 + $0x20] sm:$0xff] }
  0xdf   :  { %v293_v17 = vld [vmem:[#allocation2 + $0x60] sm:$0xff]  ;;  %326 = vst.msk [vmem:[%s583_s3 + $0x30] sm:$0xff] %vm19_vm0, %v310_v14  ;;  %v308_v18 = vadd.f32 %v488_v37, %v285_v16 }
  0xe0   :  { %334 = vst.msk [vmem:[%s583_s3 + $0x70] sm:$0xff] %vm19_vm0, %v318_v15  ;;  %v316_v19 = vadd.f32 %v488_v37, %v293_v17  ;;  %v288_v20 = vld [vmem:[#allocation2 + $0x38] sm:$0xff] }
  0xe1   :  { %v296_v21 = vld [vmem:[#allocation2 + $0x78] sm:$0xff]  ;;  %324 = vst.msk [vmem:[%s583_s3 + $0x20] sm:$0xff] %vm19_vm0, %v308_v18  ;;  %v311_v22 = vadd.f32 %v488_v37, %v288_v20 }
  0xe2   :  { %332 = vst.msk [vmem:[%s583_s3 + $0x60] sm:$0xff] %vm19_vm0, %v316_v19  ;;  %v319_v23 = vadd.f32 %v488_v37, %v296_v21  ;;  %v286_v24 = vld [vmem:[#allocation2 + $0x28] sm:$0xff] }
  0xe3   :  { %v294_v25 = vld [vmem:[#allocation2 + $0x68] sm:$0xff]  ;;  %327 = vst.msk [vmem:[%s583_s3 + $0x38] sm:$0xff] %vm19_vm0, %v311_v22  ;;  %v309_v26 = vadd.f32 %v488_v37, %v286_v24 }
  0xe4   :  { %335 = vst.msk [vmem:[%s583_s3 + $0x78] sm:$0xff] %vm19_vm0, %v319_v23  ;;  %v317_v27 = vadd.f32 %v488_v37, %v294_v25 }
  0xe5   :  { %325 = vst.msk [vmem:[%s583_s3 + $0x28] sm:$0xff] %vm19_vm0, %v309_v26 }
  0xe6   :  { %333 = vst.msk [vmem:[%s583_s3 + $0x68] sm:$0xff] %vm19_vm0, %v317_v27 }

// kernel: _lambda_.41
= control target key start
LH: loop header
LB: loop body
LE: loop exit
PB: predicated region body
PF: predicated region fallthrough
CT: control target
= control target key end

     0   :  { %vm67_vm0 = vcmask 261120   ;;  %vm403_vm1 = vcmask 257024   ;;  %s982_s0 = inlined_call_operand.vmem [shape: f32[128,32], index: 0, kind: input, shape index: {}]   ;;  %s983_s1 = inlined_call_operand.vmem [shape: f32[128,32], index: 1, kind: input, shape index: {}]   ;;  %s984_s4 = inlined_call_operand.vmem [shape: f32[128,32], index: 4, kind: output, shape index: {0}]   ;;  %s985_s2 = inlined_call_operand.vmem [shape: f32[1,32], index: 2, kind: input, shape index: {}]   ;;  %s986_s3 = inlined_call_operand.vmem [shape: f32[1,32], index: 3, kind: input, shape index: {}]   ;;  %s987_s5 = inlined_call_operand.vmem [shape: bf16[128,32], index: 5, kind: output, shape index: {1}]  }
   0x1   :  { %v19_v0 = vld [vmem:[%s982_s0] sm:$0xff]  ;;  %v21_v2 = vld [vmem:[%s982_s0 + $0x10] sm:$0xff]  ;;  %v20_v5 = vld [vmem:[%s982_s0 + $0x8] sm:$0xff] }
   0x2   :  { %v35_v1 = vld [vmem:[%s983_s1] sm:$0xff]  ;;  %v37_v4 = vld [vmem:[%s983_s1 + $0x10] sm:$0xff]  ;;  %v36_v6 = vld [vmem:[%s983_s1 + $0x8] sm:$0xff] }
   0x3   :  { %v533_v3 = vadd.f32 %v35_v1, %v19_v0  ;;  %v544_v7 = vadd.f32 %v37_v4, %v21_v2  ;;  %v546_v8 = vadd.f32 %v36_v6, %v20_v5  ;;  %v22_v9 = vld [vmem:[%s982_s0 + $0x18] sm:$0xff]  ;;  %v23_v11 = vld [vmem:[%s982_s0 + $0x20] sm:$0xff]  ;;  %v24_v15 = vld [vmem:[%s982_s0 + $0x28] sm:$0xff] }
   0x4   :  { %v38_v10 = vld [vmem:[%s983_s1 + $0x18] sm:$0xff]  ;;  %v39_v14 = vld [vmem:[%s983_s1 + $0x20] sm:$0xff]  ;;  %v40_v16 = vld [vmem:[%s983_s1 + $0x28] sm:$0xff] }
   0x5   :  { %v84_v12 = vsel %vm67_vm0, %v533_v3, 0.0  ;;  %68 = vst.msk [vmem:[%s984_s4] sm:$0xff] %vm67_vm0, %v533_v3  ;;  %v564_v13 = vadd.f32 %v38_v10, %v22_v9  ;;  %v90_v17 = vsel %vm67_vm0, %v544_v7, 0.0  ;;  %70 = vst.msk [vmem:[%s984_s4 + $0x10] sm:$0xff] %vm67_vm0, %v544_v7  ;;  %v587_v18 = vadd.f32 %v39_v14, %v23_v11  ;;  %v25_v20 = vld [vmem:[%s982_s0 + $0x30] sm:$0xff]  ;;  %v26_v22 = vld [vmem:[%s982_s0 + $0x38] sm:$0xff] }
   0x6   :  { %85 = vadd.xlane.f32.xlu0 %v84_v12  ;;  %69 = vst.msk [vmem:[%s984_s4 + $0x8] sm:$0xff] %vm67_vm0, %v546_v8  ;;  %v589_v19 = vadd.f32 %v40_v16, %v24_v15  ;;  %v41_v21 = vld [vmem:[%s983_s1 + $0x30] sm:$0xff]  ;;  %91 = vadd.xlane.f32.xlu1 %v90_v17  ;;  %v87_v23 = vsel %vm67_vm0, %v546_v8, 0.0  ;;  %v42_v25 = vld [vmem:[%s983_s1 + $0x38] sm:$0xff]  ;;  %v27_v26 = vld [vmem:[%s982_s0 + $0x40] sm:$0xff] }
   0x7   :  { %71 = vst.msk [vmem:[%s984_s4 + $0x18] sm:$0xff] %vm67_vm0, %v564_v13  ;;  %v607_v24 = vadd.f32 %v41_v21, %v25_v20  ;;  %v43_v27 = vld [vmem:[%s983_s1 + $0x40] sm:$0xff]  ;;  %v93_v28 = vsel %vm67_vm0, %v564_v13, 0.0  ;;  %72 = vst.msk [vmem:[%s984_s4 + $0x20] sm:$0xff] %vm67_vm0, %v587_v18  ;;  %v630_v29 = vadd.f32 %v42_v25, %v26_v22  ;;  %v28_v31 = vld [vmem:[%s982_s0 + $0x48] sm:$0xff]  ;;  %v96_v43 = vsel %vm67_vm0, %v587_v18, 0.0 }
   0x8   :  { %73 = vst.msk [vmem:[%s984_s4 + $0x28] sm:$0xff] %vm67_vm0, %v589_v19  ;;  %v632_v30 = vadd.f32 %v43_v27, %v27_v26  ;;  %v44_v32 = vld [vmem:[%s983_s1 + $0x48] sm:$0xff]  ;;  %v29_v33 = vld [vmem:[%s982_s0 + $0x50] sm:$0xff]  ;;  %v30_v36 = vld [vmem:[%s982_s0 + $0x58] sm:$0xff]  ;;  %v99_v48 = vsel %vm67_vm0, %v589_v19, 0.0 }
   0x9   :  { %74 = vst.msk [vmem:[%s984_s4 + $0x30] sm:$0xff] %vm67_vm0, %v607_v24  ;;  %v648_v34 = vadd.f32 %v44_v32, %v28_v31  ;;  %v45_v35 = vld [vmem:[%s983_s1 + $0x50] sm:$0xff]  ;;  %v46_v37 = vld [vmem:[%s983_s1 + $0x58] sm:$0xff]  ;;  %75 = vst.msk [vmem:[%s984_s4 + $0x38] sm:$0xff] %vm67_vm0, %v630_v29  ;;  %v102_v54 = vsel %vm67_vm0, %v607_v24, 0.0  ;;  %v105_v55 = vsel %vm67_vm0, %v630_v29, 0.0 }
   0xa   :  { %88 = vadd.xlane.f32.xlu0 %v87_v23  ;;  %76 = vst.msk [vmem:[%s984_s4 + $0x40] sm:$0xff] %vm67_vm0, %v632_v30  ;;  %v669_v38 = vadd.f32 %v45_v35, %v29_v33  ;;  %v671_v39 = vadd.f32 %v46_v37, %v30_v36  ;;  %v31_v40 = vld [vmem:[%s982_s0 + $0x60] sm:$0xff]  ;;  %v32_v42 = vld [vmem:[%s982_s0 + $0x68] sm:$0xff]  ;;  %94 = vadd.xlane.f32.xlu1 %v93_v28  ;;  %v33_v46 = vld [vmem:[%s982_s0 + $0x70] sm:$0xff]  ;;  %v108_v56 = vsel %vm67_vm0, %v632_v30, 0.0 }
   0xb   :  { %v47_v41 = vld [vmem:[%s983_s1 + $0x60] sm:$0xff]  ;;  %77 = vst.msk [vmem:[%s984_s4 + $0x48] sm:$0xff] %vm67_vm0, %v648_v34  ;;  %v48_v45 = vld [vmem:[%s983_s1 + $0x68] sm:$0xff]  ;;  %v49_v47 = vld [vmem:[%s983_s1 + $0x70] sm:$0xff]  ;;  %v111_v57 = vsel %vm67_vm0, %v648_v34, 0.0 }
   0xc   :  { %v689_v44 = vadd.f32 %v47_v41, %v31_v40  ;;  %78 = vst.msk [vmem:[%s984_s4 + $0x50] sm:$0xff] %vm67_vm0, %v669_v38  ;;  %79 = vst.msk [vmem:[%s984_s4 + $0x58] sm:$0xff] %vm67_vm0, %v671_v39  ;;  %v712_v49 = vadd.f32 %v48_v45, %v32_v42  ;;  %v714_v50 = vadd.f32 %v49_v47, %v33_v46  ;;  %v34_v51 = vld [vmem:[%s982_s0 + $0x78] sm:$0xff]  ;;  %v114_v58 = vsel %vm67_vm0, %v669_v38, 0.0 }
   0xd   :  { %v50_v52 = vld [vmem:[%s983_s1 + $0x78] sm:$0xff]  ;;  %v117_v59 = vsel %vm67_vm0, %v671_v39, 0.0 }
   0xe   :  { %80 = vst.msk [vmem:[%s984_s4 + $0x60] sm:$0xff] %vm67_vm0, %v689_v44  ;;  %v727_v53 = vadd.f32 %v50_v52, %v34_v51  ;;  %97 = vadd.xlane.f32.xlu0 %v96_v43  ;;  %81 = vst.msk [vmem:[%s984_s4 + $0x68] sm:$0xff] %vm67_vm0, %v712_v49  ;;  %100 = vadd.xlane.f32.xlu1 %v99_v48  ;;  %v120_v60 = vsel %vm67_vm0, %v689_v44, 0.0  ;;  %v123_v61 = vsel %vm67_vm0, %v712_v49, 0.0  ;;  %v126_v62 = vsel %vm67_vm0, %v714_v50, 0.0 }
   0xf   :  { %82 = vst.msk [vmem:[%s984_s4 + $0x70] sm:$0xff] %vm67_vm0, %v714_v50 }
  0x10   :  { %83 = vst.msk [vmem:[%s984_s4 + $0x78] sm:$0xff] %vm67_vm0, %v727_v53  ;;  %v129_v63 = vsel %vm67_vm0, %v727_v53, 0.0 }
  0x12   :  { %103 = vadd.xlane.f32.xlu0 %v102_v54  ;;  %106 = vadd.xlane.f32.xlu1 %v105_v55 }
  0x16   :  { %109 = vadd.xlane.f32.xlu0 %v108_v56  ;;  %112 = vadd.xlane.f32.xlu1 %v111_v57 }
  0x1a   :  { %115 = vadd.xlane.f32.xlu0 %v114_v58  ;;  %118 = vadd.xlane.f32.xlu1 %v117_v59 }
  0x1e   :  { %121 = vadd.xlane.f32.xlu0 %v120_v60  ;;  %124 = vadd.xlane.f32.xlu1 %v123_v61 }
  0x22   :  { %127 = vadd.xlane.f32.xlu0 %v126_v62  ;;  %130 = vadd.xlane.f32.xlu1 %v129_v63 }
  0x8f   :  { %v86_v0 = vpop.xlane.xlu0 %85  ;;  %v92_v2 = vpop.xlane.xlu1 %91 }
  0x90   :  { %v133_v1 = vmul.f32 0.03125, %v86_v0  ;;  %v135_v4 = vmul.f32 0.03125, %v92_v2 }
  0x92   :  { %v765_v5 = vsub.f32 %v533_v3, %v133_v1  ;;  %v768_v6 = vsub.f32 %v544_v7, %v135_v4 }
  0x93   :  { %v89_v9 = vpop.xlane.xlu0 %88  ;;  %v95_v11 = vpop.xlane.xlu1 %94 }
  0x94   :  { %v134_v10 = vmul.f32 0.03125, %v89_v9  ;;  %v165_v12 = vmul.f32 %v765_v5, %v765_v5  ;;  %v136_v14 = vmul.f32 0.03125, %v95_v11  ;;  %v167_v15 = vmul.f32 %v768_v6, %v768_v6 }
  0x96   :  { %v775_v16 = vsub.f32 %v546_v8, %v134_v10  ;;  %v181_v17 = vsel %vm67_vm0, %v165_v12, 0.0  ;;  %v779_v3 = vsub.f32 %v564_v13, %v136_v14  ;;  %v187_v22 = vsel %vm67_vm0, %v167_v15, 0.0 }
  0x97   :  { %182 = vadd.xlane.f32.xlu0 %v181_v17  ;;  %v98_v7 = vpop.xlane.xlu0 %97  ;;  %v101_v21 = vpop.xlane.xlu1 %100 }
  0x98   :  { %v137_v20 = vmul.f32 0.03125, %v98_v7  ;;  %v166_v23 = vmul.f32 %v775_v16, %v775_v16  ;;  %v138_v25 = vmul.f32 0.03125, %v101_v21  ;;  %v168_v26 = vmul.f32 %v779_v3, %v779_v3 }
  0x9a   :  { %v787_v8 = vsub.f32 %v587_v18, %v137_v20  ;;  %v184_v27 = vsel %vm67_vm0, %v166_v23, 0.0  ;;  %v791_v13 = vsub.f32 %v589_v19, %v138_v25  ;;  %v190_v33 = vsel %vm67_vm0, %v168_v26, 0.0 }
  0x9b   :  { %188 = vadd.xlane.f32.xlu0 %v187_v22  ;;  %185 = vadd.xlane.f32.xlu1 %v184_v27  ;;  %v104_v28 = vpop.xlane.xlu0 %103  ;;  %v107_v32 = vpop.xlane.xlu1 %106 }
  0x9c   :  { %v139_v31 = vmul.f32 0.03125, %v104_v28  ;;  %v169_v35 = vmul.f32 %v787_v8, %v787_v8  ;;  %v140_v36 = vmul.f32 0.03125, %v107_v32  ;;  %v170_v18 = vmul.f32 %v791_v13, %v791_v13 }
  0x9e   :  { %v799_v37 = vsub.f32 %v607_v24, %v139_v31  ;;  %v193_v19 = vsel %vm67_vm0, %v169_v35, 0.0  ;;  %v803_v40 = vsub.f32 %v630_v29, %v140_v36  ;;  %v196_v45 = vsel %vm67_vm0, %v170_v18, 0.0 }
  0x9f   :  { %191 = vadd.xlane.f32.xlu1 %v190_v33  ;;  %194 = vadd.xlane.f32.xlu0 %v193_v19  ;;  %v110_v41 = vpop.xlane.xlu0 %109  ;;  %v113_v43 = vpop.xlane.xlu1 %112 }
  0xa0   :  { %v141_v42 = vmul.f32 0.03125, %v110_v41  ;;  %v171_v46 = vmul.f32 %v799_v37, %v799_v37  ;;  %v142_v47 = vmul.f32 0.03125, %v113_v43  ;;  %v172_v24 = vmul.f32 %v803_v40, %v803_v40 }
  0xa2   :  { %v811_v48 = vsub.f32 %v632_v30, %v141_v42  ;;  %v199_v29 = vsel %vm67_vm0, %v171_v46, 0.0  ;;  %v815_v51 = vsub.f32 %v648_v34, %v142_v47  ;;  %v202_v56 = vsel %vm67_vm0, %v172_v24, 0.0 }
  0xa3   :  { %197 = vadd.xlane.f32.xlu1 %v196_v45  ;;  %200 = vadd.xlane.f32.xlu0 %v199_v29  ;;  %v116_v52 = vpop.xlane.xlu0 %115  ;;  %v119_v55 = vpop.xlane.xlu1 %118 }
  0xa4   :  { %v143_v54 = vmul.f32 0.03125, %v116_v52  ;;  %v173_v57 = vmul.f32 %v811_v48, %v811_v48  ;;  %v144_v58 = vmul.f32 0.03125, %v119_v55  ;;  %v174_v30 = vmul.f32 %v815_v51, %v815_v51 }
  0xa6   :  { %v823_v59 = vsub.f32 %v669_v38, %v143_v54  ;;  %v205_v34 = vsel %vm67_vm0, %v173_v57, 0.0  ;;  %v827_v60 = vsub.f32 %v671_v39, %v144_v58  ;;  %v208_v0 = vsel %vm67_vm0, %v174_v30, 0.0 }
  0xa7   :  { %203 = vadd.xlane.f32.xlu1 %v202_v56  ;;  %206 = vadd.xlane.f32.xlu0 %v205_v34  ;;  %v122_v61 = vpop.xlane.xlu0 %121  ;;  %v125_v63 = vpop.xlane.xlu1 %124  ;;  %v863_v34 = vld [vmem:[%s985_s2] ss:$0 sm:$0xff] }
  0xa8   :  { %v145_v62 = vmul.f32 0.03125, %v122_v61  ;;  %v175_v1 = vmul.f32 %v823_v59, %v823_v59  ;;  %v146_v2 = vmul.f32 0.03125, %v125_v63  ;;  %v176_v38 = vmul.f32 %v827_v60, %v827_v60 }
  0xaa   :  { %v835_v4 = vsub.f32 %v689_v44, %v145_v62  ;;  %v211_v39 = vsel %vm67_vm0, %v175_v1, 0.0  ;;  %v839_v9 = vsub.f32 %v712_v49, %v146_v2  ;;  %v214_v14 = vsel %vm67_vm0, %v176_v38, 0.0 }
  0xab   :  { %209 = vadd.xlane.f32.xlu1 %v208_v0  ;;  %212 = vadd.xlane.f32.xlu0 %v211_v39  ;;  %v128_v10 = vpop.xlane.xlu0 %127  ;;  %v131_v12 = vpop.xlane.xlu1 %130  ;;  %v869_v0 = vld [vmem:[%s986_s3] ss:$0 sm:$0xff] }
  0xac   :  { %v147_v11 = vmul.f32 0.03125, %v128_v10  ;;  %v177_v15 = vmul.f32 %v835_v4, %v835_v4  ;;  %v148_v17 = vmul.f32 0.03125, %v131_v12  ;;  %v178_v44 = vmul.f32 %v839_v9, %v839_v9 }
  0xae   :  { %v847_v7 = vsub.f32 %v714_v50, %v147_v11  ;;  %v217_v49 = vsel %vm67_vm0, %v177_v15, 0.0  ;;  %v851_v20 = vsub.f32 %v727_v53, %v148_v17  ;;  %v220_v21 = vsel %vm67_vm0, %v178_v44, 0.0 }
  0xaf   :  { %215 = vadd.xlane.f32.xlu1 %v214_v14  ;;  %218 = vadd.xlane.f32.xlu0 %v217_v49 }
  0xb0   :  { %v179_v22 = vmul.f32 %v847_v7, %v847_v7  ;;  %v180_v23 = vmul.f32 %v851_v20, %v851_v20 }
  0xb2   :  { %v223_v25 = vsel %vm67_vm0, %v179_v22, 0.0  ;;  %v226_v50 = vsel %vm67_vm0, %v180_v23, 0.0 }
  0xb3   :  { %221 = vadd.xlane.f32.xlu1 %v220_v21  ;;  %224 = vadd.xlane.f32.xlu0 %v223_v25 }
  0xb7   :  { %227 = vadd.xlane.f32.xlu1 %v226_v50 }
 0x120   :  { %v183_v26 = vpop.xlane.xlu0 %182 }
 0x121   :  { %v229_v53 = vmul.f32 0.03125, %v183_v26 }
 0x123   :  { %v245_v27 = vadd.f32 1e-05, %v229_v53 }
 0x124   :  { %v186_v28 = vpop.xlane.xlu1 %185  ;;  %v189_v31 = vpop.xlane.xlu0 %188 }
 0x125   :  { %462 = vrsqrt.f32 %v245_v27  ;;  %v230_v32 = vmul.f32 0.03125, %v186_v28  ;;  %v231_v33 = vmul.f32 0.03125, %v189_v31 }
 0x127   :  { %v246_v35 = vadd.f32 1e-05, %v230_v32  ;;  %v247_v36 = vadd.f32 1e-05, %v231_v33 }
 0x128   :  { %v192_v18 = vpop.xlane.xlu1 %191  ;;  %v195_v19 = vpop.xlane.xlu0 %194 }
 0x129   :  { %464 = vrsqrt.f32 %v246_v35  ;;  %v232_v41 = vmul.f32 0.03125, %v192_v18  ;;  %v233_v42 = vmul.f32 0.03125, %v195_v19 }
 0x12a   :  { %466 = vrsqrt.f32 %v247_v36 }
 0x12b   :  { %v248_v43 = vadd.f32 1e-05, %v232_v41  ;;  %v249_v45 = vadd.f32 1e-05, %v233_v42 }
 0x12c   :  { %v198_v46 = vpop.xlane.xlu1 %197  ;;  %v201_v47 = vpop.xlane.xlu0 %200 }
 0x12d   :  { %468 = vrsqrt.f32 %v248_v43  ;;  %v234_v24 = vmul.f32 0.03125, %v198_v46  ;;  %v235_v29 = vmul.f32 0.03125, %v201_v47 }
 0x12e   :  { %470 = vrsqrt.f32 %v249_v45 }
 0x12f   :  { %v250_v52 = vadd.f32 1e-05, %v234_v24  ;;  %v251_v54 = vadd.f32 1e-05, %v235_v29 }
 0x130   :  { %v204_v55 = vpop.xlane.xlu1 %203  ;;  %v207_v56 = vpop.xlane.xlu0 %206 }
 0x131   :  { %472 = vrsqrt.f32 %v250_v52  ;;  %v236_v57 = vmul.f32 0.03125, %v204_v55  ;;  %v237_v58 = vmul.f32 0.03125, %v207_v56 }
 0x132   :  { %v463_v30 = vpop.eup %462  ;;  %474 = vrsqrt.f32 %v251_v54 }
 0x133   :  { %v277_v61 = vmul.f32 %v463_v30, %v765_v5  ;;  %v252_v62 = vadd.f32 1e-05, %v236_v57  ;;  %v253_v63 = vadd.f32 1e-05, %v237_v58 }
 0x134   :  { %v210_v1 = vpop.xlane.xlu1 %209  ;;  %v213_v2 = vpop.xlane.xlu0 %212 }
 0x135   :  { %v300_v38 = vmul.f32 %v863_v34, %v277_v61  ;;  %476 = vrsqrt.f32 %v252_v62  ;;  %v238_v39 = vmul.f32 0.03125, %v210_v1  ;;  %v239_v10 = vmul.f32 0.03125, %v213_v2 }
 0x136   :  { %v465_v11 = vpop.eup %464  ;;  %478 = vrsqrt.f32 %v253_v63 }
 0x137   :  { %v467_v12 = vpop.eup %466  ;;  %v323_v14 = vadd.f32 %v869_v0, %v300_v38  ;;  %v278_v5 = vmul.f32 %v465_v11, %v775_v16  ;;  %v254_v15 = vadd.f32 1e-05, %v238_v39  ;;  %v255_v17 = vadd.f32 1e-05, %v239_v10 }
 0x138   :  { %v279_v44 = vmul.f32 %v467_v12, %v768_v6  ;;  %v216_v49 = vpop.xlane.xlu1 %215  ;;  %v219_v21 = vpop.xlane.xlu0 %218 }
 0x139   :  { %v446_v22 = vpack.c.bf16 %v323_v14, %v323_v14  ;;  %v301_v23 = vmul.f32 %v863_v34, %v278_v5  ;;  %480 = vrsqrt.f32 %v254_v15  ;;  %v240_v25 = vmul.f32 0.03125, %v216_v49 }
 0x13a   :  { %v469_v50 = vpop.eup %468  ;;  %v302_v26 = vmul.f32 %v863_v34, %v279_v44  ;;  %482 = vrsqrt.f32 %v255_v17  ;;  %v241_v53 = vmul.f32 0.03125, %v219_v21 }
 0x13b   :  { %v471_v27 = vpop.eup %470  ;;  %404 = vst.msk [vmem:[%s987_s5] sm:$0xf] %vm403_vm1, %v446_v22  ;;  %v324_v6 = vadd.f32 %v869_v0, %v301_v23  ;;  %v280_v16 = vmul.f32 %v469_v50, %v779_v3  ;;  %v256_v28 = vadd.f32 1e-05, %v240_v25 }
 0x13c   :  { %v325_v31 = vadd.f32 %v869_v0, %v302_v26  ;;  %v281_v32 = vmul.f32 %v471_v27, %v787_v8  ;;  %v257_v33 = vadd.f32 1e-05, %v241_v53  ;;  %v222_v35 = vpop.xlane.xlu1 %221  ;;  %v225_v36 = vpop.xlane.xlu0 %224 }
 0x13d   :  { %v447_v18 = vpack.c.bf16 %v324_v6, %v324_v6  ;;  %v303_v19 = vmul.f32 %v863_v34, %v280_v16  ;;  %484 = vrsqrt.f32 %v256_v28  ;;  %v242_v41 = vmul.f32 0.03125, %v222_v35 }
 0x13e   :  { %v473_v42 = vpop.eup %472  ;;  %v448_v43 = vpack.c.bf16 %v325_v31, %v325_v31  ;;  %v304_v45 = vmul.f32 %v863_v34, %v281_v32  ;;  %486 = vrsqrt.f32 %v257_v33  ;;  %v243_v46 = vmul.f32 0.03125, %v225_v36 }
 0x13f   :  { %v475_v3 = vpop.eup %474  ;;  %405 = vst.msk [vmem:[%s987_s5 + $0x4] sm:$0xf] %vm403_vm1, %v447_v18  ;;  %v326_v8 = vadd.f32 %v869_v0, %v303_v19  ;;  %v282_v47 = vmul.f32 %v473_v42, %v791_v13  ;;  %v258_v24 = vadd.f32 1e-05, %v242_v41 }
 0x140   :  { %406 = vst.msk [vmem:[%s987_s5 + $0x8] sm:$0xf] %vm403_vm1, %v448_v43  ;;  %v327_v29 = vadd.f32 %v869_v0, %v304_v45  ;;  %v283_v52 = vmul.f32 %v475_v3, %v799_v37  ;;  %v259_v54 = vadd.f32 1e-05, %v243_v46  ;;  %v228_v55 = vpop.xlane.xlu1 %227 }
 0x141   :  { %v449_v56 = vpack.c.bf16 %v326_v8, %v326_v8  ;;  %v305_v57 = vmul.f32 %v863_v34, %v282_v47  ;;  %488 = vrsqrt.f32 %v258_v24  ;;  %v244_v58 = vmul.f32 0.03125, %v228_v55 }
 0x142   :  { %v477_v30 = vpop.eup %476  ;;  %v450_v61 = vpack.c.bf16 %v327_v29, %v327_v29  ;;  %v306_v13 = vmul.f32 %v863_v34, %v283_v52  ;;  %490 = vrsqrt.f32 %v259_v54 }
 0x143   :  { %v479_v62 = vpop.eup %478  ;;  %407 = vst.msk [vmem:[%s987_s5 + $0xc] sm:$0xf] %vm403_vm1, %v449_v56  ;;  %v328_v37 = vadd.f32 %v869_v0, %v305_v57  ;;  %v284_v63 = vmul.f32 %v477_v30, %v803_v40  ;;  %v260_v1 = vadd.f32 1e-05, %v244_v58 }
 0x144   :  { %408 = vst.msk [vmem:[%s987_s5 + $0x10] sm:$0xf] %vm403_vm1, %v450_v61  ;;  %v329_v2 = vadd.f32 %v869_v0, %v306_v13  ;;  %v285_v38 = vmul.f32 %v479_v62, %v811_v48 }
 0x145   :  { %v451_v39 = vpack.c.bf16 %v328_v37, %v328_v37  ;;  %v307_v10 = vmul.f32 %v863_v34, %v284_v63  ;;  %492 = vrsqrt.f32 %v260_v1 }
 0x146   :  { %v481_v11 = vpop.eup %480  ;;  %v452_v12 = vpack.c.bf16 %v329_v2, %v329_v2  ;;  %v308_v14 = vmul.f32 %v863_v34, %v285_v38 }
 0x147   :  { %v483_v5 = vpop.eup %482  ;;  %409 = vst.msk [vmem:[%s987_s5 + $0x14] sm:$0xf] %vm403_vm1, %v451_v39  ;;  %v330_v40 = vadd.f32 %v869_v0, %v307_v10  ;;  %v286_v15 = vmul.f32 %v481_v11, %v815_v51 }
 0x148   :  { %410 = vst.msk [vmem:[%s987_s5 + $0x18] sm:$0xf] %vm403_vm1, %v452_v12  ;;  %v331_v48 = vadd.f32 %v869_v0, %v308_v14  ;;  %v287_v17 = vmul.f32 %v483_v5, %v823_v59 }
 0x149   :  { %v453_v44 = vpack.c.bf16 %v330_v40, %v330_v40  ;;  %v309_v49 = vmul.f32 %v863_v34, %v286_v15 }
 0x14a   :  { %v485_v21 = vpop.eup %484  ;;  %v454_v22 = vpack.c.bf16 %v331_v48, %v331_v48  ;;  %v310_v23 = vmul.f32 %v863_v34, %v287_v17 }
 0x14b   :  { %v487_v25 = vpop.eup %486  ;;  %411 = vst.msk [vmem:[%s987_s5 + $0x1c] sm:$0xf] %vm403_vm1, %v453_v44  ;;  %v332_v51 = vadd.f32 %v869_v0, %v309_v49  ;;  %v288_v50 = vmul.f32 %v485_v21, %v827_v60 }
 0x14c   :  { %412 = vst.msk [vmem:[%s987_s5 + $0x20] sm:$0xf] %vm403_vm1, %v454_v22  ;;  %v333_v59 = vadd.f32 %v869_v0, %v310_v23  ;;  %v289_v26 = vmul.f32 %v487_v25, %v835_v4 }
 0x14d   :  { %v455_v53 = vpack.c.bf16 %v332_v51, %v332_v51  ;;  %v311_v27 = vmul.f32 %v863_v34, %v288_v50 }
 0x14e   :  { %v489_v6 = vpop.eup %488  ;;  %v456_v16 = vpack.c.bf16 %v333_v59, %v333_v59  ;;  %v312_v28 = vmul.f32 %v863_v34, %v289_v26 }
 0x14f   :  { %v491_v31 = vpop.eup %490  ;;  %413 = vst.msk [vmem:[%s987_s5 + $0x24] sm:$0xf] %vm403_vm1, %v455_v53  ;;  %v334_v60 = vadd.f32 %v869_v0, %v311_v27  ;;  %v290_v32 = vmul.f32 %v489_v6, %v839_v9 }
 0x150   :  { %414 = vst.msk [vmem:[%s987_s5 + $0x28] sm:$0xf] %vm403_vm1, %v456_v16  ;;  %v335_v4 = vadd.f32 %v869_v0, %v312_v28  ;;  %v291_v33 = vmul.f32 %v491_v31, %v847_v7 }
 0x151   :  { %v457_v35 = vpack.c.bf16 %v334_v60, %v334_v60  ;;  %v313_v36 = vmul.f32 %v863_v34, %v290_v32 }
 0x152   :  { %v493_v18 = vpop.eup %492  ;;  %v458_v19 = vpack.c.bf16 %v335_v4, %v335_v4  ;;  %v314_v41 = vmul.f32 %v863_v34, %v291_v33 }
 0x153   :  { %415 = vst.msk [vmem:[%s987_s5 + $0x2c] sm:$0xf] %vm403_vm1, %v457_v35  ;;  %v336_v9 = vadd.f32 %v869_v0, %v313_v36  ;;  %v292_v42 = vmul.f32 %v493_v18, %v851_v20 }
 0x154   :  { %416 = vst.msk [vmem:[%s987_s5 + $0x30] sm:$0xf] %vm403_vm1, %v458_v19  ;;  %v337_v7 = vadd.f32 %v869_v0, %v314_v41 }
 0x155   :  { %v459_v43 = vpack.c.bf16 %v336_v9, %v336_v9  ;;  %v315_v45 = vmul.f32 %v863_v34, %v292_v42 }
 0x156   :  { %v460_v46 = vpack.c.bf16 %v337_v7, %v337_v7 }
 0x157   :  { %417 = vst.msk [vmem:[%s987_s5 + $0x34] sm:$0xf] %vm403_vm1, %v459_v43  ;;  %v338_v3 = vadd.f32 %v869_v0, %v315_v45 }
 0x158   :  { %418 = vst.msk [vmem:[%s987_s5 + $0x38] sm:$0xf] %vm403_vm1, %v460_v46 }
 0x159   :  { %v461_v20 = vpack.c.bf16 %v338_v3, %v338_v3 }
 0x15b   :  { %419 = vst.msk [vmem:[%s987_s5 + $0x3c] sm:$0xf] %vm403_vm1, %v461_v20 }

// kernel: _lambda_.42
= control target key start
LH: loop header
LB: loop body
LE: loop exit
PB: predicated region body
PF: predicated region fallthrough
CT: control target
= control target key end

     0   :  { %vm123_vm0 = vcmask 261120   ;;  %s936_s1 = inlined_call_operand.vmem [shape: bf16[32,128], index: 1, kind: input, shape index: {}]   ;;  %s937_s0 = inlined_call_operand.vmem [shape: bf16[128,32], index: 0, kind: input, shape index: {}]   ;;  %s938_s2 = inlined_call_operand.vmem [shape: f32[1,128], index: 2, kind: input, shape index: {}]   ;;  %s939_s3 = inlined_call_operand.vmem [shape: bf16[128,128], index: 3, kind: output, shape index: {}]  }
   0x1   :  { %v679_v0 = vld [vmem:[%s936_s1 + $0x8] sm:$0xff]   ;;  %v680_v1 = vld [vmem:[%s936_s1] sm:$0xff]   ;;  %v685_v6 = vld [vmem:[%s937_s0 + $0x10] sm:$0xff]  }
   0x2   :  { %655 = vmatprep.subr.bf16.mxu0 %v679_v0  ;;  %675 = vmatprep.subr.bf16.mxu1 %v679_v0  ;;  %v681_v2 = vld [vmem:[%s937_s0] sm:$0xff]   ;;  %v683_v4 = vld [vmem:[%s937_s0 + $0x8] sm:$0xff]   ;;  %v686_v7 = vld [vmem:[%s937_s0 + $0x30] sm:$0xff]  }
   0x3   :  { %656 = vmatpush3.bf16.msra.mxu0 %v679_v0  ;;  %677 = vmatpush3.bf16.msra.mxu1 %v679_v0  ;;  %v682_v3 = vld [vmem:[%s937_s0 + $0x20] sm:$0xff]   ;;  %v684_v5 = vld [vmem:[%s937_s0 + $0x28] sm:$0xff]   ;;  %v687_v8 = vld [vmem:[%s937_s0 + $0x18] sm:$0xff]  }
   0x4   :  { %657 = vmatprep.subr.bf16.mxu0 %v680_v1  ;;  %676 = vmatprep.subr.bf16.mxu1 %v680_v1  ;;  %v688_v9 = vld [vmem:[%s937_s0 + $0x38] sm:$0xff]   ;;  %v782_v10 = vld [vmem:[%s938_s2] ss:$0 sm:$0xff] }
   0x5   :  { %659 = vmatprep.mubr.msk.bf16.mxu0 %vm123_vm0, %v681_v2  ;;  %667 = vmatprep.mubr.msk.bf16.mxu1 %vm123_vm0, %v682_v3 }
   0x7   :  { %658 = vmatpush3.bf16.msra.mxu0 %v680_v1  ;;  %678 = vmatpush3.bf16.msra.mxu1 %v680_v1 }
   0xa   :  { %660 = vmatmul.mubr.msk.bf16.vlgmr.msra.gmra.mxu0 %vm123_vm0, %v683_v4  ;;  %668 = vmatmul.mubr.msk.bf16.vlgmr.msra.gmra.mxu1 %vm123_vm0, %v684_v5 }
   0xb   :  { %663 = vmatprep.mubr.msk.bf16.mxu0 %vm123_vm0, %v685_v6  ;;  %671 = vmatprep.mubr.msk.bf16.mxu1 %vm123_vm0, %v686_v7 }
  0x12   :  { %664 = vmatmul.mubr.msk.bf16.gmra.mxu0 %vm123_vm0, %v687_v8  ;;  %672 = vmatmul.mubr.msk.bf16.gmra.mxu1 %vm123_vm0, %v688_v9 }
  0xca   :  { %v661_v11 = vpop.f32.mrf.mxu0  ;;  %v669_v12 = vpop.f32.mrf.mxu1 }
  0xcb   :  { %v785_v13 = vadd.f32 %v661_v11, %v782_v10  ;;  %v788_v14 = vadd.f32 %v669_v12, %v782_v10 }
  0xcc   :  { %v182_v15 = vpop.f32.mrf.mxu0  ;;  %v214_v16 = vpop.f32.mrf.mxu1 }
  0xcd   :  { %v337_v17 = vmul.f32 0.044715, %v785_v13  ;;  %v345_v18 = vmul.f32 0.044715, %v788_v14  ;;  %v793_v19 = vadd.f32 %v782_v10, %v182_v15  ;;  %v796_v20 = vadd.f32 %v782_v10, %v214_v16 }
  0xce   :  { %v662_v21 = vpop.f32.mrf.mxu0  ;;  %v670_v22 = vpop.f32.mrf.mxu1 }
  0xcf   :  { %v353_v23 = vmul.f32 %v337_v17, %v785_v13  ;;  %v361_v24 = vmul.f32 %v345_v18, %v788_v14  ;;  %v801_v25 = vadd.f32 %v662_v21, %v782_v10  ;;  %v804_v26 = vadd.f32 %v670_v22, %v782_v10 }
  0xd0   :  { %v335_v27 = vmul.f32 0.044715, %v793_v19  ;;  %v343_v28 = vmul.f32 0.044715, %v796_v20  ;;  %v185_v29 = vpop.f32.mrf.mxu0  ;;  %v217_v30 = vpop.f32.mrf.mxu1 }
  0xd1   :  { %v369_v31 = vmul.f32 %v353_v23, %v785_v13  ;;  %v377_v32 = vmul.f32 %v361_v24, %v788_v14  ;;  %v338_v33 = vmul.f32 0.044715, %v801_v25  ;;  %v346_v36 = vmul.f32 0.044715, %v804_v26 }
  0xd2   :  { %v351_v34 = vmul.f32 %v335_v27, %v793_v19  ;;  %v359_v35 = vmul.f32 %v343_v28, %v796_v20  ;;  %v818_v40 = vadd.f32 %v782_v10, %v185_v29  ;;  %v665_v41 = vpop.f32.mrf.mxu0  ;;  %v824_v45 = vadd.f32 %v782_v10, %v217_v30  ;;  %v673_v46 = vpop.f32.mrf.mxu1 }
  0xd3   :  { %v385_v37 = vadd.f32 %v369_v31, %v785_v13  ;;  %v393_v38 = vadd.f32 %v377_v32, %v788_v14  ;;  %v354_v39 = vmul.f32 %v338_v33, %v801_v25  ;;  %v362_v44 = vmul.f32 %v346_v36, %v804_v26 }
  0xd4   :  { %v367_v42 = vmul.f32 %v351_v34, %v793_v19  ;;  %v375_v43 = vmul.f32 %v359_v35, %v796_v20  ;;  %v336_v53 = vmul.f32 0.044715, %v818_v40  ;;  %v344_v55 = vmul.f32 0.044715, %v824_v45  ;;  %v198_v56 = vpop.f32.mrf.mxu0  ;;  %v230_v60 = vpop.f32.mrf.mxu1 }
  0xd5   :  { %v401_v47 = vmul.f32 0.7978846, %v385_v37  ;;  %v409_v48 = vmul.f32 0.7978846, %v393_v38  ;;  %v370_v49 = vmul.f32 %v354_v39, %v801_v25  ;;  %v378_v52 = vmul.f32 %v362_v44, %v804_v26 }
  0xd6   :  { %v383_v50 = vadd.f32 %v367_v42, %v793_v19  ;;  %v391_v51 = vadd.f32 %v375_v43, %v796_v20  ;;  %v352_v62 = vmul.f32 %v336_v53, %v818_v40  ;;  %v360_v63 = vmul.f32 %v344_v55, %v824_v45  ;;  %v666_v8 = vpop.f32.mrf.mxu0  ;;  %v674_v9 = vpop.f32.mrf.mxu1 }
  0xd7   :  { %689 = vtanh.f32 %v401_v47  ;;  %v386_v54 = vadd.f32 %v370_v49, %v801_v25  ;;  %v394_v59 = vadd.f32 %v378_v52, %v804_v26  ;;  %v837_v0 = vadd.f32 %v665_v41, %v782_v10 }
  0xd8   :  { %691 = vtanh.f32 %v409_v48  ;;  %v399_v57 = vmul.f32 0.7978846, %v383_v50  ;;  %v407_v58 = vmul.f32 0.7978846, %v391_v51  ;;  %v840_v2 = vadd.f32 %v673_v46, %v782_v10  ;;  %v201_v38 = vpop.f32.mrf.mxu0  ;;  %v233_v52 = vpop.f32.mrf.mxu1 }
  0xd9   :  { %v402_v61 = vmul.f32 0.7978846, %v386_v54  ;;  %v410_v1 = vmul.f32 0.7978846, %v394_v59  ;;  %v843_v3 = vadd.f32 %v782_v10, %v198_v56  ;;  %v368_v4 = vmul.f32 %v352_v62, %v818_v40 }
  0xda   :  { %693 = vtanh.f32 %v399_v57  ;;  %v376_v5 = vmul.f32 %v360_v63, %v824_v45  ;;  %v341_v6 = vmul.f32 0.044715, %v837_v0  ;;  %v349_v7 = vmul.f32 0.044715, %v840_v2 }
  0xdb   :  { %695 = vtanh.f32 %v407_v58  ;;  %v384_v11 = vadd.f32 %v368_v4, %v818_v40  ;;  %v339_v17 = vmul.f32 0.044715, %v843_v3  ;;  %v855_v18 = vadd.f32 %v782_v10, %v230_v60 }
  0xdc   :  { %697 = vtanh.f32 %v402_v61  ;;  %v392_v12 = vadd.f32 %v376_v5, %v824_v45  ;;  %v357_v15 = vmul.f32 %v341_v6, %v837_v0  ;;  %v365_v16 = vmul.f32 %v349_v7, %v840_v2 }
  0xdd   :  { %699 = vtanh.f32 %v410_v1  ;;  %v400_v21 = vmul.f32 0.7978846, %v384_v11  ;;  %v858_v23 = vadd.f32 %v666_v8, %v782_v10  ;;  %v861_v24 = vadd.f32 %v674_v9, %v782_v10 }
  0xde   :  { %v408_v22 = vmul.f32 0.7978846, %v392_v12  ;;  %v373_v27 = vmul.f32 %v357_v15, %v837_v0  ;;  %v381_v28 = vmul.f32 %v365_v16, %v840_v2  ;;  %v355_v29 = vmul.f32 %v339_v17, %v843_v3 }
  0xdf   :  { %701 = vtanh.f32 %v400_v21  ;;  %v347_v30 = vmul.f32 0.044715, %v855_v18  ;;  %v342_v31 = vmul.f32 0.044715, %v858_v23  ;;  %v350_v37 = vmul.f32 0.044715, %v861_v24 }
  0xe0   :  { %703 = vtanh.f32 %v408_v22  ;;  %v389_v32 = vadd.f32 %v373_v27, %v837_v0  ;;  %v397_v33 = vadd.f32 %v381_v28, %v840_v2  ;;  %v371_v34 = vmul.f32 %v355_v29, %v843_v3 }
  0xe1   :  { %v363_v35 = vmul.f32 %v347_v30, %v855_v18  ;;  %v358_v36 = vmul.f32 %v342_v31, %v858_v23  ;;  %v321_v43 = vmul.f32 0.5, %v785_v13  ;;  %v329_v44 = vmul.f32 0.5, %v788_v14 }
  0xe2   :  { %v405_v41 = vmul.f32 0.7978846, %v389_v32  ;;  %v366_v47 = vmul.f32 %v350_v37, %v861_v24  ;;  %v319_v48 = vmul.f32 0.5, %v793_v19  ;;  %v327_v49 = vmul.f32 0.5, %v796_v20 }
  0xe3   :  { %v374_v46 = vmul.f32 %v358_v36, %v858_v23  ;;  %v413_v50 = vmul.f32 0.7978846, %v397_v33  ;;  %v881_v51 = vadd.f32 %v782_v10, %v201_v38  ;;  %v387_v55 = vadd.f32 %v371_v34, %v843_v3 }
  0xe4   :  { %v690_v39 = vpop.eup %689  ;;  %v379_v13 = vmul.f32 %v363_v35, %v855_v18  ;;  %v322_v57 = vmul.f32 0.5, %v801_v25  ;;  %v330_v19 = vmul.f32 0.5, %v804_v26  ;;  %705 = vtanh.f32 %v405_v41 }
  0xe5   :  { %v692_v42 = vpop.eup %691  ;;  %v433_v54 = vadd.f32 1.0, %v690_v39  ;;  %v390_v14 = vadd.f32 %v374_v46, %v858_v23  ;;  %v382_v20 = vmul.f32 %v366_v47, %v861_v24  ;;  %v320_v60 = vmul.f32 0.5, %v818_v40 }
  0xe6   :  { %v441_v59 = vadd.f32 1.0, %v692_v42  ;;  %v891_v62 = vadd.f32 %v782_v10, %v233_v52  ;;  %707 = vtanh.f32 %v413_v50  ;;  %v340_v25 = vmul.f32 0.044715, %v881_v51 }
  0xe7   :  { %v694_v53 = vpop.eup %693  ;;  %v406_v61 = vmul.f32 0.7978846, %v390_v14  ;;  %v398_v4 = vadd.f32 %v382_v20, %v861_v24  ;;  %v449_v5 = vmul.f32 %v433_v54, %v321_v43  ;;  %v403_v6 = vmul.f32 0.7978846, %v387_v55 }
  0xe8   :  { %v696_v56 = vpop.eup %695  ;;  %v395_v7 = vadd.f32 %v379_v13, %v855_v18  ;;  %v356_v40 = vmul.f32 %v340_v25, %v881_v51  ;;  %v457_v11 = vmul.f32 %v441_v59, %v329_v44  ;;  %v431_v10 = vadd.f32 1.0, %v694_v53 }
  0xe9   :  { %v698_v58 = vpop.eup %697  ;;  %709 = vtanh.f32 %v406_v61  ;;  %v414_v9 = vmul.f32 0.7978846, %v398_v4  ;;  %v348_v15 = vmul.f32 0.044715, %v891_v62  ;;  %v439_v17 = vadd.f32 1.0, %v696_v56 }
  0xea   :  { %v700_v63 = vpop.eup %699  ;;  %v434_v1 = vadd.f32 1.0, %v698_v58  ;;  %v372_v22 = vmul.f32 %v356_v40, %v881_v51  ;;  %v411_v30 = vmul.f32 0.7978846, %v395_v7  ;;  %v328_v32 = vmul.f32 0.5, %v824_v45 }
  0xeb   :  { %v442_v26 = vadd.f32 1.0, %v700_v63  ;;  %711 = vtanh.f32 %v414_v9  ;;  %v364_v31 = vmul.f32 %v348_v15, %v891_v62  ;;  %v447_v35 = vmul.f32 %v431_v10, %v319_v48 }
  0xec   :  { %v450_v8 = vmul.f32 %v434_v1, %v322_v57  ;;  %v702_v16 = vpop.eup %701  ;;  %713 = vtanh.f32 %v403_v6  ;;  %v388_v34 = vadd.f32 %v372_v22, %v881_v51  ;;  %v455_v38 = vmul.f32 %v439_v17, %v327_v49 }
  0xed   :  { %v458_v12 = vmul.f32 %v442_v26, %v330_v19  ;;  %v704_v27 = vpop.eup %703  ;;  %v432_v29 = vadd.f32 1.0, %v702_v16  ;;  %v380_v37 = vmul.f32 %v364_v31, %v891_v62  ;;  %715 = vtanh.f32 %v411_v30 }
  0xee   :  { %v606_v21 = vpack.c.bf16 %v450_v8, %v449_v5  ;;  %v440_v33 = vadd.f32 1.0, %v704_v27  ;;  %v404_v41 = vmul.f32 0.7978846, %v388_v34  ;;  %v325_v50 = vmul.f32 0.5, %v837_v0 }
  0xef   :  { %v626_v28 = vpack.c.bf16 %v458_v12, %v457_v11  ;;  %v448_v36 = vmul.f32 %v432_v29, %v320_v60  ;;  %v396_v43 = vadd.f32 %v380_v37, %v891_v62  ;;  %v326_v53 = vmul.f32 0.5, %v858_v23 }
  0xf0   :  { %638 = vst [vmem:[%s939_s3 + $0x8] sm:$0xff] %v606_v21   ;;  %v456_v39 = vmul.f32 %v440_v33, %v328_v32  ;;  %717 = vtanh.f32 %v404_v41  ;;  %v333_v13 = vmul.f32 0.5, %v840_v2  ;;  %v334_v57 = vmul.f32 0.5, %v861_v24 }
  0xf1   :  { %642 = vst [vmem:[%s939_s3 + $0x28] sm:$0xff] %v626_v28   ;;  %v601_v42 = vpack.c.bf16 %v448_v36, %v447_v35  ;;  %v706_v44 = vpop.eup %705  ;;  %v412_v46 = vmul.f32 0.7978846, %v396_v43  ;;  %v323_v1 = vmul.f32 0.5, %v843_v3  ;;  %v324_v2 = vmul.f32 0.5, %v881_v51 }
  0xf2   :  { %v621_v45 = vpack.c.bf16 %v456_v39, %v455_v38  ;;  %v437_v48 = vadd.f32 1.0, %v706_v44  ;;  %v331_v6 = vmul.f32 0.5, %v855_v18  ;;  %v332_v7 = vmul.f32 0.5, %v891_v62 }
  0xf3   :  { %602 = vst [vmem:[%s939_s3] sm:$0xff] %v601_v42   ;;  %v708_v47 = vpop.eup %707  ;;  %719 = vtanh.f32 %v412_v46 }
  0xf4   :  { %641 = vst [vmem:[%s939_s3 + $0x20] sm:$0xff] %v621_v45   ;;  %v445_v52 = vadd.f32 1.0, %v708_v47  ;;  %v453_v14 = vmul.f32 %v437_v48, %v325_v50 }
  0xf6   :  { %v710_v49 = vpop.eup %709  ;;  %v461_v58 = vmul.f32 %v445_v52, %v333_v13 }
  0xf7   :  { %v438_v54 = vadd.f32 1.0, %v710_v49 }
  0xf8   :  { %v712_v55 = vpop.eup %711 }
  0xf9   :  { %v454_v56 = vmul.f32 %v438_v54, %v326_v53  ;;  %v446_v19 = vadd.f32 1.0, %v712_v55  ;;  %v714_v20 = vpop.eup %713 }
  0xfa   :  { %v716_v61 = vpop.eup %715  ;;  %v435_v63 = vadd.f32 1.0, %v714_v20 }
  0xfb   :  { %v616_v59 = vpack.c.bf16 %v454_v56, %v453_v14  ;;  %v462_v60 = vmul.f32 %v446_v19, %v334_v57  ;;  %v443_v4 = vadd.f32 1.0, %v716_v61 }
  0xfc   :  { %v451_v5 = vmul.f32 %v435_v63, %v323_v1 }
  0xfd   :  { %640 = vst [vmem:[%s939_s3 + $0x18] sm:$0xff] %v616_v59   ;;  %v636_v0 = vpack.c.bf16 %v462_v60, %v461_v58  ;;  %v718_v23 = vpop.eup %717  ;;  %v459_v40 = vmul.f32 %v443_v4, %v331_v6 }
  0xfe   :  { %v436_v24 = vadd.f32 1.0, %v718_v23 }
  0xff   :  { %644 = vst [vmem:[%s939_s3 + $0x38] sm:$0xff] %v636_v0  }
 0x100   :  { %v720_v25 = vpop.eup %719  ;;  %v452_v26 = vmul.f32 %v436_v24, %v324_v2 }
 0x101   :  { %v444_v8 = vadd.f32 1.0, %v720_v25 }
 0x102   :  { %v611_v9 = vpack.c.bf16 %v452_v26, %v451_v5 }
 0x103   :  { %v460_v11 = vmul.f32 %v444_v8, %v332_v7 }
 0x104   :  { %639 = vst [vmem:[%s939_s3 + $0x10] sm:$0xff] %v611_v9  }
 0x105   :  { %v631_v3 = vpack.c.bf16 %v460_v11, %v459_v40 }
 0x107   :  { %643 = vst [vmem:[%s939_s3 + $0x30] sm:$0xff] %v631_v3  }

// kernel: _lambda_.43
= control target key start
LH: loop header
LB: loop body
LE: loop exit
PB: predicated region body
PF: predicated region fallthrough
CT: control target
= control target key end

     0   :  { %vm22_vm0 = vcmask 261120   ;;  %v505_v1 = vmov 0.0   ;;  %s744_s1 = inlined_call_operand.vmem [shape: bf16[128,32], index: 1, kind: input, shape index: {}]   ;;  %s745_s0 = inlined_call_operand.vmem [shape: bf16[128,128], index: 0, kind: input, shape index: {}]   ;;  %s746_s2 = inlined_call_operand.vmem [shape: f32[1,32], index: 2, kind: input, shape index: {}]   ;;  %s747_s3 = inlined_call_operand.vmem [shape: f32[128,32], index: 3, kind: input, shape index: {}]   ;;  %s748_s4 = inlined_call_operand.vmem [shape: f32[128,32], index: 4, kind: output, shape index: {}]  }
   0x1   :  { %v489_v0 = vld [vmem:[%s744_s1 + $0x38] sm:$0xff]   ;;  %25 = vst.msk [vmem:[#allocation2 + $0x10] sm:$0xff] %vm22_vm0, %v505_v1  ;;  %23 = vst.msk [vmem:[#allocation2] sm:$0xff] %vm22_vm0, %v505_v1  ;;  %v490_v2 = vld [vmem:[%s744_s1 + $0x30] sm:$0xff]  }
   0x2   :  { %24 = vst.msk [vmem:[#allocation2 + $0x8] sm:$0xff] %vm22_vm0, %v505_v1  ;;  %26 = vst.msk [vmem:[#allocation2 + $0x18] sm:$0xff] %vm22_vm0, %v505_v1  ;;  %440 = vmatprep.subr.bf16.mxu0 %v489_v0  ;;  %472 = vmatprep.subr.bf16.mxu1 %v489_v0  ;;  %v491_v3 = vld [vmem:[%s744_s1 + $0x28] sm:$0xff]   ;;  %v492_v4 = vld [vmem:[%s744_s1 + $0x20] sm:$0xff]  }
   0x3   :  { %27 = vst.msk [vmem:[#allocation2 + $0x20] sm:$0xff] %vm22_vm0, %v505_v1  ;;  %28 = vst.msk [vmem:[#allocation2 + $0x28] sm:$0xff] %vm22_vm0, %v505_v1  ;;  %441 = vmatpush3.bf16.msra.mxu0 %v489_v0  ;;  %480 = vmatpush3.bf16.msra.mxu1 %v489_v0  ;;  %v497_v5 = vld [vmem:[%s745_s0] sm:$0xff]   ;;  %v493_v7 = vld [vmem:[%s744_s1 + $0x18] sm:$0xff]  }
   0x4   :  { %29 = vst.msk [vmem:[#allocation2 + $0x30] sm:$0xff] %vm22_vm0, %v505_v1  ;;  %30 = vst.msk [vmem:[#allocation2 + $0x38] sm:$0xff] %vm22_vm0, %v505_v1  ;;  %442 = vmatprep.subr.bf16.mxu0 %v490_v2  ;;  %473 = vmatprep.subr.bf16.mxu1 %v490_v2  ;;  %v498_v6 = vld [vmem:[%s745_s0 + $0x20] sm:$0xff]   ;;  %v494_v8 = vld [vmem:[%s744_s1 + $0x10] sm:$0xff]  }
   0x5   :  { %31 = vst.msk [vmem:[#allocation2 + $0x40] sm:$0xff] %vm22_vm0, %v505_v1  ;;  %32 = vst.msk [vmem:[#allocation2 + $0x48] sm:$0xff] %vm22_vm0, %v505_v1  ;;  %456 = vmatprep.mubr.bf16.mxu0 %v497_v5  ;;  %464 = vmatprep.mubr.bf16.mxu1 %v498_v6  ;;  %v495_v9 = vld [vmem:[%s744_s1 + $0x8] sm:$0xff]   ;;  %v496_v10 = vld [vmem:[%s744_s1] sm:$0xff]  }
   0x6   :  { %33 = vst.msk [vmem:[#allocation2 + $0x50] sm:$0xff] %vm22_vm0, %v505_v1  ;;  %34 = vst.msk [vmem:[#allocation2 + $0x58] sm:$0xff] %vm22_vm0, %v505_v1  ;;  %v499_v11 = vld [vmem:[%s745_s0 + $0x8] sm:$0xff]   ;;  %v501_v13 = vld [vmem:[%s745_s0 + $0x10] sm:$0xff]  }
   0x7   :  { %35 = vst.msk [vmem:[#allocation2 + $0x60] sm:$0xff] %vm22_vm0, %v505_v1  ;;  %36 = vst.msk [vmem:[#allocation2 + $0x68] sm:$0xff] %vm22_vm0, %v505_v1  ;;  %443 = vmatpush3.bf16.msra.mxu0 %v490_v2  ;;  %481 = vmatpush3.bf16.msra.mxu1 %v490_v2  ;;  %v500_v12 = vld [vmem:[%s745_s0 + $0x28] sm:$0xff]   ;;  %v502_v14 = vld [vmem:[%s745_s0 + $0x30] sm:$0xff]  }
   0x8   :  { %37 = vst.msk [vmem:[#allocation2 + $0x70] sm:$0xff] %vm22_vm0, %v505_v1  ;;  %38 = vst.msk [vmem:[#allocation2 + $0x78] sm:$0xff] %vm22_vm0, %v505_v1  ;;  %444 = vmatprep.subr.bf16.mxu0 %v491_v3  ;;  %474 = vmatprep.subr.bf16.mxu1 %v491_v3  ;;  %v503_v15 = vld [vmem:[%s745_s0 + $0x18] sm:$0xff]   ;;  %v41_v17 = vld [vmem:[#allocation2 + $0x10] sm:$0xff] }
   0x9   :  { %v504_v16 = vld [vmem:[%s745_s0 + $0x38] sm:$0xff]   ;;  %v39_v21 = vld [vmem:[#allocation2] sm:$0xff]  ;;  %v40_v33 = vld [vmem:[#allocation2 + $0x8] sm:$0xff] }
   0xa   :  { %v42_v27 = vld [vmem:[#allocation2 + $0x18] sm:$0xff]  ;;  %v604_v43 = vld [vmem:[%s746_s2] ss:$0 sm:$0xff]  ;;  %v357_v48 = vld [vmem:[%s747_s3 + $0x10] sm:$0xff] }
   0xb   :  { %445 = vmatpush3.bf16.msra.mxu0 %v491_v3  ;;  %482 = vmatpush3.bf16.msra.mxu1 %v491_v3  ;;  %v45_v39 = vld [vmem:[#allocation2 + $0x30] sm:$0xff]  ;;  %v43_v46 = vld [vmem:[#allocation2 + $0x20] sm:$0xff]  ;;  %v46_v61 = vld [vmem:[#allocation2 + $0x38] sm:$0xff] }
   0xc   :  { %446 = vmatprep.subr.bf16.mxu0 %v492_v4  ;;  %475 = vmatprep.subr.bf16.mxu1 %v492_v4  ;;  %v47_v22 = vld [vmem:[#allocation2 + $0x40] sm:$0xff]  ;;  %v48_v34 = vld [vmem:[#allocation2 + $0x48] sm:$0xff]  ;;  %v365_v53 = vld [vmem:[%s747_s3 + $0x50] sm:$0xff] }
   0xd   :  { %v49_v18 = vld [vmem:[#allocation2 + $0x50] sm:$0xff]  ;;  %v50_v28 = vld [vmem:[#allocation2 + $0x58] sm:$0xff]  ;;  %v355_v58 = vld [vmem:[%s747_s3] sm:$0xff] }
   0xe   :  { %v51_v47 = vld [vmem:[#allocation2 + $0x60] sm:$0xff] }
   0xf   :  { %447 = vmatpush3.bf16.msra.mxu0 %v492_v4  ;;  %483 = vmatpush3.bf16.msra.mxu1 %v492_v4  ;;  %v53_v40 = vld [vmem:[#allocation2 + $0x70] sm:$0xff]  ;;  %v54_v62 = vld [vmem:[#allocation2 + $0x78] sm:$0xff]  ;;  %v363_v1 = vld [vmem:[%s747_s3 + $0x40] sm:$0xff] }
  0x10   :  { %448 = vmatprep.subr.bf16.mxu0 %v493_v7  ;;  %476 = vmatprep.subr.bf16.mxu1 %v493_v7 }
  0x13   :  { %449 = vmatpush3.bf16.msra.mxu0 %v493_v7  ;;  %484 = vmatpush3.bf16.msra.mxu1 %v493_v7 }
  0x14   :  { %450 = vmatprep.subr.bf16.mxu0 %v494_v8  ;;  %477 = vmatprep.subr.bf16.mxu1 %v494_v8 }
  0x17   :  { %451 = vmatpush3.bf16.msra.mxu0 %v494_v8  ;;  %485 = vmatpush3.bf16.msra.mxu1 %v494_v8  ;;  %v358_v8 = vld [vmem:[%s747_s3 + $0x18] sm:$0xff] }
  0x18   :  { %452 = vmatprep.subr.bf16.mxu0 %v495_v9  ;;  %478 = vmatprep.subr.bf16.mxu1 %v495_v9 }
  0x1b   :  { %453 = vmatpush3.bf16.msra.mxu0 %v495_v9  ;;  %486 = vmatpush3.bf16.msra.mxu1 %v495_v9  ;;  %v44_v9 = vld [vmem:[#allocation2 + $0x28] sm:$0xff] }
  0x1c   :  { %454 = vmatprep.subr.bf16.mxu0 %v496_v10  ;;  %479 = vmatprep.subr.bf16.mxu1 %v496_v10 }
  0x1f   :  { %455 = vmatpush3.bf16.msra.mxu0 %v496_v10  ;;  %487 = vmatpush3.bf16.msra.mxu1 %v496_v10  ;;  %v52_v10 = vld [vmem:[#allocation2 + $0x68] sm:$0xff] }
  0x22   :  { %457 = vmatmul.mubr.bf16.vlgmr.msra.gmra.mxu0 %v499_v11  ;;  %465 = vmatmul.mubr.bf16.vlgmr.msra.gmra.mxu1 %v500_v12 }
  0x23   :  { %460 = vmatprep.mubr.bf16.mxu0 %v501_v13  ;;  %468 = vmatprep.mubr.bf16.mxu1 %v502_v14  ;;  %v366_v13 = vld [vmem:[%s747_s3 + $0x58] sm:$0xff] }
  0x2a   :  { %461 = vmatmul.mubr.bf16.gmra.mxu0 %v503_v15  ;;  %469 = vmatmul.mubr.bf16.gmra.mxu1 %v504_v16 }
  0xe2   :  { %v458_v19 = vpop.f32.mrf.mxu0  ;;  %v466_v20 = vpop.f32.mrf.mxu1 }
  0xe3   :  { %v282_v23 = vadd.f32 %v458_v19, %v41_v17  ;;  %v290_v24 = vadd.f32 %v466_v20, %v49_v18 }
  0xe4   :  { %v217_v25 = vpop.f32.mrf.mxu0  ;;  %v249_v26 = vpop.f32.mrf.mxu1 }
  0xe5   :  { %299 = vst.msk [vmem:[#allocation2 + $0x10] sm:$0xff] %vm22_vm0, %v282_v23  ;;  %307 = vst.msk [vmem:[#allocation2 + $0x50] sm:$0xff] %vm22_vm0, %v290_v24  ;;  %v280_v29 = vadd.f32 %v217_v25, %v39_v21  ;;  %v288_v30 = vadd.f32 %v249_v26, %v47_v22  ;;  %v356_v22 = vld [vmem:[%s747_s3 + $0x8] sm:$0xff] }
  0xe6   :  { %v459_v31 = vpop.f32.mrf.mxu0  ;;  %v467_v32 = vpop.f32.mrf.mxu1  ;;  %v364_v25 = vld [vmem:[%s747_s3 + $0x48] sm:$0xff] }
  0xe7   :  { %297 = vst.msk [vmem:[#allocation2] sm:$0xff] %vm22_vm0, %v280_v29  ;;  %305 = vst.msk [vmem:[#allocation2 + $0x40] sm:$0xff] %vm22_vm0, %v288_v30  ;;  %v283_v35 = vadd.f32 %v459_v31, %v42_v27  ;;  %v291_v36 = vadd.f32 %v467_v32, %v50_v28  ;;  %v361_v32 = vld [vmem:[%s747_s3 + $0x30] sm:$0xff] }
  0xe8   :  { %v220_v37 = vpop.f32.mrf.mxu0  ;;  %v252_v38 = vpop.f32.mrf.mxu1 }
  0xe9   :  { %300 = vst.msk [vmem:[#allocation2 + $0x18] sm:$0xff] %vm22_vm0, %v283_v35  ;;  %308 = vst.msk [vmem:[#allocation2 + $0x58] sm:$0xff] %vm22_vm0, %v291_v36  ;;  %v281_v41 = vadd.f32 %v220_v37, %v40_v33  ;;  %v289_v42 = vadd.f32 %v252_v38, %v48_v34  ;;  %v369_v35 = vld [vmem:[%s747_s3 + $0x70] sm:$0xff] }
  0xea   :  { %v462_v44 = vpop.f32.mrf.mxu0  ;;  %v470_v45 = vpop.f32.mrf.mxu1 }
  0xeb   :  { %298 = vst.msk [vmem:[#allocation2 + $0x8] sm:$0xff] %vm22_vm0, %v281_v41  ;;  %306 = vst.msk [vmem:[#allocation2 + $0x48] sm:$0xff] %vm22_vm0, %v289_v42  ;;  %v286_v49 = vadd.f32 %v462_v44, %v45_v39  ;;  %v294_v50 = vadd.f32 %v470_v45, %v53_v40  ;;  %v359_v40 = vld [vmem:[%s747_s3 + $0x20] sm:$0xff] }
  0xec   :  { %v318_v51 = vld [vmem:[#allocation2 + $0x10] sm:$0xff]  ;;  %v233_v54 = vpop.f32.mrf.mxu0  ;;  %v265_v55 = vpop.f32.mrf.mxu1  ;;  %v367_v44 = vld [vmem:[%s747_s3 + $0x60] sm:$0xff] }
  0xed   :  { %v326_v52 = vld [vmem:[#allocation2 + $0x50] sm:$0xff]  ;;  %v341_v56 = vadd.f32 %v604_v43, %v318_v51  ;;  %303 = vst.msk [vmem:[#allocation2 + $0x30] sm:$0xff] %vm22_vm0, %v286_v49  ;;  %311 = vst.msk [vmem:[#allocation2 + $0x70] sm:$0xff] %vm22_vm0, %v294_v50  ;;  %v284_v59 = vadd.f32 %v233_v54, %v43_v46  ;;  %v292_v60 = vadd.f32 %v265_v55, %v51_v47  ;;  %v362_v49 = vld [vmem:[%s747_s3 + $0x38] sm:$0xff] }
  0xee   :  { %v349_v57 = vadd.f32 %v604_v43, %v326_v52  ;;  %v316_v63 = vld [vmem:[#allocation2] sm:$0xff]  ;;  %v463_v2 = vpop.f32.mrf.mxu0  ;;  %v471_v3 = vpop.f32.mrf.mxu1  ;;  %v370_v54 = vld [vmem:[%s747_s3 + $0x78] sm:$0xff] }
  0xef   :  { %v324_v0 = vld [vmem:[#allocation2 + $0x40] sm:$0xff]  ;;  %v373_v4 = vadd.f32 %v357_v48, %v341_v56  ;;  %v339_v6 = vadd.f32 %v604_v43, %v316_v63  ;;  %301 = vst.msk [vmem:[#allocation2 + $0x20] sm:$0xff] %vm22_vm0, %v284_v59  ;;  %309 = vst.msk [vmem:[#allocation2 + $0x60] sm:$0xff] %vm22_vm0, %v292_v60  ;;  %v287_v14 = vadd.f32 %v463_v2, %v46_v61  ;;  %v368_v60 = vld [vmem:[%s747_s3 + $0x68] sm:$0xff] }
  0xf0   :  { %v381_v5 = vadd.f32 %v365_v53, %v349_v57  ;;  %v347_v7 = vadd.f32 %v604_v43, %v324_v0  ;;  %v319_v11 = vld [vmem:[#allocation2 + $0x18] sm:$0xff]  ;;  %v295_v15 = vadd.f32 %v471_v3, %v54_v62  ;;  %v236_v16 = vpop.f32.mrf.mxu0  ;;  %v268_v17 = vpop.f32.mrf.mxu1  ;;  %v360_v57 = vld [vmem:[%s747_s3 + $0x28] sm:$0xff] }
  0xf1   :  { %v327_v12 = vld [vmem:[#allocation2 + $0x58] sm:$0xff]  ;;  %389 = vst.msk [vmem:[%s748_s4 + $0x10] sm:$0xff] %vm22_vm0, %v373_v4  ;;  %v371_v18 = vadd.f32 %v355_v58, %v339_v6  ;;  %v342_v20 = vadd.f32 %v604_v43, %v319_v11  ;;  %304 = vst.msk [vmem:[#allocation2 + $0x38] sm:$0xff] %vm22_vm0, %v287_v14  ;;  %v285_v26 = vadd.f32 %v236_v16, %v44_v9 }
  0xf2   :  { %397 = vst.msk [vmem:[%s748_s4 + $0x50] sm:$0xff] %vm22_vm0, %v381_v5  ;;  %v379_v19 = vadd.f32 %v363_v1, %v347_v7  ;;  %v350_v21 = vadd.f32 %v604_v43, %v327_v12  ;;  %v317_v23 = vld [vmem:[#allocation2 + $0x8] sm:$0xff]  ;;  %312 = vst.msk [vmem:[#allocation2 + $0x78] sm:$0xff] %vm22_vm0, %v295_v15  ;;  %v293_v27 = vadd.f32 %v268_v17, %v52_v10 }
  0xf3   :  { %v325_v24 = vld [vmem:[#allocation2 + $0x48] sm:$0xff]  ;;  %387 = vst.msk [vmem:[%s748_s4] sm:$0xff] %vm22_vm0, %v371_v18  ;;  %v374_v28 = vadd.f32 %v358_v8, %v342_v20  ;;  %v340_v30 = vadd.f32 %v604_v43, %v317_v23  ;;  %302 = vst.msk [vmem:[#allocation2 + $0x28] sm:$0xff] %vm22_vm0, %v285_v26 }
  0xf4   :  { %395 = vst.msk [vmem:[%s748_s4 + $0x40] sm:$0xff] %vm22_vm0, %v379_v19  ;;  %v382_v29 = vadd.f32 %v366_v13, %v350_v21  ;;  %v348_v31 = vadd.f32 %v604_v43, %v325_v24  ;;  %v322_v33 = vld [vmem:[#allocation2 + $0x30] sm:$0xff]  ;;  %310 = vst.msk [vmem:[#allocation2 + $0x68] sm:$0xff] %vm22_vm0, %v293_v27 }
  0xf5   :  { %v330_v34 = vld [vmem:[#allocation2 + $0x70] sm:$0xff]  ;;  %390 = vst.msk [vmem:[%s748_s4 + $0x18] sm:$0xff] %vm22_vm0, %v374_v28  ;;  %v372_v36 = vadd.f32 %v356_v22, %v340_v30  ;;  %v345_v38 = vadd.f32 %v604_v43, %v322_v33 }
  0xf6   :  { %398 = vst.msk [vmem:[%s748_s4 + $0x58] sm:$0xff] %vm22_vm0, %v382_v29  ;;  %v380_v37 = vadd.f32 %v364_v25, %v348_v31  ;;  %v353_v39 = vadd.f32 %v604_v43, %v330_v34  ;;  %v320_v41 = vld [vmem:[#allocation2 + $0x20] sm:$0xff] }
  0xf7   :  { %v328_v42 = vld [vmem:[#allocation2 + $0x60] sm:$0xff]  ;;  %388 = vst.msk [vmem:[%s748_s4 + $0x8] sm:$0xff] %vm22_vm0, %v372_v36  ;;  %v377_v45 = vadd.f32 %v361_v32, %v345_v38  ;;  %v343_v47 = vadd.f32 %v604_v43, %v320_v41 }
  0xf8   :  { %396 = vst.msk [vmem:[%s748_s4 + $0x48] sm:$0xff] %vm22_vm0, %v380_v37  ;;  %v385_v46 = vadd.f32 %v369_v35, %v353_v39  ;;  %v351_v48 = vadd.f32 %v604_v43, %v328_v42  ;;  %v323_v52 = vld [vmem:[#allocation2 + $0x38] sm:$0xff] }
  0xf9   :  { %393 = vst.msk [vmem:[%s748_s4 + $0x30] sm:$0xff] %vm22_vm0, %v377_v45  ;;  %v375_v50 = vadd.f32 %v359_v40, %v343_v47  ;;  %v331_v53 = vld [vmem:[#allocation2 + $0x78] sm:$0xff]  ;;  %v346_v55 = vadd.f32 %v604_v43, %v323_v52 }
  0xfa   :  { %401 = vst.msk [vmem:[%s748_s4 + $0x70] sm:$0xff] %vm22_vm0, %v385_v46  ;;  %v383_v51 = vadd.f32 %v367_v44, %v351_v48  ;;  %v354_v56 = vadd.f32 %v604_v43, %v331_v53  ;;  %v321_v58 = vld [vmem:[#allocation2 + $0x28] sm:$0xff] }
  0xfb   :  { %391 = vst.msk [vmem:[%s748_s4 + $0x20] sm:$0xff] %vm22_vm0, %v375_v50  ;;  %v329_v59 = vld [vmem:[#allocation2 + $0x68] sm:$0xff]  ;;  %v378_v61 = vadd.f32 %v362_v49, %v346_v55  ;;  %v344_v63 = vadd.f32 %v604_v43, %v321_v58 }
  0xfc   :  { %399 = vst.msk [vmem:[%s748_s4 + $0x60] sm:$0xff] %vm22_vm0, %v383_v51  ;;  %v386_v62 = vadd.f32 %v370_v54, %v354_v56  ;;  %v352_v0 = vadd.f32 %v604_v43, %v329_v59 }
  0xfd   :  { %394 = vst.msk [vmem:[%s748_s4 + $0x38] sm:$0xff] %vm22_vm0, %v378_v61  ;;  %v376_v1 = vadd.f32 %v360_v57, %v344_v63 }
  0xfe   :  { %402 = vst.msk [vmem:[%s748_s4 + $0x78] sm:$0xff] %vm22_vm0, %v386_v62  ;;  %v384_v2 = vadd.f32 %v368_v60, %v352_v0 }
  0xff   :  { %392 = vst.msk [vmem:[%s748_s4 + $0x28] sm:$0xff] %vm22_vm0, %v376_v1 }
 0x100   :  { %400 = vst.msk [vmem:[%s748_s4 + $0x68] sm:$0xff] %vm22_vm0, %v384_v2 }

// kernel: _lambda_.46
= control target key start
LH: loop header
LB: loop body
LE: loop exit
PB: predicated region body
PF: predicated region fallthrough
CT: control target
= control target key end

     0   :  { %s1409_s12 = smov 0   ;;  %s1411_s13 = smov 0   ;;  %s1617_s0 = inlined_call_operand.vmem [shape: bf16[3,2,8,16,16], index: 0, kind: input, shape index: {}]   ;;  %s1618_s1 = inlined_call_operand.vmem [shape: f32[2,16,16], index: 1, kind: input, shape index: {}]   ;;  %s1619_s2 = inlined_call_operand.vmem [shape: f32[4,16,16], index: 2, kind: input, shape index: {}]   ;;  %s1620_s3 = inlined_call_operand.vmem [shape: bf16[2,8,16,16], index: 3, kind: output, shape index: {}]  }
   0x1   :  { %s1413_s14 = smov 0   ;;  %s1415_s15 = smov 0  }
   0x2   :  { %s1417_s16 = smov 0   ;;  %s1419_s17 = smov 0  }
   0x3   :  { %s1421_s18 = smov 0  }
   0x4 LB: > { %s22_s19 = sadd.s32 1, %s1377_s16  ;;  %s25_s20 = sadd.s32 1, %s1381_s17  ;;  %s1385_s18 = sphi %s1421_s18, %s13_s18   ;;  %s1381_s17 = sphi %s1419_s17, %s1626_s17   ;;  %s1377_s16 = sphi %s1417_s16, %s1625_s16   ;;  %s1373_s15 = sphi %s1415_s15, %s1624_s15   ;;  %s1369_s14 = sphi %s1413_s14, %s1623_s14   ;;  %s1365_s13 = sphi %s1411_s13, %s1622_s13   ;;  %s1361_s12 = sphi %s1409_s12, %s1621_s12  }
   0x5   : > { %p23_p0 = scmp.ge.s32.totalorder %s22_s19, 2  ;;  %p41_p1 = scmp.ne.s32.totalorder %s1365_s13, %s1361_s12 }
   0x6   : > { %p42_p2 = scmp.eq.s32.totalorder %s1385_s18, 0  ;;  %s34_s24 = sadd.s32 1, %s1365_s13 }
   0x7   : > { %s1628_s19 = smov (%p23_p0, %s22_s19), 0  ;;  %s1630_s20 = smov (!%p23_p0, %s25_s20), %s1381_s17 }
   0x8   : > { %p43_p3 = por %p42_p2, %p41_p1  ;;  %p27_p4 = scmp.ge.s32.totalorder %s1630_s20, 2 }
   0x9   : > { %s29_s21 = ssub.s32 %s1377_s16, %s1628_s19  ;;  %p1095_p6 = scmp.ge.s32.totalorder %s1385_s18, 4 }
   0xa   : > { %s1632_s20 = smov (%p27_p4, %s1630_s20), 0 }
   0xb   : > { %s30_s22 = ssub.s32 %s1381_s17, %s1632_s20  ;;  %145 = sbr.rel (%p1095_p6) target bundleno = 29 (0x1d), region = 20 }
   0xc   : > { %s31_s23 = sor.u32 %s30_s22, %s29_s21 }
   0xd   : > { %p32_p5 = scmp.eq.s32.totalorder %s31_s23, 0 }
   0xf   : > { %s1460_s25 = scalar_select %p32_p5, %s1365_s13, %s34_s24  }
  0x10   : > { %148 = sbr.rel (!%p43_p3) target bundleno = 29 (0x1d), region = 24  ;;  %s150_s26 = sand.u32 (%p43_p3), 1, %s1365_s13  }
  0x11   : > { %s1153_s27 = sshll.u32 (%p43_p3), %s1381_s17, 3  ;;  %s1227_s28 = smul.u32 (%p43_p3), 96, %s150_s26 }
  0x12   : > { %s1098_s29 = sshll.u32 (%p43_p3), %s1377_s16, 4 }
  0x13   : > { %s156_s30 = sadd.s32 (%p43_p3), %s1153_s27, %s1098_s29  ;;  %s152_s8 = scalar_lea.vmem (%p43_p3), [#allocation2], %s1227_s28 }
  0x14   : > { %s1099_s4 = sshll.u32 (%p43_p3), %s156_s30, 2 }
  0x15   : > { %s158_s7 = scalar_lea.vmem %s1617_s0, %s1099_s4 }
  0x16   : > { %v175_v0 = vld [vmem:[%s158_s7] sm:$0xff]   ;;  %v179_v1 = vld [vmem:[%s158_s7 + $0x8] sm:$0xff]   ;;  %v183_v2 = vld [vmem:[%s158_s7 + $0x10] sm:$0xff]  }
  0x17   : > { %176 = vst [vmem:[%s152_s8] sm:$0xff] %v175_v0   ;;  %180 = vst [vmem:[%s152_s8 + $0x8] sm:$0xff] %v179_v1   ;;  %v187_v3 = vld [vmem:[%s158_s7 + $0x18] sm:$0xff]   ;;  %v191_v4 = vld [vmem:[%s158_s7 + $0x80] sm:$0xff]  }
  0x18   : > { %184 = vst [vmem:[%s152_s8 + $0x10] sm:$0xff] %v183_v2   ;;  %v195_v5 = vld [vmem:[%s158_s7 + $0x88] sm:$0xff]   ;;  %188 = vst [vmem:[%s152_s8 + $0x18] sm:$0xff] %v187_v3   ;;  %v199_v6 = vld [vmem:[%s158_s7 + $0x90] sm:$0xff]  }
  0x19   : > { %192 = vst [vmem:[%s152_s8 + $0x20] sm:$0xff] %v191_v4   ;;  %196 = vst [vmem:[%s152_s8 + $0x28] sm:$0xff] %v195_v5   ;;  %v203_v7 = vld [vmem:[%s158_s7 + $0x98] sm:$0xff]   ;;  %v207_v8 = vld [vmem:[%s158_s7 + $0x100] sm:$0xff]  }
  0x1a   : > { %200 = vst [vmem:[%s152_s8 + $0x30] sm:$0xff] %v199_v6   ;;  %204 = vst [vmem:[%s152_s8 + $0x38] sm:$0xff] %v203_v7   ;;  %v211_v9 = vld [vmem:[%s158_s7 + $0x108] sm:$0xff]   ;;  %v215_v10 = vld [vmem:[%s158_s7 + $0x110] sm:$0xff]  }
  0x1b   : > { %208 = vst [vmem:[%s152_s8 + $0x40] sm:$0xff] %v207_v8   ;;  %v219_v11 = vld [vmem:[%s158_s7 + $0x118] sm:$0xff]   ;;  %212 = vst [vmem:[%s152_s8 + $0x48] sm:$0xff] %v211_v9  }
  0x1c   : > { %216 = vst [vmem:[%s152_s8 + $0x50] sm:$0xff] %v215_v10   ;;  %220 = vst [vmem:[%s152_s8 + $0x58] sm:$0xff] %v219_v11  }
  0x1d PF: > { %p1100_p7 = scmp.ge.s32.totalorder %s1385_s18, 1  ;;  %p301_p8 = scmp.lt.s32.totalorder %s1385_s18, 5 }
  0x1f   : > { %p302_p9 = pnand %p1100_p7, %p301_p8 }
  0x20   : > { %s308_s9 = sand.u32 (!%p302_p9), 1, %s1361_s12   ;;  %p342_p10 = scmp.lt.s32.totalorder (!%p302_p9), %s1369_s14, 1 }
  0x21   : > { %305 = sbr.rel (%p302_p9) target bundleno = 778 (0x30a), region = 69 }
  0x22   : > { %s1228_s10 = smul.u32 (!%p302_p9), 96, %s308_s9 }
  0x24   : > { %s1478_s11 = scalar_lea.vmem (!%p302_p9), [#allocation2], %s1228_s10 }
  0x26   : > { %v1387_v12 = vmov 0.0   ;;  %vm1388_vm0 = vmmov 0   ;;  %vm395_vm1 = vcmask 130048   ;;  %v1287_v13 = vld [vmem:[%s1478_s11 + $0x20] sm:$0xff]   ;;  %v1288_v14 = vld [vmem:[%s1478_s11 + $0x28] sm:$0xff]   ;;  %v1291_v17 = vld [vmem:[%s1478_s11 + $0x30] sm:$0xff]  }
  0x27   : > { %1179 = vmatprep.subr.bf16.mxu0 %v1387_v12  ;;  %1185 = vmatprep.subr.bf16.mxu1 %v1387_v12  ;;  %v400_v15 = vsel %vm395_vm1, %v1287_v13, 0  ;;  %v457_v16 = vsel %vm395_vm1, %v1288_v14, 0  ;;  %v1292_v18 = vld [vmem:[%s1478_s11 + $0x38] sm:$0xff]   ;;  %v1289_v19 = vld [vmem:[%s1478_s11] sm:$0xff]   ;;  %v1290_v20 = vld [vmem:[%s1478_s11 + $0x8] sm:$0xff]   ;;  %v514_v21 = vsel %vm395_vm1, %v1291_v17, 0 }
  0x28   : > { %1181 = vmatprep.mubr.msk.bf16.mxu0 %vm1388_vm0, %v1387_v12  ;;  %1187 = vmatprep.mubr.msk.bf16.mxu1 %vm1388_vm0, %v1387_v12  ;;  %v571_v22 = vsel %vm395_vm1, %v1292_v18, 0  ;;  %v1293_v23 = vld [vmem:[%s1478_s11 + $0x10] sm:$0xff]   ;;  %v1294_v24 = vld [vmem:[%s1478_s11 + $0x18] sm:$0xff]   ;;  %s1634_s14 = smov (!%p342_p10, %s1369_s14), 1  ;;  %v632_v31 = vld [vmem:[%s1619_s2] sm:$0xff]  ;;  %vm972_vm2 = vcmask 125952  }
  0x29   : > { %1180 = vmatpush3.bf16.xpose.msra.mxu0 %v400_v15  ;;  %1186 = vmatpush3.bf16.xpose.msra.mxu1 %v457_v16  ;;  %s1154_s12 = sshll.u32 %s1634_s14, 4  ;;  %v634_v34 = vld [vmem:[%s1619_s2 + $0x10] sm:$0xff]  ;;  %v633_v44 = vld [vmem:[%s1619_s2 + $0x8] sm:$0xff]  ;;  %v635_v48 = vld [vmem:[%s1619_s2 + $0x18] sm:$0xff] }
  0x2a   : > { %1191 = vmatprep.subr.bf16.mxu0 %v1387_v12  ;;  %1197 = vmatprep.subr.bf16.mxu1 %v1387_v12  ;;  %s346_s23 = scalar_lea.vmem %s1618_s1, %s1154_s12  ;;  %v636_v58 = vld [vmem:[%s1619_s2 + $0x20] sm:$0xff]  ;;  %v638_v62 = vld [vmem:[%s1619_s2 + $0x30] sm:$0xff]  ;;  %v637_v8 = vld [vmem:[%s1619_s2 + $0x28] sm:$0xff] }
  0x2b   : > { %v622_v26 = vld [vmem:[%s346_s23] sm:$0xff]  ;;  %v623_v37 = vld [vmem:[%s346_s23 + $0x8] sm:$0xff]  ;;  %v639_v14 = vld [vmem:[%s1619_s2 + $0x38] sm:$0xff] }
  0x30   : > { %1182 = vmatmul.mubr.msk.bf16.vlgmr.msra.gmra.mxu0 %vm395_vm1, %v1289_v19  ;;  %1188 = vmatmul.mubr.msk.bf16.vlgmr.msra.gmra.mxu1 %vm395_vm1, %v1290_v20 }
  0x31   : > { %1192 = vmatpush3.bf16.xpose.msra.mxu0 %v514_v21  ;;  %1198 = vmatpush3.bf16.xpose.msra.mxu1 %v571_v22 }
  0x32   : > { %1193 = vmatprep.mubr.msk.bf16.mxu0 %vm1388_vm0, %v1387_v12  ;;  %1199 = vmatprep.mubr.msk.bf16.mxu1 %vm1388_vm0, %v1387_v12 }
  0x33   : > { %1203 = vmatprep.subr.bf16.mxu0 %v1387_v12  ;;  %1209 = vmatprep.subr.bf16.mxu1 %v1387_v12 }
  0x38   : > { %1194 = vmatmul.mubr.msk.bf16.vlgmr.msra.gmra.mxu0 %vm395_vm1, %v1293_v23  ;;  %1200 = vmatmul.mubr.msk.bf16.vlgmr.msra.gmra.mxu1 %vm395_vm1, %v1294_v24 }
  0x39   : > { %1205 = vmatprep.mubr.msk.bf16.mxu0 %vm1388_vm0, %v1387_v12  ;;  %1211 = vmatprep.mubr.msk.bf16.mxu1 %vm1388_vm0, %v1387_v12 }
  0xf0   : > { %v436_v25 = vpop.f32.mrf.mxu0  ;;  %v493_v28 = vpop.f32.mrf.mxu1 }
  0xf1   : > { %v614_v27 = vmul.f32 0.25, %v436_v25  ;;  %v616_v29 = vmul.f32 0.25, %v493_v28 }
  0xf2   : > { %v1183_v30 = vpop.f32.mrf.mxu0  ;;  %v1189_v33 = vpop.f32.mrf.mxu1 }
  0xf3   : > { %v624_v32 = vadd.f32 %v622_v26, %v614_v27  ;;  %v626_v35 = vadd.f32 %v622_v26, %v616_v29 }
  0xf4   : > { %v439_v36 = vpop.f32.mrf.mxu0  ;;  %v496_v39 = vpop.f32.mrf.mxu1 }
  0xf5   : > { %v615_v38 = vmul.f32 0.25, %v439_v36  ;;  %v640_v40 = vadd.f32 %v632_v31, %v624_v32  ;;  %v617_v41 = vmul.f32 0.25, %v496_v39  ;;  %v642_v43 = vadd.f32 %v634_v34, %v626_v35 }
  0xf6   : > { %v1184_v42 = vpop.f32.mrf.mxu0  ;;  %v1190_v46 = vpop.f32.mrf.mxu1 }
  0xf7   : > { %v625_v45 = vadd.f32 %v623_v37, %v615_v38  ;;  %v648_v47 = vsel %vm395_vm1, %v640_v40, -inf  ;;  %v627_v49 = vadd.f32 %v623_v37, %v617_v41  ;;  %v654_v50 = vsel %vm395_vm1, %v642_v43, -inf }
  0xf8   : > { %649 = vmax.xlane.f32.xlu0 %v648_v47  ;;  %v550_v51 = vpop.f32.mrf.mxu0  ;;  %655 = vmax.xlane.f32.xlu1 %v654_v50  ;;  %v607_v52 = vpop.f32.mrf.mxu1 }
  0xf9   : > { %v618_v53 = vmul.f32 0.25, %v550_v51  ;;  %v641_v54 = vadd.f32 %v633_v44, %v625_v45  ;;  %v620_v55 = vmul.f32 0.25, %v607_v52  ;;  %v643_v57 = vadd.f32 %v635_v48, %v627_v49 }
  0xfa   : > { %v1195_v56 = vpop.f32.mrf.mxu0  ;;  %v1201_v60 = vpop.f32.mrf.mxu1 }
  0xfb   : > { %v628_v59 = vadd.f32 %v622_v26, %v618_v53  ;;  %v651_v61 = vsel %vm395_vm1, %v641_v54, -inf  ;;  %v630_v63 = vadd.f32 %v622_v26, %v620_v55  ;;  %v657_v0 = vsel %vm395_vm1, %v643_v57, -inf  ;;  %v1295_v60 = vld [vmem:[%s1478_s11 + $0x40] sm:$0xff]  }
  0xfc   : > { %652 = vmax.xlane.f32.xlu0 %v651_v61  ;;  %v553_v1 = vpop.f32.mrf.mxu0  ;;  %658 = vmax.xlane.f32.xlu1 %v657_v0  ;;  %v610_v2 = vpop.f32.mrf.mxu1  ;;  %v1296_v61 = vld [vmem:[%s1478_s11 + $0x48] sm:$0xff]  }
  0xfd   : > { %v619_v3 = vmul.f32 0.25, %v553_v1  ;;  %v644_v4 = vadd.f32 %v636_v58, %v628_v59  ;;  %v621_v5 = vmul.f32 0.25, %v610_v2  ;;  %v646_v7 = vadd.f32 %v638_v62, %v630_v63  ;;  %1204 = vmatpush3.bf16.msra.mxu0 %v1295_v60  ;;  %1210 = vmatpush3.bf16.msra.mxu1 %v1296_v61 }
  0xfe   : > { %v1196_v6 = vpop.f32.mrf.mxu0  ;;  %v1202_v10 = vpop.f32.mrf.mxu1  ;;  %1215 = vmatprep.subr.bf16.mxu0 %v1387_v12  ;;  %1221 = vmatprep.subr.bf16.mxu1 %v1387_v12 }
  0xff   : > { %v629_v9 = vadd.f32 %v623_v37, %v619_v3  ;;  %v660_v11 = vsel %vm395_vm1, %v644_v4, -inf  ;;  %v631_v13 = vadd.f32 %v623_v37, %v621_v5  ;;  %v666_v15 = vsel %vm395_vm1, %v646_v7, -inf }
 0x100   : > { %661 = vmax.xlane.f32.xlu0 %v660_v11  ;;  %v1297_v11 = vld [vmem:[%s1478_s11 + $0x50] sm:$0xff]  }
 0x101   : > { %v645_v16 = vadd.f32 %v637_v8, %v629_v9  ;;  %v647_v18 = vadd.f32 %v639_v14, %v631_v13 }
 0x103   : > { %v663_v17 = vsel %vm395_vm1, %v645_v16, -inf  ;;  %v669_v19 = vsel %vm395_vm1, %v647_v18, -inf }
 0x104   : > { %667 = vmax.xlane.f32.xlu0 %v666_v15  ;;  %664 = vmax.xlane.f32.xlu1 %v663_v17 }
 0x108   : > { %670 = vmax.xlane.f32.xlu1 %v669_v19 }
 0x181   : > { %v650_v20 = vpop.xlane.xlu0 %649  ;;  %v656_v21 = vpop.xlane.xlu1 %655 }
 0x182   : > { %v672_v22 = vsub.f32 %v640_v40, %v650_v20  ;;  %v674_v23 = vsub.f32 %v642_v43, %v656_v21 }
 0x184   : > { %v680_v24 = vmul.f32 1.442695, %v672_v22  ;;  %v684_v25 = vmul.f32 1.442695, %v674_v23 }
 0x185   : > { %v653_v26 = vpop.xlane.xlu0 %652  ;;  %v659_v27 = vpop.xlane.xlu1 %658 }
 0x186   : > { %1299 = vpow2.f32 %v680_v24  ;;  %v673_v28 = vsub.f32 %v641_v54, %v653_v26  ;;  %v675_v29 = vsub.f32 %v643_v57, %v659_v27 }
 0x187   : > { %1301 = vpow2.f32 %v684_v25 }
 0x188   : > { %v682_v30 = vmul.f32 1.442695, %v673_v28  ;;  %v686_v31 = vmul.f32 1.442695, %v675_v29 }
 0x189   : > { %v662_v32 = vpop.xlane.xlu0 %661 }
 0x18a   : > { %1303 = vpow2.f32 %v682_v30  ;;  %v676_v33 = vsub.f32 %v644_v4, %v662_v32 }
 0x18b   : > { %1305 = vpow2.f32 %v686_v31 }
 0x18c   : > { %v688_v34 = vmul.f32 1.442695, %v676_v33 }
 0x18d   : > { %v668_v35 = vpop.xlane.xlu0 %667  ;;  %v665_v36 = vpop.xlane.xlu1 %664 }
 0x18e   : > { %1307 = vpow2.f32 %v688_v34  ;;  %v678_v37 = vsub.f32 %v646_v7, %v668_v35  ;;  %v677_v38 = vsub.f32 %v645_v16, %v665_v36 }
 0x190   : > { %v692_v39 = vmul.f32 1.442695, %v678_v37  ;;  %v690_v40 = vmul.f32 1.442695, %v677_v38 }
 0x191   : > { %v671_v41 = vpop.xlane.xlu1 %670 }
 0x192   : > { %1309 = vpow2.f32 %v692_v39  ;;  %v679_v42 = vsub.f32 %v647_v18, %v671_v41  ;;  %v1298_v18 = vld [vmem:[%s1478_s11 + $0x58] sm:$0xff]   ;;  %s1103_s11 = sshll.u32 %s1373_s15, 2 }
 0x193   : > { %v1300_v43 = vpop.eup %1299  ;;  %1311 = vpow2.f32 %v690_v40  ;;  %p350_p11 = scmp.lt.s32.totalorder %s1103_s11, 7 }
 0x194   : > { %v694_v44 = vmul.f32 1.442695, %v679_v42  ;;  %v696_v45 = vsel %vm395_vm1, %v1300_v43, 0.0  ;;  %v1302_v46 = vpop.eup %1301 }
 0x195   : > { %697 = vadd.xlane.f32.xlu0 %v696_v45  ;;  %v702_v48 = vsel %vm395_vm1, %v1302_v46, 0.0  ;;  %s1636_s11 = smov (!%p350_p11, %s1103_s11), 7 }
 0x196   : > { %1313 = vpow2.f32 %v694_v44  ;;  %s1104_s24 = sshll.u32 %s1636_s11, 1 }
 0x197   : > { %v1304_v47 = vpop.eup %1303  ;;  %s354_s26 = sadd.s32 %s1154_s12, %s1104_s24 }
 0x198   : > { %v699_v49 = vsel %vm395_vm1, %v1304_v47, 0.0  ;;  %v1306_v50 = vpop.eup %1305  ;;  %s1106_s27 = sshll.u32 %s354_s26, 2 }
 0x199   : > { %703 = vadd.xlane.f32.xlu0 %v702_v48  ;;  %700 = vadd.xlane.f32.xlu1 %v699_v49  ;;  %v705_v53 = vsel %vm395_vm1, %v1306_v50, 0.0  ;;  %s1578_s30 = scalar_lea.vmem %s1620_s3, %s1106_s27 }
 0x19b   : > { %v1308_v51 = vpop.eup %1307 }
 0x19c   : > { %v708_v52 = vsel %vm395_vm1, %v1308_v51, 0.0 }
 0x19d   : > { %709 = vadd.xlane.f32.xlu0 %v708_v52  ;;  %706 = vadd.xlane.f32.xlu1 %v705_v53 }
 0x19f   : > { %v1310_v54 = vpop.eup %1309 }
 0x1a0   : > { %v1312_v55 = vpop.eup %1311  ;;  %v714_v56 = vsel %vm395_vm1, %v1310_v54, 0.0 }
 0x1a1   : > { %715 = vadd.xlane.f32.xlu0 %v714_v56  ;;  %v711_v57 = vsel %vm395_vm1, %v1312_v55, 0.0 }
 0x1a2   : > { %712 = vadd.xlane.f32.xlu1 %v711_v57 }
 0x1a3   : > { %v1314_v58 = vpop.eup %1313 }
 0x1a4   : > { %v717_v59 = vsel %vm395_vm1, %v1314_v58, 0.0 }
 0x1a6   : > { %718 = vadd.xlane.f32.xlu1 %v717_v59 }
 0x21e   : > { %v698_v62 = vpop.xlane.xlu0 %697 }
 0x21f   : > { %1315 = vrcp.f32 %v698_v62 }
 0x222   : > { %v704_v63 = vpop.xlane.xlu0 %703  ;;  %v701_v0 = vpop.xlane.xlu1 %700 }
 0x223   : > { %1317 = vrcp.f32 %v701_v0 }
 0x224   : > { %1319 = vrcp.f32 %v704_v63 }
 0x226   : > { %v710_v1 = vpop.xlane.xlu0 %709  ;;  %v707_v2 = vpop.xlane.xlu1 %706 }
 0x227   : > { %1321 = vrcp.f32 %v707_v2 }
 0x228   : > { %1323 = vrcp.f32 %v710_v1 }
 0x22a   : > { %v716_v3 = vpop.xlane.xlu0 %715 }
 0x22b   : > { %v713_v4 = vpop.xlane.xlu1 %712 }
 0x22c   : > { %1325 = vrcp.f32 %v713_v4  ;;  %v1316_v5 = vpop.eup %1315 }
 0x22d   : > { %1327 = vrcp.f32 %v716_v3  ;;  %v728_v8 = vmul.f32 %v1316_v5, %v1300_v43 }
 0x22f   : > { %v719_v6 = vpop.xlane.xlu1 %718 }
 0x230   : > { %1329 = vrcp.f32 %v719_v6  ;;  %v1318_v7 = vpop.eup %1317 }
 0x231   : > { %v729_v9 = vmul.f32 %v1318_v7, %v1304_v47  ;;  %v1320_v10 = vpop.eup %1319 }
 0x232   : > { %v730_v15 = vmul.f32 %v1320_v10, %v1302_v46 }
 0x233   : > { %v736_v13 = vpack.c.bf16 %v729_v9, %v728_v8 }
 0x234   : > { %v1322_v14 = vpop.eup %1321 }
 0x235   : > { %1206 = vmatmul.mubr.msk.bf16.vlgmr.msra.gmra.mxu0 %vm395_vm1, %v736_v13  ;;  %v731_v16 = vmul.f32 %v1322_v14, %v1306_v50  ;;  %v1324_v17 = vpop.eup %1323 }
 0x236   : > { %1216 = vmatpush3.bf16.msra.mxu0 %v1297_v11  ;;  %1217 = vmatprep.mubr.msk.bf16.mxu0 %vm1388_vm0, %v1387_v12  ;;  %v732_v21 = vmul.f32 %v1324_v17, %v1308_v51 }
 0x237   : > { %v737_v19 = vpack.c.bf16 %v731_v16, %v730_v15 }
 0x239   : > { %v1326_v20 = vpop.eup %1325  ;;  %1212 = vmatmul.mubr.msk.bf16.vlgmr.msra.gmra.mxu1 %vm395_vm1, %v737_v19 }
 0x23a   : > { %v733_v22 = vmul.f32 %v1326_v20, %v1312_v55  ;;  %v1328_v23 = vpop.eup %1327  ;;  %1222 = vmatpush3.bf16.msra.mxu1 %v1298_v18  ;;  %1223 = vmatprep.mubr.msk.bf16.mxu1 %vm1388_vm0, %v1387_v12 }
 0x23b   : > { %v734_v26 = vmul.f32 %v1328_v23, %v1310_v54 }
 0x23c   : > { %v738_v24 = vpack.c.bf16 %v733_v22, %v732_v21 }
 0x23d   : > { %v1330_v25 = vpop.eup %1329 }
 0x23e   : > { %v735_v27 = vmul.f32 %v1330_v25, %v1314_v58  ;;  %1218 = vmatmul.mubr.msk.bf16.vlgmr.msra.gmra.mxu0 %vm395_vm1, %v738_v24 }
 0x240   : > { %v739_v28 = vpack.c.bf16 %v735_v27, %v734_v26 }
 0x242   : > { %1224 = vmatmul.mubr.msk.bf16.vlgmr.msra.gmra.mxu1 %vm395_vm1, %v739_v28 }
 0x2f5   : > { %v783_v12 = vpop.f32.mrf.mxu0 }
 0x2f6   : > { %v1155_v29 = vpack.c.bf16 %v783_v12, %v783_v12 }
 0x2f7   : > { %v1207_v30 = vpop.f32.mrf.mxu0 }
 0x2f8   : > { %973 = vst.msk [vmem:[%s1578_s30] sm:$0xf] %vm972_vm2, %v1155_v29 }
 0x2f9   : > { %v786_v31 = vpop.f32.mrf.mxu0  ;;  %v833_v32 = vpop.f32.mrf.mxu1 }
 0x2fa   : > { %v1156_v33 = vpack.c.bf16 %v786_v31, %v786_v31  ;;  %v1157_v34 = vpack.c.bf16 %v833_v32, %v833_v32 }
 0x2fb   : > { %v1208_v35 = vpop.f32.mrf.mxu0  ;;  %v1213_v36 = vpop.f32.mrf.mxu1 }
 0x2fc   : > { %974 = vst.msk [vmem:[%s1578_s30 + $0x4] sm:$0xf] %vm972_vm2, %v1156_v33  ;;  %975 = vst.msk [vmem:[%s1578_s30 + $0x8] sm:$0xf] %vm972_vm2, %v1157_v34 }
 0x2fd   : > { %v836_v37 = vpop.f32.mrf.mxu1 }
 0x2fe   : > { %v883_v38 = vpop.f32.mrf.mxu0  ;;  %v1158_v39 = vpack.c.bf16 %v836_v37, %v836_v37 }
 0x2ff   : > { %v1159_v40 = vpack.c.bf16 %v883_v38, %v883_v38  ;;  %v1214_v41 = vpop.f32.mrf.mxu1 }
 0x300   : > { %v1219_v42 = vpop.f32.mrf.mxu0  ;;  %976 = vst.msk [vmem:[%s1578_s30 + $0xc] sm:$0xf] %vm972_vm2, %v1158_v39 }
 0x301   : > { %977 = vst.msk [vmem:[%s1578_s30 + $0x10] sm:$0xf] %vm972_vm2, %v1159_v40 }
 0x302   : > { %v886_v43 = vpop.f32.mrf.mxu0  ;;  %v933_v44 = vpop.f32.mrf.mxu1 }
 0x303   : > { %v1160_v45 = vpack.c.bf16 %v886_v43, %v886_v43  ;;  %v1161_v46 = vpack.c.bf16 %v933_v44, %v933_v44 }
 0x304   : > { %v1220_v47 = vpop.f32.mrf.mxu0  ;;  %v1225_v48 = vpop.f32.mrf.mxu1 }
 0x305   : > { %978 = vst.msk [vmem:[%s1578_s30 + $0x14] sm:$0xf] %vm972_vm2, %v1160_v45  ;;  %979 = vst.msk [vmem:[%s1578_s30 + $0x18] sm:$0xf] %vm972_vm2, %v1161_v46 }
 0x306   : > { %v936_v49 = vpop.f32.mrf.mxu1 }
 0x307   : > { %v1162_v50 = vpack.c.bf16 %v936_v49, %v936_v49 }
 0x308   : > { %v1226_v51 = vpop.f32.mrf.mxu1 }
 0x309   : > { %980 = vst.msk [vmem:[%s1578_s30 + $0x1c] sm:$0xf] %vm972_vm2, %v1162_v50 }
 0x30a PF: > { %s13_s18 = sadd.s32 1, %s1385_s18   ;;  %s1621_s12 = smov %s1365_s13 }
 0x30b   : > { %p10_p12 = scmp.ge.s32.totalorder %s13_s18, 6   ;;  %s1622_s13 = smov %s1460_s25 }
 0x30c   : > { %s1623_s14 = smov %s1377_s16  ;;  %s1624_s15 = smov %s1381_s17 }
 0x30d   : > { %s1625_s16 = smov %s1628_s19  ;;  %s1626_s17 = smov %s1632_s20 }
 0x30e   :  { %12 = sbr.rel (!%p10_p12) target bundleno = 4 (0x4), region = 113 }

// kernel: _lambda_.51
= control target key start
LH: loop header
LB: loop body
LE: loop exit
PB: predicated region body
PF: predicated region fallthrough
CT: control target
= control target key end

     0   :  { %s182_s0 = inlined_call_operand.vmem [shape: f32[32,128], index: 0, kind: input, shape index: {}]   ;;  %s183_s1 = inlined_call_operand.vmem [shape: f32[1,128], index: 1, kind: input, shape index: {}]   ;;  %s184_s2 = inlined_call_operand.vmem [shape: f32[1,128], index: 2, kind: input, shape index: {}]   ;;  %s185_s3 = inlined_call_operand.vmem [shape: bf16[32,128], index: 3, kind: output, shape index: {}]  }
   0x1   :  { %v14_v0 = vld [vmem:[%s182_s0] sm:$0xff]  ;;  %v16_v1 = vld [vmem:[%s182_s0 + $0x10] sm:$0xff]  ;;  %v15_v2 = vld [vmem:[%s182_s0 + $0x8] sm:$0xff] }
   0x2   :  { %18 = vadd.xlane.f32.xlu0 %v14_v0  ;;  %22 = vadd.xlane.f32.xlu1 %v16_v1  ;;  %v17_v3 = vld [vmem:[%s182_s0 + $0x18] sm:$0xff]  ;;  %v109_v34 = vld [vmem:[%s183_s1] ss:$0 sm:$0xff] }
   0x3   :  { %v110_v39 = vld [vmem:[%s184_s2] ss:$0 sm:$0xff] }
   0x6   :  { %20 = vadd.xlane.f32.xlu0 %v15_v2  ;;  %24 = vadd.xlane.f32.xlu1 %v17_v3 }
  0x8b   :  { %v19_v4 = vpop.xlane.xlu0 %18  ;;  %v23_v5 = vpop.xlane.xlu1 %22 }
  0x8c   :  { %v27_v6 = vmul.f32 0.0078125, %v19_v4  ;;  %v29_v7 = vmul.f32 0.0078125, %v23_v5 }
  0x8e   :  { %v31_v8 = vsub.f32 %v14_v0, %v27_v6  ;;  %v33_v9 = vsub.f32 %v16_v1, %v29_v7 }
  0x8f   :  { %v21_v10 = vpop.xlane.xlu0 %20  ;;  %v25_v11 = vpop.xlane.xlu1 %24 }
  0x90   :  { %v28_v12 = vmul.f32 0.0078125, %v21_v10  ;;  %v35_v13 = vmul.f32 %v31_v8, %v31_v8  ;;  %v30_v14 = vmul.f32 0.0078125, %v25_v11  ;;  %v37_v17 = vmul.f32 %v33_v9, %v33_v9 }
  0x92   :  { %v32_v15 = vsub.f32 %v15_v2, %v28_v12  ;;  %39 = vadd.xlane.f32.xlu0 %v35_v13  ;;  %v34_v16 = vsub.f32 %v17_v3, %v30_v14 }
  0x94   :  { %v36_v18 = vmul.f32 %v32_v15, %v32_v15  ;;  %v38_v19 = vmul.f32 %v34_v16, %v34_v16 }
  0x96   :  { %43 = vadd.xlane.f32.xlu0 %v37_v17  ;;  %41 = vadd.xlane.f32.xlu1 %v36_v18 }
  0x9a   :  { %45 = vadd.xlane.f32.xlu1 %v38_v19 }
 0x11b   :  { %v40_v20 = vpop.xlane.xlu0 %39 }
 0x11c   :  { %v47_v21 = vmul.f32 0.0078125, %v40_v20 }
 0x11e   :  { %v51_v22 = vadd.f32 1e-05, %v47_v21 }
 0x11f   :  { %v42_v23 = vpop.xlane.xlu1 %41  ;;  %v44_v24 = vpop.xlane.xlu0 %43 }
 0x120   :  { %130 = vrsqrt.f32 %v51_v22  ;;  %v48_v25 = vmul.f32 0.0078125, %v42_v23  ;;  %v49_v26 = vmul.f32 0.0078125, %v44_v24 }
 0x122   :  { %v52_v27 = vadd.f32 1e-05, %v48_v25  ;;  %v53_v28 = vadd.f32 1e-05, %v49_v26 }
 0x123   :  { %v46_v29 = vpop.xlane.xlu1 %45 }
 0x124   :  { %132 = vrsqrt.f32 %v52_v27  ;;  %v50_v30 = vmul.f32 0.0078125, %v46_v29 }
 0x125   :  { %134 = vrsqrt.f32 %v53_v28 }
 0x126   :  { %v54_v31 = vadd.f32 1e-05, %v50_v30 }
 0x128   :  { %136 = vrsqrt.f32 %v54_v31 }
 0x12d   :  { %v131_v32 = vpop.eup %130 }
 0x12e   :  { %v59_v33 = vmul.f32 %v131_v32, %v31_v8 }
 0x130   :  { %v70_v37 = vmul.f32 %v109_v34, %v59_v33 }
 0x131   :  { %v133_v35 = vpop.eup %132 }
 0x132   :  { %v135_v36 = vpop.eup %134  ;;  %v60_v38 = vmul.f32 %v133_v35, %v32_v15  ;;  %v81_v43 = vadd.f32 %v110_v39, %v70_v37 }
 0x133   :  { %v61_v40 = vmul.f32 %v135_v36, %v33_v9 }
 0x134   :  { %v71_v41 = vmul.f32 %v109_v34, %v60_v38 }
 0x135   :  { %v137_v42 = vpop.eup %136  ;;  %v72_v45 = vmul.f32 %v109_v34, %v61_v40 }
 0x136   :  { %v82_v44 = vadd.f32 %v110_v39, %v71_v41  ;;  %v62_v46 = vmul.f32 %v137_v42, %v34_v16 }
 0x137   :  { %v83_v49 = vadd.f32 %v110_v39, %v72_v45 }
 0x138   :  { %v122_v47 = vpack.c.bf16 %v82_v44, %v81_v43  ;;  %v73_v48 = vmul.f32 %v109_v34, %v62_v46 }
 0x13a   :  { %123 = vst [vmem:[%s185_s3] sm:$0xff] %v122_v47   ;;  %v84_v50 = vadd.f32 %v110_v39, %v73_v48 }
 0x13c   :  { %v127_v51 = vpack.c.bf16 %v84_v50, %v83_v49 }
 0x13e   :  { %129 = vst [vmem:[%s185_s3 + $0x8] sm:$0xff] %v127_v51  }

// kernel: _lambda_.52
= control target key start
LH: loop header
LB: loop body
LE: loop exit
PB: predicated region body
PF: predicated region fallthrough
CT: control target
= control target key end

     0   :  { %vm16_vm0 = vcmask 523264   ;;  %v229_v1 = vmov 0.0   ;;  %s299_s1 = inlined_call_operand.vmem [shape: bf16[128,64], index: 1, kind: input, shape index: {}]   ;;  %s300_s0 = inlined_call_operand.vmem [shape: bf16[32,128], index: 0, kind: input, shape index: {}]   ;;  %s301_s2 = inlined_call_operand.vmem [shape: f32[32,64], index: 2, kind: output, shape index: {}]  }
   0x1   :  { %v219_v0 = vld [vmem:[%s299_s1 + $0x38] sm:$0xff]   ;;  %19 = vst.msk [vmem:[#allocation2 + $0x10] sm:$0xff] %vm16_vm0, %v229_v1  ;;  %17 = vst.msk [vmem:[#allocation2] sm:$0xff] %vm16_vm0, %v229_v1  ;;  %v220_v2 = vld [vmem:[%s299_s1 + $0x30] sm:$0xff]  }
   0x2   :  { %18 = vst.msk [vmem:[#allocation2 + $0x8] sm:$0xff] %vm16_vm0, %v229_v1  ;;  %20 = vst.msk [vmem:[#allocation2 + $0x18] sm:$0xff] %vm16_vm0, %v229_v1  ;;  %198 = vmatprep.subr.bf16.mxu0 %v219_v0  ;;  %v221_v3 = vld [vmem:[%s299_s1 + $0x28] sm:$0xff]   ;;  %v222_v4 = vld [vmem:[%s299_s1 + $0x20] sm:$0xff]  }
   0x3   :  { %199 = vmatpush3.bf16.msra.mxu0 %v219_v0  ;;  %v227_v5 = vld [vmem:[%s300_s0] sm:$0xff]   ;;  %v223_v6 = vld [vmem:[%s299_s1 + $0x18] sm:$0xff]   ;;  %v224_v7 = vld [vmem:[%s299_s1 + $0x10] sm:$0xff]  }
   0x4   :  { %200 = vmatprep.subr.bf16.mxu0 %v220_v2  ;;  %214 = vmatprep.mubr.bf16.mxu0 %v227_v5  ;;  %v225_v8 = vld [vmem:[%s299_s1 + $0x8] sm:$0xff]   ;;  %v226_v9 = vld [vmem:[%s299_s1] sm:$0xff]  }
   0x5   :  { %v228_v10 = vld [vmem:[%s300_s0 + $0x8] sm:$0xff]  }
   0x7   :  { %201 = vmatpush3.bf16.msra.mxu0 %v220_v2 }
   0x8   :  { %202 = vmatprep.subr.bf16.mxu0 %v221_v3  ;;  %v23_v11 = vld [vmem:[#allocation2 + $0x10] sm:$0xff]  ;;  %v21_v13 = vld [vmem:[#allocation2] sm:$0xff] }
   0x9   :  { %v24_v16 = vld [vmem:[#allocation2 + $0x18] sm:$0xff]  ;;  %v22_v19 = vld [vmem:[#allocation2 + $0x8] sm:$0xff] }
   0xb   :  { %203 = vmatpush3.bf16.msra.mxu0 %v221_v3 }
   0xc   :  { %204 = vmatprep.subr.bf16.mxu0 %v222_v4 }
   0xf   :  { %205 = vmatpush3.bf16.msra.mxu0 %v222_v4 }
  0x10   :  { %206 = vmatprep.subr.bf16.mxu0 %v223_v6 }
  0x13   :  { %207 = vmatpush3.bf16.msra.mxu0 %v223_v6 }
  0x14   :  { %208 = vmatprep.subr.bf16.mxu0 %v224_v7 }
  0x17   :  { %209 = vmatpush3.bf16.msra.mxu0 %v224_v7 }
  0x18   :  { %210 = vmatprep.subr.bf16.mxu0 %v225_v8 }
  0x1b   :  { %211 = vmatpush3.bf16.msra.mxu0 %v225_v8 }
  0x1c   :  { %212 = vmatprep.subr.bf16.mxu0 %v226_v9 }
  0x1f   :  { %213 = vmatpush3.bf16.msra.mxu0 %v226_v9 }
  0x22   :  { %215 = vmatmul.mubr.bf16.vlgmr.msra.gmra.mxu0 %v228_v10 }
  0xe2   :  { %v216_v12 = vpop.f32.mrf.mxu0 }
  0xe3   :  { %v156_v14 = vadd.f32 %v216_v12, %v23_v11 }
  0xe4   :  { %v139_v15 = vpop.f32.mrf.mxu0 }
  0xe5   :  { %161 = vst.msk [vmem:[#allocation2 + $0x10] sm:$0xff] %vm16_vm0, %v156_v14  ;;  %v154_v17 = vadd.f32 %v139_v15, %v21_v13 }
  0xe6   :  { %v217_v18 = vpop.f32.mrf.mxu0 }
  0xe7   :  { %159 = vst.msk [vmem:[#allocation2] sm:$0xff] %vm16_vm0, %v154_v17  ;;  %v157_v20 = vadd.f32 %v217_v18, %v24_v16 }
  0xe8   :  { %v142_v21 = vpop.f32.mrf.mxu0 }
  0xe9   :  { %162 = vst.msk [vmem:[#allocation2 + $0x18] sm:$0xff] %vm16_vm0, %v157_v20  ;;  %v155_v22 = vadd.f32 %v142_v21, %v22_v19 }
  0xeb   :  { %160 = vst.msk [vmem:[#allocation2 + $0x8] sm:$0xff] %vm16_vm0, %v155_v22 }
  0xec   :  { %v168_v23 = vld [vmem:[#allocation2 + $0x10] sm:$0xff] }
  0xed   :  { %172 = vst.msk [vmem:[%s301_s2 + $0x10] sm:$0xff] %vm16_vm0, %v168_v23 }
  0xee   :  { %v166_v24 = vld [vmem:[#allocation2] sm:$0xff] }
  0xef   :  { %170 = vst.msk [vmem:[%s301_s2] sm:$0xff] %vm16_vm0, %v166_v24 }
  0xf0   :  { %v169_v25 = vld [vmem:[#allocation2 + $0x18] sm:$0xff] }
  0xf1   :  { %173 = vst.msk [vmem:[%s301_s2 + $0x18] sm:$0xff] %vm16_vm0, %v169_v25 }
  0xf2   :  { %v167_v26 = vld [vmem:[#allocation2 + $0x8] sm:$0xff] }
  0xf3   :  { %171 = vst.msk [vmem:[%s301_s2 + $0x8] sm:$0xff] %vm16_vm0, %v167_v26 }

// kernel: _lambda_.53
= control target key start
LH: loop header
LB: loop body
LE: loop exit
PB: predicated region body
PF: predicated region fallthrough
CT: control target
= control target key end

     0   :  { %vm18_vm0 = vcmask 523264   ;;  %vm110_vm1 = vcmask 519168   ;;  %s199_s0 = inlined_call_operand.vmem [shape: f32[32,64], index: 0, kind: input, shape index: {}]   ;;  %s200_s1 = inlined_call_operand.vmem [shape: f32[1,64], index: 1, kind: input, shape index: {}]   ;;  %s201_s2 = inlined_call_operand.vmem [shape: f32[1,64], index: 2, kind: input, shape index: {}]   ;;  %s202_s3 = inlined_call_operand.vmem [shape: bf16[32,64], index: 3, kind: output, shape index: {}]  }
   0x1   :  { %v14_v0 = vld [vmem:[%s199_s0] sm:$0xff]  ;;  %v16_v1 = vld [vmem:[%s199_s0 + $0x10] sm:$0xff]  ;;  %v15_v2 = vld [vmem:[%s199_s0 + $0x8] sm:$0xff] }
   0x2   :  { %v19_v3 = vsel %vm18_vm0, %v14_v0, 0.0  ;;  %v25_v4 = vsel %vm18_vm0, %v16_v1, 0.0  ;;  %v17_v5 = vld [vmem:[%s199_s0 + $0x18] sm:$0xff]  ;;  %v22_v6 = vsel %vm18_vm0, %v15_v2, 0.0  ;;  %v119_v41 = vld [vmem:[%s200_s1] ss:$0 sm:$0xff] }
   0x3   :  { %20 = vadd.xlane.f32.xlu0 %v19_v3  ;;  %26 = vadd.xlane.f32.xlu1 %v25_v4  ;;  %v28_v7 = vsel %vm18_vm0, %v17_v5, 0.0  ;;  %v120_v43 = vld [vmem:[%s201_s2] ss:$0 sm:$0xff] }
   0x7   :  { %23 = vadd.xlane.f32.xlu0 %v22_v6  ;;  %29 = vadd.xlane.f32.xlu1 %v28_v7 }
  0x8c   :  { %v21_v8 = vpop.xlane.xlu0 %20  ;;  %v27_v9 = vpop.xlane.xlu1 %26 }
  0x8d   :  { %v32_v10 = vmul.f32 0.015625, %v21_v8  ;;  %v34_v11 = vmul.f32 0.015625, %v27_v9 }
  0x8f   :  { %v36_v12 = vsub.f32 %v14_v0, %v32_v10  ;;  %v38_v13 = vsub.f32 %v16_v1, %v34_v11 }
  0x90   :  { %v24_v14 = vpop.xlane.xlu0 %23  ;;  %v30_v15 = vpop.xlane.xlu1 %29 }
  0x91   :  { %v33_v16 = vmul.f32 0.015625, %v24_v14  ;;  %v35_v17 = vmul.f32 0.015625, %v30_v15  ;;  %v40_v18 = vmul.f32 %v36_v12, %v36_v12  ;;  %v42_v19 = vmul.f32 %v38_v13, %v38_v13 }
  0x93   :  { %v37_v20 = vsub.f32 %v15_v2, %v33_v16  ;;  %v39_v21 = vsub.f32 %v17_v5, %v35_v17  ;;  %v44_v22 = vsel %vm18_vm0, %v40_v18, 0.0  ;;  %v50_v23 = vsel %vm18_vm0, %v42_v19, 0.0 }
  0x94   :  { %45 = vadd.xlane.f32.xlu0 %v44_v22 }
  0x95   :  { %v41_v24 = vmul.f32 %v37_v20, %v37_v20  ;;  %v43_v25 = vmul.f32 %v39_v21, %v39_v21 }
  0x97   :  { %v47_v26 = vsel %vm18_vm0, %v41_v24, 0.0  ;;  %v53_v27 = vsel %vm18_vm0, %v43_v25, 0.0 }
  0x98   :  { %51 = vadd.xlane.f32.xlu0 %v50_v23  ;;  %48 = vadd.xlane.f32.xlu1 %v47_v26 }
  0x9c   :  { %54 = vadd.xlane.f32.xlu1 %v53_v27 }
 0x11d   :  { %v46_v28 = vpop.xlane.xlu0 %45 }
 0x11e   :  { %v56_v29 = vmul.f32 0.015625, %v46_v28 }
 0x120   :  { %v60_v30 = vadd.f32 1e-05, %v56_v29 }
 0x121   :  { %v49_v31 = vpop.xlane.xlu1 %48  ;;  %v52_v32 = vpop.xlane.xlu0 %51 }
 0x122   :  { %129 = vrsqrt.f32 %v60_v30  ;;  %v57_v33 = vmul.f32 0.015625, %v49_v31  ;;  %v58_v34 = vmul.f32 0.015625, %v52_v32 }
 0x124   :  { %v61_v35 = vadd.f32 1e-05, %v57_v33  ;;  %v62_v36 = vadd.f32 1e-05, %v58_v34 }
 0x125   :  { %v55_v37 = vpop.xlane.xlu1 %54 }
 0x126   :  { %131 = vrsqrt.f32 %v61_v35  ;;  %v59_v38 = vmul.f32 0.015625, %v55_v37 }
 0x127   :  { %133 = vrsqrt.f32 %v62_v36 }
 0x128   :  { %v63_v39 = vadd.f32 1e-05, %v59_v38 }
 0x12a   :  { %135 = vrsqrt.f32 %v63_v39 }
 0x12f   :  { %v130_v40 = vpop.eup %129 }
 0x130   :  { %v68_v42 = vmul.f32 %v130_v40, %v36_v12 }
 0x132   :  { %v79_v44 = vmul.f32 %v119_v41, %v68_v42 }
 0x133   :  { %v132_v45 = vpop.eup %131 }
 0x134   :  { %v134_v46 = vpop.eup %133  ;;  %v90_v47 = vadd.f32 %v120_v43, %v79_v44  ;;  %v69_v48 = vmul.f32 %v132_v45, %v37_v20 }
 0x135   :  { %v70_v49 = vmul.f32 %v134_v46, %v38_v13 }
 0x136   :  { %v125_v50 = vpack.c.bf16 %v90_v47, %v90_v47  ;;  %v80_v51 = vmul.f32 %v119_v41, %v69_v48 }
 0x137   :  { %v136_v52 = vpop.eup %135  ;;  %v81_v53 = vmul.f32 %v119_v41, %v70_v49 }
 0x138   :  { %111 = vst.msk [vmem:[%s202_s3] sm:$0xf] %vm110_vm1, %v125_v50  ;;  %v91_v54 = vadd.f32 %v120_v43, %v80_v51  ;;  %v71_v55 = vmul.f32 %v136_v52, %v39_v21 }
 0x139   :  { %v92_v56 = vadd.f32 %v120_v43, %v81_v53 }
 0x13a   :  { %v126_v57 = vpack.c.bf16 %v91_v54, %v91_v54  ;;  %v82_v58 = vmul.f32 %v119_v41, %v71_v55 }
 0x13b   :  { %v127_v59 = vpack.c.bf16 %v92_v56, %v92_v56 }
 0x13c   :  { %112 = vst.msk [vmem:[%s202_s3 + $0x4] sm:$0xf] %vm110_vm1, %v126_v57  ;;  %v93_v60 = vadd.f32 %v120_v43, %v82_v58 }
 0x13d   :  { %113 = vst.msk [vmem:[%s202_s3 + $0x8] sm:$0xf] %vm110_vm1, %v127_v59 }
 0x13e   :  { %v128_v61 = vpack.c.bf16 %v93_v60, %v93_v60 }
 0x140   :  { %114 = vst.msk [vmem:[%s202_s3 + $0xc] sm:$0xf] %vm110_vm1, %v128_v61 }

// kernel: _lambda_.54
= control target key start
LH: loop header
LB: loop body
LE: loop exit
PB: predicated region body
PF: predicated region fallthrough
CT: control target
= control target key end

     0   :  { %vm20_vm0 = vcmask 523264   ;;  %v284_v1 = vmov 0   ;;  %v285_v2 = vmov 0.0   ;;  %v187_v12 = vlaneseq  ;;  %s361_s1 = inlined_call_operand.vmem [shape: bf16[64,192], index: 1, kind: input, shape index: {}]   ;;  %s362_s0 = inlined_call_operand.vmem [shape: bf16[32,64], index: 0, kind: input, shape index: {}]   ;;  %s363_s2 = inlined_call_operand.vmem [shape: f32[1,192], index: 2, kind: input, shape index: {}]   ;;  %s364_s3 = inlined_call_operand.vmem [shape: bf16[32,192], index: 3, kind: output, shape index: {}]  }
   0x1   :  { %v270_v0 = vld [vmem:[%s361_s1 + $0x34] ss:$8 sps:$4 sm:$0xff]   ;;  %137 = vmatprep.mubr.bf16.mxu0 %v284_v1  ;;  %147 = vmatprep.mubr.bf16.mxu1 %v284_v1  ;;  %21 = vst.msk [vmem:[#allocation2 + $0x8] sm:$0xff] %vm20_vm0, %v285_v2  ;;  %23 = vst.msk [vmem:[#allocation2 + $0x18] sm:$0xff] %vm20_vm0, %v285_v2  ;;  %v272_v3 = vld [vmem:[%s361_s1 + $0x30] ss:$8 sps:$4 sm:$0xff]  }
   0x2   :  { %25 = vst.msk [vmem:[#allocation2 + $0x28] sm:$0xff] %vm20_vm0, %v285_v2  ;;  %27 = vst.msk [vmem:[#allocation2 + $0x38] sm:$0xff] %vm20_vm0, %v285_v2  ;;  %113 = vmatprep.subr.bf16.mxu0 %v270_v0  ;;  %260 = vmatprep.subr.bf16.mxu1 %v270_v0  ;;  %v273_v4 = vld [vmem:[%s361_s1 + $0x24] ss:$8 sps:$4 sm:$0xff]   ;;  %v275_v5 = vld [vmem:[%s361_s1 + $0x20] ss:$8 sps:$4 sm:$0xff]  }
   0x3   :  { %114 = vmatpush1.bf16.msra.mxu0 %v272_v3  ;;  %264 = vmatpush1.bf16.msra.mxu1 %v272_v3  ;;  %v276_v6 = vld [vmem:[%s361_s1 + $0x14] ss:$8 sps:$4 sm:$0xff]   ;;  %v278_v7 = vld [vmem:[%s361_s1 + $0x10] ss:$8 sps:$4 sm:$0xff]   ;;  %v279_v8 = vld [vmem:[%s361_s1 + $0x4] ss:$8 sps:$4 sm:$0xff]  }
   0x4   :  { %115 = vmatprep.subr.bf16.mxu0 %v273_v4  ;;  %261 = vmatprep.subr.bf16.mxu1 %v273_v4  ;;  %v281_v9 = vld [vmem:[%s361_s1] ss:$8 sps:$4 sm:$0xff]   ;;  %v188_v17 = vshrl.u32 %v187_v12, 7  ;;  %vm229_vm1 = vcmask 1043456   ;;  %vm230_vm2 = vcmask 523268  }
   0x5   :  { %v282_v10 = vld [vmem:[%s362_s0] sm:$0xff]   ;;  %v283_v11 = vld [vmem:[%s362_s0 + $0x8] sm:$0xff]   ;;  %vm231_vm3 = vmor %vm230_vm2, %vm229_vm1 }
   0x6   :  { %v189_v26 = vsub.s32 0, %v188_v17  ;;  %v193_v27 = vsub.s32 1, %v188_v17  ;;  %v185_v28 = vld [vmem:[%s363_s2] sm:$0x3] }
   0x7   :  { %116 = vmatpush1.bf16.msra.mxu0 %v275_v5  ;;  %265 = vmatpush1.bf16.msra.mxu1 %v275_v5 }
   0x8   :  { %117 = vmatprep.subr.bf16.mxu0 %v276_v6  ;;  %262 = vmatprep.subr.bf16.mxu1 %v276_v6  ;;  %v29_v15 = vld [vmem:[#allocation2 + $0x8] sm:$0xff]  ;;  %v31_v24 = vld [vmem:[#allocation2 + $0x18] sm:$0xff]  ;;  %v190_v33 = vrot.slane %v185_v28, %v189_v26  ;;  %v194_v34 = vrot.slane %v185_v28, %v193_v27 }
   0x9   :  { %v33_v16 = vld [vmem:[#allocation2 + $0x28] sm:$0xff]  ;;  %v35_v25 = vld [vmem:[#allocation2 + $0x38] sm:$0xff] }
   0xb   :  { %118 = vmatpush1.bf16.msra.mxu0 %v278_v7  ;;  %266 = vmatpush1.bf16.msra.mxu1 %v278_v7 }
   0xc   :  { %119 = vmatprep.subr.bf16.mxu0 %v279_v8  ;;  %263 = vmatprep.subr.bf16.mxu1 %v279_v8 }
   0xf   :  { %120 = vmatpush1.bf16.msra.mxu0 %v281_v9  ;;  %267 = vmatpush1.bf16.msra.mxu1 %v281_v9 }
  0x12   :  { %250 = vmatmul.mubr.msk.bf16.vlgmr.msra.gmra.mxu0 %vm20_vm0, %v282_v10  ;;  %251 = vmatmul.mubr.msk.bf16.vlgmr.msra.gmra.mxu1 %vm20_vm0, %v283_v11 }
  0xd2   :  { %v139_v13 = vpop.f32.mrf.mxu0  ;;  %v149_v14 = vpop.f32.mrf.mxu1 }
  0xd3   :  { %v197_v37 = vadd.f32 %v190_v33, %v139_v13  ;;  %v201_v38 = vadd.f32 %v190_v33, %v149_v14 }
  0xd4   :  { %v141_v18 = vpop.f32.mrf.mxu0  ;;  %v151_v19 = vpop.f32.mrf.mxu1 }
  0xd5   :  { %v159_v20 = vadd.f32 %v141_v18, %v29_v15  ;;  %v163_v21 = vadd.f32 %v151_v19, %v33_v16 }
  0xd6   :  { %v143_v22 = vpop.f32.mrf.mxu0  ;;  %v153_v23 = vpop.f32.mrf.mxu1 }
  0xd7   :  { %167 = vst.msk [vmem:[#allocation2 + $0x8] sm:$0xff] %vm20_vm0, %v159_v20  ;;  %171 = vst.msk [vmem:[#allocation2 + $0x28] sm:$0xff] %vm20_vm0, %v163_v21  ;;  %v199_v45 = vadd.f32 %v190_v33, %v143_v22  ;;  %v203_v46 = vadd.f32 %v190_v33, %v153_v23 }
  0xd8   :  { %v145_v29 = vpop.f32.mrf.mxu0  ;;  %v155_v30 = vpop.f32.mrf.mxu1 }
  0xd9   :  { %v161_v31 = vadd.f32 %v145_v29, %v31_v24  ;;  %v165_v32 = vadd.f32 %v155_v30, %v35_v25 }
  0xdb   :  { %169 = vst.msk [vmem:[#allocation2 + $0x18] sm:$0xff] %vm20_vm0, %v161_v31  ;;  %173 = vst.msk [vmem:[#allocation2 + $0x38] sm:$0xff] %vm20_vm0, %v165_v32 }
  0xde   :  { %v178_v35 = vld [vmem:[#allocation2 + $0x8] sm:$0xff] }
  0xdf   :  { %v182_v36 = vld [vmem:[#allocation2 + $0x28] sm:$0xff]  ;;  %v198_v39 = vadd.f32 %v194_v34, %v178_v35 }
  0xe0   :  { %v202_v40 = vadd.f32 %v194_v34, %v182_v36 }
  0xe1   :  { %v256_v41 = vpack.c.bf16 %v198_v39, %v197_v37 }
  0xe2   :  { %v258_v42 = vpack.c.bf16 %v202_v40, %v201_v38  ;;  %v180_v43 = vld [vmem:[#allocation2 + $0x18] sm:$0xff] }
  0xe3   :  { %v184_v44 = vld [vmem:[#allocation2 + $0x38] sm:$0xff]  ;;  %232 = vst.msk [vmem:[%s364_s3] sm:$0xff] %vm231_vm3, %v256_v41  ;;  %v200_v47 = vadd.f32 %v194_v34, %v180_v43 }
  0xe4   :  { %234 = vst.msk [vmem:[%s364_s3 + $0x10] sm:$0xff] %vm231_vm3, %v258_v42  ;;  %v204_v48 = vadd.f32 %v194_v34, %v184_v44 }
  0xe5   :  { %v257_v49 = vpack.c.bf16 %v200_v47, %v199_v45 }
  0xe6   :  { %v259_v50 = vpack.c.bf16 %v204_v48, %v203_v46 }
  0xe7   :  { %233 = vst.msk [vmem:[%s364_s3 + $0x8] sm:$0xff] %vm231_vm3, %v257_v49 }
  0xe8   :  { %235 = vst.msk [vmem:[%s364_s3 + $0x18] sm:$0xff] %vm231_vm3, %v259_v50 }

// kernel: _lambda_.55
= control target key start
LH: loop header
LB: loop body
LE: loop exit
PB: predicated region body
PF: predicated region fallthrough
CT: control target
= control target key end

     0   :  { %s707_s9 = smov 0   ;;  %s709_s10 = smov 0   ;;  %s817_s0 = inlined_call_operand.vmem [shape: bf16[3,4,2,16,16], index: 0, kind: input, shape index: {}]   ;;  %s818_s1 = inlined_call_operand.vmem [shape: f32[4,16,16], index: 1, kind: input, shape index: {}]   ;;  %s819_s2 = inlined_call_operand.vmem [shape: bf16[4,2,16,16], index: 2, kind: output, shape index: {}]  }
   0x1   :  { %s711_s11 = smov 0   ;;  %s713_s12 = smov 0  }
   0x2   :  { %s715_s13 = smov 0   ;;  %s717_s14 = smov 0  }
   0x3   :  { %s719_s15 = smov 0  }
   0x4 LB: > { %s21_s16 = sadd.s32 1, %s680_s13  ;;  %s24_s17 = sadd.s32 1, %s684_s14  ;;  %s688_s15 = sphi %s719_s15, %s12_s15   ;;  %s684_s14 = sphi %s717_s14, %s825_s14   ;;  %s680_s13 = sphi %s715_s13, %s824_s13   ;;  %s676_s12 = sphi %s713_s12, %s823_s12   ;;  %s672_s11 = sphi %s711_s11, %s822_s11   ;;  %s668_s10 = sphi %s709_s10, %s821_s10   ;;  %s664_s9 = sphi %s707_s9, %s820_s9  }
   0x5   : > { %p22_p0 = scmp.ge.s32.totalorder %s21_s16, 4  ;;  %p40_p1 = scmp.ne.s32.totalorder %s668_s10, %s664_s9 }
   0x6   : > { %p41_p2 = scmp.eq.s32.totalorder %s688_s15, 0  ;;  %s33_s21 = sadd.s32 1, %s668_s10 }
   0x7   : > { %s827_s16 = smov (%p22_p0, %s21_s16), 0  ;;  %s829_s17 = smov (!%p22_p0, %s24_s17), %s684_s14 }
   0x8   : > { %p42_p3 = por %p41_p2, %p40_p1  ;;  %p26_p4 = scmp.ge.s32.totalorder %s829_s17, 2 }
   0x9   : > { %s28_s18 = ssub.s32 %s680_s13, %s827_s16  ;;  %p521_p6 = scmp.ge.s32.totalorder %s688_s15, 8 }
   0xa   : > { %s831_s17 = smov (%p26_p4, %s829_s17), 0 }
   0xb   : > { %s29_s19 = ssub.s32 %s684_s14, %s831_s17  ;;  %120 = sbr.rel (%p521_p6) target bundleno = 26 (0x1a), region = 16 }
   0xc   : > { %s30_s20 = sor.u32 %s29_s19, %s28_s18 }
   0xd   : > { %p31_p5 = scmp.eq.s32.totalorder %s30_s20, 0 }
   0xf   : > { %s758_s22 = scalar_select %p31_p5, %s668_s10, %s33_s21  }
  0x10   : > { %123 = sbr.rel (!%p42_p3) target bundleno = 26 (0x1a), region = 20  ;;  %s125_s23 = sand.u32 (%p42_p3), 1, %s668_s10  }
  0x11   : > { %s522_s24 = sshll.u32 (%p42_p3), %s684_s14, 1  ;;  %s563_s25 = smul.u32 (%p42_p3), 24, %s125_s23 }
  0x12   : > { %s523_s26 = sshll.u32 (%p42_p3), %s680_s13, 2 }
  0x13   : > { %s130_s27 = sadd.s32 (%p42_p3), %s523_s26, %s522_s24  ;;  %s127_s4 = scalar_lea.vmem (%p42_p3), [#allocation2], %s563_s25 }
  0x14   : > { %s524_s28 = sshll.u32 (%p42_p3), %s130_s27, 2 }
  0x15   : > { %s132_s3 = scalar_lea.vmem %s817_s0, %s524_s28 }
  0x16   : > { %v149_v0 = vld [vmem:[%s132_s3] sm:$0xff]  }
  0x17   : > { %v153_v1 = vld [vmem:[%s132_s3 + $0x40] sm:$0xff]   ;;  %150 = vst [vmem:[%s127_s4] sm:$0xff] %v149_v0  }
  0x18   : > { %v157_v2 = vld [vmem:[%s132_s3 + $0x80] sm:$0xff]   ;;  %154 = vst [vmem:[%s127_s4 + $0x8] sm:$0xff] %v153_v1  }
  0x19   : > { %158 = vst [vmem:[%s127_s4 + $0x10] sm:$0xff] %v157_v2  }
  0x1a PF: > { %p525_p7 = scmp.ge.s32.totalorder %s688_s15, 1  ;;  %p203_p8 = scmp.lt.s32.totalorder %s688_s15, 9 }
  0x1c   : > { %p204_p9 = pnand %p525_p7, %p203_p8 }
  0x1d   : > { %s210_s5 = sand.u32 (!%p204_p9), 1, %s664_s9   ;;  %p240_p10 = scmp.lt.s32.totalorder (!%p204_p9), %s672_s11, 3 }
  0x1e   : > { %207 = sbr.rel (%p204_p9) target bundleno = 760 (0x2f8), region = 65  ;;  %p247_p11 = scmp.lt.s32.totalorder (!%p204_p9), %s676_s12, 1 }
  0x1f   : > { %s564_s6 = smul.u32 (!%p204_p9), 24, %s210_s5 }
  0x21   : > { %s770_s7 = scalar_lea.vmem (!%p204_p9), [#allocation2], %s564_s6 }
  0x23   : > { %v690_v3 = vmov 0.0   ;;  %vm691_vm0 = vmmov 0   ;;  %vm273_vm1 = vcmask 130048   ;;  %v623_v4 = vld [vmem:[%s770_s7 + $0x8] sm:$0xff]   ;;  %v624_v6 = vld [vmem:[%s770_s7] sm:$0xff]   ;;  %s833_s11 = smov (!%p240_p10, %s672_s11), 3 }
  0x24   : > { %551 = vmatprep.subr.bf16.mxu0 %v690_v3  ;;  %553 = vmatprep.mubr.msk.bf16.mxu0 %vm691_vm0, %v690_v3  ;;  %v278_v5 = vsel %vm273_vm1, %v623_v4, 0  ;;  %s544_s8 = sshll.u32 %s833_s11, 4  ;;  %v625_v29 = vld [vmem:[%s770_s7 + $0x10] sm:$0xff]   ;;  %s835_s12 = smov (!%p247_p11, %s676_s12), 1  ;;  %vm408_vm2 = vcmask 125952  }
  0x25   : > { %557 = vmatprep.subr.bf16.mxu1 %v690_v3  ;;  %559 = vmatprep.mubr.msk.bf16.mxu1 %vm691_vm0, %v690_v3  ;;  %s244_s19 = scalar_lea.vmem %s818_s1, %s544_s8  ;;  %s529_s20 = sshll.u32 %s833_s11, 2 }
  0x26   : > { %552 = vmatpush3.bf16.xpose.msra.mxu0 %v278_v5  ;;  %v323_v8 = vld [vmem:[%s244_s19] sm:$0xff]  ;;  %v324_v13 = vld [vmem:[%s244_s19 + $0x8] sm:$0xff]  ;;  %558 = vmatpush3.bf16.msra.mxu1 %v625_v29  ;;  %s528_s21 = sshll.u32 %s835_s12, 1 }
  0x27   : > { %s251_s23 = sadd.s32 %s529_s20, %s528_s21 }
  0x28   : > { %s530_s24 = sshll.u32 %s251_s23, 2 }
  0x29   : > { %s253_s27 = scalar_lea.vmem %s819_s2, %s530_s24 }
  0x2d   : > { %554 = vmatmul.mubr.msk.bf16.vlgmr.msra.gmra.mxu0 %vm273_vm1, %v624_v6 }
  0xed   : > { %v314_v7 = vpop.f32.mrf.mxu0 }
  0xee   : > { %v321_v9 = vmul.f32 0.25, %v314_v7 }
  0xef   : > { %v555_v10 = vpop.f32.mrf.mxu0 }
  0xf0   : > { %v325_v11 = vadd.f32 %v323_v8, %v321_v9 }
  0xf1   : > { %v317_v12 = vpop.f32.mrf.mxu0 }
  0xf2   : > { %v322_v14 = vmul.f32 0.25, %v317_v12  ;;  %v327_v15 = vsel %vm273_vm1, %v325_v11, -inf }
  0xf3   : > { %328 = vmax.xlane.f32.xlu0 %v327_v15  ;;  %v556_v16 = vpop.f32.mrf.mxu0 }
  0xf4   : > { %v326_v17 = vadd.f32 %v324_v13, %v322_v14 }
  0xf6   : > { %v330_v18 = vsel %vm273_vm1, %v326_v17, -inf }
  0xf7   : > { %331 = vmax.xlane.f32.xlu0 %v330_v18 }
 0x17c   : > { %v329_v19 = vpop.xlane.xlu0 %328 }
 0x17d   : > { %v333_v20 = vsub.f32 %v325_v11, %v329_v19 }
 0x17f   : > { %v335_v21 = vmul.f32 1.442695, %v333_v20 }
 0x180   : > { %v332_v22 = vpop.xlane.xlu0 %331 }
 0x181   : > { %626 = vpow2.f32 %v335_v21  ;;  %v334_v23 = vsub.f32 %v326_v17, %v332_v22 }
 0x183   : > { %v337_v24 = vmul.f32 1.442695, %v334_v23 }
 0x185   : > { %628 = vpow2.f32 %v337_v24 }
 0x18e   : > { %v627_v25 = vpop.eup %626 }
 0x18f   : > { %v339_v26 = vsel %vm273_vm1, %v627_v25, 0.0 }
 0x190   : > { %340 = vadd.xlane.f32.xlu1 %v339_v26 }
 0x192   : > { %v629_v27 = vpop.eup %628 }
 0x193   : > { %v342_v28 = vsel %vm273_vm1, %v629_v27, 0.0 }
 0x194   : > { %343 = vadd.xlane.f32.xlu1 %v342_v28 }
 0x219   : > { %v341_v30 = vpop.xlane.xlu1 %340 }
 0x21a   : > { %630 = vrcp.f32 %v341_v30 }
 0x21d   : > { %v344_v31 = vpop.xlane.xlu1 %343 }
 0x21e   : > { %632 = vrcp.f32 %v344_v31 }
 0x227   : > { %v631_v32 = vpop.eup %630 }
 0x228   : > { %v347_v34 = vmul.f32 %v631_v32, %v627_v25 }
 0x22b   : > { %v633_v33 = vpop.eup %632 }
 0x22c   : > { %v348_v35 = vmul.f32 %v633_v33, %v629_v27 }
 0x22e   : > { %v349_v36 = vpack.c.bf16 %v348_v35, %v347_v34 }
 0x230   : > { %560 = vmatmul.mubr.msk.bf16.vlgmr.msra.gmra.mxu1 %vm273_vm1, %v349_v36 }
 0x2f0   : > { %v393_v37 = vpop.f32.mrf.mxu1 }
 0x2f1   : > { %v545_v38 = vpack.c.bf16 %v393_v37, %v393_v37 }
 0x2f2   : > { %v561_v39 = vpop.f32.mrf.mxu1 }
 0x2f3   : > { %409 = vst.msk [vmem:[%s253_s27] sm:$0xf] %vm408_vm2, %v545_v38 }
 0x2f4   : > { %v396_v40 = vpop.f32.mrf.mxu1 }
 0x2f5   : > { %v546_v41 = vpack.c.bf16 %v396_v40, %v396_v40 }
 0x2f6   : > { %v562_v42 = vpop.f32.mrf.mxu1 }
 0x2f7   : > { %410 = vst.msk [vmem:[%s253_s27 + $0x4] sm:$0xf] %vm408_vm2, %v546_v41 }
 0x2f8 PF: > { %s12_s15 = sadd.s32 1, %s688_s15   ;;  %s820_s9 = smov %s668_s10 }
 0x2f9   : > { %p9_p12 = scmp.ge.s32.totalorder %s12_s15, 10   ;;  %s821_s10 = smov %s758_s22 }
 0x2fa   : > { %s822_s11 = smov %s680_s13  ;;  %s823_s12 = smov %s684_s14 }
 0x2fb   : > { %s824_s13 = smov %s827_s16  ;;  %s825_s14 = smov %s831_s17 }
 0x2fc   :  { %11 = sbr.rel (!%p9_p12) target bundleno = 4 (0x4), region = 109 }

// kernel: _lambda_.56
= control target key start
LH: loop header
LB: loop body
LE: loop exit
PB: predicated region body
PF: predicated region fallthrough
CT: control target
= control target key end

     0   :  { %vm19_vm0 = vcmask 523264   ;;  %v198_v1 = vmov 0.0   ;;  %s266_s1 = inlined_call_operand.vmem [shape: bf16[64,64], index: 1, kind: input, shape index: {}]   ;;  %s267_s0 = inlined_call_operand.vmem [shape: bf16[32,64], index: 0, kind: input, shape index: {}]   ;;  %s268_s2 = inlined_call_operand.vmem [shape: f32[1,64], index: 2, kind: input, shape index: {}]   ;;  %s269_s3 = inlined_call_operand.vmem [shape: f32[32,64], index: 3, kind: output, shape index: {}]  }
   0x1   :  { %v192_v0 = vld [vmem:[%s266_s1 + $0x18] sm:$0xff]   ;;  %22 = vst.msk [vmem:[#allocation2 + $0x10] sm:$0xff] %vm19_vm0, %v198_v1  ;;  %20 = vst.msk [vmem:[#allocation2] sm:$0xff] %vm19_vm0, %v198_v1  ;;  %v193_v2 = vld [vmem:[%s266_s1 + $0x10] sm:$0xff]  }
   0x2   :  { %21 = vst.msk [vmem:[#allocation2 + $0x8] sm:$0xff] %vm19_vm0, %v198_v1  ;;  %23 = vst.msk [vmem:[#allocation2 + $0x18] sm:$0xff] %vm19_vm0, %v198_v1  ;;  %179 = vmatprep.subr.bf16.mxu0 %v192_v0  ;;  %v194_v3 = vld [vmem:[%s266_s1 + $0x8] sm:$0xff]   ;;  %v196_v4 = vld [vmem:[%s267_s0] sm:$0xff]  }
   0x3   :  { %180 = vmatpush3.bf16.msra.mxu0 %v192_v0  ;;  %187 = vmatprep.mubr.msk.bf16.mxu0 %vm19_vm0, %v196_v4  ;;  %v195_v5 = vld [vmem:[%s266_s1] sm:$0xff]   ;;  %v197_v6 = vld [vmem:[%s267_s0 + $0x8] sm:$0xff]  }
   0x4   :  { %181 = vmatprep.subr.bf16.mxu0 %v193_v2  ;;  %v172_v19 = vld [vmem:[%s268_s2] ss:$0 sm:$0xff] }
   0x7   :  { %182 = vmatpush3.bf16.msra.mxu0 %v193_v2 }
   0x8   :  { %183 = vmatprep.subr.bf16.mxu0 %v194_v3  ;;  %v26_v7 = vld [vmem:[#allocation2 + $0x10] sm:$0xff]  ;;  %v24_v9 = vld [vmem:[#allocation2] sm:$0xff] }
   0x9   :  { %v27_v12 = vld [vmem:[#allocation2 + $0x18] sm:$0xff]  ;;  %v25_v15 = vld [vmem:[#allocation2 + $0x8] sm:$0xff] }
   0xb   :  { %184 = vmatpush3.bf16.msra.mxu0 %v194_v3 }
   0xc   :  { %185 = vmatprep.subr.bf16.mxu0 %v195_v5 }
   0xf   :  { %186 = vmatpush3.bf16.msra.mxu0 %v195_v5 }
  0x12   :  { %188 = vmatmul.mubr.msk.bf16.vlgmr.msra.gmra.mxu0 %vm19_vm0, %v197_v6 }
  0xd2   :  { %v189_v8 = vpop.f32.mrf.mxu0 }
  0xd3   :  { %v132_v10 = vadd.f32 %v189_v8, %v26_v7 }
  0xd4   :  { %v115_v11 = vpop.f32.mrf.mxu0 }
  0xd5   :  { %136 = vst.msk [vmem:[#allocation2 + $0x10] sm:$0xff] %vm19_vm0, %v132_v10  ;;  %v130_v13 = vadd.f32 %v115_v11, %v24_v9 }
  0xd6   :  { %v190_v14 = vpop.f32.mrf.mxu0 }
  0xd7   :  { %134 = vst.msk [vmem:[#allocation2] sm:$0xff] %vm19_vm0, %v130_v13  ;;  %v133_v16 = vadd.f32 %v190_v14, %v27_v12 }
  0xd8   :  { %v118_v17 = vpop.f32.mrf.mxu0 }
  0xd9   :  { %137 = vst.msk [vmem:[#allocation2 + $0x18] sm:$0xff] %vm19_vm0, %v133_v16  ;;  %v131_v18 = vadd.f32 %v118_v17, %v25_v15 }
  0xdb   :  { %135 = vst.msk [vmem:[#allocation2 + $0x8] sm:$0xff] %vm19_vm0, %v131_v18 }
  0xdc   :  { %v143_v20 = vld [vmem:[#allocation2 + $0x10] sm:$0xff] }
  0xdd   :  { %v154_v21 = vadd.f32 %v172_v19, %v143_v20 }
  0xde   :  { %v141_v22 = vld [vmem:[#allocation2] sm:$0xff] }
  0xdf   :  { %158 = vst.msk [vmem:[%s269_s3 + $0x10] sm:$0xff] %vm19_vm0, %v154_v21  ;;  %v152_v23 = vadd.f32 %v172_v19, %v141_v22 }
  0xe0   :  { %v144_v24 = vld [vmem:[#allocation2 + $0x18] sm:$0xff] }
  0xe1   :  { %156 = vst.msk [vmem:[%s269_s3] sm:$0xff] %vm19_vm0, %v152_v23  ;;  %v155_v25 = vadd.f32 %v172_v19, %v144_v24 }
  0xe2   :  { %v142_v26 = vld [vmem:[#allocation2 + $0x8] sm:$0xff] }
  0xe3   :  { %159 = vst.msk [vmem:[%s269_s3 + $0x18] sm:$0xff] %vm19_vm0, %v155_v25  ;;  %v153_v27 = vadd.f32 %v172_v19, %v142_v26 }
  0xe5   :  { %157 = vst.msk [vmem:[%s269_s3 + $0x8] sm:$0xff] %vm19_vm0, %v153_v27 }

// kernel: _lambda_.57
= control target key start
LH: loop header
LB: loop body
LE: loop exit
PB: predicated region body
PF: predicated region fallthrough
CT: control target
= control target key end

     0   :  { %vm31_vm0 = vcmask 523264   ;;  %vm127_vm1 = vcmask 519168   ;;  %s258_s0 = inlined_call_operand.vmem [shape: f32[32,64], index: 0, kind: input, shape index: {}]   ;;  %s259_s1 = inlined_call_operand.vmem [shape: f32[32,64], index: 1, kind: input, shape index: {}]   ;;  %s260_s4 = inlined_call_operand.vmem [shape: f32[32,64], index: 4, kind: output, shape index: {0}]   ;;  %s261_s2 = inlined_call_operand.vmem [shape: f32[1,64], index: 2, kind: input, shape index: {}]   ;;  %s262_s3 = inlined_call_operand.vmem [shape: f32[1,64], index: 3, kind: input, shape index: {}]   ;;  %s263_s5 = inlined_call_operand.vmem [shape: bf16[32,64], index: 5, kind: output, shape index: {1}]  }
   0x1   :  { %v19_v0 = vld [vmem:[%s258_s0] sm:$0xff]  ;;  %v21_v2 = vld [vmem:[%s258_s0 + $0x10] sm:$0xff]  ;;  %v20_v5 = vld [vmem:[%s258_s0 + $0x8] sm:$0xff] }
   0x2   :  { %v23_v1 = vld [vmem:[%s259_s1] sm:$0xff]  ;;  %v25_v4 = vld [vmem:[%s259_s1 + $0x10] sm:$0xff]  ;;  %v24_v6 = vld [vmem:[%s259_s1 + $0x8] sm:$0xff] }
   0x3   :  { %v27_v3 = vadd.f32 %v23_v1, %v19_v0  ;;  %v29_v7 = vadd.f32 %v25_v4, %v21_v2  ;;  %v28_v8 = vadd.f32 %v24_v6, %v20_v5  ;;  %v22_v9 = vld [vmem:[%s258_s0 + $0x18] sm:$0xff]  ;;  %v140_v49 = vld [vmem:[%s261_s2] ss:$0 sm:$0xff] }
   0x4   :  { %v26_v10 = vld [vmem:[%s259_s1 + $0x18] sm:$0xff]  ;;  %v141_v51 = vld [vmem:[%s262_s3] ss:$0 sm:$0xff] }
   0x5   :  { %v36_v11 = vsel %vm31_vm0, %v27_v3, 0.0  ;;  %32 = vst.msk [vmem:[%s260_s4] sm:$0xff] %vm31_vm0, %v27_v3  ;;  %v30_v12 = vadd.f32 %v26_v10, %v22_v9  ;;  %v42_v13 = vsel %vm31_vm0, %v29_v7, 0.0  ;;  %34 = vst.msk [vmem:[%s260_s4 + $0x10] sm:$0xff] %vm31_vm0, %v29_v7  ;;  %v39_v14 = vsel %vm31_vm0, %v28_v8, 0.0 }
   0x6   :  { %37 = vadd.xlane.f32.xlu0 %v36_v11  ;;  %33 = vst.msk [vmem:[%s260_s4 + $0x8] sm:$0xff] %vm31_vm0, %v28_v8  ;;  %43 = vadd.xlane.f32.xlu1 %v42_v13 }
   0x7   :  { %35 = vst.msk [vmem:[%s260_s4 + $0x18] sm:$0xff] %vm31_vm0, %v30_v12  ;;  %v45_v15 = vsel %vm31_vm0, %v30_v12, 0.0 }
   0xa   :  { %40 = vadd.xlane.f32.xlu0 %v39_v14  ;;  %46 = vadd.xlane.f32.xlu1 %v45_v15 }
  0x8f   :  { %v38_v16 = vpop.xlane.xlu0 %37  ;;  %v44_v18 = vpop.xlane.xlu1 %43 }
  0x90   :  { %v49_v17 = vmul.f32 0.015625, %v38_v16  ;;  %v51_v19 = vmul.f32 0.015625, %v44_v18 }
  0x92   :  { %v53_v20 = vsub.f32 %v27_v3, %v49_v17  ;;  %v55_v21 = vsub.f32 %v29_v7, %v51_v19 }
  0x93   :  { %v41_v22 = vpop.xlane.xlu0 %40  ;;  %v47_v24 = vpop.xlane.xlu1 %46 }
  0x94   :  { %v50_v23 = vmul.f32 0.015625, %v41_v22  ;;  %v57_v25 = vmul.f32 %v53_v20, %v53_v20  ;;  %v52_v26 = vmul.f32 0.015625, %v47_v24  ;;  %v59_v27 = vmul.f32 %v55_v21, %v55_v21 }
  0x96   :  { %v54_v28 = vsub.f32 %v28_v8, %v50_v23  ;;  %v61_v29 = vsel %vm31_vm0, %v57_v25, 0.0  ;;  %v56_v30 = vsub.f32 %v30_v12, %v52_v26  ;;  %v67_v31 = vsel %vm31_vm0, %v59_v27, 0.0 }
  0x97   :  { %62 = vadd.xlane.f32.xlu0 %v61_v29 }
  0x98   :  { %v58_v32 = vmul.f32 %v54_v28, %v54_v28  ;;  %v60_v33 = vmul.f32 %v56_v30, %v56_v30 }
  0x9a   :  { %v64_v34 = vsel %vm31_vm0, %v58_v32, 0.0  ;;  %v70_v35 = vsel %vm31_vm0, %v60_v33, 0.0 }
  0x9b   :  { %68 = vadd.xlane.f32.xlu0 %v67_v31  ;;  %65 = vadd.xlane.f32.xlu1 %v64_v34 }
  0x9f   :  { %71 = vadd.xlane.f32.xlu1 %v70_v35 }
 0x120   :  { %v63_v36 = vpop.xlane.xlu0 %62 }
 0x121   :  { %v73_v37 = vmul.f32 0.015625, %v63_v36 }
 0x123   :  { %v77_v38 = vadd.f32 1e-05, %v73_v37 }
 0x124   :  { %v66_v39 = vpop.xlane.xlu1 %65  ;;  %v69_v40 = vpop.xlane.xlu0 %68 }
 0x125   :  { %150 = vrsqrt.f32 %v77_v38  ;;  %v74_v41 = vmul.f32 0.015625, %v66_v39  ;;  %v75_v42 = vmul.f32 0.015625, %v69_v40 }
 0x127   :  { %v78_v43 = vadd.f32 1e-05, %v74_v41  ;;  %v79_v44 = vadd.f32 1e-05, %v75_v42 }
 0x128   :  { %v72_v45 = vpop.xlane.xlu1 %71 }
 0x129   :  { %152 = vrsqrt.f32 %v78_v43  ;;  %v76_v46 = vmul.f32 0.015625, %v72_v45 }
 0x12a   :  { %154 = vrsqrt.f32 %v79_v44 }
 0x12b   :  { %v80_v47 = vadd.f32 1e-05, %v76_v46 }
 0x12d   :  { %156 = vrsqrt.f32 %v80_v47 }
 0x132   :  { %v151_v48 = vpop.eup %150 }
 0x133   :  { %v85_v50 = vmul.f32 %v151_v48, %v53_v20 }
 0x135   :  { %v96_v52 = vmul.f32 %v140_v49, %v85_v50 }
 0x136   :  { %v153_v53 = vpop.eup %152 }
 0x137   :  { %v155_v54 = vpop.eup %154  ;;  %v107_v55 = vadd.f32 %v141_v51, %v96_v52  ;;  %v86_v56 = vmul.f32 %v153_v53, %v54_v28 }
 0x138   :  { %v87_v57 = vmul.f32 %v155_v54, %v55_v21 }
 0x139   :  { %v146_v58 = vpack.c.bf16 %v107_v55, %v107_v55  ;;  %v97_v59 = vmul.f32 %v140_v49, %v86_v56 }
 0x13a   :  { %v157_v60 = vpop.eup %156  ;;  %v98_v61 = vmul.f32 %v140_v49, %v87_v57 }
 0x13b   :  { %128 = vst.msk [vmem:[%s263_s5] sm:$0xf] %vm127_vm1, %v146_v58  ;;  %v108_v62 = vadd.f32 %v141_v51, %v97_v59  ;;  %v88_v63 = vmul.f32 %v157_v60, %v56_v30 }
 0x13c   :  { %v109_v0 = vadd.f32 %v141_v51, %v98_v61 }
 0x13d   :  { %v147_v1 = vpack.c.bf16 %v108_v62, %v108_v62  ;;  %v99_v2 = vmul.f32 %v140_v49, %v88_v63 }
 0x13e   :  { %v148_v3 = vpack.c.bf16 %v109_v0, %v109_v0 }
 0x13f   :  { %129 = vst.msk [vmem:[%s263_s5 + $0x4] sm:$0xf] %vm127_vm1, %v147_v1  ;;  %v110_v4 = vadd.f32 %v141_v51, %v99_v2 }
 0x140   :  { %130 = vst.msk [vmem:[%s263_s5 + $0x8] sm:$0xf] %vm127_vm1, %v148_v3 }
 0x141   :  { %v149_v5 = vpack.c.bf16 %v110_v4, %v110_v4 }
 0x143   :  { %131 = vst.msk [vmem:[%s263_s5 + $0xc] sm:$0xf] %vm127_vm1, %v149_v5 }

// kernel: _lambda_.58
= control target key start
LH: loop header
LB: loop body
LE: loop exit
PB: predicated region body
PF: predicated region fallthrough
CT: control target
= control target key end

     0   :  { %v367_v1 = vmov 0   ;;  %vm97_vm0 = vcmask 523264   ;;  %v186_v11 = vlaneseq  ;;  %s468_s1 = inlined_call_operand.vmem [shape: bf16[64,256], index: 1, kind: input, shape index: {}]   ;;  %s469_s0 = inlined_call_operand.vmem [shape: bf16[32,64], index: 0, kind: input, shape index: {}]   ;;  %s470_s2 = inlined_call_operand.vmem [shape: f32[1,256], index: 2, kind: input, shape index: {}]   ;;  %s471_s3 = inlined_call_operand.vmem [shape: bf16[32,256], index: 3, kind: output, shape index: {}]  }
   0x1   :  { %v337_v0 = vld [vmem:[%s468_s1 + $0x34] ss:$8 sps:$4 sm:$0xff]   ;;  %136 = vmatprep.mubr.bf16.mxu0 %v367_v1  ;;  %146 = vmatprep.mubr.bf16.mxu1 %v367_v1  ;;  %v339_v2 = vld [vmem:[%s468_s1 + $0x30] ss:$8 sps:$4 sm:$0xff]   ;;  %v340_v3 = vld [vmem:[%s468_s1 + $0x24] ss:$8 sps:$4 sm:$0xff]  }
   0x2   :  { %112 = vmatprep.subr.bf16.mxu0 %v337_v0  ;;  %328 = vmatprep.subr.bf16.mxu1 %v337_v0  ;;  %v342_v4 = vld [vmem:[%s468_s1 + $0x20] ss:$8 sps:$4 sm:$0xff]   ;;  %v343_v5 = vld [vmem:[%s468_s1 + $0x14] ss:$8 sps:$4 sm:$0xff]   ;;  %v345_v6 = vld [vmem:[%s468_s1 + $0x10] ss:$8 sps:$4 sm:$0xff]  }
   0x3   :  { %113 = vmatpush1.bf16.msra.mxu0 %v339_v2  ;;  %332 = vmatpush1.bf16.msra.mxu1 %v339_v2  ;;  %v346_v7 = vld [vmem:[%s468_s1 + $0x4] ss:$8 sps:$4 sm:$0xff]   ;;  %v348_v8 = vld [vmem:[%s468_s1] ss:$8 sps:$4 sm:$0xff]   ;;  %v187_v12 = vshrl.u32 %v186_v11, 7 }
   0x4   :  { %114 = vmatprep.subr.bf16.mxu0 %v340_v3  ;;  %329 = vmatprep.subr.bf16.mxu1 %v340_v3  ;;  %v349_v9 = vld [vmem:[%s469_s0] sm:$0xff]   ;;  %v350_v10 = vld [vmem:[%s469_s0 + $0x8] sm:$0xff]  }
   0x5   :  { %v188_v13 = vsub.s32 0, %v187_v12  ;;  %v184_v14 = vld [vmem:[%s470_s2] sm:$0x3]  ;;  %v192_v15 = vsub.s32 1, %v187_v12 }
   0x7   :  { %115 = vmatpush1.bf16.msra.mxu0 %v342_v4  ;;  %333 = vmatpush1.bf16.msra.mxu1 %v342_v4  ;;  %v189_v16 = vrot.slane %v184_v14, %v188_v13  ;;  %v193_v19 = vrot.slane %v184_v14, %v192_v15 }
   0x8   :  { %116 = vmatprep.subr.bf16.mxu0 %v343_v5  ;;  %330 = vmatprep.subr.bf16.mxu1 %v343_v5 }
   0xb   :  { %117 = vmatpush1.bf16.msra.mxu0 %v345_v6  ;;  %334 = vmatpush1.bf16.msra.mxu1 %v345_v6 }
   0xc   :  { %118 = vmatprep.subr.bf16.mxu0 %v346_v7  ;;  %331 = vmatprep.subr.bf16.mxu1 %v346_v7 }
   0xf   :  { %119 = vmatpush1.bf16.msra.mxu0 %v348_v8  ;;  %335 = vmatpush1.bf16.msra.mxu1 %v348_v8 }
  0x12   :  { %318 = vmatmul.mubr.msk.bf16.vlgmr.msra.gmra.mxu0 %vm97_vm0, %v349_v9  ;;  %319 = vmatmul.mubr.msk.bf16.vlgmr.msra.gmra.mxu1 %vm97_vm0, %v350_v10 }
  0xd2   :  { %v138_v17 = vpop.f32.mrf.mxu0  ;;  %v148_v18 = vpop.f32.mrf.mxu1 }
  0xd3   :  { %v421_v20 = vadd.f32 %v189_v16, %v138_v17  ;;  %v423_v21 = vadd.f32 %v189_v16, %v148_v18 }
  0xd4   :  { %v140_v22 = vpop.f32.mrf.mxu0  ;;  %v150_v23 = vpop.f32.mrf.mxu1 }
  0xd5   :  { %v212_v24 = vmul.f32 0.044715, %v421_v20  ;;  %v216_v25 = vmul.f32 0.044715, %v423_v21  ;;  %v197_v26 = vadd.f32 %v193_v19, %v140_v22  ;;  %v427_v27 = vadd.f32 %v193_v19, %v150_v23 }
  0xd6   :  { %v142_v28 = vpop.f32.mrf.mxu0  ;;  %v152_v29 = vpop.f32.mrf.mxu1 }
  0xd7   :  { %v220_v30 = vmul.f32 %v212_v24, %v421_v20  ;;  %v224_v31 = vmul.f32 %v216_v25, %v423_v21  ;;  %v431_v32 = vadd.f32 %v189_v16, %v142_v28  ;;  %v433_v33 = vadd.f32 %v189_v16, %v152_v29 }
  0xd8   :  { %v213_v34 = vmul.f32 0.044715, %v197_v26  ;;  %v217_v35 = vmul.f32 0.044715, %v427_v27  ;;  %v144_v36 = vpop.f32.mrf.mxu0  ;;  %v154_v40 = vpop.f32.mrf.mxu1  ;;  %v204_v16 = vmul.f32 0.5, %v421_v20  ;;  %v205_v17 = vmul.f32 0.5, %v197_v26 }
  0xd9   :  { %v228_v37 = vmul.f32 %v220_v30, %v421_v20  ;;  %v232_v38 = vmul.f32 %v224_v31, %v423_v21  ;;  %v214_v39 = vmul.f32 0.044715, %v431_v32  ;;  %v218_v43 = vmul.f32 0.044715, %v433_v33 }
  0xda   :  { %v221_v41 = vmul.f32 %v213_v34, %v197_v26  ;;  %v225_v42 = vmul.f32 %v217_v35, %v427_v27  ;;  %v199_v47 = vadd.f32 %v193_v19, %v144_v36  ;;  %v203_v51 = vadd.f32 %v193_v19, %v154_v40 }
  0xdb   :  { %v236_v44 = vadd.f32 %v228_v37, %v421_v20  ;;  %v240_v45 = vadd.f32 %v232_v38, %v423_v21  ;;  %v222_v46 = vmul.f32 %v214_v39, %v431_v32  ;;  %v226_v50 = vmul.f32 %v218_v43, %v433_v33 }
  0xdc   :  { %v229_v48 = vmul.f32 %v221_v41, %v197_v26  ;;  %v233_v49 = vmul.f32 %v225_v42, %v427_v27  ;;  %v215_v58 = vmul.f32 0.044715, %v199_v47  ;;  %v219_v60 = vmul.f32 0.044715, %v203_v51 }
  0xdd   :  { %v244_v52 = vmul.f32 0.7978846, %v236_v44  ;;  %v248_v53 = vmul.f32 0.7978846, %v240_v45  ;;  %v230_v54 = vmul.f32 %v222_v46, %v431_v32  ;;  %v234_v57 = vmul.f32 %v226_v50, %v433_v33 }
  0xde   :  { %v237_v55 = vadd.f32 %v229_v48, %v197_v26  ;;  %v241_v56 = vadd.f32 %v233_v49, %v427_v27  ;;  %v223_v1 = vmul.f32 %v215_v58, %v199_v47  ;;  %v227_v2 = vmul.f32 %v219_v60, %v203_v51 }
  0xdf   :  { %351 = vtanh.f32 %v244_v52  ;;  %v238_v59 = vadd.f32 %v230_v54, %v431_v32  ;;  %v242_v63 = vadd.f32 %v234_v57, %v433_v33  ;;  %v208_v19 = vmul.f32 0.5, %v423_v21 }
  0xe0   :  { %353 = vtanh.f32 %v248_v53  ;;  %v245_v61 = vmul.f32 0.7978846, %v237_v55  ;;  %v249_v62 = vmul.f32 0.7978846, %v241_v56  ;;  %v231_v4 = vmul.f32 %v223_v1, %v199_v47 }
  0xe1   :  { %v246_v0 = vmul.f32 0.7978846, %v238_v59  ;;  %v250_v3 = vmul.f32 0.7978846, %v242_v63  ;;  %v235_v5 = vmul.f32 %v227_v2, %v203_v51  ;;  %v209_v22 = vmul.f32 0.5, %v427_v27 }
  0xe2   :  { %355 = vtanh.f32 %v245_v61  ;;  %v239_v6 = vadd.f32 %v231_v4, %v199_v47  ;;  %v206_v21 = vmul.f32 0.5, %v431_v32  ;;  %v207_v27 = vmul.f32 0.5, %v199_v47 }
  0xe3   :  { %357 = vtanh.f32 %v249_v62  ;;  %v243_v7 = vadd.f32 %v235_v5, %v203_v51  ;;  %v210_v39 = vmul.f32 0.5, %v433_v33  ;;  %v211_v40 = vmul.f32 0.5, %v203_v51 }
  0xe4   :  { %359 = vtanh.f32 %v246_v0  ;;  %v247_v8 = vmul.f32 0.7978846, %v239_v6 }
  0xe5   :  { %361 = vtanh.f32 %v250_v3  ;;  %v251_v9 = vmul.f32 0.7978846, %v243_v7 }
  0xe6   :  { %363 = vtanh.f32 %v247_v8 }
  0xe7   :  { %365 = vtanh.f32 %v251_v9 }
  0xec   :  { %v352_v10 = vpop.eup %351 }
  0xed   :  { %v354_v11 = vpop.eup %353  ;;  %v260_v12 = vadd.f32 1.0, %v352_v10 }
  0xee   :  { %v264_v14 = vadd.f32 1.0, %v354_v11 }
  0xef   :  { %v356_v13 = vpop.eup %355  ;;  %v268_v25 = vmul.f32 %v260_v12, %v204_v16 }
  0xf0   :  { %v358_v15 = vpop.eup %357  ;;  %v261_v18 = vadd.f32 1.0, %v356_v13  ;;  %v272_v30 = vmul.f32 %v264_v14, %v208_v19 }
  0xf1   :  { %v265_v23 = vadd.f32 1.0, %v358_v15  ;;  %v360_v24 = vpop.eup %359 }
  0xf2   :  { %v269_v28 = vmul.f32 %v261_v18, %v205_v17  ;;  %v362_v29 = vpop.eup %361  ;;  %v262_v36 = vadd.f32 1.0, %v360_v24 }
  0xf3   :  { %v273_v31 = vmul.f32 %v265_v23, %v209_v22  ;;  %v364_v37 = vpop.eup %363  ;;  %v266_v20 = vadd.f32 1.0, %v362_v29 }
  0xf4   :  { %v324_v34 = vpack.c.bf16 %v269_v28, %v268_v25  ;;  %v366_v26 = vpop.eup %365  ;;  %v263_v38 = vadd.f32 1.0, %v364_v37  ;;  %v270_v42 = vmul.f32 %v262_v36, %v206_v21 }
  0xf5   :  { %v326_v35 = vpack.c.bf16 %v273_v31, %v272_v30  ;;  %v267_v41 = vadd.f32 1.0, %v366_v26  ;;  %v274_v44 = vmul.f32 %v266_v20, %v210_v39 }
  0xf6   :  { %300 = vst [vmem:[%s471_s3] sm:$0xff] %v324_v34  ;;  %v271_v43 = vmul.f32 %v263_v38, %v207_v27 }
  0xf7   :  { %302 = vst [vmem:[%s471_s3 + $0x10] sm:$0xff] %v326_v35  ;;  %v275_v45 = vmul.f32 %v267_v41, %v211_v40 }
  0xf8   :  { %v325_v46 = vpack.c.bf16 %v271_v43, %v270_v42 }
  0xf9   :  { %v327_v48 = vpack.c.bf16 %v275_v45, %v274_v44 }
  0xfa   :  { %301 = vst [vmem:[%s471_s3 + $0x8] sm:$0xff] %v325_v46 }
  0xfb   :  { %303 = vst [vmem:[%s471_s3 + $0x18] sm:$0xff] %v327_v48 }

// kernel: _lambda_.59
= control target key start
LH: loop header
LB: loop body
LE: loop exit
PB: predicated region body
PF: predicated region fallthrough
CT: control target
= control target key end

     0   :  { %vm22_vm0 = vcmask 523264   ;;  %v363_v20 = vmov 0.0   ;;  %s488_s1 = inlined_call_operand.vmem [shape: bf16[256,64], index: 1, kind: input, shape index: {}]   ;;  %s489_s0 = inlined_call_operand.vmem [shape: bf16[32,256], index: 0, kind: input, shape index: {}]   ;;  %s490_s2 = inlined_call_operand.vmem [shape: f32[1,64], index: 2, kind: input, shape index: {}]   ;;  %s491_s3 = inlined_call_operand.vmem [shape: f32[32,64], index: 3, kind: input, shape index: {}]   ;;  %s492_s4 = inlined_call_operand.vmem [shape: f32[32,64], index: 4, kind: output, shape index: {}]  }
   0x1   :  { %v341_v0 = vld [vmem:[%s488_s1 + $0x78] sm:$0xff]   ;;  %v343_v2 = vld [vmem:[%s488_s1 + $0x70] sm:$0xff]   ;;  %v345_v4 = vld [vmem:[%s488_s1 + $0x68] sm:$0xff]   ;;  %23 = vst.msk [vmem:[#allocation2] sm:$0xff] %vm22_vm0, %v363_v20 }
   0x2   :  { %v342_v1 = vld [vmem:[%s488_s1 + $0x38] sm:$0xff]   ;;  %296 = vmatprep.subr.bf16.mxu0 %v341_v0  ;;  %324 = vmatprep.subr.bf16.mxu1 %v341_v0  ;;  %v344_v3 = vld [vmem:[%s488_s1 + $0x30] sm:$0xff]   ;;  %v346_v5 = vld [vmem:[%s488_s1 + $0x28] sm:$0xff]   ;;  %24 = vst.msk [vmem:[#allocation2 + $0x8] sm:$0xff] %vm22_vm0, %v363_v20 }
   0x3   :  { %297 = vmatpush3.bf16.msra.mxu0 %v342_v1  ;;  %332 = vmatpush3.bf16.msra.mxu1 %v342_v1  ;;  %v347_v6 = vld [vmem:[%s488_s1 + $0x60] sm:$0xff]   ;;  %v349_v8 = vld [vmem:[%s488_s1 + $0x58] sm:$0xff]   ;;  %v351_v10 = vld [vmem:[%s488_s1 + $0x50] sm:$0xff]   ;;  %25 = vst.msk [vmem:[#allocation2 + $0x10] sm:$0xff] %vm22_vm0, %v363_v20 }
   0x4   :  { %298 = vmatprep.subr.bf16.mxu0 %v343_v2  ;;  %325 = vmatprep.subr.bf16.mxu1 %v343_v2  ;;  %v348_v7 = vld [vmem:[%s488_s1 + $0x20] sm:$0xff]   ;;  %v350_v9 = vld [vmem:[%s488_s1 + $0x18] sm:$0xff]   ;;  %v352_v13 = vld [vmem:[%s488_s1 + $0x10] sm:$0xff]   ;;  %26 = vst.msk [vmem:[#allocation2 + $0x18] sm:$0xff] %vm22_vm0, %v363_v20 }
   0x5   :  { %v359_v11 = vld [vmem:[%s489_s0 + $0x4] ss:$8 sps:$4 sm:$0xff]   ;;  %v362_v12 = vld [vmem:[%s489_s0 + $0x14] ss:$8 sps:$4 sm:$0xff]   ;;  %v357_v18 = vld [vmem:[%s489_s0] ss:$8 sps:$4 sm:$0xff]  }
   0x6   :  { %v353_v14 = vld [vmem:[%s488_s1 + $0x48] sm:$0xff]   ;;  %215 = vmatprep.mubr.bf16.mxu0 %v359_v11  ;;  %223 = vmatprep.mubr.bf16.mxu1 %v362_v12  ;;  %v355_v16 = vld [vmem:[%s488_s1 + $0x40] sm:$0xff]   ;;  %v360_v19 = vld [vmem:[%s489_s0 + $0x10] ss:$8 sps:$4 sm:$0xff]  }
   0x7   :  { %299 = vmatpush3.bf16.msra.mxu0 %v344_v3  ;;  %333 = vmatpush3.bf16.msra.mxu1 %v344_v3  ;;  %v354_v15 = vld [vmem:[%s488_s1 + $0x8] sm:$0xff]   ;;  %v356_v17 = vld [vmem:[%s488_s1] sm:$0xff]   ;;  %v261_v45 = vld [vmem:[%s491_s3 + $0x10] sm:$0xff] }
   0x8   :  { %300 = vmatprep.subr.bf16.mxu0 %v345_v4  ;;  %326 = vmatprep.subr.bf16.mxu1 %v345_v4  ;;  %v27_v23 = vld [vmem:[#allocation2] sm:$0xff]  ;;  %v260_v50 = vld [vmem:[%s491_s3 + $0x8] sm:$0xff]  ;;  %v262_v53 = vld [vmem:[%s491_s3 + $0x18] sm:$0xff] }
   0x9   :  { %v28_v33 = vld [vmem:[#allocation2 + $0x8] sm:$0xff]  ;;  %v295_v41 = vld [vmem:[%s490_s2] ss:$0 sm:$0xff] }
   0xa   :  { %v29_v25 = vld [vmem:[#allocation2 + $0x10] sm:$0xff]  ;;  %v259_v42 = vld [vmem:[%s491_s3] sm:$0xff] }
   0xb   :  { %301 = vmatpush3.bf16.msra.mxu0 %v346_v5  ;;  %334 = vmatpush3.bf16.msra.mxu1 %v346_v5  ;;  %v30_v35 = vld [vmem:[#allocation2 + $0x18] sm:$0xff] }
   0xc   :  { %302 = vmatprep.subr.bf16.mxu0 %v347_v6  ;;  %327 = vmatprep.subr.bf16.mxu1 %v347_v6 }
   0xf   :  { %303 = vmatpush3.bf16.msra.mxu0 %v348_v7  ;;  %335 = vmatpush3.bf16.msra.mxu1 %v348_v7 }
  0x10   :  { %304 = vmatprep.subr.bf16.mxu0 %v349_v8  ;;  %328 = vmatprep.subr.bf16.mxu1 %v349_v8 }
  0x13   :  { %305 = vmatpush3.bf16.msra.mxu0 %v350_v9  ;;  %336 = vmatpush3.bf16.msra.mxu1 %v350_v9 }
  0x14   :  { %306 = vmatprep.subr.bf16.mxu0 %v351_v10  ;;  %329 = vmatprep.subr.bf16.mxu1 %v351_v10 }
  0x17   :  { %307 = vmatpush3.bf16.msra.mxu0 %v352_v13  ;;  %337 = vmatpush3.bf16.msra.mxu1 %v352_v13 }
  0x18   :  { %308 = vmatprep.subr.bf16.mxu0 %v353_v14  ;;  %330 = vmatprep.subr.bf16.mxu1 %v353_v14 }
  0x1b   :  { %309 = vmatpush3.bf16.msra.mxu0 %v354_v15  ;;  %338 = vmatpush3.bf16.msra.mxu1 %v354_v15 }
  0x1c   :  { %310 = vmatprep.subr.bf16.mxu0 %v355_v16  ;;  %331 = vmatprep.subr.bf16.mxu1 %v355_v16 }
  0x1f   :  { %311 = vmatpush3.bf16.msra.mxu0 %v356_v17  ;;  %339 = vmatpush3.bf16.msra.mxu1 %v356_v17 }
  0x22   :  { %216 = vmatmul.mubr.bf16.vlgmr.msra.gmra.mxu0 %v357_v18  ;;  %224 = vmatmul.mubr.bf16.vlgmr.msra.gmra.mxu1 %v360_v19 }
  0xe2   :  { %v312_v21 = vpop.f32.mrf.mxu0  ;;  %v318_v22 = vpop.f32.mrf.mxu1 }
  0xe4   :  { %v313_v24 = vpop.f32.mrf.mxu0  ;;  %v319_v26 = vpop.f32.mrf.mxu1 }
  0xe5   :  { %v314_v27 = vadd.f32 %v313_v24, %v312_v21  ;;  %v320_v28 = vadd.f32 %v319_v26, %v318_v22 }
  0xe6   :  { %v315_v29 = vpop.f32.mrf.mxu0  ;;  %v321_v30 = vpop.f32.mrf.mxu1 }
  0xe7   :  { %v232_v31 = vadd.f32 %v314_v27, %v27_v23  ;;  %v234_v32 = vadd.f32 %v320_v28, %v29_v25 }
  0xe8   :  { %v316_v34 = vpop.f32.mrf.mxu0  ;;  %v322_v36 = vpop.f32.mrf.mxu1 }
  0xe9   :  { %237 = vst.msk [vmem:[#allocation2] sm:$0xff] %vm22_vm0, %v232_v31  ;;  %239 = vst.msk [vmem:[#allocation2 + $0x10] sm:$0xff] %vm22_vm0, %v234_v32  ;;  %v317_v37 = vadd.f32 %v316_v34, %v315_v29  ;;  %v323_v38 = vadd.f32 %v322_v36, %v321_v30 }
  0xeb   :  { %v233_v39 = vadd.f32 %v317_v37, %v28_v33  ;;  %v235_v40 = vadd.f32 %v323_v38, %v30_v35 }
  0xed   :  { %238 = vst.msk [vmem:[#allocation2 + $0x8] sm:$0xff] %vm22_vm0, %v233_v39  ;;  %240 = vst.msk [vmem:[#allocation2 + $0x18] sm:$0xff] %vm22_vm0, %v235_v40 }
  0xf0   :  { %v244_v43 = vld [vmem:[#allocation2] sm:$0xff]  ;;  %v246_v44 = vld [vmem:[#allocation2 + $0x10] sm:$0xff] }
  0xf1   :  { %v255_v46 = vadd.f32 %v295_v41, %v244_v43  ;;  %v257_v47 = vadd.f32 %v295_v41, %v246_v44 }
  0xf3   :  { %v263_v48 = vadd.f32 %v259_v42, %v255_v46  ;;  %v265_v49 = vadd.f32 %v261_v45, %v257_v47 }
  0xf4   :  { %v245_v51 = vld [vmem:[#allocation2 + $0x8] sm:$0xff]  ;;  %v247_v52 = vld [vmem:[#allocation2 + $0x18] sm:$0xff] }
  0xf5   :  { %267 = vst.msk [vmem:[%s492_s4] sm:$0xff] %vm22_vm0, %v263_v48  ;;  %269 = vst.msk [vmem:[%s492_s4 + $0x10] sm:$0xff] %vm22_vm0, %v265_v49  ;;  %v256_v54 = vadd.f32 %v295_v41, %v245_v51  ;;  %v258_v55 = vadd.f32 %v295_v41, %v247_v52 }
  0xf7   :  { %v264_v56 = vadd.f32 %v260_v50, %v256_v54  ;;  %v266_v57 = vadd.f32 %v262_v53, %v258_v55 }
  0xf9   :  { %268 = vst.msk [vmem:[%s492_s4 + $0x8] sm:$0xff] %vm22_vm0, %v264_v56  ;;  %270 = vst.msk [vmem:[%s492_s4 + $0x18] sm:$0xff] %vm22_vm0, %v266_v57 }

// kernel: _lambda_.62
= control target key start
LH: loop header
LB: loop body
LE: loop exit
PB: predicated region body
PF: predicated region fallthrough
CT: control target
= control target key end

     0   :  { %s743_s12 = smov 0   ;;  %s745_s13 = smov 0   ;;  %s859_s0 = inlined_call_operand.vmem [shape: bf16[3,4,2,16,16], index: 0, kind: input, shape index: {}]   ;;  %s860_s1 = inlined_call_operand.vmem [shape: f32[4,16,16], index: 1, kind: input, shape index: {}]   ;;  %s861_s2 = inlined_call_operand.vmem [shape: f32[1,16,16], index: 2, kind: input, shape index: {}]   ;;  %s862_s3 = inlined_call_operand.vmem [shape: bf16[4,2,16,16], index: 3, kind: output, shape index: {}]  }
   0x1   :  { %s747_s14 = smov 0   ;;  %s749_s15 = smov 0  }
   0x2   :  { %s751_s16 = smov 0   ;;  %s753_s17 = smov 0  }
   0x3   :  { %s755_s18 = smov 0  }
   0x4 LB: > { %s22_s19 = sadd.s32 1, %s711_s16  ;;  %s25_s20 = sadd.s32 1, %s715_s17  ;;  %s719_s18 = sphi %s755_s18, %s13_s18   ;;  %s715_s17 = sphi %s753_s17, %s868_s17   ;;  %s711_s16 = sphi %s751_s16, %s867_s16   ;;  %s707_s15 = sphi %s749_s15, %s866_s15   ;;  %s703_s14 = sphi %s747_s14, %s865_s14   ;;  %s699_s13 = sphi %s745_s13, %s864_s13   ;;  %s695_s12 = sphi %s743_s12, %s863_s12  }
   0x5   : > { %p23_p0 = scmp.ge.s32.totalorder %s22_s19, 4  ;;  %p41_p1 = scmp.ne.s32.totalorder %s699_s13, %s695_s12 }
   0x6   : > { %p42_p2 = scmp.eq.s32.totalorder %s719_s18, 0  ;;  %s34_s24 = sadd.s32 1, %s699_s13 }
   0x7   : > { %s870_s19 = smov (%p23_p0, %s22_s19), 0  ;;  %s872_s20 = smov (!%p23_p0, %s25_s20), %s715_s17 }
   0x8   : > { %p43_p3 = por %p42_p2, %p41_p1  ;;  %p27_p4 = scmp.ge.s32.totalorder %s872_s20, 2 }
   0x9   : > { %s29_s21 = ssub.s32 %s711_s16, %s870_s19  ;;  %p552_p6 = scmp.ge.s32.totalorder %s719_s18, 8 }
   0xa   : > { %s874_s20 = smov (%p27_p4, %s872_s20), 0 }
   0xb   : > { %s30_s22 = ssub.s32 %s715_s17, %s874_s20  ;;  %145 = sbr.rel (%p552_p6) target bundleno = 26 (0x1a), region = 20 }
   0xc   : > { %s31_s23 = sor.u32 %s30_s22, %s29_s21 }
   0xd   : > { %p32_p5 = scmp.eq.s32.totalorder %s31_s23, 0 }
   0xf   : > { %s794_s25 = scalar_select %p32_p5, %s699_s13, %s34_s24  }
  0x10   : > { %148 = sbr.rel (!%p43_p3) target bundleno = 26 (0x1a), region = 24  ;;  %s150_s26 = sand.u32 (%p43_p3), 1, %s699_s13  }
  0x11   : > { %s553_s27 = sshll.u32 (%p43_p3), %s715_s17, 1  ;;  %s594_s28 = smul.u32 (%p43_p3), 24, %s150_s26 }
  0x12   : > { %s554_s29 = sshll.u32 (%p43_p3), %s711_s16, 2 }
  0x13   : > { %s155_s30 = sadd.s32 (%p43_p3), %s554_s29, %s553_s27  ;;  %s152_s8 = scalar_lea.vmem (%p43_p3), [#allocation2], %s594_s28 }
  0x14   : > { %s555_s4 = sshll.u32 (%p43_p3), %s155_s30, 2 }
  0x15   : > { %s157_s7 = scalar_lea.vmem %s859_s0, %s555_s4 }
  0x16   : > { %v174_v0 = vld [vmem:[%s157_s7] sm:$0xff]  }
  0x17   : > { %v178_v1 = vld [vmem:[%s157_s7 + $0x40] sm:$0xff]   ;;  %175 = vst [vmem:[%s152_s8] sm:$0xff] %v174_v0  }
  0x18   : > { %v182_v2 = vld [vmem:[%s157_s7 + $0x80] sm:$0xff]   ;;  %179 = vst [vmem:[%s152_s8 + $0x8] sm:$0xff] %v178_v1  }
  0x19   : > { %183 = vst [vmem:[%s152_s8 + $0x10] sm:$0xff] %v182_v2  }
  0x1a PF: > { %p556_p7 = scmp.ge.s32.totalorder %s719_s18, 1  ;;  %p228_p8 = scmp.lt.s32.totalorder %s719_s18, 9 }
  0x1c   : > { %p229_p9 = pnand %p556_p7, %p228_p8 }
  0x1d   : > { %s235_s9 = sand.u32 (!%p229_p9), 1, %s695_s12   ;;  %p267_p10 = scmp.lt.s32.totalorder (!%p229_p9), %s703_s14, 3 }
  0x1e   : > { %232 = sbr.rel (%p229_p9) target bundleno = 762 (0x2fa), region = 69  ;;  %p274_p11 = scmp.lt.s32.totalorder (!%p229_p9), %s707_s15, 1 }
  0x1f   : > { %s595_s10 = smul.u32 (!%p229_p9), 24, %s235_s9 }
  0x21   : > { %s806_s11 = scalar_lea.vmem (!%p229_p9), [#allocation2], %s595_s10 }
  0x23   : > { %v721_v3 = vmov 0.0   ;;  %vm722_vm0 = vmmov 0   ;;  %vm300_vm1 = vcmask 130048   ;;  %v654_v4 = vld [vmem:[%s806_s11 + $0x8] sm:$0xff]   ;;  %v655_v6 = vld [vmem:[%s806_s11] sm:$0xff]   ;;  %s876_s14 = smov (!%p267_p10, %s703_s14), 3 }
  0x24   : > { %582 = vmatprep.subr.bf16.mxu0 %v721_v3  ;;  %584 = vmatprep.mubr.msk.bf16.mxu0 %vm722_vm0, %v721_v3  ;;  %v305_v5 = vsel %vm300_vm1, %v654_v4, 0  ;;  %s575_s12 = sshll.u32 %s876_s14, 4  ;;  %v354_v11 = vld [vmem:[%s861_s2] sm:$0xff]  ;;  %v355_v18 = vld [vmem:[%s861_s2 + $0x8] sm:$0xff]  ;;  %s878_s15 = smov (!%p274_p11, %s707_s15), 1  ;;  %vm439_vm2 = vcmask 125952  }
  0x25   : > { %588 = vmatprep.subr.bf16.mxu1 %v721_v3  ;;  %590 = vmatprep.mubr.msk.bf16.mxu1 %vm722_vm0, %v721_v3  ;;  %s271_s23 = scalar_lea.vmem %s860_s1, %s575_s12  ;;  %v656_v33 = vld [vmem:[%s806_s11 + $0x10] sm:$0xff]   ;;  %s559_s29 = sshll.u32 %s878_s15, 1 }
  0x26   : > { %583 = vmatpush3.bf16.xpose.msra.mxu0 %v305_v5  ;;  %v350_v8 = vld [vmem:[%s271_s23] sm:$0xff]  ;;  %v351_v14 = vld [vmem:[%s271_s23 + $0x8] sm:$0xff]  ;;  %589 = vmatpush3.bf16.msra.mxu1 %v656_v33  ;;  %s560_s30 = sshll.u32 %s876_s14, 2 }
  0x27   : > { %s278_s4 = sadd.s32 %s560_s30, %s559_s29 }
  0x28   : > { %s561_s5 = sshll.u32 %s278_s4, 2 }
  0x29   : > { %s280_s8 = scalar_lea.vmem %s862_s3, %s561_s5 }
  0x2d   : > { %585 = vmatmul.mubr.msk.bf16.vlgmr.msra.gmra.mxu0 %vm300_vm1, %v655_v6 }
  0xed   : > { %v341_v7 = vpop.f32.mrf.mxu0 }
  0xee   : > { %v348_v9 = vmul.f32 0.25, %v341_v7 }
  0xef   : > { %v586_v10 = vpop.f32.mrf.mxu0 }
  0xf0   : > { %v352_v12 = vadd.f32 %v350_v8, %v348_v9 }
  0xf1   : > { %v344_v13 = vpop.f32.mrf.mxu0 }
  0xf2   : > { %v349_v15 = vmul.f32 0.25, %v344_v13  ;;  %v356_v16 = vadd.f32 %v354_v11, %v352_v12 }
  0xf3   : > { %v587_v17 = vpop.f32.mrf.mxu0 }
  0xf4   : > { %v353_v19 = vadd.f32 %v351_v14, %v349_v15  ;;  %v358_v20 = vsel %vm300_vm1, %v356_v16, -inf }
  0xf5   : > { %359 = vmax.xlane.f32.xlu0 %v358_v20 }
  0xf6   : > { %v357_v21 = vadd.f32 %v355_v18, %v353_v19 }
  0xf8   : > { %v361_v22 = vsel %vm300_vm1, %v357_v21, -inf }
  0xf9   : > { %362 = vmax.xlane.f32.xlu0 %v361_v22 }
 0x17e   : > { %v360_v23 = vpop.xlane.xlu0 %359 }
 0x17f   : > { %v364_v24 = vsub.f32 %v356_v16, %v360_v23 }
 0x181   : > { %v366_v25 = vmul.f32 1.442695, %v364_v24 }
 0x182   : > { %v363_v26 = vpop.xlane.xlu0 %362 }
 0x183   : > { %657 = vpow2.f32 %v366_v25  ;;  %v365_v27 = vsub.f32 %v357_v21, %v363_v26 }
 0x185   : > { %v368_v28 = vmul.f32 1.442695, %v365_v27 }
 0x187   : > { %659 = vpow2.f32 %v368_v28 }
 0x190   : > { %v658_v29 = vpop.eup %657 }
 0x191   : > { %v370_v30 = vsel %vm300_vm1, %v658_v29, 0.0 }
 0x192   : > { %371 = vadd.xlane.f32.xlu1 %v370_v30 }
 0x194   : > { %v660_v31 = vpop.eup %659 }
 0x195   : > { %v373_v32 = vsel %vm300_vm1, %v660_v31, 0.0 }
 0x196   : > { %374 = vadd.xlane.f32.xlu1 %v373_v32 }
 0x21b   : > { %v372_v34 = vpop.xlane.xlu1 %371 }
 0x21c   : > { %661 = vrcp.f32 %v372_v34 }
 0x21f   : > { %v375_v35 = vpop.xlane.xlu1 %374 }
 0x220   : > { %663 = vrcp.f32 %v375_v35 }
 0x229   : > { %v662_v36 = vpop.eup %661 }
 0x22a   : > { %v378_v38 = vmul.f32 %v662_v36, %v658_v29 }
 0x22d   : > { %v664_v37 = vpop.eup %663 }
 0x22e   : > { %v379_v39 = vmul.f32 %v664_v37, %v660_v31 }
 0x230   : > { %v380_v40 = vpack.c.bf16 %v379_v39, %v378_v38 }
 0x232   : > { %591 = vmatmul.mubr.msk.bf16.vlgmr.msra.gmra.mxu1 %vm300_vm1, %v380_v40 }
 0x2f2   : > { %v424_v41 = vpop.f32.mrf.mxu1 }
 0x2f3   : > { %v576_v42 = vpack.c.bf16 %v424_v41, %v424_v41 }
 0x2f4   : > { %v592_v43 = vpop.f32.mrf.mxu1 }
 0x2f5   : > { %440 = vst.msk [vmem:[%s280_s8] sm:$0xf] %vm439_vm2, %v576_v42 }
 0x2f6   : > { %v427_v44 = vpop.f32.mrf.mxu1 }
 0x2f7   : > { %v577_v45 = vpack.c.bf16 %v427_v44, %v427_v44 }
 0x2f8   : > { %v593_v46 = vpop.f32.mrf.mxu1 }
 0x2f9   : > { %441 = vst.msk [vmem:[%s280_s8 + $0x4] sm:$0xf] %vm439_vm2, %v577_v45 }
 0x2fa PF: > { %s13_s18 = sadd.s32 1, %s719_s18   ;;  %s863_s12 = smov %s699_s13 }
 0x2fb   : > { %p10_p12 = scmp.ge.s32.totalorder %s13_s18, 10   ;;  %s864_s13 = smov %s794_s25 }
 0x2fc   : > { %s865_s14 = smov %s711_s16  ;;  %s866_s15 = smov %s715_s17 }
 0x2fd   : > { %s867_s16 = smov %s870_s19  ;;  %s868_s17 = smov %s874_s20 }
 0x2fe   :  { %12 = sbr.rel (!%p10_p12) target bundleno = 4 (0x4), region = 113 }

// kernel: _lambda_.68
= control target key start
LH: loop header
LB: loop body
LE: loop exit
PB: predicated region body
PF: predicated region fallthrough
CT: control target
= control target key end

     0   :  { %vm16_vm0 = vcmask 523264   ;;  %vm40_vm1 = vcmask 1041409   ;;  %vm43_vm2 = vcmask 517120   ;;  %s77_s0 = inlined_call_operand.vmem [shape: bf16[2,16,64], index: 0, kind: input, shape index: {}]   ;;  %s78_s1 = inlined_call_operand.vmem [shape: f32[2,64], index: 1, kind: output, shape index: {}]  }
   0x1   :  { %v50_v0 = vld [vmem:[%s77_s0] sm:$0xff]   ;;  %v57_v1 = vld [vmem:[%s77_s0 + $0x8] sm:$0xff]  }
   0x2   :  { %v51_v2 = vunpack.c.l.bf16 %v50_v0  ;;  %v52_v3 = vunpack.c.h.bf16 %v50_v0  ;;  %v55_v4 = vunpack.c.l.bf16 %v57_v1  ;;  %v56_v5 = vunpack.c.h.bf16 %v57_v1 }
   0x4   :  { %v17_v6 = vsel %vm16_vm0, %v51_v2, 0.0  ;;  %v18_v7 = vsel %vm16_vm0, %v52_v3, 0.0  ;;  %v26_v8 = vsel %vm16_vm0, %v55_v4, 0.0  ;;  %v27_v9 = vsel %vm16_vm0, %v56_v5, 0.0 }
   0x5   :  { %v19_v10 = vadd.f32 %v18_v7, %v17_v6  ;;  %v28_v11 = vadd.f32 %v27_v9, %v26_v8 }
   0x7   :  { %v20_v12 = vrot.slane %v19_v10, 4  ;;  %v29_v13 = vrot.slane %v28_v11, 4 }
   0x9   :  { %v21_v14 = vadd.f32 %v20_v12, %v19_v10  ;;  %v30_v15 = vadd.f32 %v29_v13, %v28_v11 }
   0xb   :  { %v22_v16 = vrot.slane %v21_v14, 2  ;;  %v31_v17 = vrot.slane %v30_v15, 2 }
   0xd   :  { %v23_v18 = vadd.f32 %v22_v16, %v21_v14  ;;  %v32_v19 = vadd.f32 %v31_v17, %v30_v15 }
   0xf   :  { %v24_v20 = vrot.slane %v23_v18, 1  ;;  %v33_v21 = vrot.slane %v32_v19, 1 }
  0x11   :  { %v25_v22 = vadd.f32 %v24_v20, %v23_v18  ;;  %v34_v23 = vadd.f32 %v33_v21, %v32_v19 }
  0x13   :  { %v36_v24 = vmul.f32 0.0625, %v25_v22  ;;  %v37_v25 = vmul.f32 0.0625, %v34_v23 }
  0x15   :  { %v41_v26 = vsel %vm40_vm1, %v37_v25, %v36_v24 }
  0x16   :  { %44 = vst.msk [vmem:[%s78_s1] sm:$0x3] %vm43_vm2, %v41_v26 }

// kernel: _lambda_.69
= control target key start
LH: loop header
LB: loop body
LE: loop exit
PB: predicated region body
PF: predicated region fallthrough
CT: control target
= control target key end

     0   :  { %v182_v1 = vmov 0.0   ;;  %vm183_vm0 = vmmov 0   ;;  %vm20_vm1 = vcmask 74752   ;;  %s229_s0 = inlined_call_operand.vmem [shape: bf16[2,64], index: 0, kind: input, shape index: {}]   ;;  %s230_s1 = inlined_call_operand.vmem [shape: bf16[64,10], index: 1, kind: input, shape index: {}]   ;;  %s231_s2 = inlined_call_operand.vmem [shape: f32[1,10], index: 2, kind: input, shape index: {}]   ;;  %s232_s3 = inlined_call_operand.hbm [shape: f32[2,10], index: 3, kind: output, shape index: {}]  }
   0x1   :  { %v156_v0 = vld [vmem:[%s230_s1 + $0x18] sm:$0xff]   ;;  %141 = vmatprep.subr.bf16.mxu0 %v182_v1  ;;  %v157_v2 = vld [vmem:[%s230_s1 + $0x10] sm:$0xff]   ;;  %149 = vmatprep.mubr.msk.bf16.mxu0 %vm183_vm0, %v182_v1  ;;  %21 = vst.msk [vmem:[#allocation2] sm:$0x3] %vm20_vm1, %v182_v1 }
   0x2   :  { %142 = vmatpush3.bf16.msra.mxu0 %v156_v0 }
   0x3   :  { %143 = vmatprep.subr.bf16.mxu0 %v182_v1 }
   0x4   :  { %8 = vsyncpa [#allocation4], 0  ;;  %v158_v3 = vld [vmem:[%s230_s1 + $0x8] sm:$0xff]   ;;  %v159_v4 = vld [vmem:[%s230_s1] sm:$0xff]   ;;  %vm56_vm2 = vcmask 523264   ;;  %s184_s1 = smov [#allocation3]  }
   0x5   :  { %v23_v5 = vld [vmem:[%s229_s0] sm:$0x1]  ;;  %s122_s24 = sshll.u32 %s184_s1, 4  ;;  %s123_s24 = int_to_ptr.vmem [resolvable:$true] %s122_s24 }
   0x6   :  { %144 = vmatpush3.bf16.msra.mxu0 %v157_v2  ;;  %v135_v12 = vld [vmem:[%s231_s2] ss:$0 sm:$0xff]  ;;  %s160_s0 = scalar_lea.vmem %s123_s24, 32  ;;  %p165_p1 = scmp.lt.s32.totalorder %s123_s24, %s123_s24 }
   0x7   :  { %145 = vmatprep.subr.bf16.mxu0 %v182_v1  ;;  %p161_p0 = scmp.ne.s32.totalorder %s123_s24, %s160_s0  ;;  %p166_p2 = scmp.lt.s32.totalorder %s160_s0, %s160_s0 }
   0x8   :  { %v22_v6 = vld [vmem:[#allocation2] sm:$0x3] }
   0x9   :  { %p167_p3 = por %p166_p2, %p165_p1 }
   0xa   :  { %146 = vmatpush3.bf16.msra.mxu0 %v158_v3 }
   0xb   :  { %147 = vmatprep.subr.bf16.mxu0 %v182_v1  ;;  %p168_p4 = pnand %p167_p3, %p161_p0 }
   0xe   :  { %148 = vmatpush3.bf16.msra.mxu0 %v159_v4 }
  0x11   :  { %150 = vmatmul.mubr.msk.bf16.vlgmr.msra.gmra.mxu0 %vm56_vm2, %v23_v5 }
  0xd1   :  { %v94_v7 = vpop.f32.mrf.mxu0 }
  0xd2   :  { %v100_v8 = vadd.f32 %v94_v7, %v22_v6 }
  0xd3   :  { %v151_v9 = vpop.f32.mrf.mxu0 }
  0xd4   :  { %102 = vst.msk [vmem:[#allocation2] sm:$0x3] %vm20_vm1, %v100_v8 }
  0xd5   :  { %v97_v10 = vpop.f32.mrf.mxu0 }
  0xd7   :  { %v152_v11 = vpop.f32.mrf.mxu0 }
  0xdb   :  { %v106_v13 = vld [vmem:[#allocation2] sm:$0x3] }
  0xdc   :  { %v114_v14 = vadd.f32 %v135_v12, %v106_v13 }
  0xde   :  { %115 = vst.msk [vmem:[#allocation3] sm:$0x3] %vm20_vm1, %v114_v14 }
  0xdf   :  { %171 = shalt.err (!%p168_p4)
}
  0xe0   :  { %125 = dma.vmem_to_hbm [thread:$0]  %s123_s24, 32, %s232_s3, [#allocation4]  }
  0xe1   :  { %180 = dma.done.wait [#allocation4], 32  }
  0xe2   :  { %181 = vsyncadd [#allocation4], 4294967264 }
  0xe3   :  { %129 = vsyncpa [#allocation4], 1 }

</bundles_post_ra>
